<compile_context>
chip_gen: v6e
topology: v6e:2x2x1
jax: 0.10.0
libtpu: 0.0.40
codegen_flags: <defaults>
</compile_context>

<pallas_src>
import functools

import numpy as np

import jax
import jax.numpy as jnp
from jax import lax
from jax.experimental import pallas as pl
from jax.experimental.pallas import tpu as pltpu


def _fused_scan(x_view, g_ref, out_f, out_b, n):
    """Fused forward/backward ReLU recurrences along the leading (outer) axis.

    x_view : (n, NB, C, L) ref view of the input slab
    g_ref  : (2, n, 1, L) raw (pre-sigmoid) gates; [0] gates the forward scan,
             [1] gates the backward scan
    out_f  : (n, NB, C, L) VMEM scratch -> forward result
    out_b  : (n, NB, C, L) VMEM scratch -> backward result

    forward : out[0]   = x[0];   out[i] = relu(sig(g0[i-1]) * out[i-1] + x[i])
    backward: out[n-1] = x[n-1]; out[i] = relu(sig(g1[i+1]) * out[i+1] + x[i])
    """
    row_f = x_view[0].astype(jnp.float32)
    row_b = x_view[n - 1].astype(jnp.float32)
    out_f[0] = row_f
    out_b[n - 1] = row_b

    def step(i_f, row_f, row_b):
        i_b = n - 1 - i_f
        # Each gate row is used exactly once -> sigmoid it here (EUP, hidden
        # under the dependent VALU chain).
        g_f = jax.nn.sigmoid(g_ref[0, i_f - 1].astype(jnp.float32))   # (1, L)
        g_b = jax.nn.sigmoid(g_ref[1, i_b + 1].astype(jnp.float32))   # (1, L)
        row_f = jnp.maximum(g_f * row_f + x_view[i_f].astype(jnp.float32), 0.0)
        row_b = jnp.maximum(g_b * row_b + x_view[i_b].astype(jnp.float32), 0.0)
        out_f[i_f] = row_f
        out_b[i_b] = row_b
        return row_f, row_b

    if n <= 64:
        # Short fixed trip count: static unroll, per-row loads (no big live slabs).
        for k in range(1, n):
            row_f, row_b = step(k, row_f, row_b)
    else:
        def body(k, carry):
            return step(k, carry[0], carry[1])

        lax.fori_loop(1, n, body, (row_f, row_b), unroll=2)


def _ct_kernel(xud_ref, xlr_ref, gud_ref, glr_ref, w4_ref, cb_ref, out_ref,
               uc_s, dc_s, lc_s, rc_s, *, C, H, W, NB):
    # ---- directional scans: up/down fused over H, left/right fused over W ------
    _fused_scan(xud_ref.at[0], gud_ref, uc_s, dc_s, H)
    _fused_scan(xlr_ref.at[0], glr_ref, lc_s, rc_s, W)

    # ---- 1x1 conv (4C -> C) + bias + ReLU ---------------------------------------
    # Contraction over C = per-sublane weight multiply + sublane reduction.
    # TODO(synk): for large C (>= 16) switch this block to (C, C) MXU matmuls.
    for o in range(C):
        w_l = w4_ref[0, o]                  # (C, 1) per-input-channel weights
        w_r = w4_ref[1, o]
        w_u = w4_ref[2, o]
        w_d = w4_ref[3, o]
        b_o = cb_ref[o]
        for j in range(NB):
            # up/down partial already in output (H, W) layout
            y_ud = jnp.sum(uc_s[:, j] * w_u + dc_s[:, j] * w_d, axis=1)   # (H, W)
            # left/right partial in (W, H) layout -> one small transpose
            y_lr = jnp.sum(lc_s[:, j] * w_l + rc_s[:, j] * w_r, axis=1)   # (W, H)
            y = jnp.maximum(y_ud + y_lr.T + b_o, 0.0)
            out_ref[0, o, j] = y.astype(out_ref.dtype)


def _round_up(x, m):
    return -(-x // m) * m


def _vmem_capacity_bytes():
    try:
        return int(pltpu.get_tpu_info().vmem_capacity_bytes)
    except Exception:
        return 64 * 1024 * 1024            # conservative fallback (v7x per-core)


def _pick_batch_block(N, C, H, W):
    """Batch elements folded into one grid step (generation-aware VMEM budget)."""
    c_pad = _round_up(C, 8)
    ud_bytes = 4 * H * c_pad * _round_up(W, 128)     # one batch elem, up/down slab
    lr_bytes = 4 * W * c_pad * _round_up(H, 128)     # one batch elem, left/right slab
    per_b = ud_bytes + lr_bytes
    # working set ~= double-buffered in/out slabs + 4 scan scratches
    budget = int(_vmem_capacity_bytes() * 0.45)
    nb = max(1, budget // (7 * per_b))
    nb = min(nb, N)
    if N >= 2:              # keep >= 2 grid steps: v7x megacore + pipelining
        nb = min(nb, -(-N // 2))
    # TODO(synk): for very large H*W (single element exceeding VMEM) add spatial
    # tiling of the scans; not needed at the module's typical tensor shapes.
    return max(1, int(nb))


def context_transfer(x, ct_weights, conv_w, conv_b):
    """Pallas forward of ContextTransferModule.

    x          : (N, C, H, W) float32
    ct_weights : (4, H, W)  raw gate logits [up, down, left, right]
    conv_w     : (C, 4*C)   1x1 conv weight, input channels ordered [lc|rc|uc|dc]
    conv_b     : (C,)       1x1 conv bias
    """
    N, C, H, W = x.shape
    NB = _pick_batch_block(N, C, H, W)
    NBLK = -(-N // NB)
    NP = NBLK * NB
    if NP != N:                  # pad the batch instead of collapsing NB
        x = jnp.pad(x, ((0, NP - N), (0, 0), (0, 0), (0, 0)))

    # Scan layouts: scanned axis leading, batch fold NB as an outer dim,
    # (C, spatial) as the tiled dims.  Layout plumbing done by XLA here.
    # TODO(synk): derive x_lr in-kernel from x_ud to drop this extra HBM pass.
    x5 = x.reshape(NBLK, NB, C, H, W)
    x_ud = x5.transpose(0, 3, 1, 2, 4)               # (NBLK, H, NB, C, W)
    x_lr = x5.transpose(0, 4, 1, 2, 3)               # (NBLK, W, NB, C, H)

    # Raw (pre-sigmoid) gates, untiled; sigmoid happens once per row in-kernel.
    gud = ct_weights[0:2].reshape(2, H, 1, W).astype(jnp.float32)              # up, down
    glr = ct_weights[2:4].transpose(0, 2, 1).reshape(2, W, 1, H).astype(jnp.float32)  # left, right

    # 1x1 conv weights as (direction, C_out, C_in, 1) columns; bias as SMEM scalars.
    w4 = conv_w.reshape(C, 4, C).transpose(1, 0, 2)[..., None].astype(jnp.float32)
    cb = conv_b.reshape(C).astype(jnp.float32)

    vmem_cap = _vmem_capacity_bytes()
    vmem_limit = int(min(vmem_cap, 128 * 1024 * 1024) * 0.9)

    kernel = functools.partial(_ct_kernel, C=C, H=H, W=W, NB=NB)
    y = pl.pallas_call(
        kernel,
        out_shape=jax.ShapeDtypeStruct((NBLK, C, NB, H, W), x.dtype),
        grid=(NBLK,),
        in_specs=[
            pl.BlockSpec((1, H, NB, C, W), lambda b: (b, 0, 0, 0, 0)),
            pl.BlockSpec((1, W, NB, C, H), lambda b: (b, 0, 0, 0, 0)),
            pl.BlockSpec((2, H, 1, W), lambda b: (0, 0, 0, 0)),
            pl.BlockSpec((2, W, 1, H), lambda b: (0, 0, 0, 0)),
            pl.BlockSpec((4, C, C, 1), lambda b: (0, 0, 0, 0)),
            pl.BlockSpec(memory_space=pltpu.MemorySpace.SMEM),
        ],
        out_specs=pl.BlockSpec((1, C, NB, H, W), lambda b: (b, 0, 0, 0, 0)),
        scratch_shapes=[
            pltpu.VMEM((H, NB, C, W), jnp.float32),   # up context
            pltpu.VMEM((H, NB, C, W), jnp.float32),   # down context
            pltpu.VMEM((W, NB, C, H), jnp.float32),   # left context
            pltpu.VMEM((W, NB, C, H), jnp.float32),   # right context
        ],
        compiler_params=pltpu.CompilerParams(
            dimension_semantics=("parallel",),
            vmem_limit_bytes=vmem_limit,
        ),
    )(x_ud, x_lr, gud, glr, w4, cb)

    # (NBLK, C, NB, H, W) -> (N, C, H, W): layout plumbing back in the wrapper.
    out = y.transpose(0, 2, 1, 3, 4).reshape(NP, C, H, W)
    return out[:N] if NP != N else out


def _reference(x, ct_weights, conv_w, conv_b):
    """Pure NumPy mirror of the PyTorch forward (verification only)."""
    x = np.asarray(x, np.float32)
    ctw = np.asarray(ct_weights, np.float32)
    N, C, H, W = x.shape
    sig = 1.0 / (1.0 + np.exp(-ctw))
    w_up, w_down, w_left, w_right = sig[0], sig[1], sig[2], sig[3]
    relu = lambda a: np.maximum(a, 0.0)

    uc = x.copy()
    for i in range(1, H):
        uc[:, :, i] = relu(w_up[i - 1] * uc[:, :, i - 1] + uc[:, :, i])
    dc = x.copy()
    for i in range(H - 2, -1, -1):
        dc[:, :, i] = relu(w_down[i + 1] * dc[:, :, i + 1] + dc[:, :, i])
    lc = x.copy()
    for i in range(1, W):
        lc[:, :, :, i] = relu(w_left[:, i - 1] * lc[:, :, :, i - 1] + lc[:, :, :, i])
    rc = x.copy()
    for i in range(W - 2, -1, -1):
        rc[:, :, :, i] = relu(w_right[:, i + 1] * rc[:, :, :, i + 1] + rc[:, :, :, i])

    ctx = np.concatenate([lc, rc, uc, dc], axis=1)          # (N, 4C, H, W)
    cw = np.asarray(conv_w, np.float32)
    cb = np.asarray(conv_b, np.float32).reshape(-1)
    y = np.einsum('oi,nihw->nohw', cw, ctx) + cb[None, :, None, None]
    return relu(y)


if __name__ == "__main__":
    N, C, H, W = 2, 4, 16, 16
    key = jax.random.PRNGKey(0)
    k1, k2, k3, k4 = jax.random.split(key, 4)

    x = jax.random.normal(k1, (N, C, H, W), jnp.float32)
    # Parameters match the module shapes; random ct_weights exercise all gate paths.
    ct_weights = 0.5 * jax.random.normal(k2, (4, H, W), jnp.float32)
    conv_w = jax.random.normal(k3, (C, 4 * C), jnp.float32) / np.sqrt(4 * C)
    conv_b = 0.1 * jax.random.normal(k4, (C,), jnp.float32)

    out = jax.jit(context_transfer)(x, ct_weights, conv_w, conv_b)
    out = jax.block_until_ready(out)

    ref = _reference(x, ct_weights, conv_w, conv_b)
    np.testing.assert_allclose(np.asarray(out), ref, rtol=1e-3, atol=1e-3)
    print("KERNEL_OK")
</pallas_src>

<mosaic_0001>
module attributes {stable_mosaic.version = 11 : i64} {
  func.func @_ct_kernel(%arg0: i32, %arg1: memref<1x16x1x4x16xf32, #tpu.memory_space<vmem>>, %arg2: memref<1x16x1x4x16xf32, #tpu.memory_space<vmem>>, %arg3: memref<2x16x1x16xf32, #tpu.memory_space<vmem>>, %arg4: memref<2x16x1x16xf32, #tpu.memory_space<vmem>>, %arg5: memref<4x4x4x1xf32, #tpu.memory_space<vmem>>, %arg6: memref<4xf32, #tpu.memory_space<smem>>, %arg7: memref<1x4x1x16x16xf32, #tpu.memory_space<vmem>>, %arg8: memref<16x1x4x16xf32, #tpu.memory_space<vmem>>, %arg9: memref<16x1x4x16xf32, #tpu.memory_space<vmem>>, %arg10: memref<16x1x4x16xf32, #tpu.memory_space<vmem>>, %arg11: memref<16x1x4x16xf32, #tpu.memory_space<vmem>>) attributes {dimension_semantics = [#tpu.dimension_semantics<parallel>], iteration_bounds = array<i64: 2>, scalar_prefetch = 0 : i64, scratch_operands = 4 : i64, tpu.core_type = #tpu.core_type<tc>, window_params = [{transform_indices = @transform_0, window_bounds = array<i64: 1, 16, 1, 4, 16>}, {transform_indices = @transform_1, window_bounds = array<i64: 1, 16, 1, 4, 16>}, {pipeline_mode = #tpu.pipeline_mode<synchronous>, transform_indices = @transform_2, window_bounds = array<i64: 2, 16, 1, 16>}, {pipeline_mode = #tpu.pipeline_mode<synchronous>, transform_indices = @transform_3, window_bounds = array<i64: 2, 16, 1, 16>}, {pipeline_mode = #tpu.pipeline_mode<synchronous>, transform_indices = @transform_4, window_bounds = array<i64: 4, 4, 4, 1>}, {transform_indices = @transform_5, window_bounds = array<i64: 4>}, {transform_indices = @transform_6, window_bounds = array<i64: 1, 4, 1, 16, 16>}]} {
    %c0_i32 = arith.constant 0 : i32
    %c0_i32_0 = arith.constant 0 : i32
    %c0_i32_1 = arith.constant 0 : i32
    %c0_i32_2 = arith.constant 0 : i32
    %c0_i32_3 = arith.constant 0 : i32
    %0 = tpu.memref_slice %arg1[%c0_i32, %c0_i32_0, %c0_i32_1, %c0_i32_2, %c0_i32_3] : memref<1x16x1x4x16xf32, #tpu.memory_space<vmem>> -> memref<1x16x1x4x16xf32, #tpu.memory_space<vmem>>
    %1 = tpu.memref_squeeze %0 : memref<1x16x1x4x16xf32, #tpu.memory_space<vmem>> -> memref<16x1x4x16xf32, #tpu.memory_space<vmem>>
    %c0 = arith.constant 0 : index
    %c0_4 = arith.constant 0 : index
    %c0_5 = arith.constant 0 : index
    %c0_6 = arith.constant 0 : index
    %2 = vector.load %1[%c0, %c0_4, %c0_5, %c0_6] : memref<16x1x4x16xf32, #tpu.memory_space<vmem>>, vector<1x1x4x16xf32>
    %3 = vector.shape_cast %2 : vector<1x1x4x16xf32> to vector<1x4x16xf32>
    %c0_i32_7 = arith.constant 0 : i32
    %c0_i32_8 = arith.constant 0 : i32
    %c0_i32_9 = arith.constant 0 : i32
    %c0_i32_10 = arith.constant 0 : i32
    %c0_i32_11 = arith.constant 0 : i32
    %4 = tpu.memref_slice %arg1[%c0_i32_7, %c0_i32_8, %c0_i32_9, %c0_i32_10, %c0_i32_11] : memref<1x16x1x4x16xf32, #tpu.memory_space<vmem>> -> memref<1x16x1x4x16xf32, #tpu.memory_space<vmem>>
    %5 = tpu.memref_squeeze %4 : memref<1x16x1x4x16xf32, #tpu.memory_space<vmem>> -> memref<16x1x4x16xf32, #tpu.memory_space<vmem>>
    %c15 = arith.constant 15 : index
    %c0_12 = arith.constant 0 : index
    %c0_13 = arith.constant 0 : index
    %c0_14 = arith.constant 0 : index
    %6 = vector.load %5[%c15, %c0_12, %c0_13, %c0_14] : memref<16x1x4x16xf32, #tpu.memory_space<vmem>>, vector<1x1x4x16xf32>
    %7 = vector.shape_cast %6 : vector<1x1x4x16xf32> to vector<1x4x16xf32>
    %c0_15 = arith.constant 0 : index
    %c0_16 = arith.constant 0 : index
    %c0_17 = arith.constant 0 : index
    %c0_18 = arith.constant 0 : index
    %8 = vector.load %arg8[%c0_15, %c0_16, %c0_17, %c0_18] : memref<16x1x4x16xf32, #tpu.memory_space<vmem>>, vector<1x1x4x16xf32>
    %9 = vector.shape_cast %8 : vector<1x1x4x16xf32> to vector<1x4x16xf32>
    %10 = vector.shape_cast %3 : vector<1x4x16xf32> to vector<1x1x4x16xf32>
    tpu.vector_store %arg8[%c0_15, %c0_16, %c0_17, %c0_18], %10 {strides = array<i32>} : memref<16x1x4x16xf32, #tpu.memory_space<vmem>>, vector<1x1x4x16xf32>,
    %c15_19 = arith.constant 15 : index
    %c0_20 = arith.constant 0 : index
    %c0_21 = arith.constant 0 : index
    %c0_22 = arith.constant 0 : index
    %11 = vector.load %arg9[%c15_19, %c0_20, %c0_21, %c0_22] : memref<16x1x4x16xf32, #tpu.memory_space<vmem>>, vector<1x1x4x16xf32>
    %12 = vector.shape_cast %11 : vector<1x1x4x16xf32> to vector<1x4x16xf32>
    %13 = vector.shape_cast %7 : vector<1x4x16xf32> to vector<1x1x4x16xf32>
    tpu.vector_store %arg9[%c15_19, %c0_20, %c0_21, %c0_22], %13 {strides = array<i32>} : memref<16x1x4x16xf32, #tpu.memory_space<vmem>>, vector<1x1x4x16xf32>,
    %c0_23 = arith.constant 0 : index
    %c0_24 = arith.constant 0 : index
    %c0_25 = arith.constant 0 : index
    %c0_26 = arith.constant 0 : index
    %14 = vector.load %arg3[%c0_23, %c0_24, %c0_25, %c0_26] : memref<2x16x1x16xf32, #tpu.memory_space<vmem>>, vector<1x1x1x16xf32>
    %15 = vector.shape_cast %14 : vector<1x1x1x16xf32> to vector<1x16xf32>
    %16 = arith.negf %15 : vector<1x16xf32>
    %17 = math.exp %16 : vector<1x16xf32>
    %cst = arith.constant 1.000000e+00 : f32
    %18 = vector.broadcast %cst : f32 to vector<1x16xf32>
    %19 = arith.addf %18, %17 : vector<1x16xf32>
    %20 = arith.divf %18, %19 : vector<1x16xf32>
    %c1 = arith.constant 1 : index
    %c15_27 = arith.constant 15 : index
    %c0_28 = arith.constant 0 : index
    %c0_29 = arith.constant 0 : index
    %21 = vector.load %arg3[%c1, %c15_27, %c0_28, %c0_29] : memref<2x16x1x16xf32, #tpu.memory_space<vmem>>, vector<1x1x1x16xf32>
    %22 = vector.shape_cast %21 : vector<1x1x1x16xf32> to vector<1x16xf32>
    %23 = arith.negf %22 : vector<1x16xf32>
    %24 = math.exp %23 : vector<1x16xf32>
    %cst_30 = arith.constant 1.000000e+00 : f32
    %25 = vector.broadcast %cst_30 : f32 to vector<1x16xf32>
    %26 = arith.addf %25, %24 : vector<1x16xf32>
    %27 = arith.divf %25, %26 : vector<1x16xf32>
    %28 = vector.shape_cast %20 : vector<1x16xf32> to vector<1x1x16xf32>
    %29 = vector.broadcast %28 : vector<1x1x16xf32> to vector<1x4x16xf32>
    %30 = arith.mulf %29, %3 : vector<1x4x16xf32>
    %c0_i32_31 = arith.constant 0 : i32
    %c0_i32_32 = arith.constant 0 : i32
    %c0_i32_33 = arith.constant 0 : i32
    %c0_i32_34 = arith.constant 0 : i32
    %c0_i32_35 = arith.constant 0 : i32
    %31 = tpu.memref_slice %arg1[%c0_i32_31, %c0_i32_32, %c0_i32_33, %c0_i32_34, %c0_i32_35] : memref<1x16x1x4x16xf32, #tpu.memory_space<vmem>> -> memref<1x16x1x4x16xf32, #tpu.memory_space<vmem>>
    %32 = tpu.memref_squeeze %31 : memref<1x16x1x4x16xf32, #tpu.memory_space<vmem>> -> memref<16x1x4x16xf32, #tpu.memory_space<vmem>>
    %c1_36 = arith.constant 1 : index
    %c0_37 = arith.constant 0 : index
    %c0_38 = arith.constant 0 : index
    %c0_39 = arith.constant 0 : index
    %33 = vector.load %32[%c1_36, %c0_37, %c0_38, %c0_39] : memref<16x1x4x16xf32, #tpu.memory_space<vmem>>, vector<1x1x4x16xf32>
    %34 = vector.shape_cast %33 : vector<1x1x4x16xf32> to vector<1x4x16xf32>
    %35 = arith.addf %30, %34 : vector<1x4x16xf32>
    %cst_40 = arith.constant 0.000000e+00 : f32
    %36 = vector.broadcast %cst_40 : f32 to vector<1x4x16xf32>
    %37 = arith.maximumf %35, %36 : vector<1x4x16xf32>
    %38 = vector.shape_cast %27 : vector<1x16xf32> to vector<1x1x16xf32>
    %39 = vector.broadcast %38 : vector<1x1x16xf32> to vector<1x4x16xf32>
    %40 = arith.mulf %39, %7 : vector<1x4x16xf32>
    %c0_i32_41 = arith.constant 0 : i32
    %c0_i32_42 = arith.constant 0 : i32
    %c0_i32_43 = arith.constant 0 : i32
    %c0_i32_44 = arith.constant 0 : i32
    %c0_i32_45 = arith.constant 0 : i32
    %41 = tpu.memref_slice %arg1[%c0_i32_41, %c0_i32_42, %c0_i32_43, %c0_i32_44, %c0_i32_45] : memref<1x16x1x4x16xf32, #tpu.memory_space<vmem>> -> memref<1x16x1x4x16xf32, #tpu.memory_space<vmem>>
    %42 = tpu.memref_squeeze %41 : memref<1x16x1x4x16xf32, #tpu.memory_space<vmem>> -> memref<16x1x4x16xf32, #tpu.memory_space<vmem>>
    %c14 = arith.constant 14 : index
    %c0_46 = arith.constant 0 : index
    %c0_47 = arith.constant 0 : index
    %c0_48 = arith.constant 0 : index
    %43 = vector.load %42[%c14, %c0_46, %c0_47, %c0_48] : memref<16x1x4x16xf32, #tpu.memory_space<vmem>>, vector<1x1x4x16xf32>
    %44 = vector.shape_cast %43 : vector<1x1x4x16xf32> to vector<1x4x16xf32>
    %45 = arith.addf %40, %44 : vector<1x4x16xf32>
    %cst_49 = arith.constant 0.000000e+00 : f32
    %46 = vector.broadcast %cst_49 : f32 to vector<1x4x16xf32>
    %47 = arith.maximumf %45, %46 : vector<1x4x16xf32>
    %c1_50 = arith.constant 1 : index
    %c0_51 = arith.constant 0 : index
    %c0_52 = arith.constant 0 : index
    %c0_53 = arith.constant 0 : index
    %48 = vector.load %arg8[%c1_50, %c0_51, %c0_52, %c0_53] : memref<16x1x4x16xf32, #tpu.memory_space<vmem>>, vector<1x1x4x16xf32>
    %49 = vector.shape_cast %48 : vector<1x1x4x16xf32> to vector<1x4x16xf32>
    %50 = vector.shape_cast %37 : vector<1x4x16xf32> to vector<1x1x4x16xf32>
    tpu.vector_store %arg8[%c1_50, %c0_51, %c0_52, %c0_53], %50 {strides = array<i32>} : memref<16x1x4x16xf32, #tpu.memory_space<vmem>>, vector<1x1x4x16xf32>,
    %c14_54 = arith.constant 14 : index
    %c0_55 = arith.constant 0 : index
    %c0_56 = arith.constant 0 : index
    %c0_57 = arith.constant 0 : index
    %51 = vector.load %arg9[%c14_54, %c0_55, %c0_56, %c0_57] : memref<16x1x4x16xf32, #tpu.memory_space<vmem>>, vector<1x1x4x16xf32>
    %52 = vector.shape_cast %51 : vector<1x1x4x16xf32> to vector<1x4x16xf32>
    %53 = vector.shape_cast %47 : vector<1x4x16xf32> to vector<1x1x4x16xf32>
    tpu.vector_store %arg9[%c14_54, %c0_55, %c0_56, %c0_57], %53 {strides = array<i32>} : memref<16x1x4x16xf32, #tpu.memory_space<vmem>>, vector<1x1x4x16xf32>,
    %c0_58 = arith.constant 0 : index
    %c1_59 = arith.constant 1 : index
    %c0_60 = arith.constant 0 : index
    %c0_61 = arith.constant 0 : index
    %54 = vector.load %arg3[%c0_58, %c1_59, %c0_60, %c0_61] : memref<2x16x1x16xf32, #tpu.memory_space<vmem>>, vector<1x1x1x16xf32>
    %55 = vector.shape_cast %54 : vector<1x1x1x16xf32> to vector<1x16xf32>
    %56 = arith.negf %55 : vector<1x16xf32>
    %57 = math.exp %56 : vector<1x16xf32>
    %cst_62 = arith.constant 1.000000e+00 : f32
    %58 = vector.broadcast %cst_62 : f32 to vector<1x16xf32>
    %59 = arith.addf %58, %57 : vector<1x16xf32>
    %60 = arith.divf %58, %59 : vector<1x16xf32>
    %c1_63 = arith.constant 1 : index
    %c14_64 = arith.constant 14 : index
    %c0_65 = arith.constant 0 : index
    %c0_66 = arith.constant 0 : index
    %61 = vector.load %arg3[%c1_63, %c14_64, %c0_65, %c0_66] : memref<2x16x1x16xf32, #tpu.memory_space<vmem>>, vector<1x1x1x16xf32>
    %62 = vector.shape_cast %61 : vector<1x1x1x16xf32> to vector<1x16xf32>
    %63 = arith.negf %62 : vector<1x16xf32>
    %64 = math.exp %63 : vector<1x16xf32>
    %cst_67 = arith.constant 1.000000e+00 : f32
    %65 = vector.broadcast %cst_67 : f32 to vector<1x16xf32>
    %66 = arith.addf %65, %64 : vector<1x16xf32>
    %67 = arith.divf %65, %66 : vector<1x16xf32>
    %68 = vector.shape_cast %60 : vector<1x16xf32> to vector<1x1x16xf32>
    %69 = vector.broadcast %68 : vector<1x1x16xf32> to vector<1x4x16xf32>
    %70 = arith.mulf %69, %37 : vector<1x4x16xf32>
    %c0_i32_68 = arith.constant 0 : i32
    %c0_i32_69 = arith.constant 0 : i32
    %c0_i32_70 = arith.constant 0 : i32
    %c0_i32_71 = arith.constant 0 : i32
    %c0_i32_72 = arith.constant 0 : i32
    %71 = tpu.memref_slice %arg1[%c0_i32_68, %c0_i32_69, %c0_i32_70, %c0_i32_71, %c0_i32_72] : memref<1x16x1x4x16xf32, #tpu.memory_space<vmem>> -> memref<1x16x1x4x16xf32, #tpu.memory_space<vmem>>
    %72 = tpu.memref_squeeze %71 : memref<1x16x1x4x16xf32, #tpu.memory_space<vmem>> -> memref<16x1x4x16xf32, #tpu.memory_space<vmem>>
    %c2 = arith.constant 2 : index
    %c0_73 = arith.constant 0 : index
    %c0_74 = arith.constant 0 : index
    %c0_75 = arith.constant 0 : index
    %73 = vector.load %72[%c2, %c0_73, %c0_74, %c0_75] : memref<16x1x4x16xf32, #tpu.memory_space<vmem>>, vector<1x1x4x16xf32>
    %74 = vector.shape_cast %73 : vector<1x1x4x16xf32> to vector<1x4x16xf32>
    %75 = arith.addf %70, %74 : vector<1x4x16xf32>
    %cst_76 = arith.constant 0.000000e+00 : f32
    %76 = vector.broadcast %cst_76 : f32 to vector<1x4x16xf32>
    %77 = arith.maximumf %75, %76 : vector<1x4x16xf32>
    %78 = vector.shape_cast %67 : vector<1x16xf32> to vector<1x1x16xf32>
    %79 = vector.broadcast %78 : vector<1x1x16xf32> to vector<1x4x16xf32>
    %80 = arith.mulf %79, %47 : vector<1x4x16xf32>
    %c0_i32_77 = arith.constant 0 : i32
    %c0_i32_78 = arith.constant 0 : i32
    %c0_i32_79 = arith.constant 0 : i32
    %c0_i32_80 = arith.constant 0 : i32
    %c0_i32_81 = arith.constant 0 : i32
    %81 = tpu.memref_slice %arg1[%c0_i32_77, %c0_i32_78, %c0_i32_79, %c0_i32_80, %c0_i32_81] : memref<1x16x1x4x16xf32, #tpu.memory_space<vmem>> -> memref<1x16x1x4x16xf32, #tpu.memory_space<vmem>>
    %82 = tpu.memref_squeeze %81 : memref<1x16x1x4x16xf32, #tpu.memory_space<vmem>> -> memref<16x1x4x16xf32, #tpu.memory_space<vmem>>
    %c13 = arith.constant 13 : index
    %c0_82 = arith.constant 0 : index
    %c0_83 = arith.constant 0 : index
    %c0_84 = arith.constant 0 : index
    %83 = vector.load %82[%c13, %c0_82, %c0_83, %c0_84] : memref<16x1x4x16xf32, #tpu.memory_space<vmem>>, vector<1x1x4x16xf32>
    %84 = vector.shape_cast %83 : vector<1x1x4x16xf32> to vector<1x4x16xf32>
    %85 = arith.addf %80, %84 : vector<1x4x16xf32>
    %cst_85 = arith.constant 0.000000e+00 : f32
    %86 = vector.broadcast %cst_85 : f32 to vector<1x4x16xf32>
    %87 = arith.maximumf %85, %86 : vector<1x4x16xf32>
    %c2_86 = arith.constant 2 : index
    %c0_87 = arith.constant 0 : index
    %c0_88 = arith.constant 0 : index
    %c0_89 = arith.constant 0 : index
    %88 = vector.load %arg8[%c2_86, %c0_87, %c0_88, %c0_89] : memref<16x1x4x16xf32, #tpu.memory_space<vmem>>, vector<1x1x4x16xf32>
    %89 = vector.shape_cast %88 : vector<1x1x4x16xf32> to vector<1x4x16xf32>
    %90 = vector.shape_cast %77 : vector<1x4x16xf32> to vector<1x1x4x16xf32>
    tpu.vector_store %arg8[%c2_86, %c0_87, %c0_88, %c0_89], %90 {strides = array<i32>} : memref<16x1x4x16xf32, #tpu.memory_space<vmem>>, vector<1x1x4x16xf32>,
    %c13_90 = arith.constant 13 : index
    %c0_91 = arith.constant 0 : index
    %c0_92 = arith.constant 0 : index
    %c0_93 = arith.constant 0 : index
    %91 = vector.load %arg9[%c13_90, %c0_91, %c0_92, %c0_93] : memref<16x1x4x16xf32, #tpu.memory_space<vmem>>, vector<1x1x4x16xf32>
    %92 = vector.shape_cast %91 : vector<1x1x4x16xf32> to vector<1x4x16xf32>
    %93 = vector.shape_cast %87 : vector<1x4x16xf32> to vector<1x1x4x16xf32>
    tpu.vector_store %arg9[%c13_90, %c0_91, %c0_92, %c0_93], %93 {strides = array<i32>} : memref<16x1x4x16xf32, #tpu.memory_space<vmem>>, vector<1x1x4x16xf32>,
    %c0_94 = arith.constant 0 : index
    %c2_95 = arith.constant 2 : index
    %c0_96 = arith.constant 0 : index
    %c0_97 = arith.constant 0 : index
    %94 = vector.load %arg3[%c0_94, %c2_95, %c0_96, %c0_97] : memref<2x16x1x16xf32, #tpu.memory_space<vmem>>, vector<1x1x1x16xf32>
    %95 = vector.shape_cast %94 : vector<1x1x1x16xf32> to vector<1x16xf32>
    %96 = arith.negf %95 : vector<1x16xf32>
    %97 = math.exp %96 : vector<1x16xf32>
    %cst_98 = arith.constant 1.000000e+00 : f32
    %98 = vector.broadcast %cst_98 : f32 to vector<1x16xf32>
    %99 = arith.addf %98, %97 : vector<1x16xf32>
    %100 = arith.divf %98, %99 : vector<1x16xf32>
    %c1_99 = arith.constant 1 : index
    %c13_100 = arith.constant 13 : index
    %c0_101 = arith.constant 0 : index
    %c0_102 = arith.constant 0 : index
    %101 = vector.load %arg3[%c1_99, %c13_100, %c0_101, %c0_102] : memref<2x16x1x16xf32, #tpu.memory_space<vmem>>, vector<1x1x1x16xf32>
    %102 = vector.shape_cast %101 : vector<1x1x1x16xf32> to vector<1x16xf32>
    %103 = arith.negf %102 : vector<1x16xf32>
    %104 = math.exp %103 : vector<1x16xf32>
    %cst_103 = arith.constant 1.000000e+00 : f32
    %105 = vector.broadcast %cst_103 : f32 to vector<1x16xf32>
    %106 = arith.addf %105, %104 : vector<1x16xf32>
    %107 = arith.divf %105, %106 : vector<1x16xf32>
    %108 = vector.shape_cast %100 : vector<1x16xf32> to vector<1x1x16xf32>
    %109 = vector.broadcast %108 : vector<1x1x16xf32> to vector<1x4x16xf32>
    %110 = arith.mulf %109, %77 : vector<1x4x16xf32>
    %c0_i32_104 = arith.constant 0 : i32
    %c0_i32_105 = arith.constant 0 : i32
    %c0_i32_106 = arith.constant 0 : i32
    %c0_i32_107 = arith.constant 0 : i32
    %c0_i32_108 = arith.constant 0 : i32
    %111 = tpu.memref_slice %arg1[%c0_i32_104, %c0_i32_105, %c0_i32_106, %c0_i32_107, %c0_i32_108] : memref<1x16x1x4x16xf32, #tpu.memory_space<vmem>> -> memref<1x16x1x4x16xf32, #tpu.memory_space<vmem>>
    %112 = tpu.memref_squeeze %111 : memref<1x16x1x4x16xf32, #tpu.memory_space<vmem>> -> memref<16x1x4x16xf32, #tpu.memory_space<vmem>>
    %c3 = arith.constant 3 : index
    %c0_109 = arith.constant 0 : index
    %c0_110 = arith.constant 0 : index
    %c0_111 = arith.constant 0 : index
    %113 = vector.load %112[%c3, %c0_109, %c0_110, %c0_111] : memref<16x1x4x16xf32, #tpu.memory_space<vmem>>, vector<1x1x4x16xf32>
    %114 = vector.shape_cast %113 : vector<1x1x4x16xf32> to vector<1x4x16xf32>
    %115 = arith.addf %110, %114 : vector<1x4x16xf32>
    %cst_112 = arith.constant 0.000000e+00 : f32
    %116 = vector.broadcast %cst_112 : f32 to vector<1x4x16xf32>
    %117 = arith.maximumf %115, %116 : vector<1x4x16xf32>
    %118 = vector.shape_cast %107 : vector<1x16xf32> to vector<1x1x16xf32>
    %119 = vector.broadcast %118 : vector<1x1x16xf32> to vector<1x4x16xf32>
    %120 = arith.mulf %119, %87 : vector<1x4x16xf32>
    %c0_i32_113 = arith.constant 0 : i32
    %c0_i32_114 = arith.constant 0 : i32
    %c0_i32_115 = arith.constant 0 : i32
    %c0_i32_116 = arith.constant 0 : i32
    %c0_i32_117 = arith.constant 0 : i32
    %121 = tpu.memref_slice %arg1[%c0_i32_113, %c0_i32_114, %c0_i32_115, %c0_i32_116, %c0_i32_117] : memref<1x16x1x4x16xf32, #tpu.memory_space<vmem>> -> memref<1x16x1x4x16xf32, #tpu.memory_space<vmem>>
    %122 = tpu.memref_squeeze %121 : memref<1x16x1x4x16xf32, #tpu.memory_space<vmem>> -> memref<16x1x4x16xf32, #tpu.memory_space<vmem>>
    %c12 = arith.constant 12 : index
    %c0_118 = arith.constant 0 : index
    %c0_119 = arith.constant 0 : index
    %c0_120 = arith.constant 0 : index
    %123 = vector.load %122[%c12, %c0_118, %c0_119, %c0_120] : memref<16x1x4x16xf32, #tpu.memory_space<vmem>>, vector<1x1x4x16xf32>
    %124 = vector.shape_cast %123 : vector<1x1x4x16xf32> to vector<1x4x16xf32>
    %125 = arith.addf %120, %124 : vector<1x4x16xf32>
    %cst_121 = arith.constant 0.000000e+00 : f32
    %126 = vector.broadcast %cst_121 : f32 to vector<1x4x16xf32>
    %127 = arith.maximumf %125, %126 : vector<1x4x16xf32>
    %c3_122 = arith.constant 3 : index
    %c0_123 = arith.constant 0 : index
    %c0_124 = arith.constant 0 : index
    %c0_125 = arith.constant 0 : index
    %128 = vector.load %arg8[%c3_122, %c0_123, %c0_124, %c0_125] : memref<16x1x4x16xf32, #tpu.memory_space<vmem>>, vector<1x1x4x16xf32>
    %129 = vector.shape_cast %128 : vector<1x1x4x16xf32> to vector<1x4x16xf32>
    %130 = vector.shape_cast %117 : vector<1x4x16xf32> to vector<1x1x4x16xf32>
    tpu.vector_store %arg8[%c3_122, %c0_123, %c0_124, %c0_125], %130 {strides = array<i32>} : memref<16x1x4x16xf32, #tpu.memory_space<vmem>>, vector<1x1x4x16xf32>,
    %c12_126 = arith.constant 12 : index
    %c0_127 = arith.constant 0 : index
    %c0_128 = arith.constant 0 : index
    %c0_129 = arith.constant 0 : index
    %131 = vector.load %arg9[%c12_126, %c0_127, %c0_128, %c0_129] : memref<16x1x4x16xf32, #tpu.memory_space<vmem>>, vector<1x1x4x16xf32>
    %132 = vector.shape_cast %131 : vector<1x1x4x16xf32> to vector<1x4x16xf32>
    %133 = vector.shape_cast %127 : vector<1x4x16xf32> to vector<1x1x4x16xf32>
    tpu.vector_store %arg9[%c12_126, %c0_127, %c0_128, %c0_129], %133 {strides = array<i32>} : memref<16x1x4x16xf32, #tpu.memory_space<vmem>>, vector<1x1x4x16xf32>,
    %c0_130 = arith.constant 0 : index
    %c3_131 = arith.constant 3 : index
    %c0_132 = arith.constant 0 : index
    %c0_133 = arith.constant 0 : index
    %134 = vector.load %arg3[%c0_130, %c3_131, %c0_132, %c0_133] : memref<2x16x1x16xf32, #tpu.memory_space<vmem>>, vector<1x1x1x16xf32>
    %135 = vector.shape_cast %134 : vector<1x1x1x16xf32> to vector<1x16xf32>
    %136 = arith.negf %135 : vector<1x16xf32>
    %137 = math.exp %136 : vector<1x16xf32>
    %cst_134 = arith.constant 1.000000e+00 : f32
    %138 = vector.broadcast %cst_134 : f32 to vector<1x16xf32>
    %139 = arith.addf %138, %137 : vector<1x16xf32>
    %140 = arith.divf %138, %139 : vector<1x16xf32>
    %c1_135 = arith.constant 1 : index
    %c12_136 = arith.constant 12 : index
    %c0_137 = arith.constant 0 : index
    %c0_138 = arith.constant 0 : index
    %141 = vector.load %arg3[%c1_135, %c12_136, %c0_137, %c0_138] : memref<2x16x1x16xf32, #tpu.memory_space<vmem>>, vector<1x1x1x16xf32>
    %142 = vector.shape_cast %141 : vector<1x1x1x16xf32> to vector<1x16xf32>
    %143 = arith.negf %142 : vector<1x16xf32>
    %144 = math.exp %143 : vector<1x16xf32>
    %cst_139 = arith.constant 1.000000e+00 : f32
    %145 = vector.broadcast %cst_139 : f32 to vector<1x16xf32>
    %146 = arith.addf %145, %144 : vector<1x16xf32>
    %147 = arith.divf %145, %146 : vector<1x16xf32>
    %148 = vector.shape_cast %140 : vector<1x16xf32> to vector<1x1x16xf32>
    %149 = vector.broadcast %148 : vector<1x1x16xf32> to vector<1x4x16xf32>
    %150 = arith.mulf %149, %117 : vector<1x4x16xf32>
    %c0_i32_140 = arith.constant 0 : i32
    %c0_i32_141 = arith.constant 0 : i32
    %c0_i32_142 = arith.constant 0 : i32
    %c0_i32_143 = arith.constant 0 : i32
    %c0_i32_144 = arith.constant 0 : i32
    %151 = tpu.memref_slice %arg1[%c0_i32_140, %c0_i32_141, %c0_i32_142, %c0_i32_143, %c0_i32_144] : memref<1x16x1x4x16xf32, #tpu.memory_space<vmem>> -> memref<1x16x1x4x16xf32, #tpu.memory_space<vmem>>
    %152 = tpu.memref_squeeze %151 : memref<1x16x1x4x16xf32, #tpu.memory_space<vmem>> -> memref<16x1x4x16xf32, #tpu.memory_space<vmem>>
    %c4 = arith.constant 4 : index
    %c0_145 = arith.constant 0 : index
    %c0_146 = arith.constant 0 : index
    %c0_147 = arith.constant 0 : index
    %153 = vector.load %152[%c4, %c0_145, %c0_146, %c0_147] : memref<16x1x4x16xf32, #tpu.memory_space<vmem>>, vector<1x1x4x16xf32>
    %154 = vector.shape_cast %153 : vector<1x1x4x16xf32> to vector<1x4x16xf32>
    %155 = arith.addf %150, %154 : vector<1x4x16xf32>
    %cst_148 = arith.constant 0.000000e+00 : f32
    %156 = vector.broadcast %cst_148 : f32 to vector<1x4x16xf32>
    %157 = arith.maximumf %155, %156 : vector<1x4x16xf32>
    %158 = vector.shape_cast %147 : vector<1x16xf32> to vector<1x1x16xf32>
    %159 = vector.broadcast %158 : vector<1x1x16xf32> to vector<1x4x16xf32>
    %160 = arith.mulf %159, %127 : vector<1x4x16xf32>
    %c0_i32_149 = arith.constant 0 : i32
    %c0_i32_150 = arith.constant 0 : i32
    %c0_i32_151 = arith.constant 0 : i32
    %c0_i32_152 = arith.constant 0 : i32
    %c0_i32_153 = arith.constant 0 : i32
    %161 = tpu.memref_slice %arg1[%c0_i32_149, %c0_i32_150, %c0_i32_151, %c0_i32_152, %c0_i32_153] : memref<1x16x1x4x16xf32, #tpu.memory_space<vmem>> -> memref<1x16x1x4x16xf32, #tpu.memory_space<vmem>>
    %162 = tpu.memref_squeeze %161 : memref<1x16x1x4x16xf32, #tpu.memory_space<vmem>> -> memref<16x1x4x16xf32, #tpu.memory_space<vmem>>
    %c11 = arith.constant 11 : index
    %c0_154 = arith.constant 0 : index
    %c0_155 = arith.constant 0 : index
    %c0_156 = arith.constant 0 : index
    %163 = vector.load %162[%c11, %c0_154, %c0_155, %c0_156] : memref<16x1x4x16xf32, #tpu.memory_space<vmem>>, vector<1x1x4x16xf32>
    %164 = vector.shape_cast %163 : vector<1x1x4x16xf32> to vector<1x4x16xf32>
    %165 = arith.addf %160, %164 : vector<1x4x16xf32>
    %cst_157 = arith.constant 0.000000e+00 : f32
    %166 = vector.broadcast %cst_157 : f32 to vector<1x4x16xf32>
    %167 = arith.maximumf %165, %166 : vector<1x4x16xf32>
    %c4_158 = arith.constant 4 : index
    %c0_159 = arith.constant 0 : index
    %c0_160 = arith.constant 0 : index
    %c0_161 = arith.constant 0 : index
    %168 = vector.load %arg8[%c4_158, %c0_159, %c0_160, %c0_161] : memref<16x1x4x16xf32, #tpu.memory_space<vmem>>, vector<1x1x4x16xf32>
    %169 = vector.shape_cast %168 : vector<1x1x4x16xf32> to vector<1x4x16xf32>
    %170 = vector.shape_cast %157 : vector<1x4x16xf32> to vector<1x1x4x16xf32>
    tpu.vector_store %arg8[%c4_158, %c0_159, %c0_160, %c0_161], %170 {strides = array<i32>} : memref<16x1x4x16xf32, #tpu.memory_space<vmem>>, vector<1x1x4x16xf32>,
    %c11_162 = arith.constant 11 : index
    %c0_163 = arith.constant 0 : index
    %c0_164 = arith.constant 0 : index
    %c0_165 = arith.constant 0 : index
    %171 = vector.load %arg9[%c11_162, %c0_163, %c0_164, %c0_165] : memref<16x1x4x16xf32, #tpu.memory_space<vmem>>, vector<1x1x4x16xf32>
    %172 = vector.shape_cast %171 : vector<1x1x4x16xf32> to vector<1x4x16xf32>
    %173 = vector.shape_cast %167 : vector<1x4x16xf32> to vector<1x1x4x16xf32>
    tpu.vector_store %arg9[%c11_162, %c0_163, %c0_164, %c0_165], %173 {strides = array<i32>} : memref<16x1x4x16xf32, #tpu.memory_space<vmem>>, vector<1x1x4x16xf32>,
    %c0_166 = arith.constant 0 : index
    %c4_167 = arith.constant 4 : index
    %c0_168 = arith.constant 0 : index
    %c0_169 = arith.constant 0 : index
    %174 = vector.load %arg3[%c0_166, %c4_167, %c0_168, %c0_169] : memref<2x16x1x16xf32, #tpu.memory_space<vmem>>, vector<1x1x1x16xf32>
    %175 = vector.shape_cast %174 : vector<1x1x1x16xf32> to vector<1x16xf32>
    %176 = arith.negf %175 : vector<1x16xf32>
    %177 = math.exp %176 : vector<1x16xf32>
    %cst_170 = arith.constant 1.000000e+00 : f32
    %178 = vector.broadcast %cst_170 : f32 to vector<1x16xf32>
    %179 = arith.addf %178, %177 : vector<1x16xf32>
    %180 = arith.divf %178, %179 : vector<1x16xf32>
    %c1_171 = arith.constant 1 : index
    %c11_172 = arith.constant 11 : index
    %c0_173 = arith.constant 0 : index
    %c0_174 = arith.constant 0 : index
    %181 = vector.load %arg3[%c1_171, %c11_172, %c0_173, %c0_174] : memref<2x16x1x16xf32, #tpu.memory_space<vmem>>, vector<1x1x1x16xf32>
    %182 = vector.shape_cast %181 : vector<1x1x1x16xf32> to vector<1x16xf32>
    %183 = arith.negf %182 : vector<1x16xf32>
    %184 = math.exp %183 : vector<1x16xf32>
    %cst_175 = arith.constant 1.000000e+00 : f32
    %185 = vector.broadcast %cst_175 : f32 to vector<1x16xf32>
    %186 = arith.addf %185, %184 : vector<1x16xf32>
    %187 = arith.divf %185, %186 : vector<1x16xf32>
    %188 = vector.shape_cast %180 : vector<1x16xf32> to vector<1x1x16xf32>
    %189 = vector.broadcast %188 : vector<1x1x16xf32> to vector<1x4x16xf32>
    %190 = arith.mulf %189, %157 : vector<1x4x16xf32>
    %c0_i32_176 = arith.constant 0 : i32
    %c0_i32_177 = arith.constant 0 : i32
    %c0_i32_178 = arith.constant 0 : i32
    %c0_i32_179 = arith.constant 0 : i32
    %c0_i32_180 = arith.constant 0 : i32
    %191 = tpu.memref_slice %arg1[%c0_i32_176, %c0_i32_177, %c0_i32_178, %c0_i32_179, %c0_i32_180] : memref<1x16x1x4x16xf32, #tpu.memory_space<vmem>> -> memref<1x16x1x4x16xf32, #tpu.memory_space<vmem>>
    %192 = tpu.memref_squeeze %191 : memref<1x16x1x4x16xf32, #tpu.memory_space<vmem>> -> memref<16x1x4x16xf32, #tpu.memory_space<vmem>>
    %c5 = arith.constant 5 : index
    %c0_181 = arith.constant 0 : index
    %c0_182 = arith.constant 0 : index
    %c0_183 = arith.constant 0 : index
    %193 = vector.load %192[%c5, %c0_181, %c0_182, %c0_183] : memref<16x1x4x16xf32, #tpu.memory_space<vmem>>, vector<1x1x4x16xf32>
    %194 = vector.shape_cast %193 : vector<1x1x4x16xf32> to vector<1x4x16xf32>
    %195 = arith.addf %190, %194 : vector<1x4x16xf32>
    %cst_184 = arith.constant 0.000000e+00 : f32
    %196 = vector.broadcast %cst_184 : f32 to vector<1x4x16xf32>
    %197 = arith.maximumf %195, %196 : vector<1x4x16xf32>
    %198 = vector.shape_cast %187 : vector<1x16xf32> to vector<1x1x16xf32>
    %199 = vector.broadcast %198 : vector<1x1x16xf32> to vector<1x4x16xf32>
    %200 = arith.mulf %199, %167 : vector<1x4x16xf32>
    %c0_i32_185 = arith.constant 0 : i32
    %c0_i32_186 = arith.constant 0 : i32
    %c0_i32_187 = arith.constant 0 : i32
    %c0_i32_188 = arith.constant 0 : i32
    %c0_i32_189 = arith.constant 0 : i32
    %201 = tpu.memref_slice %arg1[%c0_i32_185, %c0_i32_186, %c0_i32_187, %c0_i32_188, %c0_i32_189] : memref<1x16x1x4x16xf32, #tpu.memory_space<vmem>> -> memref<1x16x1x4x16xf32, #tpu.memory_space<vmem>>
    %202 = tpu.memref_squeeze %201 : memref<1x16x1x4x16xf32, #tpu.memory_space<vmem>> -> memref<16x1x4x16xf32, #tpu.memory_space<vmem>>
    %c10 = arith.constant 10 : index
    %c0_190 = arith.constant 0 : index
    %c0_191 = arith.constant 0 : index
    %c0_192 = arith.constant 0 : index
    %203 = vector.load %202[%c10, %c0_190, %c0_191, %c0_192] : memref<16x1x4x16xf32, #tpu.memory_space<vmem>>, vector<1x1x4x16xf32>
    %204 = vector.shape_cast %203 : vector<1x1x4x16xf32> to vector<1x4x16xf32>
    %205 = arith.addf %200, %204 : vector<1x4x16xf32>
    %cst_193 = arith.constant 0.000000e+00 : f32
    %206 = vector.broadcast %cst_193 : f32 to vector<1x4x16xf32>
    %207 = arith.maximumf %205, %206 : vector<1x4x16xf32>
    %c5_194 = arith.constant 5 : index
    %c0_195 = arith.constant 0 : index
    %c0_196 = arith.constant 0 : index
    %c0_197 = arith.constant 0 : index
    %208 = vector.load %arg8[%c5_194, %c0_195, %c0_196, %c0_197] : memref<16x1x4x16xf32, #tpu.memory_space<vmem>>, vector<1x1x4x16xf32>
    %209 = vector.shape_cast %208 : vector<1x1x4x16xf32> to vector<1x4x16xf32>
    %210 = vector.shape_cast %197 : vector<1x4x16xf32> to vector<1x1x4x16xf32>
    tpu.vector_store %arg8[%c5_194, %c0_195, %c0_196, %c0_197], %210 {strides = array<i32>} : memref<16x1x4x16xf32, #tpu.memory_space<vmem>>, vector<1x1x4x16xf32>,
    %c10_198 = arith.constant 10 : index
    %c0_199 = arith.constant 0 : index
    %c0_200 = arith.constant 0 : index
    %c0_201 = arith.constant 0 : index
    %211 = vector.load %arg9[%c10_198, %c0_199, %c0_200, %c0_201] : memref<16x1x4x16xf32, #tpu.memory_space<vmem>>, vector<1x1x4x16xf32>
    %212 = vector.shape_cast %211 : vector<1x1x4x16xf32> to vector<1x4x16xf32>
    %213 = vector.shape_cast %207 : vector<1x4x16xf32> to vector<1x1x4x16xf32>
    tpu.vector_store %arg9[%c10_198, %c0_199, %c0_200, %c0_201], %213 {strides = array<i32>} : memref<16x1x4x16xf32, #tpu.memory_space<vmem>>, vector<1x1x4x16xf32>,
    %c0_202 = arith.constant 0 : index
    %c5_203 = arith.constant 5 : index
    %c0_204 = arith.constant 0 : index
    %c0_205 = arith.constant 0 : index
    %214 = vector.load %arg3[%c0_202, %c5_203, %c0_204, %c0_205] : memref<2x16x1x16xf32, #tpu.memory_space<vmem>>, vector<1x1x1x16xf32>
    %215 = vector.shape_cast %214 : vector<1x1x1x16xf32> to vector<1x16xf32>
    %216 = arith.negf %215 : vector<1x16xf32>
    %217 = math.exp %216 : vector<1x16xf32>
    %cst_206 = arith.constant 1.000000e+00 : f32
    %218 = vector.broadcast %cst_206 : f32 to vector<1x16xf32>
    %219 = arith.addf %218, %217 : vector<1x16xf32>
    %220 = arith.divf %218, %219 : vector<1x16xf32>
    %c1_207 = arith.constant 1 : index
    %c10_208 = arith.constant 10 : index
    %c0_209 = arith.constant 0 : index
    %c0_210 = arith.constant 0 : index
    %221 = vector.load %arg3[%c1_207, %c10_208, %c0_209, %c0_210] : memref<2x16x1x16xf32, #tpu.memory_space<vmem>>, vector<1x1x1x16xf32>
    %222 = vector.shape_cast %221 : vector<1x1x1x16xf32> to vector<1x16xf32>
    %223 = arith.negf %222 : vector<1x16xf32>
    %224 = math.exp %223 : vector<1x16xf32>
    %cst_211 = arith.constant 1.000000e+00 : f32
    %225 = vector.broadcast %cst_211 : f32 to vector<1x16xf32>
    %226 = arith.addf %225, %224 : vector<1x16xf32>
    %227 = arith.divf %225, %226 : vector<1x16xf32>
    %228 = vector.shape_cast %220 : vector<1x16xf32> to vector<1x1x16xf32>
    %229 = vector.broadcast %228 : vector<1x1x16xf32> to vector<1x4x16xf32>
    %230 = arith.mulf %229, %197 : vector<1x4x16xf32>
    %c0_i32_212 = arith.constant 0 : i32
    %c0_i32_213 = arith.constant 0 : i32
    %c0_i32_214 = arith.constant 0 : i32
    %c0_i32_215 = arith.constant 0 : i32
    %c0_i32_216 = arith.constant 0 : i32
    %231 = tpu.memref_slice %arg1[%c0_i32_212, %c0_i32_213, %c0_i32_214, %c0_i32_215, %c0_i32_216] : memref<1x16x1x4x16xf32, #tpu.memory_space<vmem>> -> memref<1x16x1x4x16xf32, #tpu.memory_space<vmem>>
    %232 = tpu.memref_squeeze %231 : memref<1x16x1x4x16xf32, #tpu.memory_space<vmem>> -> memref<16x1x4x16xf32, #tpu.memory_space<vmem>>
    %c6 = arith.constant 6 : index
    %c0_217 = arith.constant 0 : index
    %c0_218 = arith.constant 0 : index
    %c0_219 = arith.constant 0 : index
    %233 = vector.load %232[%c6, %c0_217, %c0_218, %c0_219] : memref<16x1x4x16xf32, #tpu.memory_space<vmem>>, vector<1x1x4x16xf32>
    %234 = vector.shape_cast %233 : vector<1x1x4x16xf32> to vector<1x4x16xf32>
    %235 = arith.addf %230, %234 : vector<1x4x16xf32>
    %cst_220 = arith.constant 0.000000e+00 : f32
    %236 = vector.broadcast %cst_220 : f32 to vector<1x4x16xf32>
    %237 = arith.maximumf %235, %236 : vector<1x4x16xf32>
    %238 = vector.shape_cast %227 : vector<1x16xf32> to vector<1x1x16xf32>
    %239 = vector.broadcast %238 : vector<1x1x16xf32> to vector<1x4x16xf32>
    %240 = arith.mulf %239, %207 : vector<1x4x16xf32>
    %c0_i32_221 = arith.constant 0 : i32
    %c0_i32_222 = arith.constant 0 : i32
    %c0_i32_223 = arith.constant 0 : i32
    %c0_i32_224 = arith.constant 0 : i32
    %c0_i32_225 = arith.constant 0 : i32
    %241 = tpu.memref_slice %arg1[%c0_i32_221, %c0_i32_222, %c0_i32_223, %c0_i32_224, %c0_i32_225] : memref<1x16x1x4x16xf32, #tpu.memory_space<vmem>> -> memref<1x16x1x4x16xf32, #tpu.memory_space<vmem>>
    %242 = tpu.memref_squeeze %241 : memref<1x16x1x4x16xf32, #tpu.memory_space<vmem>> -> memref<16x1x4x16xf32, #tpu.memory_space<vmem>>
    %c9 = arith.constant 9 : index
    %c0_226 = arith.constant 0 : index
    %c0_227 = arith.constant 0 : index
    %c0_228 = arith.constant 0 : index
    %243 = vector.load %242[%c9, %c0_226, %c0_227, %c0_228] : memref<16x1x4x16xf32, #tpu.memory_space<vmem>>, vector<1x1x4x16xf32>
    %244 = vector.shape_cast %243 : vector<1x1x4x16xf32> to vector<1x4x16xf32>
    %245 = arith.addf %240, %244 : vector<1x4x16xf32>
    %cst_229 = arith.constant 0.000000e+00 : f32
    %246 = vector.broadcast %cst_229 : f32 to vector<1x4x16xf32>
    %247 = arith.maximumf %245, %246 : vector<1x4x16xf32>
    %c6_230 = arith.constant 6 : index
    %c0_231 = arith.constant 0 : index
    %c0_232 = arith.constant 0 : index
    %c0_233 = arith.constant 0 : index
    %248 = vector.load %arg8[%c6_230, %c0_231, %c0_232, %c0_233] : memref<16x1x4x16xf32, #tpu.memory_space<vmem>>, vector<1x1x4x16xf32>
    %249 = vector.shape_cast %248 : vector<1x1x4x16xf32> to vector<1x4x16xf32>
    %250 = vector.shape_cast %237 : vector<1x4x16xf32> to vector<1x1x4x16xf32>
    tpu.vector_store %arg8[%c6_230, %c0_231, %c0_232, %c0_233], %250 {strides = array<i32>} : memref<16x1x4x16xf32, #tpu.memory_space<vmem>>, vector<1x1x4x16xf32>,
    %c9_234 = arith.constant 9 : index
    %c0_235 = arith.constant 0 : index
    %c0_236 = arith.constant 0 : index
    %c0_237 = arith.constant 0 : index
    %251 = vector.load %arg9[%c9_234, %c0_235, %c0_236, %c0_237] : memref<16x1x4x16xf32, #tpu.memory_space<vmem>>, vector<1x1x4x16xf32>
    %252 = vector.shape_cast %251 : vector<1x1x4x16xf32> to vector<1x4x16xf32>
    %253 = vector.shape_cast %247 : vector<1x4x16xf32> to vector<1x1x4x16xf32>
    tpu.vector_store %arg9[%c9_234, %c0_235, %c0_236, %c0_237], %253 {strides = array<i32>} : memref<16x1x4x16xf32, #tpu.memory_space<vmem>>, vector<1x1x4x16xf32>,
    %c0_238 = arith.constant 0 : index
    %c6_239 = arith.constant 6 : index
    %c0_240 = arith.constant 0 : index
    %c0_241 = arith.constant 0 : index
    %254 = vector.load %arg3[%c0_238, %c6_239, %c0_240, %c0_241] : memref<2x16x1x16xf32, #tpu.memory_space<vmem>>, vector<1x1x1x16xf32>
    %255 = vector.shape_cast %254 : vector<1x1x1x16xf32> to vector<1x16xf32>
    %256 = arith.negf %255 : vector<1x16xf32>
    %257 = math.exp %256 : vector<1x16xf32>
    %cst_242 = arith.constant 1.000000e+00 : f32
    %258 = vector.broadcast %cst_242 : f32 to vector<1x16xf32>
    %259 = arith.addf %258, %257 : vector<1x16xf32>
    %260 = arith.divf %258, %259 : vector<1x16xf32>
    %c1_243 = arith.constant 1 : index
    %c9_244 = arith.constant 9 : index
    %c0_245 = arith.constant 0 : index
    %c0_246 = arith.constant 0 : index
    %261 = vector.load %arg3[%c1_243, %c9_244, %c0_245, %c0_246] : memref<2x16x1x16xf32, #tpu.memory_space<vmem>>, vector<1x1x1x16xf32>
    %262 = vector.shape_cast %261 : vector<1x1x1x16xf32> to vector<1x16xf32>
    %263 = arith.negf %262 : vector<1x16xf32>
    %264 = math.exp %263 : vector<1x16xf32>
    %cst_247 = arith.constant 1.000000e+00 : f32
    %265 = vector.broadcast %cst_247 : f32 to vector<1x16xf32>
    %266 = arith.addf %265, %264 : vector<1x16xf32>
    %267 = arith.divf %265, %266 : vector<1x16xf32>
    %268 = vector.shape_cast %260 : vector<1x16xf32> to vector<1x1x16xf32>
    %269 = vector.broadcast %268 : vector<1x1x16xf32> to vector<1x4x16xf32>
    %270 = arith.mulf %269, %237 : vector<1x4x16xf32>
    %c0_i32_248 = arith.constant 0 : i32
    %c0_i32_249 = arith.constant 0 : i32
    %c0_i32_250 = arith.constant 0 : i32
    %c0_i32_251 = arith.constant 0 : i32
    %c0_i32_252 = arith.constant 0 : i32
    %271 = tpu.memref_slice %arg1[%c0_i32_248, %c0_i32_249, %c0_i32_250, %c0_i32_251, %c0_i32_252] : memref<1x16x1x4x16xf32, #tpu.memory_space<vmem>> -> memref<1x16x1x4x16xf32, #tpu.memory_space<vmem>>
    %272 = tpu.memref_squeeze %271 : memref<1x16x1x4x16xf32, #tpu.memory_space<vmem>> -> memref<16x1x4x16xf32, #tpu.memory_space<vmem>>
    %c7 = arith.constant 7 : index
    %c0_253 = arith.constant 0 : index
    %c0_254 = arith.constant 0 : index
    %c0_255 = arith.constant 0 : index
    %273 = vector.load %272[%c7, %c0_253, %c0_254, %c0_255] : memref<16x1x4x16xf32, #tpu.memory_space<vmem>>, vector<1x1x4x16xf32>
    %274 = vector.shape_cast %273 : vector<1x1x4x16xf32> to vector<1x4x16xf32>
    %275 = arith.addf %270, %274 : vector<1x4x16xf32>
    %cst_256 = arith.constant 0.000000e+00 : f32
    %276 = vector.broadcast %cst_256 : f32 to vector<1x4x16xf32>
    %277 = arith.maximumf %275, %276 : vector<1x4x16xf32>
    %278 = vector.shape_cast %267 : vector<1x16xf32> to vector<1x1x16xf32>
    %279 = vector.broadcast %278 : vector<1x1x16xf32> to vector<1x4x16xf32>
    %280 = arith.mulf %279, %247 : vector<1x4x16xf32>
    %c0_i32_257 = arith.constant 0 : i32
    %c0_i32_258 = arith.constant 0 : i32
    %c0_i32_259 = arith.constant 0 : i32
    %c0_i32_260 = arith.constant 0 : i32
    %c0_i32_261 = arith.constant 0 : i32
    %281 = tpu.memref_slice %arg1[%c0_i32_257, %c0_i32_258, %c0_i32_259, %c0_i32_260, %c0_i32_261] : memref<1x16x1x4x16xf32, #tpu.memory_space<vmem>> -> memref<1x16x1x4x16xf32, #tpu.memory_space<vmem>>
    %282 = tpu.memref_squeeze %281 : memref<1x16x1x4x16xf32, #tpu.memory_space<vmem>> -> memref<16x1x4x16xf32, #tpu.memory_space<vmem>>
    %c8 = arith.constant 8 : index
    %c0_262 = arith.constant 0 : index
    %c0_263 = arith.constant 0 : index
    %c0_264 = arith.constant 0 : index
    %283 = vector.load %282[%c8, %c0_262, %c0_263, %c0_264] : memref<16x1x4x16xf32, #tpu.memory_space<vmem>>, vector<1x1x4x16xf32>
    %284 = vector.shape_cast %283 : vector<1x1x4x16xf32> to vector<1x4x16xf32>
    %285 = arith.addf %280, %284 : vector<1x4x16xf32>
    %cst_265 = arith.constant 0.000000e+00 : f32
    %286 = vector.broadcast %cst_265 : f32 to vector<1x4x16xf32>
    %287 = arith.maximumf %285, %286 : vector<1x4x16xf32>
    %c7_266 = arith.constant 7 : index
    %c0_267 = arith.constant 0 : index
    %c0_268 = arith.constant 0 : index
    %c0_269 = arith.constant 0 : index
    %288 = vector.load %arg8[%c7_266, %c0_267, %c0_268, %c0_269] : memref<16x1x4x16xf32, #tpu.memory_space<vmem>>, vector<1x1x4x16xf32>
    %289 = vector.shape_cast %288 : vector<1x1x4x16xf32> to vector<1x4x16xf32>
    %290 = vector.shape_cast %277 : vector<1x4x16xf32> to vector<1x1x4x16xf32>
    tpu.vector_store %arg8[%c7_266, %c0_267, %c0_268, %c0_269], %290 {strides = array<i32>} : memref<16x1x4x16xf32, #tpu.memory_space<vmem>>, vector<1x1x4x16xf32>,
    %c8_270 = arith.constant 8 : index
    %c0_271 = arith.constant 0 : index
    %c0_272 = arith.constant 0 : index
    %c0_273 = arith.constant 0 : index
    %291 = vector.load %arg9[%c8_270, %c0_271, %c0_272, %c0_273] : memref<16x1x4x16xf32, #tpu.memory_space<vmem>>, vector<1x1x4x16xf32>
    %292 = vector.shape_cast %291 : vector<1x1x4x16xf32> to vector<1x4x16xf32>
    %293 = vector.shape_cast %287 : vector<1x4x16xf32> to vector<1x1x4x16xf32>
    tpu.vector_store %arg9[%c8_270, %c0_271, %c0_272, %c0_273], %293 {strides = array<i32>} : memref<16x1x4x16xf32, #tpu.memory_space<vmem>>, vector<1x1x4x16xf32>,
    %c0_274 = arith.constant 0 : index
    %c7_275 = arith.constant 7 : index
    %c0_276 = arith.constant 0 : index
    %c0_277 = arith.constant 0 : index
    %294 = vector.load %arg3[%c0_274, %c7_275, %c0_276, %c0_277] : memref<2x16x1x16xf32, #tpu.memory_space<vmem>>, vector<1x1x1x16xf32>
    %295 = vector.shape_cast %294 : vector<1x1x1x16xf32> to vector<1x16xf32>
    %296 = arith.negf %295 : vector<1x16xf32>
    %297 = math.exp %296 : vector<1x16xf32>
    %cst_278 = arith.constant 1.000000e+00 : f32
    %298 = vector.broadcast %cst_278 : f32 to vector<1x16xf32>
    %299 = arith.addf %298, %297 : vector<1x16xf32>
    %300 = arith.divf %298, %299 : vector<1x16xf32>
    %c1_279 = arith.constant 1 : index
    %c8_280 = arith.constant 8 : index
    %c0_281 = arith.constant 0 : index
    %c0_282 = arith.constant 0 : index
    %301 = vector.load %arg3[%c1_279, %c8_280, %c0_281, %c0_282] : memref<2x16x1x16xf32, #tpu.memory_space<vmem>>, vector<1x1x1x16xf32>
    %302 = vector.shape_cast %301 : vector<1x1x1x16xf32> to vector<1x16xf32>
    %303 = arith.negf %302 : vector<1x16xf32>
    %304 = math.exp %303 : vector<1x16xf32>
    %cst_283 = arith.constant 1.000000e+00 : f32
    %305 = vector.broadcast %cst_283 : f32 to vector<1x16xf32>
    %306 = arith.addf %305, %304 : vector<1x16xf32>
    %307 = arith.divf %305, %306 : vector<1x16xf32>
    %308 = vector.shape_cast %300 : vector<1x16xf32> to vector<1x1x16xf32>
    %309 = vector.broadcast %308 : vector<1x1x16xf32> to vector<1x4x16xf32>
    %310 = arith.mulf %309, %277 : vector<1x4x16xf32>
    %c0_i32_284 = arith.constant 0 : i32
    %c0_i32_285 = arith.constant 0 : i32
    %c0_i32_286 = arith.constant 0 : i32
    %c0_i32_287 = arith.constant 0 : i32
    %c0_i32_288 = arith.constant 0 : i32
    %311 = tpu.memref_slice %arg1[%c0_i32_284, %c0_i32_285, %c0_i32_286, %c0_i32_287, %c0_i32_288] : memref<1x16x1x4x16xf32, #tpu.memory_space<vmem>> -> memref<1x16x1x4x16xf32, #tpu.memory_space<vmem>>
    %312 = tpu.memref_squeeze %311 : memref<1x16x1x4x16xf32, #tpu.memory_space<vmem>> -> memref<16x1x4x16xf32, #tpu.memory_space<vmem>>
    %c8_289 = arith.constant 8 : index
    %c0_290 = arith.constant 0 : index
    %c0_291 = arith.constant 0 : index
    %c0_292 = arith.constant 0 : index
    %313 = vector.load %312[%c8_289, %c0_290, %c0_291, %c0_292] : memref<16x1x4x16xf32, #tpu.memory_space<vmem>>, vector<1x1x4x16xf32>
    %314 = vector.shape_cast %313 : vector<1x1x4x16xf32> to vector<1x4x16xf32>
    %315 = arith.addf %310, %314 : vector<1x4x16xf32>
    %cst_293 = arith.constant 0.000000e+00 : f32
    %316 = vector.broadcast %cst_293 : f32 to vector<1x4x16xf32>
    %317 = arith.maximumf %315, %316 : vector<1x4x16xf32>
    %318 = vector.shape_cast %307 : vector<1x16xf32> to vector<1x1x16xf32>
    %319 = vector.broadcast %318 : vector<1x1x16xf32> to vector<1x4x16xf32>
    %320 = arith.mulf %319, %287 : vector<1x4x16xf32>
    %c0_i32_294 = arith.constant 0 : i32
    %c0_i32_295 = arith.constant 0 : i32
    %c0_i32_296 = arith.constant 0 : i32
    %c0_i32_297 = arith.constant 0 : i32
    %c0_i32_298 = arith.constant 0 : i32
    %321 = tpu.memref_slice %arg1[%c0_i32_294, %c0_i32_295, %c0_i32_296, %c0_i32_297, %c0_i32_298] : memref<1x16x1x4x16xf32, #tpu.memory_space<vmem>> -> memref<1x16x1x4x16xf32, #tpu.memory_space<vmem>>
    %322 = tpu.memref_squeeze %321 : memref<1x16x1x4x16xf32, #tpu.memory_space<vmem>> -> memref<16x1x4x16xf32, #tpu.memory_space<vmem>>
    %c7_299 = arith.constant 7 : index
    %c0_300 = arith.constant 0 : index
    %c0_301 = arith.constant 0 : index
    %c0_302 = arith.constant 0 : index
    %323 = vector.load %322[%c7_299, %c0_300, %c0_301, %c0_302] : memref<16x1x4x16xf32, #tpu.memory_space<vmem>>, vector<1x1x4x16xf32>
    %324 = vector.shape_cast %323 : vector<1x1x4x16xf32> to vector<1x4x16xf32>
    %325 = arith.addf %320, %324 : vector<1x4x16xf32>
    %cst_303 = arith.constant 0.000000e+00 : f32
    %326 = vector.broadcast %cst_303 : f32 to vector<1x4x16xf32>
    %327 = arith.maximumf %325, %326 : vector<1x4x16xf32>
    %c8_304 = arith.constant 8 : index
    %c0_305 = arith.constant 0 : index
    %c0_306 = arith.constant 0 : index
    %c0_307 = arith.constant 0 : index
    %328 = vector.load %arg8[%c8_304, %c0_305, %c0_306, %c0_307] : memref<16x1x4x16xf32, #tpu.memory_space<vmem>>, vector<1x1x4x16xf32>
    %329 = vector.shape_cast %328 : vector<1x1x4x16xf32> to vector<1x4x16xf32>
    %330 = vector.shape_cast %317 : vector<1x4x16xf32> to vector<1x1x4x16xf32>
    tpu.vector_store %arg8[%c8_304, %c0_305, %c0_306, %c0_307], %330 {strides = array<i32>} : memref<16x1x4x16xf32, #tpu.memory_space<vmem>>, vector<1x1x4x16xf32>,
    %c7_308 = arith.constant 7 : index
    %c0_309 = arith.constant 0 : index
    %c0_310 = arith.constant 0 : index
    %c0_311 = arith.constant 0 : index
    %331 = vector.load %arg9[%c7_308, %c0_309, %c0_310, %c0_311] : memref<16x1x4x16xf32, #tpu.memory_space<vmem>>, vector<1x1x4x16xf32>
    %332 = vector.shape_cast %331 : vector<1x1x4x16xf32> to vector<1x4x16xf32>
    %333 = vector.shape_cast %327 : vector<1x4x16xf32> to vector<1x1x4x16xf32>
    tpu.vector_store %arg9[%c7_308, %c0_309, %c0_310, %c0_311], %333 {strides = array<i32>} : memref<16x1x4x16xf32, #tpu.memory_space<vmem>>, vector<1x1x4x16xf32>,
    %c0_312 = arith.constant 0 : index
    %c8_313 = arith.constant 8 : index
    %c0_314 = arith.constant 0 : index
    %c0_315 = arith.constant 0 : index
    %334 = vector.load %arg3[%c0_312, %c8_313, %c0_314, %c0_315] : memref<2x16x1x16xf32, #tpu.memory_space<vmem>>, vector<1x1x1x16xf32>
    %335 = vector.shape_cast %334 : vector<1x1x1x16xf32> to vector<1x16xf32>
    %336 = arith.negf %335 : vector<1x16xf32>
    %337 = math.exp %336 : vector<1x16xf32>
    %cst_316 = arith.constant 1.000000e+00 : f32
    %338 = vector.broadcast %cst_316 : f32 to vector<1x16xf32>
    %339 = arith.addf %338, %337 : vector<1x16xf32>
    %340 = arith.divf %338, %339 : vector<1x16xf32>
    %c1_317 = arith.constant 1 : index
    %c7_318 = arith.constant 7 : index
    %c0_319 = arith.constant 0 : index
    %c0_320 = arith.constant 0 : index
    %341 = vector.load %arg3[%c1_317, %c7_318, %c0_319, %c0_320] : memref<2x16x1x16xf32, #tpu.memory_space<vmem>>, vector<1x1x1x16xf32>
    %342 = vector.shape_cast %341 : vector<1x1x1x16xf32> to vector<1x16xf32>
    %343 = arith.negf %342 : vector<1x16xf32>
    %344 = math.exp %343 : vector<1x16xf32>
    %cst_321 = arith.constant 1.000000e+00 : f32
    %345 = vector.broadcast %cst_321 : f32 to vector<1x16xf32>
    %346 = arith.addf %345, %344 : vector<1x16xf32>
    %347 = arith.divf %345, %346 : vector<1x16xf32>
    %348 = vector.shape_cast %340 : vector<1x16xf32> to vector<1x1x16xf32>
    %349 = vector.broadcast %348 : vector<1x1x16xf32> to vector<1x4x16xf32>
    %350 = arith.mulf %349, %317 : vector<1x4x16xf32>
    %c0_i32_322 = arith.constant 0 : i32
    %c0_i32_323 = arith.constant 0 : i32
    %c0_i32_324 = arith.constant 0 : i32
    %c0_i32_325 = arith.constant 0 : i32
    %c0_i32_326 = arith.constant 0 : i32
    %351 = tpu.memref_slice %arg1[%c0_i32_322, %c0_i32_323, %c0_i32_324, %c0_i32_325, %c0_i32_326] : memref<1x16x1x4x16xf32, #tpu.memory_space<vmem>> -> memref<1x16x1x4x16xf32, #tpu.memory_space<vmem>>
    %352 = tpu.memref_squeeze %351 : memref<1x16x1x4x16xf32, #tpu.memory_space<vmem>> -> memref<16x1x4x16xf32, #tpu.memory_space<vmem>>
    %c9_327 = arith.constant 9 : index
    %c0_328 = arith.constant 0 : index
    %c0_329 = arith.constant 0 : index
    %c0_330 = arith.constant 0 : index
    %353 = vector.load %352[%c9_327, %c0_328, %c0_329, %c0_330] : memref<16x1x4x16xf32, #tpu.memory_space<vmem>>, vector<1x1x4x16xf32>
    %354 = vector.shape_cast %353 : vector<1x1x4x16xf32> to vector<1x4x16xf32>
    %355 = arith.addf %350, %354 : vector<1x4x16xf32>
    %cst_331 = arith.constant 0.000000e+00 : f32
    %356 = vector.broadcast %cst_331 : f32 to vector<1x4x16xf32>
    %357 = arith.maximumf %355, %356 : vector<1x4x16xf32>
    %358 = vector.shape_cast %347 : vector<1x16xf32> to vector<1x1x16xf32>
    %359 = vector.broadcast %358 : vector<1x1x16xf32> to vector<1x4x16xf32>
    %360 = arith.mulf %359, %327 : vector<1x4x16xf32>
    %c0_i32_332 = arith.constant 0 : i32
    %c0_i32_333 = arith.constant 0 : i32
    %c0_i32_334 = arith.constant 0 : i32
    %c0_i32_335 = arith.constant 0 : i32
    %c0_i32_336 = arith.constant 0 : i32
    %361 = tpu.memref_slice %arg1[%c0_i32_332, %c0_i32_333, %c0_i32_334, %c0_i32_335, %c0_i32_336] : memref<1x16x1x4x16xf32, #tpu.memory_space<vmem>> -> memref<1x16x1x4x16xf32, #tpu.memory_space<vmem>>
    %362 = tpu.memref_squeeze %361 : memref<1x16x1x4x16xf32, #tpu.memory_space<vmem>> -> memref<16x1x4x16xf32, #tpu.memory_space<vmem>>
    %c6_337 = arith.constant 6 : index
    %c0_338 = arith.constant 0 : index
    %c0_339 = arith.constant 0 : index
    %c0_340 = arith.constant 0 : index
    %363 = vector.load %362[%c6_337, %c0_338, %c0_339, %c0_340] : memref<16x1x4x16xf32, #tpu.memory_space<vmem>>, vector<1x1x4x16xf32>
    %364 = vector.shape_cast %363 : vector<1x1x4x16xf32> to vector<1x4x16xf32>
    %365 = arith.addf %360, %364 : vector<1x4x16xf32>
    %cst_341 = arith.constant 0.000000e+00 : f32
    %366 = vector.broadcast %cst_341 : f32 to vector<1x4x16xf32>
    %367 = arith.maximumf %365, %366 : vector<1x4x16xf32>
    %c9_342 = arith.constant 9 : index
    %c0_343 = arith.constant 0 : index
    %c0_344 = arith.constant 0 : index
    %c0_345 = arith.constant 0 : index
    %368 = vector.load %arg8[%c9_342, %c0_343, %c0_344, %c0_345] : memref<16x1x4x16xf32, #tpu.memory_space<vmem>>, vector<1x1x4x16xf32>
    %369 = vector.shape_cast %368 : vector<1x1x4x16xf32> to vector<1x4x16xf32>
    %370 = vector.shape_cast %357 : vector<1x4x16xf32> to vector<1x1x4x16xf32>
    tpu.vector_store %arg8[%c9_342, %c0_343, %c0_344, %c0_345], %370 {strides = array<i32>} : memref<16x1x4x16xf32, #tpu.memory_space<vmem>>, vector<1x1x4x16xf32>,
    %c6_346 = arith.constant 6 : index
    %c0_347 = arith.constant 0 : index
    %c0_348 = arith.constant 0 : index
    %c0_349 = arith.constant 0 : index
    %371 = vector.load %arg9[%c6_346, %c0_347, %c0_348, %c0_349] : memref<16x1x4x16xf32, #tpu.memory_space<vmem>>, vector<1x1x4x16xf32>
    %372 = vector.shape_cast %371 : vector<1x1x4x16xf32> to vector<1x4x16xf32>
    %373 = vector.shape_cast %367 : vector<1x4x16xf32> to vector<1x1x4x16xf32>
    tpu.vector_store %arg9[%c6_346, %c0_347, %c0_348, %c0_349], %373 {strides = array<i32>} : memref<16x1x4x16xf32, #tpu.memory_space<vmem>>, vector<1x1x4x16xf32>,
    %c0_350 = arith.constant 0 : index
    %c9_351 = arith.constant 9 : index
    %c0_352 = arith.constant 0 : index
    %c0_353 = arith.constant 0 : index
    %374 = vector.load %arg3[%c0_350, %c9_351, %c0_352, %c0_353] : memref<2x16x1x16xf32, #tpu.memory_space<vmem>>, vector<1x1x1x16xf32>
    %375 = vector.shape_cast %374 : vector<1x1x1x16xf32> to vector<1x16xf32>
    %376 = arith.negf %375 : vector<1x16xf32>
    %377 = math.exp %376 : vector<1x16xf32>
    %cst_354 = arith.constant 1.000000e+00 : f32
    %378 = vector.broadcast %cst_354 : f32 to vector<1x16xf32>
    %379 = arith.addf %378, %377 : vector<1x16xf32>
    %380 = arith.divf %378, %379 : vector<1x16xf32>
    %c1_355 = arith.constant 1 : index
    %c6_356 = arith.constant 6 : index
    %c0_357 = arith.constant 0 : index
    %c0_358 = arith.constant 0 : index
    %381 = vector.load %arg3[%c1_355, %c6_356, %c0_357, %c0_358] : memref<2x16x1x16xf32, #tpu.memory_space<vmem>>, vector<1x1x1x16xf32>
    %382 = vector.shape_cast %381 : vector<1x1x1x16xf32> to vector<1x16xf32>
    %383 = arith.negf %382 : vector<1x16xf32>
    %384 = math.exp %383 : vector<1x16xf32>
    %cst_359 = arith.constant 1.000000e+00 : f32
    %385 = vector.broadcast %cst_359 : f32 to vector<1x16xf32>
    %386 = arith.addf %385, %384 : vector<1x16xf32>
    %387 = arith.divf %385, %386 : vector<1x16xf32>
    %388 = vector.shape_cast %380 : vector<1x16xf32> to vector<1x1x16xf32>
    %389 = vector.broadcast %388 : vector<1x1x16xf32> to vector<1x4x16xf32>
    %390 = arith.mulf %389, %357 : vector<1x4x16xf32>
    %c0_i32_360 = arith.constant 0 : i32
    %c0_i32_361 = arith.constant 0 : i32
    %c0_i32_362 = arith.constant 0 : i32
    %c0_i32_363 = arith.constant 0 : i32
    %c0_i32_364 = arith.constant 0 : i32
    %391 = tpu.memref_slice %arg1[%c0_i32_360, %c0_i32_361, %c0_i32_362, %c0_i32_363, %c0_i32_364] : memref<1x16x1x4x16xf32, #tpu.memory_space<vmem>> -> memref<1x16x1x4x16xf32, #tpu.memory_space<vmem>>
    %392 = tpu.memref_squeeze %391 : memref<1x16x1x4x16xf32, #tpu.memory_space<vmem>> -> memref<16x1x4x16xf32, #tpu.memory_space<vmem>>
    %c10_365 = arith.constant 10 : index
    %c0_366 = arith.constant 0 : index
    %c0_367 = arith.constant 0 : index
    %c0_368 = arith.constant 0 : index
    %393 = vector.load %392[%c10_365, %c0_366, %c0_367, %c0_368] : memref<16x1x4x16xf32, #tpu.memory_space<vmem>>, vector<1x1x4x16xf32>
    %394 = vector.shape_cast %393 : vector<1x1x4x16xf32> to vector<1x4x16xf32>
    %395 = arith.addf %390, %394 : vector<1x4x16xf32>
    %cst_369 = arith.constant 0.000000e+00 : f32
    %396 = vector.broadcast %cst_369 : f32 to vector<1x4x16xf32>
    %397 = arith.maximumf %395, %396 : vector<1x4x16xf32>
    %398 = vector.shape_cast %387 : vector<1x16xf32> to vector<1x1x16xf32>
    %399 = vector.broadcast %398 : vector<1x1x16xf32> to vector<1x4x16xf32>
    %400 = arith.mulf %399, %367 : vector<1x4x16xf32>
    %c0_i32_370 = arith.constant 0 : i32
    %c0_i32_371 = arith.constant 0 : i32
    %c0_i32_372 = arith.constant 0 : i32
    %c0_i32_373 = arith.constant 0 : i32
    %c0_i32_374 = arith.constant 0 : i32
    %401 = tpu.memref_slice %arg1[%c0_i32_370, %c0_i32_371, %c0_i32_372, %c0_i32_373, %c0_i32_374] : memref<1x16x1x4x16xf32, #tpu.memory_space<vmem>> -> memref<1x16x1x4x16xf32, #tpu.memory_space<vmem>>
    %402 = tpu.memref_squeeze %401 : memref<1x16x1x4x16xf32, #tpu.memory_space<vmem>> -> memref<16x1x4x16xf32, #tpu.memory_space<vmem>>
    %c5_375 = arith.constant 5 : index
    %c0_376 = arith.constant 0 : index
    %c0_377 = arith.constant 0 : index
    %c0_378 = arith.constant 0 : index
    %403 = vector.load %402[%c5_375, %c0_376, %c0_377, %c0_378] : memref<16x1x4x16xf32, #tpu.memory_space<vmem>>, vector<1x1x4x16xf32>
    %404 = vector.shape_cast %403 : vector<1x1x4x16xf32> to vector<1x4x16xf32>
    %405 = arith.addf %400, %404 : vector<1x4x16xf32>
    %cst_379 = arith.constant 0.000000e+00 : f32
    %406 = vector.broadcast %cst_379 : f32 to vector<1x4x16xf32>
    %407 = arith.maximumf %405, %406 : vector<1x4x16xf32>
    %c10_380 = arith.constant 10 : index
    %c0_381 = arith.constant 0 : index
    %c0_382 = arith.constant 0 : index
    %c0_383 = arith.constant 0 : index
    %408 = vector.load %arg8[%c10_380, %c0_381, %c0_382, %c0_383] : memref<16x1x4x16xf32, #tpu.memory_space<vmem>>, vector<1x1x4x16xf32>
    %409 = vector.shape_cast %408 : vector<1x1x4x16xf32> to vector<1x4x16xf32>
    %410 = vector.shape_cast %397 : vector<1x4x16xf32> to vector<1x1x4x16xf32>
    tpu.vector_store %arg8[%c10_380, %c0_381, %c0_382, %c0_383], %410 {strides = array<i32>} : memref<16x1x4x16xf32, #tpu.memory_space<vmem>>, vector<1x1x4x16xf32>,
    %c5_384 = arith.constant 5 : index
    %c0_385 = arith.constant 0 : index
    %c0_386 = arith.constant 0 : index
    %c0_387 = arith.constant 0 : index
    %411 = vector.load %arg9[%c5_384, %c0_385, %c0_386, %c0_387] : memref<16x1x4x16xf32, #tpu.memory_space<vmem>>, vector<1x1x4x16xf32>
    %412 = vector.shape_cast %411 : vector<1x1x4x16xf32> to vector<1x4x16xf32>
    %413 = vector.shape_cast %407 : vector<1x4x16xf32> to vector<1x1x4x16xf32>
    tpu.vector_store %arg9[%c5_384, %c0_385, %c0_386, %c0_387], %413 {strides = array<i32>} : memref<16x1x4x16xf32, #tpu.memory_space<vmem>>, vector<1x1x4x16xf32>,
    %c0_388 = arith.constant 0 : index
    %c10_389 = arith.constant 10 : index
    %c0_390 = arith.constant 0 : index
    %c0_391 = arith.constant 0 : index
    %414 = vector.load %arg3[%c0_388, %c10_389, %c0_390, %c0_391] : memref<2x16x1x16xf32, #tpu.memory_space<vmem>>, vector<1x1x1x16xf32>
    %415 = vector.shape_cast %414 : vector<1x1x1x16xf32> to vector<1x16xf32>
    %416 = arith.negf %415 : vector<1x16xf32>
    %417 = math.exp %416 : vector<1x16xf32>
    %cst_392 = arith.constant 1.000000e+00 : f32
    %418 = vector.broadcast %cst_392 : f32 to vector<1x16xf32>
    %419 = arith.addf %418, %417 : vector<1x16xf32>
    %420 = arith.divf %418, %419 : vector<1x16xf32>
    %c1_393 = arith.constant 1 : index
    %c5_394 = arith.constant 5 : index
    %c0_395 = arith.constant 0 : index
    %c0_396 = arith.constant 0 : index
    %421 = vector.load %arg3[%c1_393, %c5_394, %c0_395, %c0_396] : memref<2x16x1x16xf32, #tpu.memory_space<vmem>>, vector<1x1x1x16xf32>
    %422 = vector.shape_cast %421 : vector<1x1x1x16xf32> to vector<1x16xf32>
    %423 = arith.negf %422 : vector<1x16xf32>
    %424 = math.exp %423 : vector<1x16xf32>
    %cst_397 = arith.constant 1.000000e+00 : f32
    %425 = vector.broadcast %cst_397 : f32 to vector<1x16xf32>
    %426 = arith.addf %425, %424 : vector<1x16xf32>
    %427 = arith.divf %425, %426 : vector<1x16xf32>
    %428 = vector.shape_cast %420 : vector<1x16xf32> to vector<1x1x16xf32>
    %429 = vector.broadcast %428 : vector<1x1x16xf32> to vector<1x4x16xf32>
    %430 = arith.mulf %429, %397 : vector<1x4x16xf32>
    %c0_i32_398 = arith.constant 0 : i32
    %c0_i32_399 = arith.constant 0 : i32
    %c0_i32_400 = arith.constant 0 : i32
    %c0_i32_401 = arith.constant 0 : i32
    %c0_i32_402 = arith.constant 0 : i32
    %431 = tpu.memref_slice %arg1[%c0_i32_398, %c0_i32_399, %c0_i32_400, %c0_i32_401, %c0_i32_402] : memref<1x16x1x4x16xf32, #tpu.memory_space<vmem>> -> memref<1x16x1x4x16xf32, #tpu.memory_space<vmem>>
    %432 = tpu.memref_squeeze %431 : memref<1x16x1x4x16xf32, #tpu.memory_space<vmem>> -> memref<16x1x4x16xf32, #tpu.memory_space<vmem>>
    %c11_403 = arith.constant 11 : index
    %c0_404 = arith.constant 0 : index
    %c0_405 = arith.constant 0 : index
    %c0_406 = arith.constant 0 : index
    %433 = vector.load %432[%c11_403, %c0_404, %c0_405, %c0_406] : memref<16x1x4x16xf32, #tpu.memory_space<vmem>>, vector<1x1x4x16xf32>
    %434 = vector.shape_cast %433 : vector<1x1x4x16xf32> to vector<1x4x16xf32>
    %435 = arith.addf %430, %434 : vector<1x4x16xf32>
    %cst_407 = arith.constant 0.000000e+00 : f32
    %436 = vector.broadcast %cst_407 : f32 to vector<1x4x16xf32>
    %437 = arith.maximumf %435, %436 : vector<1x4x16xf32>
    %438 = vector.shape_cast %427 : vector<1x16xf32> to vector<1x1x16xf32>
    %439 = vector.broadcast %438 : vector<1x1x16xf32> to vector<1x4x16xf32>
    %440 = arith.mulf %439, %407 : vector<1x4x16xf32>
    %c0_i32_408 = arith.constant 0 : i32
    %c0_i32_409 = arith.constant 0 : i32
    %c0_i32_410 = arith.constant 0 : i32
    %c0_i32_411 = arith.constant 0 : i32
    %c0_i32_412 = arith.constant 0 : i32
    %441 = tpu.memref_slice %arg1[%c0_i32_408, %c0_i32_409, %c0_i32_410, %c0_i32_411, %c0_i32_412] : memref<1x16x1x4x16xf32, #tpu.memory_space<vmem>> -> memref<1x16x1x4x16xf32, #tpu.memory_space<vmem>>
    %442 = tpu.memref_squeeze %441 : memref<1x16x1x4x16xf32, #tpu.memory_space<vmem>> -> memref<16x1x4x16xf32, #tpu.memory_space<vmem>>
    %c4_413 = arith.constant 4 : index
    %c0_414 = arith.constant 0 : index
    %c0_415 = arith.constant 0 : index
    %c0_416 = arith.constant 0 : index
    %443 = vector.load %442[%c4_413, %c0_414, %c0_415, %c0_416] : memref<16x1x4x16xf32, #tpu.memory_space<vmem>>, vector<1x1x4x16xf32>
    %444 = vector.shape_cast %443 : vector<1x1x4x16xf32> to vector<1x4x16xf32>
    %445 = arith.addf %440, %444 : vector<1x4x16xf32>
    %cst_417 = arith.constant 0.000000e+00 : f32
    %446 = vector.broadcast %cst_417 : f32 to vector<1x4x16xf32>
    %447 = arith.maximumf %445, %446 : vector<1x4x16xf32>
    %c11_418 = arith.constant 11 : index
    %c0_419 = arith.constant 0 : index
    %c0_420 = arith.constant 0 : index
    %c0_421 = arith.constant 0 : index
    %448 = vector.load %arg8[%c11_418, %c0_419, %c0_420, %c0_421] : memref<16x1x4x16xf32, #tpu.memory_space<vmem>>, vector<1x1x4x16xf32>
    %449 = vector.shape_cast %448 : vector<1x1x4x16xf32> to vector<1x4x16xf32>
    %450 = vector.shape_cast %437 : vector<1x4x16xf32> to vector<1x1x4x16xf32>
    tpu.vector_store %arg8[%c11_418, %c0_419, %c0_420, %c0_421], %450 {strides = array<i32>} : memref<16x1x4x16xf32, #tpu.memory_space<vmem>>, vector<1x1x4x16xf32>,
    %c4_422 = arith.constant 4 : index
    %c0_423 = arith.constant 0 : index
    %c0_424 = arith.constant 0 : index
    %c0_425 = arith.constant 0 : index
    %451 = vector.load %arg9[%c4_422, %c0_423, %c0_424, %c0_425] : memref<16x1x4x16xf32, #tpu.memory_space<vmem>>, vector<1x1x4x16xf32>
    %452 = vector.shape_cast %451 : vector<1x1x4x16xf32> to vector<1x4x16xf32>
    %453 = vector.shape_cast %447 : vector<1x4x16xf32> to vector<1x1x4x16xf32>
    tpu.vector_store %arg9[%c4_422, %c0_423, %c0_424, %c0_425], %453 {strides = array<i32>} : memref<16x1x4x16xf32, #tpu.memory_space<vmem>>, vector<1x1x4x16xf32>,
    %c0_426 = arith.constant 0 : index
    %c11_427 = arith.constant 11 : index
    %c0_428 = arith.constant 0 : index
    %c0_429 = arith.constant 0 : index
    %454 = vector.load %arg3[%c0_426, %c11_427, %c0_428, %c0_429] : memref<2x16x1x16xf32, #tpu.memory_space<vmem>>, vector<1x1x1x16xf32>
    %455 = vector.shape_cast %454 : vector<1x1x1x16xf32> to vector<1x16xf32>
    %456 = arith.negf %455 : vector<1x16xf32>
    %457 = math.exp %456 : vector<1x16xf32>
    %cst_430 = arith.constant 1.000000e+00 : f32
    %458 = vector.broadcast %cst_430 : f32 to vector<1x16xf32>
    %459 = arith.addf %458, %457 : vector<1x16xf32>
    %460 = arith.divf %458, %459 : vector<1x16xf32>
    %c1_431 = arith.constant 1 : index
    %c4_432 = arith.constant 4 : index
    %c0_433 = arith.constant 0 : index
    %c0_434 = arith.constant 0 : index
    %461 = vector.load %arg3[%c1_431, %c4_432, %c0_433, %c0_434] : memref<2x16x1x16xf32, #tpu.memory_space<vmem>>, vector<1x1x1x16xf32>
    %462 = vector.shape_cast %461 : vector<1x1x1x16xf32> to vector<1x16xf32>
    %463 = arith.negf %462 : vector<1x16xf32>
    %464 = math.exp %463 : vector<1x16xf32>
    %cst_435 = arith.constant 1.000000e+00 : f32
    %465 = vector.broadcast %cst_435 : f32 to vector<1x16xf32>
    %466 = arith.addf %465, %464 : vector<1x16xf32>
    %467 = arith.divf %465, %466 : vector<1x16xf32>
    %468 = vector.shape_cast %460 : vector<1x16xf32> to vector<1x1x16xf32>
    %469 = vector.broadcast %468 : vector<1x1x16xf32> to vector<1x4x16xf32>
    %470 = arith.mulf %469, %437 : vector<1x4x16xf32>
    %c0_i32_436 = arith.constant 0 : i32
    %c0_i32_437 = arith.constant 0 : i32
    %c0_i32_438 = arith.constant 0 : i32
    %c0_i32_439 = arith.constant 0 : i32
    %c0_i32_440 = arith.constant 0 : i32
    %471 = tpu.memref_slice %arg1[%c0_i32_436, %c0_i32_437, %c0_i32_438, %c0_i32_439, %c0_i32_440] : memref<1x16x1x4x16xf32, #tpu.memory_space<vmem>> -> memref<1x16x1x4x16xf32, #tpu.memory_space<vmem>>
    %472 = tpu.memref_squeeze %471 : memref<1x16x1x4x16xf32, #tpu.memory_space<vmem>> -> memref<16x1x4x16xf32, #tpu.memory_space<vmem>>
    %c12_441 = arith.constant 12 : index
    %c0_442 = arith.constant 0 : index
    %c0_443 = arith.constant 0 : index
    %c0_444 = arith.constant 0 : index
    %473 = vector.load %472[%c12_441, %c0_442, %c0_443, %c0_444] : memref<16x1x4x16xf32, #tpu.memory_space<vmem>>, vector<1x1x4x16xf32>
    %474 = vector.shape_cast %473 : vector<1x1x4x16xf32> to vector<1x4x16xf32>
    %475 = arith.addf %470, %474 : vector<1x4x16xf32>
    %cst_445 = arith.constant 0.000000e+00 : f32
    %476 = vector.broadcast %cst_445 : f32 to vector<1x4x16xf32>
    %477 = arith.maximumf %475, %476 : vector<1x4x16xf32>
    %478 = vector.shape_cast %467 : vector<1x16xf32> to vector<1x1x16xf32>
    %479 = vector.broadcast %478 : vector<1x1x16xf32> to vector<1x4x16xf32>
    %480 = arith.mulf %479, %447 : vector<1x4x16xf32>
    %c0_i32_446 = arith.constant 0 : i32
    %c0_i32_447 = arith.constant 0 : i32
    %c0_i32_448 = arith.constant 0 : i32
    %c0_i32_449 = arith.constant 0 : i32
    %c0_i32_450 = arith.constant 0 : i32
    %481 = tpu.memref_slice %arg1[%c0_i32_446, %c0_i32_447, %c0_i32_448, %c0_i32_449, %c0_i32_450] : memref<1x16x1x4x16xf32, #tpu.memory_space<vmem>> -> memref<1x16x1x4x16xf32, #tpu.memory_space<vmem>>
    %482 = tpu.memref_squeeze %481 : memref<1x16x1x4x16xf32, #tpu.memory_space<vmem>> -> memref<16x1x4x16xf32, #tpu.memory_space<vmem>>
    %c3_451 = arith.constant 3 : index
    %c0_452 = arith.constant 0 : index
    %c0_453 = arith.constant 0 : index
    %c0_454 = arith.constant 0 : index
    %483 = vector.load %482[%c3_451, %c0_452, %c0_453, %c0_454] : memref<16x1x4x16xf32, #tpu.memory_space<vmem>>, vector<1x1x4x16xf32>
    %484 = vector.shape_cast %483 : vector<1x1x4x16xf32> to vector<1x4x16xf32>
    %485 = arith.addf %480, %484 : vector<1x4x16xf32>
    %cst_455 = arith.constant 0.000000e+00 : f32
    %486 = vector.broadcast %cst_455 : f32 to vector<1x4x16xf32>
    %487 = arith.maximumf %485, %486 : vector<1x4x16xf32>
    %c12_456 = arith.constant 12 : index
    %c0_457 = arith.constant 0 : index
    %c0_458 = arith.constant 0 : index
    %c0_459 = arith.constant 0 : index
    %488 = vector.load %arg8[%c12_456, %c0_457, %c0_458, %c0_459] : memref<16x1x4x16xf32, #tpu.memory_space<vmem>>, vector<1x1x4x16xf32>
    %489 = vector.shape_cast %488 : vector<1x1x4x16xf32> to vector<1x4x16xf32>
    %490 = vector.shape_cast %477 : vector<1x4x16xf32> to vector<1x1x4x16xf32>
    tpu.vector_store %arg8[%c12_456, %c0_457, %c0_458, %c0_459], %490 {strides = array<i32>} : memref<16x1x4x16xf32, #tpu.memory_space<vmem>>, vector<1x1x4x16xf32>,
    %c3_460 = arith.constant 3 : index
    %c0_461 = arith.constant 0 : index
    %c0_462 = arith.constant 0 : index
    %c0_463 = arith.constant 0 : index
    %491 = vector.load %arg9[%c3_460, %c0_461, %c0_462, %c0_463] : memref<16x1x4x16xf32, #tpu.memory_space<vmem>>, vector<1x1x4x16xf32>
    %492 = vector.shape_cast %491 : vector<1x1x4x16xf32> to vector<1x4x16xf32>
    %493 = vector.shape_cast %487 : vector<1x4x16xf32> to vector<1x1x4x16xf32>
    tpu.vector_store %arg9[%c3_460, %c0_461, %c0_462, %c0_463], %493 {strides = array<i32>} : memref<16x1x4x16xf32, #tpu.memory_space<vmem>>, vector<1x1x4x16xf32>,
    %c0_464 = arith.constant 0 : index
    %c12_465 = arith.constant 12 : index
    %c0_466 = arith.constant 0 : index
    %c0_467 = arith.constant 0 : index
    %494 = vector.load %arg3[%c0_464, %c12_465, %c0_466, %c0_467] : memref<2x16x1x16xf32, #tpu.memory_space<vmem>>, vector<1x1x1x16xf32>
    %495 = vector.shape_cast %494 : vector<1x1x1x16xf32> to vector<1x16xf32>
    %496 = arith.negf %495 : vector<1x16xf32>
    %497 = math.exp %496 : vector<1x16xf32>
    %cst_468 = arith.constant 1.000000e+00 : f32
    %498 = vector.broadcast %cst_468 : f32 to vector<1x16xf32>
    %499 = arith.addf %498, %497 : vector<1x16xf32>
    %500 = arith.divf %498, %499 : vector<1x16xf32>
    %c1_469 = arith.constant 1 : index
    %c3_470 = arith.constant 3 : index
    %c0_471 = arith.constant 0 : index
    %c0_472 = arith.constant 0 : index
    %501 = vector.load %arg3[%c1_469, %c3_470, %c0_471, %c0_472] : memref<2x16x1x16xf32, #tpu.memory_space<vmem>>, vector<1x1x1x16xf32>
    %502 = vector.shape_cast %501 : vector<1x1x1x16xf32> to vector<1x16xf32>
    %503 = arith.negf %502 : vector<1x16xf32>
    %504 = math.exp %503 : vector<1x16xf32>
    %cst_473 = arith.constant 1.000000e+00 : f32
    %505 = vector.broadcast %cst_473 : f32 to vector<1x16xf32>
    %506 = arith.addf %505, %504 : vector<1x16xf32>
    %507 = arith.divf %505, %506 : vector<1x16xf32>
    %508 = vector.shape_cast %500 : vector<1x16xf32> to vector<1x1x16xf32>
    %509 = vector.broadcast %508 : vector<1x1x16xf32> to vector<1x4x16xf32>
    %510 = arith.mulf %509, %477 : vector<1x4x16xf32>
    %c0_i32_474 = arith.constant 0 : i32
    %c0_i32_475 = arith.constant 0 : i32
    %c0_i32_476 = arith.constant 0 : i32
    %c0_i32_477 = arith.constant 0 : i32
    %c0_i32_478 = arith.constant 0 : i32
    %511 = tpu.memref_slice %arg1[%c0_i32_474, %c0_i32_475, %c0_i32_476, %c0_i32_477, %c0_i32_478] : memref<1x16x1x4x16xf32, #tpu.memory_space<vmem>> -> memref<1x16x1x4x16xf32, #tpu.memory_space<vmem>>
    %512 = tpu.memref_squeeze %511 : memref<1x16x1x4x16xf32, #tpu.memory_space<vmem>> -> memref<16x1x4x16xf32, #tpu.memory_space<vmem>>
    %c13_479 = arith.constant 13 : index
    %c0_480 = arith.constant 0 : index
    %c0_481 = arith.constant 0 : index
    %c0_482 = arith.constant 0 : index
    %513 = vector.load %512[%c13_479, %c0_480, %c0_481, %c0_482] : memref<16x1x4x16xf32, #tpu.memory_space<vmem>>, vector<1x1x4x16xf32>
    %514 = vector.shape_cast %513 : vector<1x1x4x16xf32> to vector<1x4x16xf32>
    %515 = arith.addf %510, %514 : vector<1x4x16xf32>
    %cst_483 = arith.constant 0.000000e+00 : f32
    %516 = vector.broadcast %cst_483 : f32 to vector<1x4x16xf32>
    %517 = arith.maximumf %515, %516 : vector<1x4x16xf32>
    %518 = vector.shape_cast %507 : vector<1x16xf32> to vector<1x1x16xf32>
    %519 = vector.broadcast %518 : vector<1x1x16xf32> to vector<1x4x16xf32>
    %520 = arith.mulf %519, %487 : vector<1x4x16xf32>
    %c0_i32_484 = arith.constant 0 : i32
    %c0_i32_485 = arith.constant 0 : i32
    %c0_i32_486 = arith.constant 0 : i32
    %c0_i32_487 = arith.constant 0 : i32
    %c0_i32_488 = arith.constant 0 : i32
    %521 = tpu.memref_slice %arg1[%c0_i32_484, %c0_i32_485, %c0_i32_486, %c0_i32_487, %c0_i32_488] : memref<1x16x1x4x16xf32, #tpu.memory_space<vmem>> -> memref<1x16x1x4x16xf32, #tpu.memory_space<vmem>>
    %522 = tpu.memref_squeeze %521 : memref<1x16x1x4x16xf32, #tpu.memory_space<vmem>> -> memref<16x1x4x16xf32, #tpu.memory_space<vmem>>
    %c2_489 = arith.constant 2 : index
    %c0_490 = arith.constant 0 : index
    %c0_491 = arith.constant 0 : index
    %c0_492 = arith.constant 0 : index
    %523 = vector.load %522[%c2_489, %c0_490, %c0_491, %c0_492] : memref<16x1x4x16xf32, #tpu.memory_space<vmem>>, vector<1x1x4x16xf32>
    %524 = vector.shape_cast %523 : vector<1x1x4x16xf32> to vector<1x4x16xf32>
    %525 = arith.addf %520, %524 : vector<1x4x16xf32>
    %cst_493 = arith.constant 0.000000e+00 : f32
    %526 = vector.broadcast %cst_493 : f32 to vector<1x4x16xf32>
    %527 = arith.maximumf %525, %526 : vector<1x4x16xf32>
    %c13_494 = arith.constant 13 : index
    %c0_495 = arith.constant 0 : index
    %c0_496 = arith.constant 0 : index
    %c0_497 = arith.constant 0 : index
    %528 = vector.load %arg8[%c13_494, %c0_495, %c0_496, %c0_497] : memref<16x1x4x16xf32, #tpu.memory_space<vmem>>, vector<1x1x4x16xf32>
    %529 = vector.shape_cast %528 : vector<1x1x4x16xf32> to vector<1x4x16xf32>
    %530 = vector.shape_cast %517 : vector<1x4x16xf32> to vector<1x1x4x16xf32>
    tpu.vector_store %arg8[%c13_494, %c0_495, %c0_496, %c0_497], %530 {strides = array<i32>} : memref<16x1x4x16xf32, #tpu.memory_space<vmem>>, vector<1x1x4x16xf32>,
    %c2_498 = arith.constant 2 : index
    %c0_499 = arith.constant 0 : index
    %c0_500 = arith.constant 0 : index
    %c0_501 = arith.constant 0 : index
    %531 = vector.load %arg9[%c2_498, %c0_499, %c0_500, %c0_501] : memref<16x1x4x16xf32, #tpu.memory_space<vmem>>, vector<1x1x4x16xf32>
    %532 = vector.shape_cast %531 : vector<1x1x4x16xf32> to vector<1x4x16xf32>
    %533 = vector.shape_cast %527 : vector<1x4x16xf32> to vector<1x1x4x16xf32>
    tpu.vector_store %arg9[%c2_498, %c0_499, %c0_500, %c0_501], %533 {strides = array<i32>} : memref<16x1x4x16xf32, #tpu.memory_space<vmem>>, vector<1x1x4x16xf32>,
    %c0_502 = arith.constant 0 : index
    %c13_503 = arith.constant 13 : index
    %c0_504 = arith.constant 0 : index
    %c0_505 = arith.constant 0 : index
    %534 = vector.load %arg3[%c0_502, %c13_503, %c0_504, %c0_505] : memref<2x16x1x16xf32, #tpu.memory_space<vmem>>, vector<1x1x1x16xf32>
    %535 = vector.shape_cast %534 : vector<1x1x1x16xf32> to vector<1x16xf32>
    %536 = arith.negf %535 : vector<1x16xf32>
    %537 = math.exp %536 : vector<1x16xf32>
    %cst_506 = arith.constant 1.000000e+00 : f32
    %538 = vector.broadcast %cst_506 : f32 to vector<1x16xf32>
    %539 = arith.addf %538, %537 : vector<1x16xf32>
    %540 = arith.divf %538, %539 : vector<1x16xf32>
    %c1_507 = arith.constant 1 : index
    %c2_508 = arith.constant 2 : index
    %c0_509 = arith.constant 0 : index
    %c0_510 = arith.constant 0 : index
    %541 = vector.load %arg3[%c1_507, %c2_508, %c0_509, %c0_510] : memref<2x16x1x16xf32, #tpu.memory_space<vmem>>, vector<1x1x1x16xf32>
    %542 = vector.shape_cast %541 : vector<1x1x1x16xf32> to vector<1x16xf32>
    %543 = arith.negf %542 : vector<1x16xf32>
    %544 = math.exp %543 : vector<1x16xf32>
    %cst_511 = arith.constant 1.000000e+00 : f32
    %545 = vector.broadcast %cst_511 : f32 to vector<1x16xf32>
    %546 = arith.addf %545, %544 : vector<1x16xf32>
    %547 = arith.divf %545, %546 : vector<1x16xf32>
    %548 = vector.shape_cast %540 : vector<1x16xf32> to vector<1x1x16xf32>
    %549 = vector.broadcast %548 : vector<1x1x16xf32> to vector<1x4x16xf32>
    %550 = arith.mulf %549, %517 : vector<1x4x16xf32>
    %c0_i32_512 = arith.constant 0 : i32
    %c0_i32_513 = arith.constant 0 : i32
    %c0_i32_514 = arith.constant 0 : i32
    %c0_i32_515 = arith.constant 0 : i32
    %c0_i32_516 = arith.constant 0 : i32
    %551 = tpu.memref_slice %arg1[%c0_i32_512, %c0_i32_513, %c0_i32_514, %c0_i32_515, %c0_i32_516] : memref<1x16x1x4x16xf32, #tpu.memory_space<vmem>> -> memref<1x16x1x4x16xf32, #tpu.memory_space<vmem>>
    %552 = tpu.memref_squeeze %551 : memref<1x16x1x4x16xf32, #tpu.memory_space<vmem>> -> memref<16x1x4x16xf32, #tpu.memory_space<vmem>>
    %c14_517 = arith.constant 14 : index
    %c0_518 = arith.constant 0 : index
    %c0_519 = arith.constant 0 : index
    %c0_520 = arith.constant 0 : index
    %553 = vector.load %552[%c14_517, %c0_518, %c0_519, %c0_520] : memref<16x1x4x16xf32, #tpu.memory_space<vmem>>, vector<1x1x4x16xf32>
    %554 = vector.shape_cast %553 : vector<1x1x4x16xf32> to vector<1x4x16xf32>
    %555 = arith.addf %550, %554 : vector<1x4x16xf32>
    %cst_521 = arith.constant 0.000000e+00 : f32
    %556 = vector.broadcast %cst_521 : f32 to vector<1x4x16xf32>
    %557 = arith.maximumf %555, %556 : vector<1x4x16xf32>
    %558 = vector.shape_cast %547 : vector<1x16xf32> to vector<1x1x16xf32>
    %559 = vector.broadcast %558 : vector<1x1x16xf32> to vector<1x4x16xf32>
    %560 = arith.mulf %559, %527 : vector<1x4x16xf32>
    %c0_i32_522 = arith.constant 0 : i32
    %c0_i32_523 = arith.constant 0 : i32
    %c0_i32_524 = arith.constant 0 : i32
    %c0_i32_525 = arith.constant 0 : i32
    %c0_i32_526 = arith.constant 0 : i32
    %561 = tpu.memref_slice %arg1[%c0_i32_522, %c0_i32_523, %c0_i32_524, %c0_i32_525, %c0_i32_526] : memref<1x16x1x4x16xf32, #tpu.memory_space<vmem>> -> memref<1x16x1x4x16xf32, #tpu.memory_space<vmem>>
    %562 = tpu.memref_squeeze %561 : memref<1x16x1x4x16xf32, #tpu.memory_space<vmem>> -> memref<16x1x4x16xf32, #tpu.memory_space<vmem>>
    %c1_527 = arith.constant 1 : index
    %c0_528 = arith.constant 0 : index
    %c0_529 = arith.constant 0 : index
    %c0_530 = arith.constant 0 : index
    %563 = vector.load %562[%c1_527, %c0_528, %c0_529, %c0_530] : memref<16x1x4x16xf32, #tpu.memory_space<vmem>>, vector<1x1x4x16xf32>
    %564 = vector.shape_cast %563 : vector<1x1x4x16xf32> to vector<1x4x16xf32>
    %565 = arith.addf %560, %564 : vector<1x4x16xf32>
    %cst_531 = arith.constant 0.000000e+00 : f32
    %566 = vector.broadcast %cst_531 : f32 to vector<1x4x16xf32>
    %567 = arith.maximumf %565, %566 : vector<1x4x16xf32>
    %c14_532 = arith.constant 14 : index
    %c0_533 = arith.constant 0 : index
    %c0_534 = arith.constant 0 : index
    %c0_535 = arith.constant 0 : index
    %568 = vector.load %arg8[%c14_532, %c0_533, %c0_534, %c0_535] : memref<16x1x4x16xf32, #tpu.memory_space<vmem>>, vector<1x1x4x16xf32>
    %569 = vector.shape_cast %568 : vector<1x1x4x16xf32> to vector<1x4x16xf32>
    %570 = vector.shape_cast %557 : vector<1x4x16xf32> to vector<1x1x4x16xf32>
    tpu.vector_store %arg8[%c14_532, %c0_533, %c0_534, %c0_535], %570 {strides = array<i32>} : memref<16x1x4x16xf32, #tpu.memory_space<vmem>>, vector<1x1x4x16xf32>,
    %c1_536 = arith.constant 1 : index
    %c0_537 = arith.constant 0 : index
    %c0_538 = arith.constant 0 : index
    %c0_539 = arith.constant 0 : index
    %571 = vector.load %arg9[%c1_536, %c0_537, %c0_538, %c0_539] : memref<16x1x4x16xf32, #tpu.memory_space<vmem>>, vector<1x1x4x16xf32>
    %572 = vector.shape_cast %571 : vector<1x1x4x16xf32> to vector<1x4x16xf32>
    %573 = vector.shape_cast %567 : vector<1x4x16xf32> to vector<1x1x4x16xf32>
    tpu.vector_store %arg9[%c1_536, %c0_537, %c0_538, %c0_539], %573 {strides = array<i32>} : memref<16x1x4x16xf32, #tpu.memory_space<vmem>>, vector<1x1x4x16xf32>,
    %c0_540 = arith.constant 0 : index
    %c14_541 = arith.constant 14 : index
    %c0_542 = arith.constant 0 : index
    %c0_543 = arith.constant 0 : index
    %574 = vector.load %arg3[%c0_540, %c14_541, %c0_542, %c0_543] : memref<2x16x1x16xf32, #tpu.memory_space<vmem>>, vector<1x1x1x16xf32>
    %575 = vector.shape_cast %574 : vector<1x1x1x16xf32> to vector<1x16xf32>
    %576 = arith.negf %575 : vector<1x16xf32>
    %577 = math.exp %576 : vector<1x16xf32>
    %cst_544 = arith.constant 1.000000e+00 : f32
    %578 = vector.broadcast %cst_544 : f32 to vector<1x16xf32>
    %579 = arith.addf %578, %577 : vector<1x16xf32>
    %580 = arith.divf %578, %579 : vector<1x16xf32>
    %c1_545 = arith.constant 1 : index
    %c1_546 = arith.constant 1 : index
    %c0_547 = arith.constant 0 : index
    %c0_548 = arith.constant 0 : index
    %581 = vector.load %arg3[%c1_545, %c1_546, %c0_547, %c0_548] : memref<2x16x1x16xf32, #tpu.memory_space<vmem>>, vector<1x1x1x16xf32>
    %582 = vector.shape_cast %581 : vector<1x1x1x16xf32> to vector<1x16xf32>
    %583 = arith.negf %582 : vector<1x16xf32>
    %584 = math.exp %583 : vector<1x16xf32>
    %cst_549 = arith.constant 1.000000e+00 : f32
    %585 = vector.broadcast %cst_549 : f32 to vector<1x16xf32>
    %586 = arith.addf %585, %584 : vector<1x16xf32>
    %587 = arith.divf %585, %586 : vector<1x16xf32>
    %588 = vector.shape_cast %580 : vector<1x16xf32> to vector<1x1x16xf32>
    %589 = vector.broadcast %588 : vector<1x1x16xf32> to vector<1x4x16xf32>
    %590 = arith.mulf %589, %557 : vector<1x4x16xf32>
    %c0_i32_550 = arith.constant 0 : i32
    %c0_i32_551 = arith.constant 0 : i32
    %c0_i32_552 = arith.constant 0 : i32
    %c0_i32_553 = arith.constant 0 : i32
    %c0_i32_554 = arith.constant 0 : i32
    %591 = tpu.memref_slice %arg1[%c0_i32_550, %c0_i32_551, %c0_i32_552, %c0_i32_553, %c0_i32_554] : memref<1x16x1x4x16xf32, #tpu.memory_space<vmem>> -> memref<1x16x1x4x16xf32, #tpu.memory_space<vmem>>
    %592 = tpu.memref_squeeze %591 : memref<1x16x1x4x16xf32, #tpu.memory_space<vmem>> -> memref<16x1x4x16xf32, #tpu.memory_space<vmem>>
    %c15_555 = arith.constant 15 : index
    %c0_556 = arith.constant 0 : index
    %c0_557 = arith.constant 0 : index
    %c0_558 = arith.constant 0 : index
    %593 = vector.load %592[%c15_555, %c0_556, %c0_557, %c0_558] : memref<16x1x4x16xf32, #tpu.memory_space<vmem>>, vector<1x1x4x16xf32>
    %594 = vector.shape_cast %593 : vector<1x1x4x16xf32> to vector<1x4x16xf32>
    %595 = arith.addf %590, %594 : vector<1x4x16xf32>
    %cst_559 = arith.constant 0.000000e+00 : f32
    %596 = vector.broadcast %cst_559 : f32 to vector<1x4x16xf32>
    %597 = arith.maximumf %595, %596 : vector<1x4x16xf32>
    %598 = vector.shape_cast %587 : vector<1x16xf32> to vector<1x1x16xf32>
    %599 = vector.broadcast %598 : vector<1x1x16xf32> to vector<1x4x16xf32>
    %600 = arith.mulf %599, %567 : vector<1x4x16xf32>
    %c0_i32_560 = arith.constant 0 : i32
    %c0_i32_561 = arith.constant 0 : i32
    %c0_i32_562 = arith.constant 0 : i32
    %c0_i32_563 = arith.constant 0 : i32
    %c0_i32_564 = arith.constant 0 : i32
    %601 = tpu.memref_slice %arg1[%c0_i32_560, %c0_i32_561, %c0_i32_562, %c0_i32_563, %c0_i32_564] : memref<1x16x1x4x16xf32, #tpu.memory_space<vmem>> -> memref<1x16x1x4x16xf32, #tpu.memory_space<vmem>>
    %602 = tpu.memref_squeeze %601 : memref<1x16x1x4x16xf32, #tpu.memory_space<vmem>> -> memref<16x1x4x16xf32, #tpu.memory_space<vmem>>
    %c0_565 = arith.constant 0 : index
    %c0_566 = arith.constant 0 : index
    %c0_567 = arith.constant 0 : index
    %c0_568 = arith.constant 0 : index
    %603 = vector.load %602[%c0_565, %c0_566, %c0_567, %c0_568] : memref<16x1x4x16xf32, #tpu.memory_space<vmem>>, vector<1x1x4x16xf32>
    %604 = vector.shape_cast %603 : vector<1x1x4x16xf32> to vector<1x4x16xf32>
    %605 = arith.addf %600, %604 : vector<1x4x16xf32>
    %cst_569 = arith.constant 0.000000e+00 : f32
    %606 = vector.broadcast %cst_569 : f32 to vector<1x4x16xf32>
    %607 = arith.maximumf %605, %606 : vector<1x4x16xf32>
    %c15_570 = arith.constant 15 : index
    %c0_571 = arith.constant 0 : index
    %c0_572 = arith.constant 0 : index
    %c0_573 = arith.constant 0 : index
    %608 = vector.load %arg8[%c15_570, %c0_571, %c0_572, %c0_573] : memref<16x1x4x16xf32, #tpu.memory_space<vmem>>, vector<1x1x4x16xf32>
    %609 = vector.shape_cast %608 : vector<1x1x4x16xf32> to vector<1x4x16xf32>
    %610 = vector.shape_cast %597 : vector<1x4x16xf32> to vector<1x1x4x16xf32>
    tpu.vector_store %arg8[%c15_570, %c0_571, %c0_572, %c0_573], %610 {strides = array<i32>} : memref<16x1x4x16xf32, #tpu.memory_space<vmem>>, vector<1x1x4x16xf32>,
    %c0_574 = arith.constant 0 : index
    %c0_575 = arith.constant 0 : index
    %c0_576 = arith.constant 0 : index
    %c0_577 = arith.constant 0 : index
    %611 = vector.load %arg9[%c0_574, %c0_575, %c0_576, %c0_577] : memref<16x1x4x16xf32, #tpu.memory_space<vmem>>, vector<1x1x4x16xf32>
    %612 = vector.shape_cast %611 : vector<1x1x4x16xf32> to vector<1x4x16xf32>
    %613 = vector.shape_cast %607 : vector<1x4x16xf32> to vector<1x1x4x16xf32>
    tpu.vector_store %arg9[%c0_574, %c0_575, %c0_576, %c0_577], %613 {strides = array<i32>} : memref<16x1x4x16xf32, #tpu.memory_space<vmem>>, vector<1x1x4x16xf32>,
    %c0_i32_578 = arith.constant 0 : i32
    %c0_i32_579 = arith.constant 0 : i32
    %c0_i32_580 = arith.constant 0 : i32
    %c0_i32_581 = arith.constant 0 : i32
    %c0_i32_582 = arith.constant 0 : i32
    %614 = tpu.memref_slice %arg2[%c0_i32_578, %c0_i32_579, %c0_i32_580, %c0_i32_581, %c0_i32_582] : memref<1x16x1x4x16xf32, #tpu.memory_space<vmem>> -> memref<1x16x1x4x16xf32, #tpu.memory_space<vmem>>
    %615 = tpu.memref_squeeze %614 : memref<1x16x1x4x16xf32, #tpu.memory_space<vmem>> -> memref<16x1x4x16xf32, #tpu.memory_space<vmem>>
    %c0_583 = arith.constant 0 : index
    %c0_584 = arith.constant 0 : index
    %c0_585 = arith.constant 0 : index
    %c0_586 = arith.constant 0 : index
    %616 = vector.load %615[%c0_583, %c0_584, %c0_585, %c0_586] : memref<16x1x4x16xf32, #tpu.memory_space<vmem>>, vector<1x1x4x16xf32>
    %617 = vector.shape_cast %616 : vector<1x1x4x16xf32> to vector<1x4x16xf32>
    %c0_i32_587 = arith.constant 0 : i32
    %c0_i32_588 = arith.constant 0 : i32
    %c0_i32_589 = arith.constant 0 : i32
    %c0_i32_590 = arith.constant 0 : i32
    %c0_i32_591 = arith.constant 0 : i32
    %618 = tpu.memref_slice %arg2[%c0_i32_587, %c0_i32_588, %c0_i32_589, %c0_i32_590, %c0_i32_591] : memref<1x16x1x4x16xf32, #tpu.memory_space<vmem>> -> memref<1x16x1x4x16xf32, #tpu.memory_space<vmem>>
    %619 = tpu.memref_squeeze %618 : memref<1x16x1x4x16xf32, #tpu.memory_space<vmem>> -> memref<16x1x4x16xf32, #tpu.memory_space<vmem>>
    %c15_592 = arith.constant 15 : index
    %c0_593 = arith.constant 0 : index
    %c0_594 = arith.constant 0 : index
    %c0_595 = arith.constant 0 : index
    %620 = vector.load %619[%c15_592, %c0_593, %c0_594, %c0_595] : memref<16x1x4x16xf32, #tpu.memory_space<vmem>>, vector<1x1x4x16xf32>
    %621 = vector.shape_cast %620 : vector<1x1x4x16xf32> to vector<1x4x16xf32>
    %c0_596 = arith.constant 0 : index
    %c0_597 = arith.constant 0 : index
    %c0_598 = arith.constant 0 : index
    %c0_599 = arith.constant 0 : index
    %622 = vector.load %arg10[%c0_596, %c0_597, %c0_598, %c0_599] : memref<16x1x4x16xf32, #tpu.memory_space<vmem>>, vector<1x1x4x16xf32>
    %623 = vector.shape_cast %622 : vector<1x1x4x16xf32> to vector<1x4x16xf32>
    %624 = vector.shape_cast %617 : vector<1x4x16xf32> to vector<1x1x4x16xf32>
    tpu.vector_store %arg10[%c0_596, %c0_597, %c0_598, %c0_599], %624 {strides = array<i32>} : memref<16x1x4x16xf32, #tpu.memory_space<vmem>>, vector<1x1x4x16xf32>,
    %c15_600 = arith.constant 15 : index
    %c0_601 = arith.constant 0 : index
    %c0_602 = arith.constant 0 : index
    %c0_603 = arith.constant 0 : index
    %625 = vector.load %arg11[%c15_600, %c0_601, %c0_602, %c0_603] : memref<16x1x4x16xf32, #tpu.memory_space<vmem>>, vector<1x1x4x16xf32>
    %626 = vector.shape_cast %625 : vector<1x1x4x16xf32> to vector<1x4x16xf32>
    %627 = vector.shape_cast %621 : vector<1x4x16xf32> to vector<1x1x4x16xf32>
    tpu.vector_store %arg11[%c15_600, %c0_601, %c0_602, %c0_603], %627 {strides = array<i32>} : memref<16x1x4x16xf32, #tpu.memory_space<vmem>>, vector<1x1x4x16xf32>,
    %c0_604 = arith.constant 0 : index
    %c0_605 = arith.constant 0 : index
    %c0_606 = arith.constant 0 : index
    %c0_607 = arith.constant 0 : index
    %628 = vector.load %arg4[%c0_604, %c0_605, %c0_606, %c0_607] : memref<2x16x1x16xf32, #tpu.memory_space<vmem>>, vector<1x1x1x16xf32>
    %629 = vector.shape_cast %628 : vector<1x1x1x16xf32> to vector<1x16xf32>
    %630 = arith.negf %629 : vector<1x16xf32>
    %631 = math.exp %630 : vector<1x16xf32>
    %cst_608 = arith.constant 1.000000e+00 : f32
    %632 = vector.broadcast %cst_608 : f32 to vector<1x16xf32>
    %633 = arith.addf %632, %631 : vector<1x16xf32>
    %634 = arith.divf %632, %633 : vector<1x16xf32>
    %c1_609 = arith.constant 1 : index
    %c15_610 = arith.constant 15 : index
    %c0_611 = arith.constant 0 : index
    %c0_612 = arith.constant 0 : index
    %635 = vector.load %arg4[%c1_609, %c15_610, %c0_611, %c0_612] : memref<2x16x1x16xf32, #tpu.memory_space<vmem>>, vector<1x1x1x16xf32>
    %636 = vector.shape_cast %635 : vector<1x1x1x16xf32> to vector<1x16xf32>
    %637 = arith.negf %636 : vector<1x16xf32>
    %638 = math.exp %637 : vector<1x16xf32>
    %cst_613 = arith.constant 1.000000e+00 : f32
    %639 = vector.broadcast %cst_613 : f32 to vector<1x16xf32>
    %640 = arith.addf %639, %638 : vector<1x16xf32>
    %641 = arith.divf %639, %640 : vector<1x16xf32>
    %642 = vector.shape_cast %634 : vector<1x16xf32> to vector<1x1x16xf32>
    %643 = vector.broadcast %642 : vector<1x1x16xf32> to vector<1x4x16xf32>
    %644 = arith.mulf %643, %617 : vector<1x4x16xf32>
    %c0_i32_614 = arith.constant 0 : i32
    %c0_i32_615 = arith.constant 0 : i32
    %c0_i32_616 = arith.constant 0 : i32
    %c0_i32_617 = arith.constant 0 : i32
    %c0_i32_618 = arith.constant 0 : i32
    %645 = tpu.memref_slice %arg2[%c0_i32_614, %c0_i32_615, %c0_i32_616, %c0_i32_617, %c0_i32_618] : memref<1x16x1x4x16xf32, #tpu.memory_space<vmem>> -> memref<1x16x1x4x16xf32, #tpu.memory_space<vmem>>
    %646 = tpu.memref_squeeze %645 : memref<1x16x1x4x16xf32, #tpu.memory_space<vmem>> -> memref<16x1x4x16xf32, #tpu.memory_space<vmem>>
    %c1_619 = arith.constant 1 : index
    %c0_620 = arith.constant 0 : index
    %c0_621 = arith.constant 0 : index
    %c0_622 = arith.constant 0 : index
    %647 = vector.load %646[%c1_619, %c0_620, %c0_621, %c0_622] : memref<16x1x4x16xf32, #tpu.memory_space<vmem>>, vector<1x1x4x16xf32>
    %648 = vector.shape_cast %647 : vector<1x1x4x16xf32> to vector<1x4x16xf32>
    %649 = arith.addf %644, %648 : vector<1x4x16xf32>
    %cst_623 = arith.constant 0.000000e+00 : f32
    %650 = vector.broadcast %cst_623 : f32 to vector<1x4x16xf32>
    %651 = arith.maximumf %649, %650 : vector<1x4x16xf32>
    %652 = vector.shape_cast %641 : vector<1x16xf32> to vector<1x1x16xf32>
    %653 = vector.broadcast %652 : vector<1x1x16xf32> to vector<1x4x16xf32>
    %654 = arith.mulf %653, %621 : vector<1x4x16xf32>
    %c0_i32_624 = arith.constant 0 : i32
    %c0_i32_625 = arith.constant 0 : i32
    %c0_i32_626 = arith.constant 0 : i32
    %c0_i32_627 = arith.constant 0 : i32
    %c0_i32_628 = arith.constant 0 : i32
    %655 = tpu.memref_slice %arg2[%c0_i32_624, %c0_i32_625, %c0_i32_626, %c0_i32_627, %c0_i32_628] : memref<1x16x1x4x16xf32, #tpu.memory_space<vmem>> -> memref<1x16x1x4x16xf32, #tpu.memory_space<vmem>>
    %656 = tpu.memref_squeeze %655 : memref<1x16x1x4x16xf32, #tpu.memory_space<vmem>> -> memref<16x1x4x16xf32, #tpu.memory_space<vmem>>
    %c14_629 = arith.constant 14 : index
    %c0_630 = arith.constant 0 : index
    %c0_631 = arith.constant 0 : index
    %c0_632 = arith.constant 0 : index
    %657 = vector.load %656[%c14_629, %c0_630, %c0_631, %c0_632] : memref<16x1x4x16xf32, #tpu.memory_space<vmem>>, vector<1x1x4x16xf32>
    %658 = vector.shape_cast %657 : vector<1x1x4x16xf32> to vector<1x4x16xf32>
    %659 = arith.addf %654, %658 : vector<1x4x16xf32>
    %cst_633 = arith.constant 0.000000e+00 : f32
    %660 = vector.broadcast %cst_633 : f32 to vector<1x4x16xf32>
    %661 = arith.maximumf %659, %660 : vector<1x4x16xf32>
    %c1_634 = arith.constant 1 : index
    %c0_635 = arith.constant 0 : index
    %c0_636 = arith.constant 0 : index
    %c0_637 = arith.constant 0 : index
    %662 = vector.load %arg10[%c1_634, %c0_635, %c0_636, %c0_637] : memref<16x1x4x16xf32, #tpu.memory_space<vmem>>, vector<1x1x4x16xf32>
    %663 = vector.shape_cast %662 : vector<1x1x4x16xf32> to vector<1x4x16xf32>
    %664 = vector.shape_cast %651 : vector<1x4x16xf32> to vector<1x1x4x16xf32>
    tpu.vector_store %arg10[%c1_634, %c0_635, %c0_636, %c0_637], %664 {strides = array<i32>} : memref<16x1x4x16xf32, #tpu.memory_space<vmem>>, vector<1x1x4x16xf32>,
    %c14_638 = arith.constant 14 : index
    %c0_639 = arith.constant 0 : index
    %c0_640 = arith.constant 0 : index
    %c0_641 = arith.constant 0 : index
    %665 = vector.load %arg11[%c14_638, %c0_639, %c0_640, %c0_641] : memref<16x1x4x16xf32, #tpu.memory_space<vmem>>, vector<1x1x4x16xf32>
    %666 = vector.shape_cast %665 : vector<1x1x4x16xf32> to vector<1x4x16xf32>
    %667 = vector.shape_cast %661 : vector<1x4x16xf32> to vector<1x1x4x16xf32>
    tpu.vector_store %arg11[%c14_638, %c0_639, %c0_640, %c0_641], %667 {strides = array<i32>} : memref<16x1x4x16xf32, #tpu.memory_space<vmem>>, vector<1x1x4x16xf32>,
    %c0_642 = arith.constant 0 : index
    %c1_643 = arith.constant 1 : index
    %c0_644 = arith.constant 0 : index
    %c0_645 = arith.constant 0 : index
    %668 = vector.load %arg4[%c0_642, %c1_643, %c0_644, %c0_645] : memref<2x16x1x16xf32, #tpu.memory_space<vmem>>, vector<1x1x1x16xf32>
    %669 = vector.shape_cast %668 : vector<1x1x1x16xf32> to vector<1x16xf32>
    %670 = arith.negf %669 : vector<1x16xf32>
    %671 = math.exp %670 : vector<1x16xf32>
    %cst_646 = arith.constant 1.000000e+00 : f32
    %672 = vector.broadcast %cst_646 : f32 to vector<1x16xf32>
    %673 = arith.addf %672, %671 : vector<1x16xf32>
    %674 = arith.divf %672, %673 : vector<1x16xf32>
    %c1_647 = arith.constant 1 : index
    %c14_648 = arith.constant 14 : index
    %c0_649 = arith.constant 0 : index
    %c0_650 = arith.constant 0 : index
    %675 = vector.load %arg4[%c1_647, %c14_648, %c0_649, %c0_650] : memref<2x16x1x16xf32, #tpu.memory_space<vmem>>, vector<1x1x1x16xf32>
    %676 = vector.shape_cast %675 : vector<1x1x1x16xf32> to vector<1x16xf32>
    %677 = arith.negf %676 : vector<1x16xf32>
    %678 = math.exp %677 : vector<1x16xf32>
    %cst_651 = arith.constant 1.000000e+00 : f32
    %679 = vector.broadcast %cst_651 : f32 to vector<1x16xf32>
    %680 = arith.addf %679, %678 : vector<1x16xf32>
    %681 = arith.divf %679, %680 : vector<1x16xf32>
    %682 = vector.shape_cast %674 : vector<1x16xf32> to vector<1x1x16xf32>
    %683 = vector.broadcast %682 : vector<1x1x16xf32> to vector<1x4x16xf32>
    %684 = arith.mulf %683, %651 : vector<1x4x16xf32>
    %c0_i32_652 = arith.constant 0 : i32
    %c0_i32_653 = arith.constant 0 : i32
    %c0_i32_654 = arith.constant 0 : i32
    %c0_i32_655 = arith.constant 0 : i32
    %c0_i32_656 = arith.constant 0 : i32
    %685 = tpu.memref_slice %arg2[%c0_i32_652, %c0_i32_653, %c0_i32_654, %c0_i32_655, %c0_i32_656] : memref<1x16x1x4x16xf32, #tpu.memory_space<vmem>> -> memref<1x16x1x4x16xf32, #tpu.memory_space<vmem>>
    %686 = tpu.memref_squeeze %685 : memref<1x16x1x4x16xf32, #tpu.memory_space<vmem>> -> memref<16x1x4x16xf32, #tpu.memory_space<vmem>>
    %c2_657 = arith.constant 2 : index
    %c0_658 = arith.constant 0 : index
    %c0_659 = arith.constant 0 : index
    %c0_660 = arith.constant 0 : index
    %687 = vector.load %686[%c2_657, %c0_658, %c0_659, %c0_660] : memref<16x1x4x16xf32, #tpu.memory_space<vmem>>, vector<1x1x4x16xf32>
    %688 = vector.shape_cast %687 : vector<1x1x4x16xf32> to vector<1x4x16xf32>
    %689 = arith.addf %684, %688 : vector<1x4x16xf32>
    %cst_661 = arith.constant 0.000000e+00 : f32
    %690 = vector.broadcast %cst_661 : f32 to vector<1x4x16xf32>
    %691 = arith.maximumf %689, %690 : vector<1x4x16xf32>
    %692 = vector.shape_cast %681 : vector<1x16xf32> to vector<1x1x16xf32>
    %693 = vector.broadcast %692 : vector<1x1x16xf32> to vector<1x4x16xf32>
    %694 = arith.mulf %693, %661 : vector<1x4x16xf32>
    %c0_i32_662 = arith.constant 0 : i32
    %c0_i32_663 = arith.constant 0 : i32
    %c0_i32_664 = arith.constant 0 : i32
    %c0_i32_665 = arith.constant 0 : i32
    %c0_i32_666 = arith.constant 0 : i32
    %695 = tpu.memref_slice %arg2[%c0_i32_662, %c0_i32_663, %c0_i32_664, %c0_i32_665, %c0_i32_666] : memref<1x16x1x4x16xf32, #tpu.memory_space<vmem>> -> memref<1x16x1x4x16xf32, #tpu.memory_space<vmem>>
    %696 = tpu.memref_squeeze %695 : memref<1x16x1x4x16xf32, #tpu.memory_space<vmem>> -> memref<16x1x4x16xf32, #tpu.memory_space<vmem>>
    %c13_667 = arith.constant 13 : index
    %c0_668 = arith.constant 0 : index
    %c0_669 = arith.constant 0 : index
    %c0_670 = arith.constant 0 : index
    %697 = vector.load %696[%c13_667, %c0_668, %c0_669, %c0_670] : memref<16x1x4x16xf32, #tpu.memory_space<vmem>>, vector<1x1x4x16xf32>
    %698 = vector.shape_cast %697 : vector<1x1x4x16xf32> to vector<1x4x16xf32>
    %699 = arith.addf %694, %698 : vector<1x4x16xf32>
    %cst_671 = arith.constant 0.000000e+00 : f32
    %700 = vector.broadcast %cst_671 : f32 to vector<1x4x16xf32>
    %701 = arith.maximumf %699, %700 : vector<1x4x16xf32>
    %c2_672 = arith.constant 2 : index
    %c0_673 = arith.constant 0 : index
    %c0_674 = arith.constant 0 : index
    %c0_675 = arith.constant 0 : index
    %702 = vector.load %arg10[%c2_672, %c0_673, %c0_674, %c0_675] : memref<16x1x4x16xf32, #tpu.memory_space<vmem>>, vector<1x1x4x16xf32>
    %703 = vector.shape_cast %702 : vector<1x1x4x16xf32> to vector<1x4x16xf32>
    %704 = vector.shape_cast %691 : vector<1x4x16xf32> to vector<1x1x4x16xf32>
    tpu.vector_store %arg10[%c2_672, %c0_673, %c0_674, %c0_675], %704 {strides = array<i32>} : memref<16x1x4x16xf32, #tpu.memory_space<vmem>>, vector<1x1x4x16xf32>,
    %c13_676 = arith.constant 13 : index
    %c0_677 = arith.constant 0 : index
    %c0_678 = arith.constant 0 : index
    %c0_679 = arith.constant 0 : index
    %705 = vector.load %arg11[%c13_676, %c0_677, %c0_678, %c0_679] : memref<16x1x4x16xf32, #tpu.memory_space<vmem>>, vector<1x1x4x16xf32>
    %706 = vector.shape_cast %705 : vector<1x1x4x16xf32> to vector<1x4x16xf32>
    %707 = vector.shape_cast %701 : vector<1x4x16xf32> to vector<1x1x4x16xf32>
    tpu.vector_store %arg11[%c13_676, %c0_677, %c0_678, %c0_679], %707 {strides = array<i32>} : memref<16x1x4x16xf32, #tpu.memory_space<vmem>>, vector<1x1x4x16xf32>,
    %c0_680 = arith.constant 0 : index
    %c2_681 = arith.constant 2 : index
    %c0_682 = arith.constant 0 : index
    %c0_683 = arith.constant 0 : index
    %708 = vector.load %arg4[%c0_680, %c2_681, %c0_682, %c0_683] : memref<2x16x1x16xf32, #tpu.memory_space<vmem>>, vector<1x1x1x16xf32>
    %709 = vector.shape_cast %708 : vector<1x1x1x16xf32> to vector<1x16xf32>
    %710 = arith.negf %709 : vector<1x16xf32>
    %711 = math.exp %710 : vector<1x16xf32>
    %cst_684 = arith.constant 1.000000e+00 : f32
    %712 = vector.broadcast %cst_684 : f32 to vector<1x16xf32>
    %713 = arith.addf %712, %711 : vector<1x16xf32>
    %714 = arith.divf %712, %713 : vector<1x16xf32>
    %c1_685 = arith.constant 1 : index
    %c13_686 = arith.constant 13 : index
    %c0_687 = arith.constant 0 : index
    %c0_688 = arith.constant 0 : index
    %715 = vector.load %arg4[%c1_685, %c13_686, %c0_687, %c0_688] : memref<2x16x1x16xf32, #tpu.memory_space<vmem>>, vector<1x1x1x16xf32>
    %716 = vector.shape_cast %715 : vector<1x1x1x16xf32> to vector<1x16xf32>
    %717 = arith.negf %716 : vector<1x16xf32>
    %718 = math.exp %717 : vector<1x16xf32>
    %cst_689 = arith.constant 1.000000e+00 : f32
    %719 = vector.broadcast %cst_689 : f32 to vector<1x16xf32>
    %720 = arith.addf %719, %718 : vector<1x16xf32>
    %721 = arith.divf %719, %720 : vector<1x16xf32>
    %722 = vector.shape_cast %714 : vector<1x16xf32> to vector<1x1x16xf32>
    %723 = vector.broadcast %722 : vector<1x1x16xf32> to vector<1x4x16xf32>
    %724 = arith.mulf %723, %691 : vector<1x4x16xf32>
    %c0_i32_690 = arith.constant 0 : i32
    %c0_i32_691 = arith.constant 0 : i32
    %c0_i32_692 = arith.constant 0 : i32
    %c0_i32_693 = arith.constant 0 : i32
    %c0_i32_694 = arith.constant 0 : i32
    %725 = tpu.memref_slice %arg2[%c0_i32_690, %c0_i32_691, %c0_i32_692, %c0_i32_693, %c0_i32_694] : memref<1x16x1x4x16xf32, #tpu.memory_space<vmem>> -> memref<1x16x1x4x16xf32, #tpu.memory_space<vmem>>
    %726 = tpu.memref_squeeze %725 : memref<1x16x1x4x16xf32, #tpu.memory_space<vmem>> -> memref<16x1x4x16xf32, #tpu.memory_space<vmem>>
    %c3_695 = arith.constant 3 : index
    %c0_696 = arith.constant 0 : index
    %c0_697 = arith.constant 0 : index
    %c0_698 = arith.constant 0 : index
    %727 = vector.load %726[%c3_695, %c0_696, %c0_697, %c0_698] : memref<16x1x4x16xf32, #tpu.memory_space<vmem>>, vector<1x1x4x16xf32>
    %728 = vector.shape_cast %727 : vector<1x1x4x16xf32> to vector<1x4x16xf32>
    %729 = arith.addf %724, %728 : vector<1x4x16xf32>
    %cst_699 = arith.constant 0.000000e+00 : f32
    %730 = vector.broadcast %cst_699 : f32 to vector<1x4x16xf32>
    %731 = arith.maximumf %729, %730 : vector<1x4x16xf32>
    %732 = vector.shape_cast %721 : vector<1x16xf32> to vector<1x1x16xf32>
    %733 = vector.broadcast %732 : vector<1x1x16xf32> to vector<1x4x16xf32>
    %734 = arith.mulf %733, %701 : vector<1x4x16xf32>
    %c0_i32_700 = arith.constant 0 : i32
    %c0_i32_701 = arith.constant 0 : i32
    %c0_i32_702 = arith.constant 0 : i32
    %c0_i32_703 = arith.constant 0 : i32
    %c0_i32_704 = arith.constant 0 : i32
    %735 = tpu.memref_slice %arg2[%c0_i32_700, %c0_i32_701, %c0_i32_702, %c0_i32_703, %c0_i32_704] : memref<1x16x1x4x16xf32, #tpu.memory_space<vmem>> -> memref<1x16x1x4x16xf32, #tpu.memory_space<vmem>>
    %736 = tpu.memref_squeeze %735 : memref<1x16x1x4x16xf32, #tpu.memory_space<vmem>> -> memref<16x1x4x16xf32, #tpu.memory_space<vmem>>
    %c12_705 = arith.constant 12 : index
    %c0_706 = arith.constant 0 : index
    %c0_707 = arith.constant 0 : index
    %c0_708 = arith.constant 0 : index
    %737 = vector.load %736[%c12_705, %c0_706, %c0_707, %c0_708] : memref<16x1x4x16xf32, #tpu.memory_space<vmem>>, vector<1x1x4x16xf32>
    %738 = vector.shape_cast %737 : vector<1x1x4x16xf32> to vector<1x4x16xf32>
    %739 = arith.addf %734, %738 : vector<1x4x16xf32>
    %cst_709 = arith.constant 0.000000e+00 : f32
    %740 = vector.broadcast %cst_709 : f32 to vector<1x4x16xf32>
    %741 = arith.maximumf %739, %740 : vector<1x4x16xf32>
    %c3_710 = arith.constant 3 : index
    %c0_711 = arith.constant 0 : index
    %c0_712 = arith.constant 0 : index
    %c0_713 = arith.constant 0 : index
    %742 = vector.load %arg10[%c3_710, %c0_711, %c0_712, %c0_713] : memref<16x1x4x16xf32, #tpu.memory_space<vmem>>, vector<1x1x4x16xf32>
    %743 = vector.shape_cast %742 : vector<1x1x4x16xf32> to vector<1x4x16xf32>
    %744 = vector.shape_cast %731 : vector<1x4x16xf32> to vector<1x1x4x16xf32>
    tpu.vector_store %arg10[%c3_710, %c0_711, %c0_712, %c0_713], %744 {strides = array<i32>} : memref<16x1x4x16xf32, #tpu.memory_space<vmem>>, vector<1x1x4x16xf32>,
    %c12_714 = arith.constant 12 : index
    %c0_715 = arith.constant 0 : index
    %c0_716 = arith.constant 0 : index
    %c0_717 = arith.constant 0 : index
    %745 = vector.load %arg11[%c12_714, %c0_715, %c0_716, %c0_717] : memref<16x1x4x16xf32, #tpu.memory_space<vmem>>, vector<1x1x4x16xf32>
    %746 = vector.shape_cast %745 : vector<1x1x4x16xf32> to vector<1x4x16xf32>
    %747 = vector.shape_cast %741 : vector<1x4x16xf32> to vector<1x1x4x16xf32>
    tpu.vector_store %arg11[%c12_714, %c0_715, %c0_716, %c0_717], %747 {strides = array<i32>} : memref<16x1x4x16xf32, #tpu.memory_space<vmem>>, vector<1x1x4x16xf32>,
    %c0_718 = arith.constant 0 : index
    %c3_719 = arith.constant 3 : index
    %c0_720 = arith.constant 0 : index
    %c0_721 = arith.constant 0 : index
    %748 = vector.load %arg4[%c0_718, %c3_719, %c0_720, %c0_721] : memref<2x16x1x16xf32, #tpu.memory_space<vmem>>, vector<1x1x1x16xf32>
    %749 = vector.shape_cast %748 : vector<1x1x1x16xf32> to vector<1x16xf32>
    %750 = arith.negf %749 : vector<1x16xf32>
    %751 = math.exp %750 : vector<1x16xf32>
    %cst_722 = arith.constant 1.000000e+00 : f32
    %752 = vector.broadcast %cst_722 : f32 to vector<1x16xf32>
    %753 = arith.addf %752, %751 : vector<1x16xf32>
    %754 = arith.divf %752, %753 : vector<1x16xf32>
    %c1_723 = arith.constant 1 : index
    %c12_724 = arith.constant 12 : index
    %c0_725 = arith.constant 0 : index
    %c0_726 = arith.constant 0 : index
    %755 = vector.load %arg4[%c1_723, %c12_724, %c0_725, %c0_726] : memref<2x16x1x16xf32, #tpu.memory_space<vmem>>, vector<1x1x1x16xf32>
    %756 = vector.shape_cast %755 : vector<1x1x1x16xf32> to vector<1x16xf32>
    %757 = arith.negf %756 : vector<1x16xf32>
    %758 = math.exp %757 : vector<1x16xf32>
    %cst_727 = arith.constant 1.000000e+00 : f32
    %759 = vector.broadcast %cst_727 : f32 to vector<1x16xf32>
    %760 = arith.addf %759, %758 : vector<1x16xf32>
    %761 = arith.divf %759, %760 : vector<1x16xf32>
    %762 = vector.shape_cast %754 : vector<1x16xf32> to vector<1x1x16xf32>
    %763 = vector.broadcast %762 : vector<1x1x16xf32> to vector<1x4x16xf32>
    %764 = arith.mulf %763, %731 : vector<1x4x16xf32>
    %c0_i32_728 = arith.constant 0 : i32
    %c0_i32_729 = arith.constant 0 : i32
    %c0_i32_730 = arith.constant 0 : i32
    %c0_i32_731 = arith.constant 0 : i32
    %c0_i32_732 = arith.constant 0 : i32
    %765 = tpu.memref_slice %arg2[%c0_i32_728, %c0_i32_729, %c0_i32_730, %c0_i32_731, %c0_i32_732] : memref<1x16x1x4x16xf32, #tpu.memory_space<vmem>> -> memref<1x16x1x4x16xf32, #tpu.memory_space<vmem>>
    %766 = tpu.memref_squeeze %765 : memref<1x16x1x4x16xf32, #tpu.memory_space<vmem>> -> memref<16x1x4x16xf32, #tpu.memory_space<vmem>>
    %c4_733 = arith.constant 4 : index
    %c0_734 = arith.constant 0 : index
    %c0_735 = arith.constant 0 : index
    %c0_736 = arith.constant 0 : index
    %767 = vector.load %766[%c4_733, %c0_734, %c0_735, %c0_736] : memref<16x1x4x16xf32, #tpu.memory_space<vmem>>, vector<1x1x4x16xf32>
    %768 = vector.shape_cast %767 : vector<1x1x4x16xf32> to vector<1x4x16xf32>
    %769 = arith.addf %764, %768 : vector<1x4x16xf32>
    %cst_737 = arith.constant 0.000000e+00 : f32
    %770 = vector.broadcast %cst_737 : f32 to vector<1x4x16xf32>
    %771 = arith.maximumf %769, %770 : vector<1x4x16xf32>
    %772 = vector.shape_cast %761 : vector<1x16xf32> to vector<1x1x16xf32>
    %773 = vector.broadcast %772 : vector<1x1x16xf32> to vector<1x4x16xf32>
    %774 = arith.mulf %773, %741 : vector<1x4x16xf32>
    %c0_i32_738 = arith.constant 0 : i32
    %c0_i32_739 = arith.constant 0 : i32
    %c0_i32_740 = arith.constant 0 : i32
    %c0_i32_741 = arith.constant 0 : i32
    %c0_i32_742 = arith.constant 0 : i32
    %775 = tpu.memref_slice %arg2[%c0_i32_738, %c0_i32_739, %c0_i32_740, %c0_i32_741, %c0_i32_742] : memref<1x16x1x4x16xf32, #tpu.memory_space<vmem>> -> memref<1x16x1x4x16xf32, #tpu.memory_space<vmem>>
    %776 = tpu.memref_squeeze %775 : memref<1x16x1x4x16xf32, #tpu.memory_space<vmem>> -> memref<16x1x4x16xf32, #tpu.memory_space<vmem>>
    %c11_743 = arith.constant 11 : index
    %c0_744 = arith.constant 0 : index
    %c0_745 = arith.constant 0 : index
    %c0_746 = arith.constant 0 : index
    %777 = vector.load %776[%c11_743, %c0_744, %c0_745, %c0_746] : memref<16x1x4x16xf32, #tpu.memory_space<vmem>>, vector<1x1x4x16xf32>
    %778 = vector.shape_cast %777 : vector<1x1x4x16xf32> to vector<1x4x16xf32>
    %779 = arith.addf %774, %778 : vector<1x4x16xf32>
    %cst_747 = arith.constant 0.000000e+00 : f32
    %780 = vector.broadcast %cst_747 : f32 to vector<1x4x16xf32>
    %781 = arith.maximumf %779, %780 : vector<1x4x16xf32>
    %c4_748 = arith.constant 4 : index
    %c0_749 = arith.constant 0 : index
    %c0_750 = arith.constant 0 : index
    %c0_751 = arith.constant 0 : index
    %782 = vector.load %arg10[%c4_748, %c0_749, %c0_750, %c0_751] : memref<16x1x4x16xf32, #tpu.memory_space<vmem>>, vector<1x1x4x16xf32>
    %783 = vector.shape_cast %782 : vector<1x1x4x16xf32> to vector<1x4x16xf32>
    %784 = vector.shape_cast %771 : vector<1x4x16xf32> to vector<1x1x4x16xf32>
    tpu.vector_store %arg10[%c4_748, %c0_749, %c0_750, %c0_751], %784 {strides = array<i32>} : memref<16x1x4x16xf32, #tpu.memory_space<vmem>>, vector<1x1x4x16xf32>,
    %c11_752 = arith.constant 11 : index
    %c0_753 = arith.constant 0 : index
    %c0_754 = arith.constant 0 : index
    %c0_755 = arith.constant 0 : index
    %785 = vector.load %arg11[%c11_752, %c0_753, %c0_754, %c0_755] : memref<16x1x4x16xf32, #tpu.memory_space<vmem>>, vector<1x1x4x16xf32>
    %786 = vector.shape_cast %785 : vector<1x1x4x16xf32> to vector<1x4x16xf32>
    %787 = vector.shape_cast %781 : vector<1x4x16xf32> to vector<1x1x4x16xf32>
    tpu.vector_store %arg11[%c11_752, %c0_753, %c0_754, %c0_755], %787 {strides = array<i32>} : memref<16x1x4x16xf32, #tpu.memory_space<vmem>>, vector<1x1x4x16xf32>,
    %c0_756 = arith.constant 0 : index
    %c4_757 = arith.constant 4 : index
    %c0_758 = arith.constant 0 : index
    %c0_759 = arith.constant 0 : index
    %788 = vector.load %arg4[%c0_756, %c4_757, %c0_758, %c0_759] : memref<2x16x1x16xf32, #tpu.memory_space<vmem>>, vector<1x1x1x16xf32>
    %789 = vector.shape_cast %788 : vector<1x1x1x16xf32> to vector<1x16xf32>
    %790 = arith.negf %789 : vector<1x16xf32>
    %791 = math.exp %790 : vector<1x16xf32>
    %cst_760 = arith.constant 1.000000e+00 : f32
    %792 = vector.broadcast %cst_760 : f32 to vector<1x16xf32>
    %793 = arith.addf %792, %791 : vector<1x16xf32>
    %794 = arith.divf %792, %793 : vector<1x16xf32>
    %c1_761 = arith.constant 1 : index
    %c11_762 = arith.constant 11 : index
    %c0_763 = arith.constant 0 : index
    %c0_764 = arith.constant 0 : index
    %795 = vector.load %arg4[%c1_761, %c11_762, %c0_763, %c0_764] : memref<2x16x1x16xf32, #tpu.memory_space<vmem>>, vector<1x1x1x16xf32>
    %796 = vector.shape_cast %795 : vector<1x1x1x16xf32> to vector<1x16xf32>
    %797 = arith.negf %796 : vector<1x16xf32>
    %798 = math.exp %797 : vector<1x16xf32>
    %cst_765 = arith.constant 1.000000e+00 : f32
    %799 = vector.broadcast %cst_765 : f32 to vector<1x16xf32>
    %800 = arith.addf %799, %798 : vector<1x16xf32>
    %801 = arith.divf %799, %800 : vector<1x16xf32>
    %802 = vector.shape_cast %794 : vector<1x16xf32> to vector<1x1x16xf32>
    %803 = vector.broadcast %802 : vector<1x1x16xf32> to vector<1x4x16xf32>
    %804 = arith.mulf %803, %771 : vector<1x4x16xf32>
    %c0_i32_766 = arith.constant 0 : i32
    %c0_i32_767 = arith.constant 0 : i32
    %c0_i32_768 = arith.constant 0 : i32
    %c0_i32_769 = arith.constant 0 : i32
    %c0_i32_770 = arith.constant 0 : i32
    %805 = tpu.memref_slice %arg2[%c0_i32_766, %c0_i32_767, %c0_i32_768, %c0_i32_769, %c0_i32_770] : memref<1x16x1x4x16xf32, #tpu.memory_space<vmem>> -> memref<1x16x1x4x16xf32, #tpu.memory_space<vmem>>
    %806 = tpu.memref_squeeze %805 : memref<1x16x1x4x16xf32, #tpu.memory_space<vmem>> -> memref<16x1x4x16xf32, #tpu.memory_space<vmem>>
    %c5_771 = arith.constant 5 : index
    %c0_772 = arith.constant 0 : index
    %c0_773 = arith.constant 0 : index
    %c0_774 = arith.constant 0 : index
    %807 = vector.load %806[%c5_771, %c0_772, %c0_773, %c0_774] : memref<16x1x4x16xf32, #tpu.memory_space<vmem>>, vector<1x1x4x16xf32>
    %808 = vector.shape_cast %807 : vector<1x1x4x16xf32> to vector<1x4x16xf32>
    %809 = arith.addf %804, %808 : vector<1x4x16xf32>
    %cst_775 = arith.constant 0.000000e+00 : f32
    %810 = vector.broadcast %cst_775 : f32 to vector<1x4x16xf32>
    %811 = arith.maximumf %809, %810 : vector<1x4x16xf32>
    %812 = vector.shape_cast %801 : vector<1x16xf32> to vector<1x1x16xf32>
    %813 = vector.broadcast %812 : vector<1x1x16xf32> to vector<1x4x16xf32>
    %814 = arith.mulf %813, %781 : vector<1x4x16xf32>
    %c0_i32_776 = arith.constant 0 : i32
    %c0_i32_777 = arith.constant 0 : i32
    %c0_i32_778 = arith.constant 0 : i32
    %c0_i32_779 = arith.constant 0 : i32
    %c0_i32_780 = arith.constant 0 : i32
    %815 = tpu.memref_slice %arg2[%c0_i32_776, %c0_i32_777, %c0_i32_778, %c0_i32_779, %c0_i32_780] : memref<1x16x1x4x16xf32, #tpu.memory_space<vmem>> -> memref<1x16x1x4x16xf32, #tpu.memory_space<vmem>>
    %816 = tpu.memref_squeeze %815 : memref<1x16x1x4x16xf32, #tpu.memory_space<vmem>> -> memref<16x1x4x16xf32, #tpu.memory_space<vmem>>
    %c10_781 = arith.constant 10 : index
    %c0_782 = arith.constant 0 : index
    %c0_783 = arith.constant 0 : index
    %c0_784 = arith.constant 0 : index
    %817 = vector.load %816[%c10_781, %c0_782, %c0_783, %c0_784] : memref<16x1x4x16xf32, #tpu.memory_space<vmem>>, vector<1x1x4x16xf32>
    %818 = vector.shape_cast %817 : vector<1x1x4x16xf32> to vector<1x4x16xf32>
    %819 = arith.addf %814, %818 : vector<1x4x16xf32>
    %cst_785 = arith.constant 0.000000e+00 : f32
    %820 = vector.broadcast %cst_785 : f32 to vector<1x4x16xf32>
    %821 = arith.maximumf %819, %820 : vector<1x4x16xf32>
    %c5_786 = arith.constant 5 : index
    %c0_787 = arith.constant 0 : index
    %c0_788 = arith.constant 0 : index
    %c0_789 = arith.constant 0 : index
    %822 = vector.load %arg10[%c5_786, %c0_787, %c0_788, %c0_789] : memref<16x1x4x16xf32, #tpu.memory_space<vmem>>, vector<1x1x4x16xf32>
    %823 = vector.shape_cast %822 : vector<1x1x4x16xf32> to vector<1x4x16xf32>
    %824 = vector.shape_cast %811 : vector<1x4x16xf32> to vector<1x1x4x16xf32>
    tpu.vector_store %arg10[%c5_786, %c0_787, %c0_788, %c0_789], %824 {strides = array<i32>} : memref<16x1x4x16xf32, #tpu.memory_space<vmem>>, vector<1x1x4x16xf32>,
    %c10_790 = arith.constant 10 : index
    %c0_791 = arith.constant 0 : index
    %c0_792 = arith.constant 0 : index
    %c0_793 = arith.constant 0 : index
    %825 = vector.load %arg11[%c10_790, %c0_791, %c0_792, %c0_793] : memref<16x1x4x16xf32, #tpu.memory_space<vmem>>, vector<1x1x4x16xf32>
    %826 = vector.shape_cast %825 : vector<1x1x4x16xf32> to vector<1x4x16xf32>
    %827 = vector.shape_cast %821 : vector<1x4x16xf32> to vector<1x1x4x16xf32>
    tpu.vector_store %arg11[%c10_790, %c0_791, %c0_792, %c0_793], %827 {strides = array<i32>} : memref<16x1x4x16xf32, #tpu.memory_space<vmem>>, vector<1x1x4x16xf32>,
    %c0_794 = arith.constant 0 : index
    %c5_795 = arith.constant 5 : index
    %c0_796 = arith.constant 0 : index
    %c0_797 = arith.constant 0 : index
    %828 = vector.load %arg4[%c0_794, %c5_795, %c0_796, %c0_797] : memref<2x16x1x16xf32, #tpu.memory_space<vmem>>, vector<1x1x1x16xf32>
    %829 = vector.shape_cast %828 : vector<1x1x1x16xf32> to vector<1x16xf32>
    %830 = arith.negf %829 : vector<1x16xf32>
    %831 = math.exp %830 : vector<1x16xf32>
    %cst_798 = arith.constant 1.000000e+00 : f32
    %832 = vector.broadcast %cst_798 : f32 to vector<1x16xf32>
    %833 = arith.addf %832, %831 : vector<1x16xf32>
    %834 = arith.divf %832, %833 : vector<1x16xf32>
    %c1_799 = arith.constant 1 : index
    %c10_800 = arith.constant 10 : index
    %c0_801 = arith.constant 0 : index
    %c0_802 = arith.constant 0 : index
    %835 = vector.load %arg4[%c1_799, %c10_800, %c0_801, %c0_802] : memref<2x16x1x16xf32, #tpu.memory_space<vmem>>, vector<1x1x1x16xf32>
    %836 = vector.shape_cast %835 : vector<1x1x1x16xf32> to vector<1x16xf32>
    %837 = arith.negf %836 : vector<1x16xf32>
    %838 = math.exp %837 : vector<1x16xf32>
    %cst_803 = arith.constant 1.000000e+00 : f32
    %839 = vector.broadcast %cst_803 : f32 to vector<1x16xf32>
    %840 = arith.addf %839, %838 : vector<1x16xf32>
    %841 = arith.divf %839, %840 : vector<1x16xf32>
    %842 = vector.shape_cast %834 : vector<1x16xf32> to vector<1x1x16xf32>
    %843 = vector.broadcast %842 : vector<1x1x16xf32> to vector<1x4x16xf32>
    %844 = arith.mulf %843, %811 : vector<1x4x16xf32>
    %c0_i32_804 = arith.constant 0 : i32
    %c0_i32_805 = arith.constant 0 : i32
    %c0_i32_806 = arith.constant 0 : i32
    %c0_i32_807 = arith.constant 0 : i32
    %c0_i32_808 = arith.constant 0 : i32
    %845 = tpu.memref_slice %arg2[%c0_i32_804, %c0_i32_805, %c0_i32_806, %c0_i32_807, %c0_i32_808] : memref<1x16x1x4x16xf32, #tpu.memory_space<vmem>> -> memref<1x16x1x4x16xf32, #tpu.memory_space<vmem>>
    %846 = tpu.memref_squeeze %845 : memref<1x16x1x4x16xf32, #tpu.memory_space<vmem>> -> memref<16x1x4x16xf32, #tpu.memory_space<vmem>>
    %c6_809 = arith.constant 6 : index
    %c0_810 = arith.constant 0 : index
    %c0_811 = arith.constant 0 : index
    %c0_812 = arith.constant 0 : index
    %847 = vector.load %846[%c6_809, %c0_810, %c0_811, %c0_812] : memref<16x1x4x16xf32, #tpu.memory_space<vmem>>, vector<1x1x4x16xf32>
    %848 = vector.shape_cast %847 : vector<1x1x4x16xf32> to vector<1x4x16xf32>
    %849 = arith.addf %844, %848 : vector<1x4x16xf32>
    %cst_813 = arith.constant 0.000000e+00 : f32
    %850 = vector.broadcast %cst_813 : f32 to vector<1x4x16xf32>
    %851 = arith.maximumf %849, %850 : vector<1x4x16xf32>
    %852 = vector.shape_cast %841 : vector<1x16xf32> to vector<1x1x16xf32>
    %853 = vector.broadcast %852 : vector<1x1x16xf32> to vector<1x4x16xf32>
    %854 = arith.mulf %853, %821 : vector<1x4x16xf32>
    %c0_i32_814 = arith.constant 0 : i32
    %c0_i32_815 = arith.constant 0 : i32
    %c0_i32_816 = arith.constant 0 : i32
    %c0_i32_817 = arith.constant 0 : i32
    %c0_i32_818 = arith.constant 0 : i32
    %855 = tpu.memref_slice %arg2[%c0_i32_814, %c0_i32_815, %c0_i32_816, %c0_i32_817, %c0_i32_818] : memref<1x16x1x4x16xf32, #tpu.memory_space<vmem>> -> memref<1x16x1x4x16xf32, #tpu.memory_space<vmem>>
    %856 = tpu.memref_squeeze %855 : memref<1x16x1x4x16xf32, #tpu.memory_space<vmem>> -> memref<16x1x4x16xf32, #tpu.memory_space<vmem>>
    %c9_819 = arith.constant 9 : index
    %c0_820 = arith.constant 0 : index
    %c0_821 = arith.constant 0 : index
    %c0_822 = arith.constant 0 : index
    %857 = vector.load %856[%c9_819, %c0_820, %c0_821, %c0_822] : memref<16x1x4x16xf32, #tpu.memory_space<vmem>>, vector<1x1x4x16xf32>
    %858 = vector.shape_cast %857 : vector<1x1x4x16xf32> to vector<1x4x16xf32>
    %859 = arith.addf %854, %858 : vector<1x4x16xf32>
    %cst_823 = arith.constant 0.000000e+00 : f32
    %860 = vector.broadcast %cst_823 : f32 to vector<1x4x16xf32>
    %861 = arith.maximumf %859, %860 : vector<1x4x16xf32>
    %c6_824 = arith.constant 6 : index
    %c0_825 = arith.constant 0 : index
    %c0_826 = arith.constant 0 : index
    %c0_827 = arith.constant 0 : index
    %862 = vector.load %arg10[%c6_824, %c0_825, %c0_826, %c0_827] : memref<16x1x4x16xf32, #tpu.memory_space<vmem>>, vector<1x1x4x16xf32>
    %863 = vector.shape_cast %862 : vector<1x1x4x16xf32> to vector<1x4x16xf32>
    %864 = vector.shape_cast %851 : vector<1x4x16xf32> to vector<1x1x4x16xf32>
    tpu.vector_store %arg10[%c6_824, %c0_825, %c0_826, %c0_827], %864 {strides = array<i32>} : memref<16x1x4x16xf32, #tpu.memory_space<vmem>>, vector<1x1x4x16xf32>,
    %c9_828 = arith.constant 9 : index
    %c0_829 = arith.constant 0 : index
    %c0_830 = arith.constant 0 : index
    %c0_831 = arith.constant 0 : index
    %865 = vector.load %arg11[%c9_828, %c0_829, %c0_830, %c0_831] : memref<16x1x4x16xf32, #tpu.memory_space<vmem>>, vector<1x1x4x16xf32>
    %866 = vector.shape_cast %865 : vector<1x1x4x16xf32> to vector<1x4x16xf32>
    %867 = vector.shape_cast %861 : vector<1x4x16xf32> to vector<1x1x4x16xf32>
    tpu.vector_store %arg11[%c9_828, %c0_829, %c0_830, %c0_831], %867 {strides = array<i32>} : memref<16x1x4x16xf32, #tpu.memory_space<vmem>>, vector<1x1x4x16xf32>,
    %c0_832 = arith.constant 0 : index
    %c6_833 = arith.constant 6 : index
    %c0_834 = arith.constant 0 : index
    %c0_835 = arith.constant 0 : index
    %868 = vector.load %arg4[%c0_832, %c6_833, %c0_834, %c0_835] : memref<2x16x1x16xf32, #tpu.memory_space<vmem>>, vector<1x1x1x16xf32>
    %869 = vector.shape_cast %868 : vector<1x1x1x16xf32> to vector<1x16xf32>
    %870 = arith.negf %869 : vector<1x16xf32>
    %871 = math.exp %870 : vector<1x16xf32>
    %cst_836 = arith.constant 1.000000e+00 : f32
    %872 = vector.broadcast %cst_836 : f32 to vector<1x16xf32>
    %873 = arith.addf %872, %871 : vector<1x16xf32>
    %874 = arith.divf %872, %873 : vector<1x16xf32>
    %c1_837 = arith.constant 1 : index
    %c9_838 = arith.constant 9 : index
    %c0_839 = arith.constant 0 : index
    %c0_840 = arith.constant 0 : index
    %875 = vector.load %arg4[%c1_837, %c9_838, %c0_839, %c0_840] : memref<2x16x1x16xf32, #tpu.memory_space<vmem>>, vector<1x1x1x16xf32>
    %876 = vector.shape_cast %875 : vector<1x1x1x16xf32> to vector<1x16xf32>
    %877 = arith.negf %876 : vector<1x16xf32>
    %878 = math.exp %877 : vector<1x16xf32>
    %cst_841 = arith.constant 1.000000e+00 : f32
    %879 = vector.broadcast %cst_841 : f32 to vector<1x16xf32>
    %880 = arith.addf %879, %878 : vector<1x16xf32>
    %881 = arith.divf %879, %880 : vector<1x16xf32>
    %882 = vector.shape_cast %874 : vector<1x16xf32> to vector<1x1x16xf32>
    %883 = vector.broadcast %882 : vector<1x1x16xf32> to vector<1x4x16xf32>
    %884 = arith.mulf %883, %851 : vector<1x4x16xf32>
    %c0_i32_842 = arith.constant 0 : i32
    %c0_i32_843 = arith.constant 0 : i32
    %c0_i32_844 = arith.constant 0 : i32
    %c0_i32_845 = arith.constant 0 : i32
    %c0_i32_846 = arith.constant 0 : i32
    %885 = tpu.memref_slice %arg2[%c0_i32_842, %c0_i32_843, %c0_i32_844, %c0_i32_845, %c0_i32_846] : memref<1x16x1x4x16xf32, #tpu.memory_space<vmem>> -> memref<1x16x1x4x16xf32, #tpu.memory_space<vmem>>
    %886 = tpu.memref_squeeze %885 : memref<1x16x1x4x16xf32, #tpu.memory_space<vmem>> -> memref<16x1x4x16xf32, #tpu.memory_space<vmem>>
    %c7_847 = arith.constant 7 : index
    %c0_848 = arith.constant 0 : index
    %c0_849 = arith.constant 0 : index
    %c0_850 = arith.constant 0 : index
    %887 = vector.load %886[%c7_847, %c0_848, %c0_849, %c0_850] : memref<16x1x4x16xf32, #tpu.memory_space<vmem>>, vector<1x1x4x16xf32>
    %888 = vector.shape_cast %887 : vector<1x1x4x16xf32> to vector<1x4x16xf32>
    %889 = arith.addf %884, %888 : vector<1x4x16xf32>
    %cst_851 = arith.constant 0.000000e+00 : f32
    %890 = vector.broadcast %cst_851 : f32 to vector<1x4x16xf32>
    %891 = arith.maximumf %889, %890 : vector<1x4x16xf32>
    %892 = vector.shape_cast %881 : vector<1x16xf32> to vector<1x1x16xf32>
    %893 = vector.broadcast %892 : vector<1x1x16xf32> to vector<1x4x16xf32>
    %894 = arith.mulf %893, %861 : vector<1x4x16xf32>
    %c0_i32_852 = arith.constant 0 : i32
    %c0_i32_853 = arith.constant 0 : i32
    %c0_i32_854 = arith.constant 0 : i32
    %c0_i32_855 = arith.constant 0 : i32
    %c0_i32_856 = arith.constant 0 : i32
    %895 = tpu.memref_slice %arg2[%c0_i32_852, %c0_i32_853, %c0_i32_854, %c0_i32_855, %c0_i32_856] : memref<1x16x1x4x16xf32, #tpu.memory_space<vmem>> -> memref<1x16x1x4x16xf32, #tpu.memory_space<vmem>>
    %896 = tpu.memref_squeeze %895 : memref<1x16x1x4x16xf32, #tpu.memory_space<vmem>> -> memref<16x1x4x16xf32, #tpu.memory_space<vmem>>
    %c8_857 = arith.constant 8 : index
    %c0_858 = arith.constant 0 : index
    %c0_859 = arith.constant 0 : index
    %c0_860 = arith.constant 0 : index
    %897 = vector.load %896[%c8_857, %c0_858, %c0_859, %c0_860] : memref<16x1x4x16xf32, #tpu.memory_space<vmem>>, vector<1x1x4x16xf32>
    %898 = vector.shape_cast %897 : vector<1x1x4x16xf32> to vector<1x4x16xf32>
    %899 = arith.addf %894, %898 : vector<1x4x16xf32>
    %cst_861 = arith.constant 0.000000e+00 : f32
    %900 = vector.broadcast %cst_861 : f32 to vector<1x4x16xf32>
    %901 = arith.maximumf %899, %900 : vector<1x4x16xf32>
    %c7_862 = arith.constant 7 : index
    %c0_863 = arith.constant 0 : index
    %c0_864 = arith.constant 0 : index
    %c0_865 = arith.constant 0 : index
    %902 = vector.load %arg10[%c7_862, %c0_863, %c0_864, %c0_865] : memref<16x1x4x16xf32, #tpu.memory_space<vmem>>, vector<1x1x4x16xf32>
    %903 = vector.shape_cast %902 : vector<1x1x4x16xf32> to vector<1x4x16xf32>
    %904 = vector.shape_cast %891 : vector<1x4x16xf32> to vector<1x1x4x16xf32>
    tpu.vector_store %arg10[%c7_862, %c0_863, %c0_864, %c0_865], %904 {strides = array<i32>} : memref<16x1x4x16xf32, #tpu.memory_space<vmem>>, vector<1x1x4x16xf32>,
    %c8_866 = arith.constant 8 : index
    %c0_867 = arith.constant 0 : index
    %c0_868 = arith.constant 0 : index
    %c0_869 = arith.constant 0 : index
    %905 = vector.load %arg11[%c8_866, %c0_867, %c0_868, %c0_869] : memref<16x1x4x16xf32, #tpu.memory_space<vmem>>, vector<1x1x4x16xf32>
    %906 = vector.shape_cast %905 : vector<1x1x4x16xf32> to vector<1x4x16xf32>
    %907 = vector.shape_cast %901 : vector<1x4x16xf32> to vector<1x1x4x16xf32>
    tpu.vector_store %arg11[%c8_866, %c0_867, %c0_868, %c0_869], %907 {strides = array<i32>} : memref<16x1x4x16xf32, #tpu.memory_space<vmem>>, vector<1x1x4x16xf32>,
    %c0_870 = arith.constant 0 : index
    %c7_871 = arith.constant 7 : index
    %c0_872 = arith.constant 0 : index
    %c0_873 = arith.constant 0 : index
    %908 = vector.load %arg4[%c0_870, %c7_871, %c0_872, %c0_873] : memref<2x16x1x16xf32, #tpu.memory_space<vmem>>, vector<1x1x1x16xf32>
    %909 = vector.shape_cast %908 : vector<1x1x1x16xf32> to vector<1x16xf32>
    %910 = arith.negf %909 : vector<1x16xf32>
    %911 = math.exp %910 : vector<1x16xf32>
    %cst_874 = arith.constant 1.000000e+00 : f32
    %912 = vector.broadcast %cst_874 : f32 to vector<1x16xf32>
    %913 = arith.addf %912, %911 : vector<1x16xf32>
    %914 = arith.divf %912, %913 : vector<1x16xf32>
    %c1_875 = arith.constant 1 : index
    %c8_876 = arith.constant 8 : index
    %c0_877 = arith.constant 0 : index
    %c0_878 = arith.constant 0 : index
    %915 = vector.load %arg4[%c1_875, %c8_876, %c0_877, %c0_878] : memref<2x16x1x16xf32, #tpu.memory_space<vmem>>, vector<1x1x1x16xf32>
    %916 = vector.shape_cast %915 : vector<1x1x1x16xf32> to vector<1x16xf32>
    %917 = arith.negf %916 : vector<1x16xf32>
    %918 = math.exp %917 : vector<1x16xf32>
    %cst_879 = arith.constant 1.000000e+00 : f32
    %919 = vector.broadcast %cst_879 : f32 to vector<1x16xf32>
    %920 = arith.addf %919, %918 : vector<1x16xf32>
    %921 = arith.divf %919, %920 : vector<1x16xf32>
    %922 = vector.shape_cast %914 : vector<1x16xf32> to vector<1x1x16xf32>
    %923 = vector.broadcast %922 : vector<1x1x16xf32> to vector<1x4x16xf32>
    %924 = arith.mulf %923, %891 : vector<1x4x16xf32>
    %c0_i32_880 = arith.constant 0 : i32
    %c0_i32_881 = arith.constant 0 : i32
    %c0_i32_882 = arith.constant 0 : i32
    %c0_i32_883 = arith.constant 0 : i32
    %c0_i32_884 = arith.constant 0 : i32
    %925 = tpu.memref_slice %arg2[%c0_i32_880, %c0_i32_881, %c0_i32_882, %c0_i32_883, %c0_i32_884] : memref<1x16x1x4x16xf32, #tpu.memory_space<vmem>> -> memref<1x16x1x4x16xf32, #tpu.memory_space<vmem>>
    %926 = tpu.memref_squeeze %925 : memref<1x16x1x4x16xf32, #tpu.memory_space<vmem>> -> memref<16x1x4x16xf32, #tpu.memory_space<vmem>>
    %c8_885 = arith.constant 8 : index
    %c0_886 = arith.constant 0 : index
    %c0_887 = arith.constant 0 : index
    %c0_888 = arith.constant 0 : index
    %927 = vector.load %926[%c8_885, %c0_886, %c0_887, %c0_888] : memref<16x1x4x16xf32, #tpu.memory_space<vmem>>, vector<1x1x4x16xf32>
    %928 = vector.shape_cast %927 : vector<1x1x4x16xf32> to vector<1x4x16xf32>
    %929 = arith.addf %924, %928 : vector<1x4x16xf32>
    %cst_889 = arith.constant 0.000000e+00 : f32
    %930 = vector.broadcast %cst_889 : f32 to vector<1x4x16xf32>
    %931 = arith.maximumf %929, %930 : vector<1x4x16xf32>
    %932 = vector.shape_cast %921 : vector<1x16xf32> to vector<1x1x16xf32>
    %933 = vector.broadcast %932 : vector<1x1x16xf32> to vector<1x4x16xf32>
    %934 = arith.mulf %933, %901 : vector<1x4x16xf32>
    %c0_i32_890 = arith.constant 0 : i32
    %c0_i32_891 = arith.constant 0 : i32
    %c0_i32_892 = arith.constant 0 : i32
    %c0_i32_893 = arith.constant 0 : i32
    %c0_i32_894 = arith.constant 0 : i32
    %935 = tpu.memref_slice %arg2[%c0_i32_890, %c0_i32_891, %c0_i32_892, %c0_i32_893, %c0_i32_894] : memref<1x16x1x4x16xf32, #tpu.memory_space<vmem>> -> memref<1x16x1x4x16xf32, #tpu.memory_space<vmem>>
    %936 = tpu.memref_squeeze %935 : memref<1x16x1x4x16xf32, #tpu.memory_space<vmem>> -> memref<16x1x4x16xf32, #tpu.memory_space<vmem>>
    %c7_895 = arith.constant 7 : index
    %c0_896 = arith.constant 0 : index
    %c0_897 = arith.constant 0 : index
    %c0_898 = arith.constant 0 : index
    %937 = vector.load %936[%c7_895, %c0_896, %c0_897, %c0_898] : memref<16x1x4x16xf32, #tpu.memory_space<vmem>>, vector<1x1x4x16xf32>
    %938 = vector.shape_cast %937 : vector<1x1x4x16xf32> to vector<1x4x16xf32>
    %939 = arith.addf %934, %938 : vector<1x4x16xf32>
    %cst_899 = arith.constant 0.000000e+00 : f32
    %940 = vector.broadcast %cst_899 : f32 to vector<1x4x16xf32>
    %941 = arith.maximumf %939, %940 : vector<1x4x16xf32>
    %c8_900 = arith.constant 8 : index
    %c0_901 = arith.constant 0 : index
    %c0_902 = arith.constant 0 : index
    %c0_903 = arith.constant 0 : index
    %942 = vector.load %arg10[%c8_900, %c0_901, %c0_902, %c0_903] : memref<16x1x4x16xf32, #tpu.memory_space<vmem>>, vector<1x1x4x16xf32>
    %943 = vector.shape_cast %942 : vector<1x1x4x16xf32> to vector<1x4x16xf32>
    %944 = vector.shape_cast %931 : vector<1x4x16xf32> to vector<1x1x4x16xf32>
    tpu.vector_store %arg10[%c8_900, %c0_901, %c0_902, %c0_903], %944 {strides = array<i32>} : memref<16x1x4x16xf32, #tpu.memory_space<vmem>>, vector<1x1x4x16xf32>,
    %c7_904 = arith.constant 7 : index
    %c0_905 = arith.constant 0 : index
    %c0_906 = arith.constant 0 : index
    %c0_907 = arith.constant 0 : index
    %945 = vector.load %arg11[%c7_904, %c0_905, %c0_906, %c0_907] : memref<16x1x4x16xf32, #tpu.memory_space<vmem>>, vector<1x1x4x16xf32>
    %946 = vector.shape_cast %945 : vector<1x1x4x16xf32> to vector<1x4x16xf32>
    %947 = vector.shape_cast %941 : vector<1x4x16xf32> to vector<1x1x4x16xf32>
    tpu.vector_store %arg11[%c7_904, %c0_905, %c0_906, %c0_907], %947 {strides = array<i32>} : memref<16x1x4x16xf32, #tpu.memory_space<vmem>>, vector<1x1x4x16xf32>,
    %c0_908 = arith.constant 0 : index
    %c8_909 = arith.constant 8 : index
    %c0_910 = arith.constant 0 : index
    %c0_911 = arith.constant 0 : index
    %948 = vector.load %arg4[%c0_908, %c8_909, %c0_910, %c0_911] : memref<2x16x1x16xf32, #tpu.memory_space<vmem>>, vector<1x1x1x16xf32>
    %949 = vector.shape_cast %948 : vector<1x1x1x16xf32> to vector<1x16xf32>
    %950 = arith.negf %949 : vector<1x16xf32>
    %951 = math.exp %950 : vector<1x16xf32>
    %cst_912 = arith.constant 1.000000e+00 : f32
    %952 = vector.broadcast %cst_912 : f32 to vector<1x16xf32>
    %953 = arith.addf %952, %951 : vector<1x16xf32>
    %954 = arith.divf %952, %953 : vector<1x16xf32>
    %c1_913 = arith.constant 1 : index
    %c7_914 = arith.constant 7 : index
    %c0_915 = arith.constant 0 : index
    %c0_916 = arith.constant 0 : index
    %955 = vector.load %arg4[%c1_913, %c7_914, %c0_915, %c0_916] : memref<2x16x1x16xf32, #tpu.memory_space<vmem>>, vector<1x1x1x16xf32>
    %956 = vector.shape_cast %955 : vector<1x1x1x16xf32> to vector<1x16xf32>
    %957 = arith.negf %956 : vector<1x16xf32>
    %958 = math.exp %957 : vector<1x16xf32>
    %cst_917 = arith.constant 1.000000e+00 : f32
    %959 = vector.broadcast %cst_917 : f32 to vector<1x16xf32>
    %960 = arith.addf %959, %958 : vector<1x16xf32>
    %961 = arith.divf %959, %960 : vector<1x16xf32>
    %962 = vector.shape_cast %954 : vector<1x16xf32> to vector<1x1x16xf32>
    %963 = vector.broadcast %962 : vector<1x1x16xf32> to vector<1x4x16xf32>
    %964 = arith.mulf %963, %931 : vector<1x4x16xf32>
    %c0_i32_918 = arith.constant 0 : i32
    %c0_i32_919 = arith.constant 0 : i32
    %c0_i32_920 = arith.constant 0 : i32
    %c0_i32_921 = arith.constant 0 : i32
    %c0_i32_922 = arith.constant 0 : i32
    %965 = tpu.memref_slice %arg2[%c0_i32_918, %c0_i32_919, %c0_i32_920, %c0_i32_921, %c0_i32_922] : memref<1x16x1x4x16xf32, #tpu.memory_space<vmem>> -> memref<1x16x1x4x16xf32, #tpu.memory_space<vmem>>
    %966 = tpu.memref_squeeze %965 : memref<1x16x1x4x16xf32, #tpu.memory_space<vmem>> -> memref<16x1x4x16xf32, #tpu.memory_space<vmem>>
    %c9_923 = arith.constant 9 : index
    %c0_924 = arith.constant 0 : index
    %c0_925 = arith.constant 0 : index
    %c0_926 = arith.constant 0 : index
    %967 = vector.load %966[%c9_923, %c0_924, %c0_925, %c0_926] : memref<16x1x4x16xf32, #tpu.memory_space<vmem>>, vector<1x1x4x16xf32>
    %968 = vector.shape_cast %967 : vector<1x1x4x16xf32> to vector<1x4x16xf32>
    %969 = arith.addf %964, %968 : vector<1x4x16xf32>
    %cst_927 = arith.constant 0.000000e+00 : f32
    %970 = vector.broadcast %cst_927 : f32 to vector<1x4x16xf32>
    %971 = arith.maximumf %969, %970 : vector<1x4x16xf32>
    %972 = vector.shape_cast %961 : vector<1x16xf32> to vector<1x1x16xf32>
    %973 = vector.broadcast %972 : vector<1x1x16xf32> to vector<1x4x16xf32>
    %974 = arith.mulf %973, %941 : vector<1x4x16xf32>
    %c0_i32_928 = arith.constant 0 : i32
    %c0_i32_929 = arith.constant 0 : i32
    %c0_i32_930 = arith.constant 0 : i32
    %c0_i32_931 = arith.constant 0 : i32
    %c0_i32_932 = arith.constant 0 : i32
    %975 = tpu.memref_slice %arg2[%c0_i32_928, %c0_i32_929, %c0_i32_930, %c0_i32_931, %c0_i32_932] : memref<1x16x1x4x16xf32, #tpu.memory_space<vmem>> -> memref<1x16x1x4x16xf32, #tpu.memory_space<vmem>>
    %976 = tpu.memref_squeeze %975 : memref<1x16x1x4x16xf32, #tpu.memory_space<vmem>> -> memref<16x1x4x16xf32, #tpu.memory_space<vmem>>
    %c6_933 = arith.constant 6 : index
    %c0_934 = arith.constant 0 : index
    %c0_935 = arith.constant 0 : index
    %c0_936 = arith.constant 0 : index
    %977 = vector.load %976[%c6_933, %c0_934, %c0_935, %c0_936] : memref<16x1x4x16xf32, #tpu.memory_space<vmem>>, vector<1x1x4x16xf32>
    %978 = vector.shape_cast %977 : vector<1x1x4x16xf32> to vector<1x4x16xf32>
    %979 = arith.addf %974, %978 : vector<1x4x16xf32>
    %cst_937 = arith.constant 0.000000e+00 : f32
    %980 = vector.broadcast %cst_937 : f32 to vector<1x4x16xf32>
    %981 = arith.maximumf %979, %980 : vector<1x4x16xf32>
    %c9_938 = arith.constant 9 : index
    %c0_939 = arith.constant 0 : index
    %c0_940 = arith.constant 0 : index
    %c0_941 = arith.constant 0 : index
    %982 = vector.load %arg10[%c9_938, %c0_939, %c0_940, %c0_941] : memref<16x1x4x16xf32, #tpu.memory_space<vmem>>, vector<1x1x4x16xf32>
    %983 = vector.shape_cast %982 : vector<1x1x4x16xf32> to vector<1x4x16xf32>
    %984 = vector.shape_cast %971 : vector<1x4x16xf32> to vector<1x1x4x16xf32>
    tpu.vector_store %arg10[%c9_938, %c0_939, %c0_940, %c0_941], %984 {strides = array<i32>} : memref<16x1x4x16xf32, #tpu.memory_space<vmem>>, vector<1x1x4x16xf32>,
    %c6_942 = arith.constant 6 : index
    %c0_943 = arith.constant 0 : index
    %c0_944 = arith.constant 0 : index
    %c0_945 = arith.constant 0 : index
    %985 = vector.load %arg11[%c6_942, %c0_943, %c0_944, %c0_945] : memref<16x1x4x16xf32, #tpu.memory_space<vmem>>, vector<1x1x4x16xf32>
    %986 = vector.shape_cast %985 : vector<1x1x4x16xf32> to vector<1x4x16xf32>
    %987 = vector.shape_cast %981 : vector<1x4x16xf32> to vector<1x1x4x16xf32>
    tpu.vector_store %arg11[%c6_942, %c0_943, %c0_944, %c0_945], %987 {strides = array<i32>} : memref<16x1x4x16xf32, #tpu.memory_space<vmem>>, vector<1x1x4x16xf32>,
    %c0_946 = arith.constant 0 : index
    %c9_947 = arith.constant 9 : index
    %c0_948 = arith.constant 0 : index
    %c0_949 = arith.constant 0 : index
    %988 = vector.load %arg4[%c0_946, %c9_947, %c0_948, %c0_949] : memref<2x16x1x16xf32, #tpu.memory_space<vmem>>, vector<1x1x1x16xf32>
    %989 = vector.shape_cast %988 : vector<1x1x1x16xf32> to vector<1x16xf32>
    %990 = arith.negf %989 : vector<1x16xf32>
    %991 = math.exp %990 : vector<1x16xf32>
    %cst_950 = arith.constant 1.000000e+00 : f32
    %992 = vector.broadcast %cst_950 : f32 to vector<1x16xf32>
    %993 = arith.addf %992, %991 : vector<1x16xf32>
    %994 = arith.divf %992, %993 : vector<1x16xf32>
    %c1_951 = arith.constant 1 : index
    %c6_952 = arith.constant 6 : index
    %c0_953 = arith.constant 0 : index
    %c0_954 = arith.constant 0 : index
    %995 = vector.load %arg4[%c1_951, %c6_952, %c0_953, %c0_954] : memref<2x16x1x16xf32, #tpu.memory_space<vmem>>, vector<1x1x1x16xf32>
    %996 = vector.shape_cast %995 : vector<1x1x1x16xf32> to vector<1x16xf32>
    %997 = arith.negf %996 : vector<1x16xf32>
    %998 = math.exp %997 : vector<1x16xf32>
    %cst_955 = arith.constant 1.000000e+00 : f32
    %999 = vector.broadcast %cst_955 : f32 to vector<1x16xf32>
    %1000 = arith.addf %999, %998 : vector<1x16xf32>
    %1001 = arith.divf %999, %1000 : vector<1x16xf32>
    %1002 = vector.shape_cast %994 : vector<1x16xf32> to vector<1x1x16xf32>
    %1003 = vector.broadcast %1002 : vector<1x1x16xf32> to vector<1x4x16xf32>
    %1004 = arith.mulf %1003, %971 : vector<1x4x16xf32>
    %c0_i32_956 = arith.constant 0 : i32
    %c0_i32_957 = arith.constant 0 : i32
    %c0_i32_958 = arith.constant 0 : i32
    %c0_i32_959 = arith.constant 0 : i32
    %c0_i32_960 = arith.constant 0 : i32
    %1005 = tpu.memref_slice %arg2[%c0_i32_956, %c0_i32_957, %c0_i32_958, %c0_i32_959, %c0_i32_960] : memref<1x16x1x4x16xf32, #tpu.memory_space<vmem>> -> memref<1x16x1x4x16xf32, #tpu.memory_space<vmem>>
    %1006 = tpu.memref_squeeze %1005 : memref<1x16x1x4x16xf32, #tpu.memory_space<vmem>> -> memref<16x1x4x16xf32, #tpu.memory_space<vmem>>
    %c10_961 = arith.constant 10 : index
    %c0_962 = arith.constant 0 : index
    %c0_963 = arith.constant 0 : index
    %c0_964 = arith.constant 0 : index
    %1007 = vector.load %1006[%c10_961, %c0_962, %c0_963, %c0_964] : memref<16x1x4x16xf32, #tpu.memory_space<vmem>>, vector<1x1x4x16xf32>
    %1008 = vector.shape_cast %1007 : vector<1x1x4x16xf32> to vector<1x4x16xf32>
    %1009 = arith.addf %1004, %1008 : vector<1x4x16xf32>
    %cst_965 = arith.constant 0.000000e+00 : f32
    %1010 = vector.broadcast %cst_965 : f32 to vector<1x4x16xf32>
    %1011 = arith.maximumf %1009, %1010 : vector<1x4x16xf32>
    %1012 = vector.shape_cast %1001 : vector<1x16xf32> to vector<1x1x16xf32>
    %1013 = vector.broadcast %1012 : vector<1x1x16xf32> to vector<1x4x16xf32>
    %1014 = arith.mulf %1013, %981 : vector<1x4x16xf32>
    %c0_i32_966 = arith.constant 0 : i32
    %c0_i32_967 = arith.constant 0 : i32
    %c0_i32_968 = arith.constant 0 : i32
    %c0_i32_969 = arith.constant 0 : i32
    %c0_i32_970 = arith.constant 0 : i32
    %1015 = tpu.memref_slice %arg2[%c0_i32_966, %c0_i32_967, %c0_i32_968, %c0_i32_969, %c0_i32_970] : memref<1x16x1x4x16xf32, #tpu.memory_space<vmem>> -> memref<1x16x1x4x16xf32, #tpu.memory_space<vmem>>
    %1016 = tpu.memref_squeeze %1015 : memref<1x16x1x4x16xf32, #tpu.memory_space<vmem>> -> memref<16x1x4x16xf32, #tpu.memory_space<vmem>>
    %c5_971 = arith.constant 5 : index
    %c0_972 = arith.constant 0 : index
    %c0_973 = arith.constant 0 : index
    %c0_974 = arith.constant 0 : index
    %1017 = vector.load %1016[%c5_971, %c0_972, %c0_973, %c0_974] : memref<16x1x4x16xf32, #tpu.memory_space<vmem>>, vector<1x1x4x16xf32>
    %1018 = vector.shape_cast %1017 : vector<1x1x4x16xf32> to vector<1x4x16xf32>
    %1019 = arith.addf %1014, %1018 : vector<1x4x16xf32>
    %cst_975 = arith.constant 0.000000e+00 : f32
    %1020 = vector.broadcast %cst_975 : f32 to vector<1x4x16xf32>
    %1021 = arith.maximumf %1019, %1020 : vector<1x4x16xf32>
    %c10_976 = arith.constant 10 : index
    %c0_977 = arith.constant 0 : index
    %c0_978 = arith.constant 0 : index
    %c0_979 = arith.constant 0 : index
    %1022 = vector.load %arg10[%c10_976, %c0_977, %c0_978, %c0_979] : memref<16x1x4x16xf32, #tpu.memory_space<vmem>>, vector<1x1x4x16xf32>
    %1023 = vector.shape_cast %1022 : vector<1x1x4x16xf32> to vector<1x4x16xf32>
    %1024 = vector.shape_cast %1011 : vector<1x4x16xf32> to vector<1x1x4x16xf32>
    tpu.vector_store %arg10[%c10_976, %c0_977, %c0_978, %c0_979], %1024 {strides = array<i32>} : memref<16x1x4x16xf32, #tpu.memory_space<vmem>>, vector<1x1x4x16xf32>,
    %c5_980 = arith.constant 5 : index
    %c0_981 = arith.constant 0 : index
    %c0_982 = arith.constant 0 : index
    %c0_983 = arith.constant 0 : index
    %1025 = vector.load %arg11[%c5_980, %c0_981, %c0_982, %c0_983] : memref<16x1x4x16xf32, #tpu.memory_space<vmem>>, vector<1x1x4x16xf32>
    %1026 = vector.shape_cast %1025 : vector<1x1x4x16xf32> to vector<1x4x16xf32>
    %1027 = vector.shape_cast %1021 : vector<1x4x16xf32> to vector<1x1x4x16xf32>
    tpu.vector_store %arg11[%c5_980, %c0_981, %c0_982, %c0_983], %1027 {strides = array<i32>} : memref<16x1x4x16xf32, #tpu.memory_space<vmem>>, vector<1x1x4x16xf32>,
    %c0_984 = arith.constant 0 : index
    %c10_985 = arith.constant 10 : index
    %c0_986 = arith.constant 0 : index
    %c0_987 = arith.constant 0 : index
    %1028 = vector.load %arg4[%c0_984, %c10_985, %c0_986, %c0_987] : memref<2x16x1x16xf32, #tpu.memory_space<vmem>>, vector<1x1x1x16xf32>
    %1029 = vector.shape_cast %1028 : vector<1x1x1x16xf32> to vector<1x16xf32>
    %1030 = arith.negf %1029 : vector<1x16xf32>
    %1031 = math.exp %1030 : vector<1x16xf32>
    %cst_988 = arith.constant 1.000000e+00 : f32
    %1032 = vector.broadcast %cst_988 : f32 to vector<1x16xf32>
    %1033 = arith.addf %1032, %1031 : vector<1x16xf32>
    %1034 = arith.divf %1032, %1033 : vector<1x16xf32>
    %c1_989 = arith.constant 1 : index
    %c5_990 = arith.constant 5 : index
    %c0_991 = arith.constant 0 : index
    %c0_992 = arith.constant 0 : index
    %1035 = vector.load %arg4[%c1_989, %c5_990, %c0_991, %c0_992] : memref<2x16x1x16xf32, #tpu.memory_space<vmem>>, vector<1x1x1x16xf32>
    %1036 = vector.shape_cast %1035 : vector<1x1x1x16xf32> to vector<1x16xf32>
    %1037 = arith.negf %1036 : vector<1x16xf32>
    %1038 = math.exp %1037 : vector<1x16xf32>
    %cst_993 = arith.constant 1.000000e+00 : f32
    %1039 = vector.broadcast %cst_993 : f32 to vector<1x16xf32>
    %1040 = arith.addf %1039, %1038 : vector<1x16xf32>
    %1041 = arith.divf %1039, %1040 : vector<1x16xf32>
    %1042 = vector.shape_cast %1034 : vector<1x16xf32> to vector<1x1x16xf32>
    %1043 = vector.broadcast %1042 : vector<1x1x16xf32> to vector<1x4x16xf32>
    %1044 = arith.mulf %1043, %1011 : vector<1x4x16xf32>
    %c0_i32_994 = arith.constant 0 : i32
    %c0_i32_995 = arith.constant 0 : i32
    %c0_i32_996 = arith.constant 0 : i32
    %c0_i32_997 = arith.constant 0 : i32
    %c0_i32_998 = arith.constant 0 : i32
    %1045 = tpu.memref_slice %arg2[%c0_i32_994, %c0_i32_995, %c0_i32_996, %c0_i32_997, %c0_i32_998] : memref<1x16x1x4x16xf32, #tpu.memory_space<vmem>> -> memref<1x16x1x4x16xf32, #tpu.memory_space<vmem>>
    %1046 = tpu.memref_squeeze %1045 : memref<1x16x1x4x16xf32, #tpu.memory_space<vmem>> -> memref<16x1x4x16xf32, #tpu.memory_space<vmem>>
    %c11_999 = arith.constant 11 : index
    %c0_1000 = arith.constant 0 : index
    %c0_1001 = arith.constant 0 : index
    %c0_1002 = arith.constant 0 : index
    %1047 = vector.load %1046[%c11_999, %c0_1000, %c0_1001, %c0_1002] : memref<16x1x4x16xf32, #tpu.memory_space<vmem>>, vector<1x1x4x16xf32>
    %1048 = vector.shape_cast %1047 : vector<1x1x4x16xf32> to vector<1x4x16xf32>
    %1049 = arith.addf %1044, %1048 : vector<1x4x16xf32>
    %cst_1003 = arith.constant 0.000000e+00 : f32
    %1050 = vector.broadcast %cst_1003 : f32 to vector<1x4x16xf32>
    %1051 = arith.maximumf %1049, %1050 : vector<1x4x16xf32>
    %1052 = vector.shape_cast %1041 : vector<1x16xf32> to vector<1x1x16xf32>
    %1053 = vector.broadcast %1052 : vector<1x1x16xf32> to vector<1x4x16xf32>
    %1054 = arith.mulf %1053, %1021 : vector<1x4x16xf32>
    %c0_i32_1004 = arith.constant 0 : i32
    %c0_i32_1005 = arith.constant 0 : i32
    %c0_i32_1006 = arith.constant 0 : i32
    %c0_i32_1007 = arith.constant 0 : i32
    %c0_i32_1008 = arith.constant 0 : i32
    %1055 = tpu.memref_slice %arg2[%c0_i32_1004, %c0_i32_1005, %c0_i32_1006, %c0_i32_1007, %c0_i32_1008] : memref<1x16x1x4x16xf32, #tpu.memory_space<vmem>> -> memref<1x16x1x4x16xf32, #tpu.memory_space<vmem>>
    %1056 = tpu.memref_squeeze %1055 : memref<1x16x1x4x16xf32, #tpu.memory_space<vmem>> -> memref<16x1x4x16xf32, #tpu.memory_space<vmem>>
    %c4_1009 = arith.constant 4 : index
    %c0_1010 = arith.constant 0 : index
    %c0_1011 = arith.constant 0 : index
    %c0_1012 = arith.constant 0 : index
    %1057 = vector.load %1056[%c4_1009, %c0_1010, %c0_1011, %c0_1012] : memref<16x1x4x16xf32, #tpu.memory_space<vmem>>, vector<1x1x4x16xf32>
    %1058 = vector.shape_cast %1057 : vector<1x1x4x16xf32> to vector<1x4x16xf32>
    %1059 = arith.addf %1054, %1058 : vector<1x4x16xf32>
    %cst_1013 = arith.constant 0.000000e+00 : f32
    %1060 = vector.broadcast %cst_1013 : f32 to vector<1x4x16xf32>
    %1061 = arith.maximumf %1059, %1060 : vector<1x4x16xf32>
    %c11_1014 = arith.constant 11 : index
    %c0_1015 = arith.constant 0 : index
    %c0_1016 = arith.constant 0 : index
    %c0_1017 = arith.constant 0 : index
    %1062 = vector.load %arg10[%c11_1014, %c0_1015, %c0_1016, %c0_1017] : memref<16x1x4x16xf32, #tpu.memory_space<vmem>>, vector<1x1x4x16xf32>
    %1063 = vector.shape_cast %1062 : vector<1x1x4x16xf32> to vector<1x4x16xf32>
    %1064 = vector.shape_cast %1051 : vector<1x4x16xf32> to vector<1x1x4x16xf32>
    tpu.vector_store %arg10[%c11_1014, %c0_1015, %c0_1016, %c0_1017], %1064 {strides = array<i32>} : memref<16x1x4x16xf32, #tpu.memory_space<vmem>>, vector<1x1x4x16xf32>,
    %c4_1018 = arith.constant 4 : index
    %c0_1019 = arith.constant 0 : index
    %c0_1020 = arith.constant 0 : index
    %c0_1021 = arith.constant 0 : index
    %1065 = vector.load %arg11[%c4_1018, %c0_1019, %c0_1020, %c0_1021] : memref<16x1x4x16xf32, #tpu.memory_space<vmem>>, vector<1x1x4x16xf32>
    %1066 = vector.shape_cast %1065 : vector<1x1x4x16xf32> to vector<1x4x16xf32>
    %1067 = vector.shape_cast %1061 : vector<1x4x16xf32> to vector<1x1x4x16xf32>
    tpu.vector_store %arg11[%c4_1018, %c0_1019, %c0_1020, %c0_1021], %1067 {strides = array<i32>} : memref<16x1x4x16xf32, #tpu.memory_space<vmem>>, vector<1x1x4x16xf32>,
    %c0_1022 = arith.constant 0 : index
    %c11_1023 = arith.constant 11 : index
    %c0_1024 = arith.constant 0 : index
    %c0_1025 = arith.constant 0 : index
    %1068 = vector.load %arg4[%c0_1022, %c11_1023, %c0_1024, %c0_1025] : memref<2x16x1x16xf32, #tpu.memory_space<vmem>>, vector<1x1x1x16xf32>
    %1069 = vector.shape_cast %1068 : vector<1x1x1x16xf32> to vector<1x16xf32>
    %1070 = arith.negf %1069 : vector<1x16xf32>
    %1071 = math.exp %1070 : vector<1x16xf32>
    %cst_1026 = arith.constant 1.000000e+00 : f32
    %1072 = vector.broadcast %cst_1026 : f32 to vector<1x16xf32>
    %1073 = arith.addf %1072, %1071 : vector<1x16xf32>
    %1074 = arith.divf %1072, %1073 : vector<1x16xf32>
    %c1_1027 = arith.constant 1 : index
    %c4_1028 = arith.constant 4 : index
    %c0_1029 = arith.constant 0 : index
    %c0_1030 = arith.constant 0 : index
    %1075 = vector.load %arg4[%c1_1027, %c4_1028, %c0_1029, %c0_1030] : memref<2x16x1x16xf32, #tpu.memory_space<vmem>>, vector<1x1x1x16xf32>
    %1076 = vector.shape_cast %1075 : vector<1x1x1x16xf32> to vector<1x16xf32>
    %1077 = arith.negf %1076 : vector<1x16xf32>
    %1078 = math.exp %1077 : vector<1x16xf32>
    %cst_1031 = arith.constant 1.000000e+00 : f32
    %1079 = vector.broadcast %cst_1031 : f32 to vector<1x16xf32>
    %1080 = arith.addf %1079, %1078 : vector<1x16xf32>
    %1081 = arith.divf %1079, %1080 : vector<1x16xf32>
    %1082 = vector.shape_cast %1074 : vector<1x16xf32> to vector<1x1x16xf32>
    %1083 = vector.broadcast %1082 : vector<1x1x16xf32> to vector<1x4x16xf32>
    %1084 = arith.mulf %1083, %1051 : vector<1x4x16xf32>
    %c0_i32_1032 = arith.constant 0 : i32
    %c0_i32_1033 = arith.constant 0 : i32
    %c0_i32_1034 = arith.constant 0 : i32
    %c0_i32_1035 = arith.constant 0 : i32
    %c0_i32_1036 = arith.constant 0 : i32
    %1085 = tpu.memref_slice %arg2[%c0_i32_1032, %c0_i32_1033, %c0_i32_1034, %c0_i32_1035, %c0_i32_1036] : memref<1x16x1x4x16xf32, #tpu.memory_space<vmem>> -> memref<1x16x1x4x16xf32, #tpu.memory_space<vmem>>
    %1086 = tpu.memref_squeeze %1085 : memref<1x16x1x4x16xf32, #tpu.memory_space<vmem>> -> memref<16x1x4x16xf32, #tpu.memory_space<vmem>>
    %c12_1037 = arith.constant 12 : index
    %c0_1038 = arith.constant 0 : index
    %c0_1039 = arith.constant 0 : index
    %c0_1040 = arith.constant 0 : index
    %1087 = vector.load %1086[%c12_1037, %c0_1038, %c0_1039, %c0_1040] : memref<16x1x4x16xf32, #tpu.memory_space<vmem>>, vector<1x1x4x16xf32>
    %1088 = vector.shape_cast %1087 : vector<1x1x4x16xf32> to vector<1x4x16xf32>
    %1089 = arith.addf %1084, %1088 : vector<1x4x16xf32>
    %cst_1041 = arith.constant 0.000000e+00 : f32
    %1090 = vector.broadcast %cst_1041 : f32 to vector<1x4x16xf32>
    %1091 = arith.maximumf %1089, %1090 : vector<1x4x16xf32>
    %1092 = vector.shape_cast %1081 : vector<1x16xf32> to vector<1x1x16xf32>
    %1093 = vector.broadcast %1092 : vector<1x1x16xf32> to vector<1x4x16xf32>
    %1094 = arith.mulf %1093, %1061 : vector<1x4x16xf32>
    %c0_i32_1042 = arith.constant 0 : i32
    %c0_i32_1043 = arith.constant 0 : i32
    %c0_i32_1044 = arith.constant 0 : i32
    %c0_i32_1045 = arith.constant 0 : i32
    %c0_i32_1046 = arith.constant 0 : i32
    %1095 = tpu.memref_slice %arg2[%c0_i32_1042, %c0_i32_1043, %c0_i32_1044, %c0_i32_1045, %c0_i32_1046] : memref<1x16x1x4x16xf32, #tpu.memory_space<vmem>> -> memref<1x16x1x4x16xf32, #tpu.memory_space<vmem>>
    %1096 = tpu.memref_squeeze %1095 : memref<1x16x1x4x16xf32, #tpu.memory_space<vmem>> -> memref<16x1x4x16xf32, #tpu.memory_space<vmem>>
    %c3_1047 = arith.constant 3 : index
    %c0_1048 = arith.constant 0 : index
    %c0_1049 = arith.constant 0 : index
    %c0_1050 = arith.constant 0 : index
    %1097 = vector.load %1096[%c3_1047, %c0_1048, %c0_1049, %c0_1050] : memref<16x1x4x16xf32, #tpu.memory_space<vmem>>, vector<1x1x4x16xf32>
    %1098 = vector.shape_cast %1097 : vector<1x1x4x16xf32> to vector<1x4x16xf32>
    %1099 = arith.addf %1094, %1098 : vector<1x4x16xf32>
    %cst_1051 = arith.constant 0.000000e+00 : f32
    %1100 = vector.broadcast %cst_1051 : f32 to vector<1x4x16xf32>
    %1101 = arith.maximumf %1099, %1100 : vector<1x4x16xf32>
    %c12_1052 = arith.constant 12 : index
    %c0_1053 = arith.constant 0 : index
    %c0_1054 = arith.constant 0 : index
    %c0_1055 = arith.constant 0 : index
    %1102 = vector.load %arg10[%c12_1052, %c0_1053, %c0_1054, %c0_1055] : memref<16x1x4x16xf32, #tpu.memory_space<vmem>>, vector<1x1x4x16xf32>
    %1103 = vector.shape_cast %1102 : vector<1x1x4x16xf32> to vector<1x4x16xf32>
    %1104 = vector.shape_cast %1091 : vector<1x4x16xf32> to vector<1x1x4x16xf32>
    tpu.vector_store %arg10[%c12_1052, %c0_1053, %c0_1054, %c0_1055], %1104 {strides = array<i32>} : memref<16x1x4x16xf32, #tpu.memory_space<vmem>>, vector<1x1x4x16xf32>,
    %c3_1056 = arith.constant 3 : index
    %c0_1057 = arith.constant 0 : index
    %c0_1058 = arith.constant 0 : index
    %c0_1059 = arith.constant 0 : index
    %1105 = vector.load %arg11[%c3_1056, %c0_1057, %c0_1058, %c0_1059] : memref<16x1x4x16xf32, #tpu.memory_space<vmem>>, vector<1x1x4x16xf32>
    %1106 = vector.shape_cast %1105 : vector<1x1x4x16xf32> to vector<1x4x16xf32>
    %1107 = vector.shape_cast %1101 : vector<1x4x16xf32> to vector<1x1x4x16xf32>
    tpu.vector_store %arg11[%c3_1056, %c0_1057, %c0_1058, %c0_1059], %1107 {strides = array<i32>} : memref<16x1x4x16xf32, #tpu.memory_space<vmem>>, vector<1x1x4x16xf32>,
    %c0_1060 = arith.constant 0 : index
    %c12_1061 = arith.constant 12 : index
    %c0_1062 = arith.constant 0 : index
    %c0_1063 = arith.constant 0 : index
    %1108 = vector.load %arg4[%c0_1060, %c12_1061, %c0_1062, %c0_1063] : memref<2x16x1x16xf32, #tpu.memory_space<vmem>>, vector<1x1x1x16xf32>
    %1109 = vector.shape_cast %1108 : vector<1x1x1x16xf32> to vector<1x16xf32>
    %1110 = arith.negf %1109 : vector<1x16xf32>
    %1111 = math.exp %1110 : vector<1x16xf32>
    %cst_1064 = arith.constant 1.000000e+00 : f32
    %1112 = vector.broadcast %cst_1064 : f32 to vector<1x16xf32>
    %1113 = arith.addf %1112, %1111 : vector<1x16xf32>
    %1114 = arith.divf %1112, %1113 : vector<1x16xf32>
    %c1_1065 = arith.constant 1 : index
    %c3_1066 = arith.constant 3 : index
    %c0_1067 = arith.constant 0 : index
    %c0_1068 = arith.constant 0 : index
    %1115 = vector.load %arg4[%c1_1065, %c3_1066, %c0_1067, %c0_1068] : memref<2x16x1x16xf32, #tpu.memory_space<vmem>>, vector<1x1x1x16xf32>
    %1116 = vector.shape_cast %1115 : vector<1x1x1x16xf32> to vector<1x16xf32>
    %1117 = arith.negf %1116 : vector<1x16xf32>
    %1118 = math.exp %1117 : vector<1x16xf32>
    %cst_1069 = arith.constant 1.000000e+00 : f32
    %1119 = vector.broadcast %cst_1069 : f32 to vector<1x16xf32>
    %1120 = arith.addf %1119, %1118 : vector<1x16xf32>
    %1121 = arith.divf %1119, %1120 : vector<1x16xf32>
    %1122 = vector.shape_cast %1114 : vector<1x16xf32> to vector<1x1x16xf32>
    %1123 = vector.broadcast %1122 : vector<1x1x16xf32> to vector<1x4x16xf32>
    %1124 = arith.mulf %1123, %1091 : vector<1x4x16xf32>
    %c0_i32_1070 = arith.constant 0 : i32
    %c0_i32_1071 = arith.constant 0 : i32
    %c0_i32_1072 = arith.constant 0 : i32
    %c0_i32_1073 = arith.constant 0 : i32
    %c0_i32_1074 = arith.constant 0 : i32
    %1125 = tpu.memref_slice %arg2[%c0_i32_1070, %c0_i32_1071, %c0_i32_1072, %c0_i32_1073, %c0_i32_1074] : memref<1x16x1x4x16xf32, #tpu.memory_space<vmem>> -> memref<1x16x1x4x16xf32, #tpu.memory_space<vmem>>
    %1126 = tpu.memref_squeeze %1125 : memref<1x16x1x4x16xf32, #tpu.memory_space<vmem>> -> memref<16x1x4x16xf32, #tpu.memory_space<vmem>>
    %c13_1075 = arith.constant 13 : index
    %c0_1076 = arith.constant 0 : index
    %c0_1077 = arith.constant 0 : index
    %c0_1078 = arith.constant 0 : index
    %1127 = vector.load %1126[%c13_1075, %c0_1076, %c0_1077, %c0_1078] : memref<16x1x4x16xf32, #tpu.memory_space<vmem>>, vector<1x1x4x16xf32>
    %1128 = vector.shape_cast %1127 : vector<1x1x4x16xf32> to vector<1x4x16xf32>
    %1129 = arith.addf %1124, %1128 : vector<1x4x16xf32>
    %cst_1079 = arith.constant 0.000000e+00 : f32
    %1130 = vector.broadcast %cst_1079 : f32 to vector<1x4x16xf32>
    %1131 = arith.maximumf %1129, %1130 : vector<1x4x16xf32>
    %1132 = vector.shape_cast %1121 : vector<1x16xf32> to vector<1x1x16xf32>
    %1133 = vector.broadcast %1132 : vector<1x1x16xf32> to vector<1x4x16xf32>
    %1134 = arith.mulf %1133, %1101 : vector<1x4x16xf32>
    %c0_i32_1080 = arith.constant 0 : i32
    %c0_i32_1081 = arith.constant 0 : i32
    %c0_i32_1082 = arith.constant 0 : i32
    %c0_i32_1083 = arith.constant 0 : i32
    %c0_i32_1084 = arith.constant 0 : i32
    %1135 = tpu.memref_slice %arg2[%c0_i32_1080, %c0_i32_1081, %c0_i32_1082, %c0_i32_1083, %c0_i32_1084] : memref<1x16x1x4x16xf32, #tpu.memory_space<vmem>> -> memref<1x16x1x4x16xf32, #tpu.memory_space<vmem>>
    %1136 = tpu.memref_squeeze %1135 : memref<1x16x1x4x16xf32, #tpu.memory_space<vmem>> -> memref<16x1x4x16xf32, #tpu.memory_space<vmem>>
    %c2_1085 = arith.constant 2 : index
    %c0_1086 = arith.constant 0 : index
    %c0_1087 = arith.constant 0 : index
    %c0_1088 = arith.constant 0 : index
    %1137 = vector.load %1136[%c2_1085, %c0_1086, %c0_1087, %c0_1088] : memref<16x1x4x16xf32, #tpu.memory_space<vmem>>, vector<1x1x4x16xf32>
    %1138 = vector.shape_cast %1137 : vector<1x1x4x16xf32> to vector<1x4x16xf32>
    %1139 = arith.addf %1134, %1138 : vector<1x4x16xf32>
    %cst_1089 = arith.constant 0.000000e+00 : f32
    %1140 = vector.broadcast %cst_1089 : f32 to vector<1x4x16xf32>
    %1141 = arith.maximumf %1139, %1140 : vector<1x4x16xf32>
    %c13_1090 = arith.constant 13 : index
    %c0_1091 = arith.constant 0 : index
    %c0_1092 = arith.constant 0 : index
    %c0_1093 = arith.constant 0 : index
    %1142 = vector.load %arg10[%c13_1090, %c0_1091, %c0_1092, %c0_1093] : memref<16x1x4x16xf32, #tpu.memory_space<vmem>>, vector<1x1x4x16xf32>
    %1143 = vector.shape_cast %1142 : vector<1x1x4x16xf32> to vector<1x4x16xf32>
    %1144 = vector.shape_cast %1131 : vector<1x4x16xf32> to vector<1x1x4x16xf32>
    tpu.vector_store %arg10[%c13_1090, %c0_1091, %c0_1092, %c0_1093], %1144 {strides = array<i32>} : memref<16x1x4x16xf32, #tpu.memory_space<vmem>>, vector<1x1x4x16xf32>,
    %c2_1094 = arith.constant 2 : index
    %c0_1095 = arith.constant 0 : index
    %c0_1096 = arith.constant 0 : index
    %c0_1097 = arith.constant 0 : index
    %1145 = vector.load %arg11[%c2_1094, %c0_1095, %c0_1096, %c0_1097] : memref<16x1x4x16xf32, #tpu.memory_space<vmem>>, vector<1x1x4x16xf32>
    %1146 = vector.shape_cast %1145 : vector<1x1x4x16xf32> to vector<1x4x16xf32>
    %1147 = vector.shape_cast %1141 : vector<1x4x16xf32> to vector<1x1x4x16xf32>
    tpu.vector_store %arg11[%c2_1094, %c0_1095, %c0_1096, %c0_1097], %1147 {strides = array<i32>} : memref<16x1x4x16xf32, #tpu.memory_space<vmem>>, vector<1x1x4x16xf32>,
    %c0_1098 = arith.constant 0 : index
    %c13_1099 = arith.constant 13 : index
    %c0_1100 = arith.constant 0 : index
    %c0_1101 = arith.constant 0 : index
    %1148 = vector.load %arg4[%c0_1098, %c13_1099, %c0_1100, %c0_1101] : memref<2x16x1x16xf32, #tpu.memory_space<vmem>>, vector<1x1x1x16xf32>
    %1149 = vector.shape_cast %1148 : vector<1x1x1x16xf32> to vector<1x16xf32>
    %1150 = arith.negf %1149 : vector<1x16xf32>
    %1151 = math.exp %1150 : vector<1x16xf32>
    %cst_1102 = arith.constant 1.000000e+00 : f32
    %1152 = vector.broadcast %cst_1102 : f32 to vector<1x16xf32>
    %1153 = arith.addf %1152, %1151 : vector<1x16xf32>
    %1154 = arith.divf %1152, %1153 : vector<1x16xf32>
    %c1_1103 = arith.constant 1 : index
    %c2_1104 = arith.constant 2 : index
    %c0_1105 = arith.constant 0 : index
    %c0_1106 = arith.constant 0 : index
    %1155 = vector.load %arg4[%c1_1103, %c2_1104, %c0_1105, %c0_1106] : memref<2x16x1x16xf32, #tpu.memory_space<vmem>>, vector<1x1x1x16xf32>
    %1156 = vector.shape_cast %1155 : vector<1x1x1x16xf32> to vector<1x16xf32>
    %1157 = arith.negf %1156 : vector<1x16xf32>
    %1158 = math.exp %1157 : vector<1x16xf32>
    %cst_1107 = arith.constant 1.000000e+00 : f32
    %1159 = vector.broadcast %cst_1107 : f32 to vector<1x16xf32>
    %1160 = arith.addf %1159, %1158 : vector<1x16xf32>
    %1161 = arith.divf %1159, %1160 : vector<1x16xf32>
    %1162 = vector.shape_cast %1154 : vector<1x16xf32> to vector<1x1x16xf32>
    %1163 = vector.broadcast %1162 : vector<1x1x16xf32> to vector<1x4x16xf32>
    %1164 = arith.mulf %1163, %1131 : vector<1x4x16xf32>
    %c0_i32_1108 = arith.constant 0 : i32
    %c0_i32_1109 = arith.constant 0 : i32
    %c0_i32_1110 = arith.constant 0 : i32
    %c0_i32_1111 = arith.constant 0 : i32
    %c0_i32_1112 = arith.constant 0 : i32
    %1165 = tpu.memref_slice %arg2[%c0_i32_1108, %c0_i32_1109, %c0_i32_1110, %c0_i32_1111, %c0_i32_1112] : memref<1x16x1x4x16xf32, #tpu.memory_space<vmem>> -> memref<1x16x1x4x16xf32, #tpu.memory_space<vmem>>
    %1166 = tpu.memref_squeeze %1165 : memref<1x16x1x4x16xf32, #tpu.memory_space<vmem>> -> memref<16x1x4x16xf32, #tpu.memory_space<vmem>>
    %c14_1113 = arith.constant 14 : index
    %c0_1114 = arith.constant 0 : index
    %c0_1115 = arith.constant 0 : index
    %c0_1116 = arith.constant 0 : index
    %1167 = vector.load %1166[%c14_1113, %c0_1114, %c0_1115, %c0_1116] : memref<16x1x4x16xf32, #tpu.memory_space<vmem>>, vector<1x1x4x16xf32>
    %1168 = vector.shape_cast %1167 : vector<1x1x4x16xf32> to vector<1x4x16xf32>
    %1169 = arith.addf %1164, %1168 : vector<1x4x16xf32>
    %cst_1117 = arith.constant 0.000000e+00 : f32
    %1170 = vector.broadcast %cst_1117 : f32 to vector<1x4x16xf32>
    %1171 = arith.maximumf %1169, %1170 : vector<1x4x16xf32>
    %1172 = vector.shape_cast %1161 : vector<1x16xf32> to vector<1x1x16xf32>
    %1173 = vector.broadcast %1172 : vector<1x1x16xf32> to vector<1x4x16xf32>
    %1174 = arith.mulf %1173, %1141 : vector<1x4x16xf32>
    %c0_i32_1118 = arith.constant 0 : i32
    %c0_i32_1119 = arith.constant 0 : i32
    %c0_i32_1120 = arith.constant 0 : i32
    %c0_i32_1121 = arith.constant 0 : i32
    %c0_i32_1122 = arith.constant 0 : i32
    %1175 = tpu.memref_slice %arg2[%c0_i32_1118, %c0_i32_1119, %c0_i32_1120, %c0_i32_1121, %c0_i32_1122] : memref<1x16x1x4x16xf32, #tpu.memory_space<vmem>> -> memref<1x16x1x4x16xf32, #tpu.memory_space<vmem>>
    %1176 = tpu.memref_squeeze %1175 : memref<1x16x1x4x16xf32, #tpu.memory_space<vmem>> -> memref<16x1x4x16xf32, #tpu.memory_space<vmem>>
    %c1_1123 = arith.constant 1 : index
    %c0_1124 = arith.constant 0 : index
    %c0_1125 = arith.constant 0 : index
    %c0_1126 = arith.constant 0 : index
    %1177 = vector.load %1176[%c1_1123, %c0_1124, %c0_1125, %c0_1126] : memref<16x1x4x16xf32, #tpu.memory_space<vmem>>, vector<1x1x4x16xf32>
    %1178 = vector.shape_cast %1177 : vector<1x1x4x16xf32> to vector<1x4x16xf32>
    %1179 = arith.addf %1174, %1178 : vector<1x4x16xf32>
    %cst_1127 = arith.constant 0.000000e+00 : f32
    %1180 = vector.broadcast %cst_1127 : f32 to vector<1x4x16xf32>
    %1181 = arith.maximumf %1179, %1180 : vector<1x4x16xf32>
    %c14_1128 = arith.constant 14 : index
    %c0_1129 = arith.constant 0 : index
    %c0_1130 = arith.constant 0 : index
    %c0_1131 = arith.constant 0 : index
    %1182 = vector.load %arg10[%c14_1128, %c0_1129, %c0_1130, %c0_1131] : memref<16x1x4x16xf32, #tpu.memory_space<vmem>>, vector<1x1x4x16xf32>
    %1183 = vector.shape_cast %1182 : vector<1x1x4x16xf32> to vector<1x4x16xf32>
    %1184 = vector.shape_cast %1171 : vector<1x4x16xf32> to vector<1x1x4x16xf32>
    tpu.vector_store %arg10[%c14_1128, %c0_1129, %c0_1130, %c0_1131], %1184 {strides = array<i32>} : memref<16x1x4x16xf32, #tpu.memory_space<vmem>>, vector<1x1x4x16xf32>,
    %c1_1132 = arith.constant 1 : index
    %c0_1133 = arith.constant 0 : index
    %c0_1134 = arith.constant 0 : index
    %c0_1135 = arith.constant 0 : index
    %1185 = vector.load %arg11[%c1_1132, %c0_1133, %c0_1134, %c0_1135] : memref<16x1x4x16xf32, #tpu.memory_space<vmem>>, vector<1x1x4x16xf32>
    %1186 = vector.shape_cast %1185 : vector<1x1x4x16xf32> to vector<1x4x16xf32>
    %1187 = vector.shape_cast %1181 : vector<1x4x16xf32> to vector<1x1x4x16xf32>
    tpu.vector_store %arg11[%c1_1132, %c0_1133, %c0_1134, %c0_1135], %1187 {strides = array<i32>} : memref<16x1x4x16xf32, #tpu.memory_space<vmem>>, vector<1x1x4x16xf32>,
    %c0_1136 = arith.constant 0 : index
    %c14_1137 = arith.constant 14 : index
    %c0_1138 = arith.constant 0 : index
    %c0_1139 = arith.constant 0 : index
    %1188 = vector.load %arg4[%c0_1136, %c14_1137, %c0_1138, %c0_1139] : memref<2x16x1x16xf32, #tpu.memory_space<vmem>>, vector<1x1x1x16xf32>
    %1189 = vector.shape_cast %1188 : vector<1x1x1x16xf32> to vector<1x16xf32>
    %1190 = arith.negf %1189 : vector<1x16xf32>
    %1191 = math.exp %1190 : vector<1x16xf32>
    %cst_1140 = arith.constant 1.000000e+00 : f32
    %1192 = vector.broadcast %cst_1140 : f32 to vector<1x16xf32>
    %1193 = arith.addf %1192, %1191 : vector<1x16xf32>
    %1194 = arith.divf %1192, %1193 : vector<1x16xf32>
    %c1_1141 = arith.constant 1 : index
    %c1_1142 = arith.constant 1 : index
    %c0_1143 = arith.constant 0 : index
    %c0_1144 = arith.constant 0 : index
    %1195 = vector.load %arg4[%c1_1141, %c1_1142, %c0_1143, %c0_1144] : memref<2x16x1x16xf32, #tpu.memory_space<vmem>>, vector<1x1x1x16xf32>
    %1196 = vector.shape_cast %1195 : vector<1x1x1x16xf32> to vector<1x16xf32>
    %1197 = arith.negf %1196 : vector<1x16xf32>
    %1198 = math.exp %1197 : vector<1x16xf32>
    %cst_1145 = arith.constant 1.000000e+00 : f32
    %1199 = vector.broadcast %cst_1145 : f32 to vector<1x16xf32>
    %1200 = arith.addf %1199, %1198 : vector<1x16xf32>
    %1201 = arith.divf %1199, %1200 : vector<1x16xf32>
    %1202 = vector.shape_cast %1194 : vector<1x16xf32> to vector<1x1x16xf32>
    %1203 = vector.broadcast %1202 : vector<1x1x16xf32> to vector<1x4x16xf32>
    %1204 = arith.mulf %1203, %1171 : vector<1x4x16xf32>
    %c0_i32_1146 = arith.constant 0 : i32
    %c0_i32_1147 = arith.constant 0 : i32
    %c0_i32_1148 = arith.constant 0 : i32
    %c0_i32_1149 = arith.constant 0 : i32
    %c0_i32_1150 = arith.constant 0 : i32
    %1205 = tpu.memref_slice %arg2[%c0_i32_1146, %c0_i32_1147, %c0_i32_1148, %c0_i32_1149, %c0_i32_1150] : memref<1x16x1x4x16xf32, #tpu.memory_space<vmem>> -> memref<1x16x1x4x16xf32, #tpu.memory_space<vmem>>
    %1206 = tpu.memref_squeeze %1205 : memref<1x16x1x4x16xf32, #tpu.memory_space<vmem>> -> memref<16x1x4x16xf32, #tpu.memory_space<vmem>>
    %c15_1151 = arith.constant 15 : index
    %c0_1152 = arith.constant 0 : index
    %c0_1153 = arith.constant 0 : index
    %c0_1154 = arith.constant 0 : index
    %1207 = vector.load %1206[%c15_1151, %c0_1152, %c0_1153, %c0_1154] : memref<16x1x4x16xf32, #tpu.memory_space<vmem>>, vector<1x1x4x16xf32>
    %1208 = vector.shape_cast %1207 : vector<1x1x4x16xf32> to vector<1x4x16xf32>
    %1209 = arith.addf %1204, %1208 : vector<1x4x16xf32>
    %cst_1155 = arith.constant 0.000000e+00 : f32
    %1210 = vector.broadcast %cst_1155 : f32 to vector<1x4x16xf32>
    %1211 = arith.maximumf %1209, %1210 : vector<1x4x16xf32>
    %1212 = vector.shape_cast %1201 : vector<1x16xf32> to vector<1x1x16xf32>
    %1213 = vector.broadcast %1212 : vector<1x1x16xf32> to vector<1x4x16xf32>
    %1214 = arith.mulf %1213, %1181 : vector<1x4x16xf32>
    %c0_i32_1156 = arith.constant 0 : i32
    %c0_i32_1157 = arith.constant 0 : i32
    %c0_i32_1158 = arith.constant 0 : i32
    %c0_i32_1159 = arith.constant 0 : i32
    %c0_i32_1160 = arith.constant 0 : i32
    %1215 = tpu.memref_slice %arg2[%c0_i32_1156, %c0_i32_1157, %c0_i32_1158, %c0_i32_1159, %c0_i32_1160] : memref<1x16x1x4x16xf32, #tpu.memory_space<vmem>> -> memref<1x16x1x4x16xf32, #tpu.memory_space<vmem>>
    %1216 = tpu.memref_squeeze %1215 : memref<1x16x1x4x16xf32, #tpu.memory_space<vmem>> -> memref<16x1x4x16xf32, #tpu.memory_space<vmem>>
    %c0_1161 = arith.constant 0 : index
    %c0_1162 = arith.constant 0 : index
    %c0_1163 = arith.constant 0 : index
    %c0_1164 = arith.constant 0 : index
    %1217 = vector.load %1216[%c0_1161, %c0_1162, %c0_1163, %c0_1164] : memref<16x1x4x16xf32, #tpu.memory_space<vmem>>, vector<1x1x4x16xf32>
    %1218 = vector.shape_cast %1217 : vector<1x1x4x16xf32> to vector<1x4x16xf32>
    %1219 = arith.addf %1214, %1218 : vector<1x4x16xf32>
    %cst_1165 = arith.constant 0.000000e+00 : f32
    %1220 = vector.broadcast %cst_1165 : f32 to vector<1x4x16xf32>
    %1221 = arith.maximumf %1219, %1220 : vector<1x4x16xf32>
    %c15_1166 = arith.constant 15 : index
    %c0_1167 = arith.constant 0 : index
    %c0_1168 = arith.constant 0 : index
    %c0_1169 = arith.constant 0 : index
    %1222 = vector.load %arg10[%c15_1166, %c0_1167, %c0_1168, %c0_1169] : memref<16x1x4x16xf32, #tpu.memory_space<vmem>>, vector<1x1x4x16xf32>
    %1223 = vector.shape_cast %1222 : vector<1x1x4x16xf32> to vector<1x4x16xf32>
    %1224 = vector.shape_cast %1211 : vector<1x4x16xf32> to vector<1x1x4x16xf32>
    tpu.vector_store %arg10[%c15_1166, %c0_1167, %c0_1168, %c0_1169], %1224 {strides = array<i32>} : memref<16x1x4x16xf32, #tpu.memory_space<vmem>>, vector<1x1x4x16xf32>,
    %c0_1170 = arith.constant 0 : index
    %c0_1171 = arith.constant 0 : index
    %c0_1172 = arith.constant 0 : index
    %c0_1173 = arith.constant 0 : index
    %1225 = vector.load %arg11[%c0_1170, %c0_1171, %c0_1172, %c0_1173] : memref<16x1x4x16xf32, #tpu.memory_space<vmem>>, vector<1x1x4x16xf32>
    %1226 = vector.shape_cast %1225 : vector<1x1x4x16xf32> to vector<1x4x16xf32>
    %1227 = vector.shape_cast %1221 : vector<1x4x16xf32> to vector<1x1x4x16xf32>
    tpu.vector_store %arg11[%c0_1170, %c0_1171, %c0_1172, %c0_1173], %1227 {strides = array<i32>} : memref<16x1x4x16xf32, #tpu.memory_space<vmem>>, vector<1x1x4x16xf32>,
    %c0_1174 = arith.constant 0 : index
    %c0_1175 = arith.constant 0 : index
    %c0_1176 = arith.constant 0 : index
    %c0_1177 = arith.constant 0 : index
    %1228 = vector.load %arg5[%c0_1174, %c0_1175, %c0_1176, %c0_1177] : memref<4x4x4x1xf32, #tpu.memory_space<vmem>>, vector<1x1x4x1xf32>
    %1229 = vector.shape_cast %1228 : vector<1x1x4x1xf32> to vector<4x1xf32>
    %c1_1178 = arith.constant 1 : index
    %c0_1179 = arith.constant 0 : index
    %c0_1180 = arith.constant 0 : index
    %c0_1181 = arith.constant 0 : index
    %1230 = vector.load %arg5[%c1_1178, %c0_1179, %c0_1180, %c0_1181] : memref<4x4x4x1xf32, #tpu.memory_space<vmem>>, vector<1x1x4x1xf32>
    %1231 = vector.shape_cast %1230 : vector<1x1x4x1xf32> to vector<4x1xf32>
    %c2_1182 = arith.constant 2 : index
    %c0_1183 = arith.constant 0 : index
    %c0_1184 = arith.constant 0 : index
    %c0_1185 = arith.constant 0 : index
    %1232 = vector.load %arg5[%c2_1182, %c0_1183, %c0_1184, %c0_1185] : memref<4x4x4x1xf32, #tpu.memory_space<vmem>>, vector<1x1x4x1xf32>
    %1233 = vector.shape_cast %1232 : vector<1x1x4x1xf32> to vector<4x1xf32>
    %c3_1186 = arith.constant 3 : index
    %c0_1187 = arith.constant 0 : index
    %c0_1188 = arith.constant 0 : index
    %c0_1189 = arith.constant 0 : index
    %1234 = vector.load %arg5[%c3_1186, %c0_1187, %c0_1188, %c0_1189] : memref<4x4x4x1xf32, #tpu.memory_space<vmem>>, vector<1x1x4x1xf32>
    %1235 = vector.shape_cast %1234 : vector<1x1x4x1xf32> to vector<4x1xf32>
    %c0_1190 = arith.constant 0 : index
    %1236 = memref.load %arg6[%c0_1190] : memref<4xf32, #tpu.memory_space<smem>>
    %c0_1191 = arith.constant 0 : index
    %c0_1192 = arith.constant 0 : index
    %c0_1193 = arith.constant 0 : index
    %c0_1194 = arith.constant 0 : index
    %1237 = vector.load %arg8[%c0_1191, %c0_1192, %c0_1193, %c0_1194] : memref<16x1x4x16xf32, #tpu.memory_space<vmem>>, vector<16x1x4x16xf32>
    %1238 = vector.shape_cast %1237 : vector<16x1x4x16xf32> to vector<16x4x16xf32>
    %1239 = vector.shape_cast %1233 : vector<4x1xf32> to vector<1x4x1xf32>
    %1240 = vector.broadcast %1239 : vector<1x4x1xf32> to vector<16x4x16xf32>
    %1241 = arith.mulf %1238, %1240 : vector<16x4x16xf32>
    %c0_1195 = arith.constant 0 : index
    %c0_1196 = arith.constant 0 : index
    %c0_1197 = arith.constant 0 : index
    %c0_1198 = arith.constant 0 : index
    %1242 = vector.load %arg9[%c0_1195, %c0_1196, %c0_1197, %c0_1198] : memref<16x1x4x16xf32, #tpu.memory_space<vmem>>, vector<16x1x4x16xf32>
    %1243 = vector.shape_cast %1242 : vector<16x1x4x16xf32> to vector<16x4x16xf32>
    %1244 = vector.shape_cast %1235 : vector<4x1xf32> to vector<1x4x1xf32>
    %1245 = vector.broadcast %1244 : vector<1x4x1xf32> to vector<16x4x16xf32>
    %1246 = arith.mulf %1243, %1245 : vector<16x4x16xf32>
    %1247 = arith.addf %1241, %1246 : vector<16x4x16xf32>
    %cst_1199 = arith.constant dense<0.000000e+00> : vector<16x16xf32>
    %1248 = vector.multi_reduction <add>, %1247, %cst_1199 [1] : vector<16x4x16xf32> to vector<16x16xf32>
    %c0_1200 = arith.constant 0 : index
    %c0_1201 = arith.constant 0 : index
    %c0_1202 = arith.constant 0 : index
    %c0_1203 = arith.constant 0 : index
    %1249 = vector.load %arg10[%c0_1200, %c0_1201, %c0_1202, %c0_1203] : memref<16x1x4x16xf32, #tpu.memory_space<vmem>>, vector<16x1x4x16xf32>
    %1250 = vector.shape_cast %1249 : vector<16x1x4x16xf32> to vector<16x4x16xf32>
    %1251 = vector.shape_cast %1229 : vector<4x1xf32> to vector<1x4x1xf32>
    %1252 = vector.broadcast %1251 : vector<1x4x1xf32> to vector<16x4x16xf32>
    %1253 = arith.mulf %1250, %1252 : vector<16x4x16xf32>
    %c0_1204 = arith.constant 0 : index
    %c0_1205 = arith.constant 0 : index
    %c0_1206 = arith.constant 0 : index
    %c0_1207 = arith.constant 0 : index
    %1254 = vector.load %arg11[%c0_1204, %c0_1205, %c0_1206, %c0_1207] : memref<16x1x4x16xf32, #tpu.memory_space<vmem>>, vector<16x1x4x16xf32>
    %1255 = vector.shape_cast %1254 : vector<16x1x4x16xf32> to vector<16x4x16xf32>
    %1256 = vector.shape_cast %1231 : vector<4x1xf32> to vector<1x4x1xf32>
    %1257 = vector.broadcast %1256 : vector<1x4x1xf32> to vector<16x4x16xf32>
    %1258 = arith.mulf %1255, %1257 : vector<16x4x16xf32>
    %1259 = arith.addf %1253, %1258 : vector<16x4x16xf32>
    %cst_1208 = arith.constant dense<0.000000e+00> : vector<16x16xf32>
    %1260 = vector.multi_reduction <add>, %1259, %cst_1208 [1] : vector<16x4x16xf32> to vector<16x16xf32>
    %1261 = tpu.transpose %1260, [1, 0] : vector<16x16xf32> -> vector<16x16xf32>
    %1262 = arith.addf %1248, %1261 : vector<16x16xf32>
    %1263 = vector.broadcast %1236 : f32 to vector<16x16xf32>
    %1264 = arith.addf %1262, %1263 : vector<16x16xf32>
    %cst_1209 = arith.constant 0.000000e+00 : f32
    %1265 = vector.broadcast %cst_1209 : f32 to vector<16x16xf32>
    %1266 = arith.maximumf %1264, %1265 : vector<16x16xf32>
    %c0_1210 = arith.constant 0 : index
    %c0_1211 = arith.constant 0 : index
    %c0_1212 = arith.constant 0 : index
    %c0_1213 = arith.constant 0 : index
    %c0_1214 = arith.constant 0 : index
    %1267 = vector.load %arg7[%c0_1210, %c0_1211, %c0_1212, %c0_1213, %c0_1214] : memref<1x4x1x16x16xf32, #tpu.memory_space<vmem>>, vector<1x1x1x16x16xf32>
    %1268 = vector.shape_cast %1267 : vector<1x1x1x16x16xf32> to vector<16x16xf32>
    %1269 = vector.shape_cast %1266 : vector<16x16xf32> to vector<1x1x1x16x16xf32>
    tpu.vector_store %arg7[%c0_1210, %c0_1211, %c0_1212, %c0_1213, %c0_1214], %1269 {strides = array<i32>} : memref<1x4x1x16x16xf32, #tpu.memory_space<vmem>>, vector<1x1x1x16x16xf32>,
    %c0_1215 = arith.constant 0 : index
    %c1_1216 = arith.constant 1 : index
    %c0_1217 = arith.constant 0 : index
    %c0_1218 = arith.constant 0 : index
    %1270 = vector.load %arg5[%c0_1215, %c1_1216, %c0_1217, %c0_1218] : memref<4x4x4x1xf32, #tpu.memory_space<vmem>>, vector<1x1x4x1xf32>
    %1271 = vector.shape_cast %1270 : vector<1x1x4x1xf32> to vector<4x1xf32>
    %c1_1219 = arith.constant 1 : index
    %c1_1220 = arith.constant 1 : index
    %c0_1221 = arith.constant 0 : index
    %c0_1222 = arith.constant 0 : index
    %1272 = vector.load %arg5[%c1_1219, %c1_1220, %c0_1221, %c0_1222] : memref<4x4x4x1xf32, #tpu.memory_space<vmem>>, vector<1x1x4x1xf32>
    %1273 = vector.shape_cast %1272 : vector<1x1x4x1xf32> to vector<4x1xf32>
    %c2_1223 = arith.constant 2 : index
    %c1_1224 = arith.constant 1 : index
    %c0_1225 = arith.constant 0 : index
    %c0_1226 = arith.constant 0 : index
    %1274 = vector.load %arg5[%c2_1223, %c1_1224, %c0_1225, %c0_1226] : memref<4x4x4x1xf32, #tpu.memory_space<vmem>>, vector<1x1x4x1xf32>
    %1275 = vector.shape_cast %1274 : vector<1x1x4x1xf32> to vector<4x1xf32>
    %c3_1227 = arith.constant 3 : index
    %c1_1228 = arith.constant 1 : index
    %c0_1229 = arith.constant 0 : index
    %c0_1230 = arith.constant 0 : index
    %1276 = vector.load %arg5[%c3_1227, %c1_1228, %c0_1229, %c0_1230] : memref<4x4x4x1xf32, #tpu.memory_space<vmem>>, vector<1x1x4x1xf32>
    %1277 = vector.shape_cast %1276 : vector<1x1x4x1xf32> to vector<4x1xf32>
    %c1_1231 = arith.constant 1 : index
    %1278 = memref.load %arg6[%c1_1231] : memref<4xf32, #tpu.memory_space<smem>>
    %c0_1232 = arith.constant 0 : index
    %c0_1233 = arith.constant 0 : index
    %c0_1234 = arith.constant 0 : index
    %c0_1235 = arith.constant 0 : index
    %1279 = vector.load %arg8[%c0_1232, %c0_1233, %c0_1234, %c0_1235] : memref<16x1x4x16xf32, #tpu.memory_space<vmem>>, vector<16x1x4x16xf32>
    %1280 = vector.shape_cast %1279 : vector<16x1x4x16xf32> to vector<16x4x16xf32>
    %1281 = vector.shape_cast %1275 : vector<4x1xf32> to vector<1x4x1xf32>
    %1282 = vector.broadcast %1281 : vector<1x4x1xf32> to vector<16x4x16xf32>
    %1283 = arith.mulf %1280, %1282 : vector<16x4x16xf32>
    %c0_1236 = arith.constant 0 : index
    %c0_1237 = arith.constant 0 : index
    %c0_1238 = arith.constant 0 : index
    %c0_1239 = arith.constant 0 : index
    %1284 = vector.load %arg9[%c0_1236, %c0_1237, %c0_1238, %c0_1239] : memref<16x1x4x16xf32, #tpu.memory_space<vmem>>, vector<16x1x4x16xf32>
    %1285 = vector.shape_cast %1284 : vector<16x1x4x16xf32> to vector<16x4x16xf32>
    %1286 = vector.shape_cast %1277 : vector<4x1xf32> to vector<1x4x1xf32>
    %1287 = vector.broadcast %1286 : vector<1x4x1xf32> to vector<16x4x16xf32>
    %1288 = arith.mulf %1285, %1287 : vector<16x4x16xf32>
    %1289 = arith.addf %1283, %1288 : vector<16x4x16xf32>
    %cst_1240 = arith.constant dense<0.000000e+00> : vector<16x16xf32>
    %1290 = vector.multi_reduction <add>, %1289, %cst_1240 [1] : vector<16x4x16xf32> to vector<16x16xf32>
    %c0_1241 = arith.constant 0 : index
    %c0_1242 = arith.constant 0 : index
    %c0_1243 = arith.constant 0 : index
    %c0_1244 = arith.constant 0 : index
    %1291 = vector.load %arg10[%c0_1241, %c0_1242, %c0_1243, %c0_1244] : memref<16x1x4x16xf32, #tpu.memory_space<vmem>>, vector<16x1x4x16xf32>
    %1292 = vector.shape_cast %1291 : vector<16x1x4x16xf32> to vector<16x4x16xf32>
    %1293 = vector.shape_cast %1271 : vector<4x1xf32> to vector<1x4x1xf32>
    %1294 = vector.broadcast %1293 : vector<1x4x1xf32> to vector<16x4x16xf32>
    %1295 = arith.mulf %1292, %1294 : vector<16x4x16xf32>
    %c0_1245 = arith.constant 0 : index
    %c0_1246 = arith.constant 0 : index
    %c0_1247 = arith.constant 0 : index
    %c0_1248 = arith.constant 0 : index
    %1296 = vector.load %arg11[%c0_1245, %c0_1246, %c0_1247, %c0_1248] : memref<16x1x4x16xf32, #tpu.memory_space<vmem>>, vector<16x1x4x16xf32>
    %1297 = vector.shape_cast %1296 : vector<16x1x4x16xf32> to vector<16x4x16xf32>
    %1298 = vector.shape_cast %1273 : vector<4x1xf32> to vector<1x4x1xf32>
    %1299 = vector.broadcast %1298 : vector<1x4x1xf32> to vector<16x4x16xf32>
    %1300 = arith.mulf %1297, %1299 : vector<16x4x16xf32>
    %1301 = arith.addf %1295, %1300 : vector<16x4x16xf32>
    %cst_1249 = arith.constant dense<0.000000e+00> : vector<16x16xf32>
    %1302 = vector.multi_reduction <add>, %1301, %cst_1249 [1] : vector<16x4x16xf32> to vector<16x16xf32>
    %1303 = tpu.transpose %1302, [1, 0] : vector<16x16xf32> -> vector<16x16xf32>
    %1304 = arith.addf %1290, %1303 : vector<16x16xf32>
    %1305 = vector.broadcast %1278 : f32 to vector<16x16xf32>
    %1306 = arith.addf %1304, %1305 : vector<16x16xf32>
    %cst_1250 = arith.constant 0.000000e+00 : f32
    %1307 = vector.broadcast %cst_1250 : f32 to vector<16x16xf32>
    %1308 = arith.maximumf %1306, %1307 : vector<16x16xf32>
    %c0_1251 = arith.constant 0 : index
    %c1_1252 = arith.constant 1 : index
    %c0_1253 = arith.constant 0 : index
    %c0_1254 = arith.constant 0 : index
    %c0_1255 = arith.constant 0 : index
    %1309 = vector.load %arg7[%c0_1251, %c1_1252, %c0_1253, %c0_1254, %c0_1255] : memref<1x4x1x16x16xf32, #tpu.memory_space<vmem>>, vector<1x1x1x16x16xf32>
    %1310 = vector.shape_cast %1309 : vector<1x1x1x16x16xf32> to vector<16x16xf32>
    %1311 = vector.shape_cast %1308 : vector<16x16xf32> to vector<1x1x1x16x16xf32>
    tpu.vector_store %arg7[%c0_1251, %c1_1252, %c0_1253, %c0_1254, %c0_1255], %1311 {strides = array<i32>} : memref<1x4x1x16x16xf32, #tpu.memory_space<vmem>>, vector<1x1x1x16x16xf32>,
    %c0_1256 = arith.constant 0 : index
    %c2_1257 = arith.constant 2 : index
    %c0_1258 = arith.constant 0 : index
    %c0_1259 = arith.constant 0 : index
    %1312 = vector.load %arg5[%c0_1256, %c2_1257, %c0_1258, %c0_1259] : memref<4x4x4x1xf32, #tpu.memory_space<vmem>>, vector<1x1x4x1xf32>
    %1313 = vector.shape_cast %1312 : vector<1x1x4x1xf32> to vector<4x1xf32>
    %c1_1260 = arith.constant 1 : index
    %c2_1261 = arith.constant 2 : index
    %c0_1262 = arith.constant 0 : index
    %c0_1263 = arith.constant 0 : index
    %1314 = vector.load %arg5[%c1_1260, %c2_1261, %c0_1262, %c0_1263] : memref<4x4x4x1xf32, #tpu.memory_space<vmem>>, vector<1x1x4x1xf32>
    %1315 = vector.shape_cast %1314 : vector<1x1x4x1xf32> to vector<4x1xf32>
    %c2_1264 = arith.constant 2 : index
    %c2_1265 = arith.constant 2 : index
    %c0_1266 = arith.constant 0 : index
    %c0_1267 = arith.constant 0 : index
    %1316 = vector.load %arg5[%c2_1264, %c2_1265, %c0_1266, %c0_1267] : memref<4x4x4x1xf32, #tpu.memory_space<vmem>>, vector<1x1x4x1xf32>
    %1317 = vector.shape_cast %1316 : vector<1x1x4x1xf32> to vector<4x1xf32>
    %c3_1268 = arith.constant 3 : index
    %c2_1269 = arith.constant 2 : index
    %c0_1270 = arith.constant 0 : index
    %c0_1271 = arith.constant 0 : index
    %1318 = vector.load %arg5[%c3_1268, %c2_1269, %c0_1270, %c0_1271] : memref<4x4x4x1xf32, #tpu.memory_space<vmem>>, vector<1x1x4x1xf32>
    %1319 = vector.shape_cast %1318 : vector<1x1x4x1xf32> to vector<4x1xf32>
    %c2_1272 = arith.constant 2 : index
    %1320 = memref.load %arg6[%c2_1272] : memref<4xf32, #tpu.memory_space<smem>>
    %c0_1273 = arith.constant 0 : index
    %c0_1274 = arith.constant 0 : index
    %c0_1275 = arith.constant 0 : index
    %c0_1276 = arith.constant 0 : index
    %1321 = vector.load %arg8[%c0_1273, %c0_1274, %c0_1275, %c0_1276] : memref<16x1x4x16xf32, #tpu.memory_space<vmem>>, vector<16x1x4x16xf32>
    %1322 = vector.shape_cast %1321 : vector<16x1x4x16xf32> to vector<16x4x16xf32>
    %1323 = vector.shape_cast %1317 : vector<4x1xf32> to vector<1x4x1xf32>
    %1324 = vector.broadcast %1323 : vector<1x4x1xf32> to vector<16x4x16xf32>
    %1325 = arith.mulf %1322, %1324 : vector<16x4x16xf32>
    %c0_1277 = arith.constant 0 : index
    %c0_1278 = arith.constant 0 : index
    %c0_1279 = arith.constant 0 : index
    %c0_1280 = arith.constant 0 : index
    %1326 = vector.load %arg9[%c0_1277, %c0_1278, %c0_1279, %c0_1280] : memref<16x1x4x16xf32, #tpu.memory_space<vmem>>, vector<16x1x4x16xf32>
    %1327 = vector.shape_cast %1326 : vector<16x1x4x16xf32> to vector<16x4x16xf32>
    %1328 = vector.shape_cast %1319 : vector<4x1xf32> to vector<1x4x1xf32>
    %1329 = vector.broadcast %1328 : vector<1x4x1xf32> to vector<16x4x16xf32>
    %1330 = arith.mulf %1327, %1329 : vector<16x4x16xf32>
    %1331 = arith.addf %1325, %1330 : vector<16x4x16xf32>
    %cst_1281 = arith.constant dense<0.000000e+00> : vector<16x16xf32>
    %1332 = vector.multi_reduction <add>, %1331, %cst_1281 [1] : vector<16x4x16xf32> to vector<16x16xf32>
    %c0_1282 = arith.constant 0 : index
    %c0_1283 = arith.constant 0 : index
    %c0_1284 = arith.constant 0 : index
    %c0_1285 = arith.constant 0 : index
    %1333 = vector.load %arg10[%c0_1282, %c0_1283, %c0_1284, %c0_1285] : memref<16x1x4x16xf32, #tpu.memory_space<vmem>>, vector<16x1x4x16xf32>
    %1334 = vector.shape_cast %1333 : vector<16x1x4x16xf32> to vector<16x4x16xf32>
    %1335 = vector.shape_cast %1313 : vector<4x1xf32> to vector<1x4x1xf32>
    %1336 = vector.broadcast %1335 : vector<1x4x1xf32> to vector<16x4x16xf32>
    %1337 = arith.mulf %1334, %1336 : vector<16x4x16xf32>
    %c0_1286 = arith.constant 0 : index
    %c0_1287 = arith.constant 0 : index
    %c0_1288 = arith.constant 0 : index
    %c0_1289 = arith.constant 0 : index
    %1338 = vector.load %arg11[%c0_1286, %c0_1287, %c0_1288, %c0_1289] : memref<16x1x4x16xf32, #tpu.memory_space<vmem>>, vector<16x1x4x16xf32>
    %1339 = vector.shape_cast %1338 : vector<16x1x4x16xf32> to vector<16x4x16xf32>
    %1340 = vector.shape_cast %1315 : vector<4x1xf32> to vector<1x4x1xf32>
    %1341 = vector.broadcast %1340 : vector<1x4x1xf32> to vector<16x4x16xf32>
    %1342 = arith.mulf %1339, %1341 : vector<16x4x16xf32>
    %1343 = arith.addf %1337, %1342 : vector<16x4x16xf32>
    %cst_1290 = arith.constant dense<0.000000e+00> : vector<16x16xf32>
    %1344 = vector.multi_reduction <add>, %1343, %cst_1290 [1] : vector<16x4x16xf32> to vector<16x16xf32>
    %1345 = tpu.transpose %1344, [1, 0] : vector<16x16xf32> -> vector<16x16xf32>
    %1346 = arith.addf %1332, %1345 : vector<16x16xf32>
    %1347 = vector.broadcast %1320 : f32 to vector<16x16xf32>
    %1348 = arith.addf %1346, %1347 : vector<16x16xf32>
    %cst_1291 = arith.constant 0.000000e+00 : f32
    %1349 = vector.broadcast %cst_1291 : f32 to vector<16x16xf32>
    %1350 = arith.maximumf %1348, %1349 : vector<16x16xf32>
    %c0_1292 = arith.constant 0 : index
    %c2_1293 = arith.constant 2 : index
    %c0_1294 = arith.constant 0 : index
    %c0_1295 = arith.constant 0 : index
    %c0_1296 = arith.constant 0 : index
    %1351 = vector.load %arg7[%c0_1292, %c2_1293, %c0_1294, %c0_1295, %c0_1296] : memref<1x4x1x16x16xf32, #tpu.memory_space<vmem>>, vector<1x1x1x16x16xf32>
    %1352 = vector.shape_cast %1351 : vector<1x1x1x16x16xf32> to vector<16x16xf32>
    %1353 = vector.shape_cast %1350 : vector<16x16xf32> to vector<1x1x1x16x16xf32>
    tpu.vector_store %arg7[%c0_1292, %c2_1293, %c0_1294, %c0_1295, %c0_1296], %1353 {strides = array<i32>} : memref<1x4x1x16x16xf32, #tpu.memory_space<vmem>>, vector<1x1x1x16x16xf32>,
    %c0_1297 = arith.constant 0 : index
    %c3_1298 = arith.constant 3 : index
    %c0_1299 = arith.constant 0 : index
    %c0_1300 = arith.constant 0 : index
    %1354 = vector.load %arg5[%c0_1297, %c3_1298, %c0_1299, %c0_1300] : memref<4x4x4x1xf32, #tpu.memory_space<vmem>>, vector<1x1x4x1xf32>
    %1355 = vector.shape_cast %1354 : vector<1x1x4x1xf32> to vector<4x1xf32>
    %c1_1301 = arith.constant 1 : index
    %c3_1302 = arith.constant 3 : index
    %c0_1303 = arith.constant 0 : index
    %c0_1304 = arith.constant 0 : index
    %1356 = vector.load %arg5[%c1_1301, %c3_1302, %c0_1303, %c0_1304] : memref<4x4x4x1xf32, #tpu.memory_space<vmem>>, vector<1x1x4x1xf32>
    %1357 = vector.shape_cast %1356 : vector<1x1x4x1xf32> to vector<4x1xf32>
    %c2_1305 = arith.constant 2 : index
    %c3_1306 = arith.constant 3 : index
    %c0_1307 = arith.constant 0 : index
    %c0_1308 = arith.constant 0 : index
    %1358 = vector.load %arg5[%c2_1305, %c3_1306, %c0_1307, %c0_1308] : memref<4x4x4x1xf32, #tpu.memory_space<vmem>>, vector<1x1x4x1xf32>
    %1359 = vector.shape_cast %1358 : vector<1x1x4x1xf32> to vector<4x1xf32>
    %c3_1309 = arith.constant 3 : index
    %c3_1310 = arith.constant 3 : index
    %c0_1311 = arith.constant 0 : index
    %c0_1312 = arith.constant 0 : index
    %1360 = vector.load %arg5[%c3_1309, %c3_1310, %c0_1311, %c0_1312] : memref<4x4x4x1xf32, #tpu.memory_space<vmem>>, vector<1x1x4x1xf32>
    %1361 = vector.shape_cast %1360 : vector<1x1x4x1xf32> to vector<4x1xf32>
    %c3_1313 = arith.constant 3 : index
    %1362 = memref.load %arg6[%c3_1313] : memref<4xf32, #tpu.memory_space<smem>>
    %c0_1314 = arith.constant 0 : index
    %c0_1315 = arith.constant 0 : index
    %c0_1316 = arith.constant 0 : index
    %c0_1317 = arith.constant 0 : index
    %1363 = vector.load %arg8[%c0_1314, %c0_1315, %c0_1316, %c0_1317] : memref<16x1x4x16xf32, #tpu.memory_space<vmem>>, vector<16x1x4x16xf32>
    %1364 = vector.shape_cast %1363 : vector<16x1x4x16xf32> to vector<16x4x16xf32>
    %1365 = vector.shape_cast %1359 : vector<4x1xf32> to vector<1x4x1xf32>
    %1366 = vector.broadcast %1365 : vector<1x4x1xf32> to vector<16x4x16xf32>
    %1367 = arith.mulf %1364, %1366 : vector<16x4x16xf32>
    %c0_1318 = arith.constant 0 : index
    %c0_1319 = arith.constant 0 : index
    %c0_1320 = arith.constant 0 : index
    %c0_1321 = arith.constant 0 : index
    %1368 = vector.load %arg9[%c0_1318, %c0_1319, %c0_1320, %c0_1321] : memref<16x1x4x16xf32, #tpu.memory_space<vmem>>, vector<16x1x4x16xf32>
    %1369 = vector.shape_cast %1368 : vector<16x1x4x16xf32> to vector<16x4x16xf32>
    %1370 = vector.shape_cast %1361 : vector<4x1xf32> to vector<1x4x1xf32>
    %1371 = vector.broadcast %1370 : vector<1x4x1xf32> to vector<16x4x16xf32>
    %1372 = arith.mulf %1369, %1371 : vector<16x4x16xf32>
    %1373 = arith.addf %1367, %1372 : vector<16x4x16xf32>
    %cst_1322 = arith.constant dense<0.000000e+00> : vector<16x16xf32>
    %1374 = vector.multi_reduction <add>, %1373, %cst_1322 [1] : vector<16x4x16xf32> to vector<16x16xf32>
    %c0_1323 = arith.constant 0 : index
    %c0_1324 = arith.constant 0 : index
    %c0_1325 = arith.constant 0 : index
    %c0_1326 = arith.constant 0 : index
    %1375 = vector.load %arg10[%c0_1323, %c0_1324, %c0_1325, %c0_1326] : memref<16x1x4x16xf32, #tpu.memory_space<vmem>>, vector<16x1x4x16xf32>
    %1376 = vector.shape_cast %1375 : vector<16x1x4x16xf32> to vector<16x4x16xf32>
    %1377 = vector.shape_cast %1355 : vector<4x1xf32> to vector<1x4x1xf32>
    %1378 = vector.broadcast %1377 : vector<1x4x1xf32> to vector<16x4x16xf32>
    %1379 = arith.mulf %1376, %1378 : vector<16x4x16xf32>
    %c0_1327 = arith.constant 0 : index
    %c0_1328 = arith.constant 0 : index
    %c0_1329 = arith.constant 0 : index
    %c0_1330 = arith.constant 0 : index
    %1380 = vector.load %arg11[%c0_1327, %c0_1328, %c0_1329, %c0_1330] : memref<16x1x4x16xf32, #tpu.memory_space<vmem>>, vector<16x1x4x16xf32>
    %1381 = vector.shape_cast %1380 : vector<16x1x4x16xf32> to vector<16x4x16xf32>
    %1382 = vector.shape_cast %1357 : vector<4x1xf32> to vector<1x4x1xf32>
    %1383 = vector.broadcast %1382 : vector<1x4x1xf32> to vector<16x4x16xf32>
    %1384 = arith.mulf %1381, %1383 : vector<16x4x16xf32>
    %1385 = arith.addf %1379, %1384 : vector<16x4x16xf32>
    %cst_1331 = arith.constant dense<0.000000e+00> : vector<16x16xf32>
    %1386 = vector.multi_reduction <add>, %1385, %cst_1331 [1] : vector<16x4x16xf32> to vector<16x16xf32>
    %1387 = tpu.transpose %1386, [1, 0] : vector<16x16xf32> -> vector<16x16xf32>
    %1388 = arith.addf %1374, %1387 : vector<16x16xf32>
    %1389 = vector.broadcast %1362 : f32 to vector<16x16xf32>
    %1390 = arith.addf %1388, %1389 : vector<16x16xf32>
    %cst_1332 = arith.constant 0.000000e+00 : f32
    %1391 = vector.broadcast %cst_1332 : f32 to vector<16x16xf32>
    %1392 = arith.maximumf %1390, %1391 : vector<16x16xf32>
    %c0_1333 = arith.constant 0 : index
    %c3_1334 = arith.constant 3 : index
    %c0_1335 = arith.constant 0 : index
    %c0_1336 = arith.constant 0 : index
    %c0_1337 = arith.constant 0 : index
    %1393 = vector.load %arg7[%c0_1333, %c3_1334, %c0_1335, %c0_1336, %c0_1337] : memref<1x4x1x16x16xf32, #tpu.memory_space<vmem>>, vector<1x1x1x16x16xf32>
    %1394 = vector.shape_cast %1393 : vector<1x1x1x16x16xf32> to vector<16x16xf32>
    %1395 = vector.shape_cast %1392 : vector<16x16xf32> to vector<1x1x1x16x16xf32>
    tpu.vector_store %arg7[%c0_1333, %c3_1334, %c0_1335, %c0_1336, %c0_1337], %1395 {strides = array<i32>} : memref<1x4x1x16x16xf32, #tpu.memory_space<vmem>>, vector<1x1x1x16x16xf32>,
    return
  }
  func.func @transform_0(%arg0: i32) -> (i32, i32, i32, i32, i32) {
    %c0_i32 = arith.constant 0 : i32
    %c0_i32_0 = arith.constant 0 : i32
    %c0_i32_1 = arith.constant 0 : i32
    %c0_i32_2 = arith.constant 0 : i32
    %c0_i32_3 = arith.constant 0 : i32
    return %arg0, %c0_i32, %c0_i32_0, %c0_i32_1, %c0_i32_2 : i32, i32, i32, i32, i32
  }
  func.func @transform_1(%arg0: i32) -> (i32, i32, i32, i32, i32) {
    %c0_i32 = arith.constant 0 : i32
    %c0_i32_0 = arith.constant 0 : i32
    %c0_i32_1 = arith.constant 0 : i32
    %c0_i32_2 = arith.constant 0 : i32
    %c0_i32_3 = arith.constant 0 : i32
    return %arg0, %c0_i32, %c0_i32_0, %c0_i32_1, %c0_i32_2 : i32, i32, i32, i32, i32
  }
  func.func @transform_2(%arg0: i32) -> (i32, i32, i32, i32) {
    %c0_i32 = arith.constant 0 : i32
    %c0_i32_0 = arith.constant 0 : i32
    %c0_i32_1 = arith.constant 0 : i32
    %c0_i32_2 = arith.constant 0 : i32
    %c0_i32_3 = arith.constant 0 : i32
    return %c0_i32, %c0_i32_0, %c0_i32_1, %c0_i32_2 : i32, i32, i32, i32
  }
  func.func @transform_3(%arg0: i32) -> (i32, i32, i32, i32) {
    %c0_i32 = arith.constant 0 : i32
    %c0_i32_0 = arith.constant 0 : i32
    %c0_i32_1 = arith.constant 0 : i32
    %c0_i32_2 = arith.constant 0 : i32
    %c0_i32_3 = arith.constant 0 : i32
    return %c0_i32, %c0_i32_0, %c0_i32_1, %c0_i32_2 : i32, i32, i32, i32
  }
  func.func @transform_4(%arg0: i32) -> (i32, i32, i32, i32) {
    %c0_i32 = arith.constant 0 : i32
    %c0_i32_0 = arith.constant 0 : i32
    %c0_i32_1 = arith.constant 0 : i32
    %c0_i32_2 = arith.constant 0 : i32
    %c0_i32_3 = arith.constant 0 : i32
    return %c0_i32, %c0_i32_0, %c0_i32_1, %c0_i32_2 : i32, i32, i32, i32
  }
  func.func @transform_5(%arg0: i32) -> i32 {
    %c0_i32 = arith.constant 0 : i32
    %c0_i32_0 = arith.constant 0 : i32
    return %c0_i32 : i32
  }
  func.func @transform_6(%arg0: i32) -> (i32, i32, i32, i32, i32) {
    %c0_i32 = arith.constant 0 : i32
    %c0_i32_0 = arith.constant 0 : i32
    %c0_i32_1 = arith.constant 0 : i32
    %c0_i32_2 = arith.constant 0 : i32
    %c0_i32_3 = arith.constant 0 : i32
    return %arg0, %c0_i32, %c0_i32_0, %c0_i32_1, %c0_i32_2 : i32, i32, i32, i32, i32
  }
}

</mosaic_0001>

<bundles_post_ra>
// kernel: context_transfer.1
= control target key start
LH: loop header
LB: loop body
LE: loop exit
PB: predicated region body
PF: predicated region fallthrough
CT: control target
= control target key end

     0   :  { %11 = vsyncpa [#allocation8], 0  ;;  %s6350_s0 = inlined_call_operand.vmem [shape: f32[2,16,1,4,16], index: 0, kind: input, shape index: {}]   ;;  %s6351_s1 = inlined_call_operand.vmem [shape: f32[2,16,1,4,16], index: 1, kind: input, shape index: {}]   ;;  %s6352_s2 = inlined_call_operand.vmem [shape: f32[2,16,1,16], index: 2, kind: input, shape index: {}]   ;;  %s6353_s3 = inlined_call_operand.vmem [shape: f32[2,16,1,16], index: 3, kind: input, shape index: {}]   ;;  %s6354_s4 = inlined_call_operand.vmem [shape: f32[4,4,4,1], index: 4, kind: input, shape index: {}]   ;;  %s6355_s5 = inlined_call_operand.vmem [shape: f32[4], index: 5, kind: input, shape index: {}]   ;;  %s6356_s6 = inlined_call_operand.hbm [shape: f32[2,4,1,16,16], index: 6, kind: output, shape index: {}]  }
   0x1   :  { %12 = vsyncpa [#allocation7], 0 }
   0x2   :  { %14 = vsyncpa [#allocation7 + $0x1], 0  ;;  %s4693_s21 = smov 0   ;;  %s4695_s22 = smov 0  }
   0x3   :  { %s4697_s23 = smov 0   ;;  %s4699_s24 = smov 0  }
   0x4 LB: > { %s4714_s25 = sadd.s32 4294967295, %s4651_s24   ;;  %s4055_s26 = sadd.s32 4294967294, %s4651_s24   ;;  %s4651_s24 = sphi %s4699_s24, %s6465_s24   ;;  %s4647_s23 = sphi %s4697_s23, %s6464_s23   ;;  %s4643_s22 = sphi %s4695_s22, %s6463_s22   ;;  %s4639_s21 = sphi %s4693_s21, %s6462_s21  }
   0x5   : > { %s4718_s27 = sadd.s32 1, %s4651_s24   ;;  %s163_s28 = sadd.s32 1, %s4647_s23 }
   0x6   : > { %s160_s29 = ssub.s32 %s4651_s24, %s4718_s27  ;;  %p173_p0 = scmp.ne.s32.totalorder %s4647_s23, %s4643_s22 }
   0x7   : > { %p161_p1 = scmp.eq.s32.totalorder %s160_s29, 0  ;;  %p174_p2 = scmp.eq.s32.totalorder %s4714_s25, 1 }
   0x8   : > { %p179_p3 = scmp.ne.s32.totalorder %s4643_s22, %s4639_s21  ;;  %p180_p4 = scmp.eq.s32.totalorder %s4055_s26, 1 }
   0x9   : > { %s4729_s30 = scalar_select %p161_p1, %s4647_s23, %s163_s28  }
   0xa   : > { %p4731_p5 = por %p174_p2, %p173_p0  ;;  %p4735_p6 = por %p180_p4, %p179_p3 }
   0xb   : > { %p4056_p7 = scmp.ge.s32.totalorder %s4651_s24, 1  ;;  %p187_p8 = scmp.lt.s32.totalorder %s4651_s24, 3 }
   0xc   : > { %p4290_p9 = scmp.eq.s32.totalorder %s4714_s25, 0  ;;  %s209_s12 = sshll.u32 %s6355_s5, 4  ;;  %s210_s12 = int_to_ptr.vmem [resolvable:$true] %s209_s12 }
   0xd   : > { %p4742_p10 = pnand %p4056_p7, %p187_p8  ;;  %s4572_s13 = scalar_lea.vmem %s210_s12, 16 }
   0xe   : > { %p4573_p13 = scmp.ne.s32.totalorder %s210_s12, %s4572_s13  ;;  %p4580_p3 = scmp.lt.s32.totalorder %s210_s12, %s210_s12 }
   0xf   : > { %p4282_p11 = pneg %p4742_p10  ;;  %p4581_p4 = scmp.lt.s32.totalorder %s4572_s13, %s4572_s13 }
  0x11   : > { %p4283_p12 = pnand %p4290_p9, %p4282_p11  ;;  %p4582_p7 = por %p4581_p4, %p4580_p3 }
  0x13   : > { %p4574_p0 = pneg %p4283_p12 }
  0x15   : > { %p4575_p1 = pnand %p4574_p0, %p4573_p13 }
  0x17   : > { %p4576_p2 = pneg %p4575_p1 }
  0x19   : > { %p4583_p8 = pnand %p4582_p7, %p4576_p2 }
  0x1b   : > { %4586 = shalt.err (!%p4583_p8)
}
  0x1c   : > { %s4653_s14 = smov [#allocation6]   ;;  %238 = sbr.rel (%p4742_p10) target bundleno = 664 (0x298), region = 44 }
  0x1d   : > { %4285 = dma.vmem_to_smem (!%p4283_p12), %s210_s12, 16, %s4653_s14, [#allocation8]  }
  0x21   : > { %4630 = dma.done.wait (%p4290_p9), [#allocation8], 16  }
  0x22   : > { %4632 = vsyncadd (%p4290_p9), [#allocation8], 4294967280 }
  0x23   : > { %244 = sfence }
  0x24   : > { %v1521_v0 = vld [vmem:[%s6354_s4] sm:$0xf]  ;;  %v4654_v1 = vmov 0   ;;  %p274_p11 = scmp.lt.s32.totalorder %s4714_s25, 1  ;;  %v4244_v3 = vld [vmem:[%s6354_s4 + $0x10] sm:$0xf]  ;;  %v307_v46 = vlaneseq }
  0x25   : > { %4331 = vset.pattern.permute.xlu1 %v4654_v1  ;;  %4330 = vset.pattern.permute.xlu0 %v4654_v1  ;;  %v4245_v2 = vld [vmem:[%s6354_s4 + $0x20] sm:$0xf]  ;;  %v4246_v4 = vld [vmem:[%s6354_s4 + $0x30] sm:$0xf]  ;;  %v4249_v5 = vld [vmem:[%s6354_s4 + $0x24] sm:$0xf] }
  0x26   : > { %1749 = vperm.xlu1 %4331, %v1521_v0   ;;  %1547 = vperm.xlu0 %4330, %v4245_v2   ;;  %s4776_s10 = scalar_select %p274_p11, %s4714_s25, 1  ;;  %v909_v6 = vld [vmem:[%s6353_s3] sm:$0x1]  ;;  %v4157_v7 = vld [vmem:[%s6353_s3 + $0x1f] sm:$0x1]  ;;  %vm287_vm0 = vcmask 125952  }
  0x27   : > { %v4156_v8 = vmul.f32 -1.442695, %v909_v6  ;;  %v4158_v9 = vmul.f32 -1.442695, %v4157_v7  ;;  %v4256_v10 = vld [vmem:[%s6354_s4 + $0x28] sm:$0xf] }
  0x28   : > { %s4273_s15 = sshll.u32 %s4776_s10, 6  ;;  %v4161_v11 = vld [vmem:[%s6353_s3 + $0x1] sm:$0x1]  ;;  %v4163_v12 = vld [vmem:[%s6353_s3 + $0x1e] sm:$0x1]  ;;  %v308_v55 = vshrl.u32 %v307_v46, 7 }
  0x29   : > { %s4793_s20 = scalar_lea.vmem %s6351_s1, %s4273_s15  ;;  %4332 = vpow2.f32 %v4156_v8  ;;  %v4162_v15 = vmul.f32 -1.442695, %v4161_v11  ;;  %v4164_v16 = vmul.f32 -1.442695, %v4163_v12  ;;  %v4247_v17 = vld [vmem:[%s6354_s4 + $0x4] sm:$0xf]  ;;  %s5055_s11 = scalar_lea.vmem %s6350_s0, %s4273_s15 }
  0x2a   : > { %1786 = vperm.xlu1 %4331, %v4244_v3   ;;  %1584 = vperm.xlu0 %4330, %v4246_v4   ;;  %v4802_v13 = vld [vmem:[%s4793_s20] sm:$0xf]  ;;  %v4805_v14 = vld [vmem:[%s4793_s20 + $0x3c] sm:$0xf]  ;;  %4334 = vpow2.f32 %v4158_v9  ;;  %v4257_v19 = vld [vmem:[%s6354_s4 + $0x38] sm:$0xf] }
  0x2b   : > { %906 = vst.msk [vmem:[#allocation4] sm:$0xf] %vm287_vm0, %v4802_v13  ;;  %908 = vst.msk [vmem:[#allocation5 + $0x3c] sm:$0xf] %vm287_vm0, %v4805_v14  ;;  %v4167_v18 = vld [vmem:[%s6353_s3 + $0x2] sm:$0x1]  ;;  %4336 = vpow2.f32 %v4162_v15 }
  0x2c   : > { %v4168_v20 = vmul.f32 -1.442695, %v4167_v18  ;;  %v4169_v21 = vld [vmem:[%s6353_s3 + $0x1d] sm:$0x1]  ;;  %4338 = vpow2.f32 %v4164_v16  ;;  %v4173_v23 = vld [vmem:[%s6353_s3 + $0x3] sm:$0x1] }
  0x2d   : > { %v4170_v22 = vmul.f32 -1.442695, %v4169_v21  ;;  %v4175_v24 = vld [vmem:[%s6353_s3 + $0x1c] sm:$0x1]  ;;  %v4248_v25 = vld [vmem:[%s6354_s4 + $0x14] sm:$0xf] }
  0x2e   : > { %2161 = vperm.xlu1 %4331, %v4249_v5   ;;  %2768 = vperm.xlu0 %4330, %v4256_v10   ;;  %4340 = vpow2.f32 %v4168_v20  ;;  %v4174_v26 = vmul.f32 -1.442695, %v4173_v23  ;;  %v4264_v27 = vld [vmem:[%s6354_s4 + $0x3c] sm:$0xf]  ;;  %v4176_v28 = vmul.f32 -1.442695, %v4175_v24 }
  0x2f   : > { %4342 = vpow2.f32 %v4170_v22  ;;  %v4179_v29 = vld [vmem:[%s6353_s3 + $0x4] sm:$0x1]  ;;  %v4181_v30 = vld [vmem:[%s6353_s3 + $0x1b] sm:$0x1]  ;;  %v4254_v31 = vld [vmem:[%s6354_s4 + $0x8] sm:$0xf] }
  0x30   : > { %4344 = vpow2.f32 %v4174_v26  ;;  %v4180_v32 = vmul.f32 -1.442695, %v4179_v29  ;;  %v4182_v33 = vmul.f32 -1.442695, %v4181_v30  ;;  %v4255_v36 = vld [vmem:[%s6354_s4 + $0x18] sm:$0xf] }
  0x31   : > { %4346 = vpow2.f32 %v4176_v28  ;;  %v4185_v39 = vld [vmem:[%s6353_s3 + $0x5] sm:$0x1]  ;;  %v4187_v41 = vld [vmem:[%s6353_s3 + $0x1a] sm:$0x1]  ;;  %v4261_v45 = vld [vmem:[%s6354_s4 + $0xc] sm:$0xf] }
  0x32   : > { %2363 = vperm.xlu1 %4331, %v4247_v17   ;;  %2805 = vperm.xlu0 %4330, %v4257_v19   ;;  %4348 = vpow2.f32 %v4180_v32  ;;  %v4186_v48 = vmul.f32 -1.442695, %v4185_v39  ;;  %v4188_v50 = vmul.f32 -1.442695, %v4187_v41  ;;  %v4191_v53 = vld [vmem:[%s6353_s3 + $0x6] sm:$0x1] }
  0x33   : > { %4350 = vpow2.f32 %v4182_v33  ;;  %v4262_v54 = vld [vmem:[%s6354_s4 + $0x1c] sm:$0xf]  ;;  %v4193_v56 = vld [vmem:[%s6353_s3 + $0x19] sm:$0x1]  ;;  %v4192_v59 = vmul.f32 -1.442695, %v4191_v53 }
  0x34   : > { %v4194_v60 = vmul.f32 -1.442695, %v4193_v56  ;;  %v4250_v61 = vld [vmem:[%s6354_s4 + $0x34] sm:$0xf]  ;;  %v4868_v62 = vsub.s32 0, %v308_v55  ;;  %vm1949_vm1 = vcmask 1041409  }
  0x35   : > { %v4197_v2 = vld [vmem:[%s6353_s3 + $0x7] sm:$0x1]  ;;  %v4199_v4 = vld [vmem:[%s6353_s3 + $0x18] sm:$0x1]  ;;  %v4263_v7 = vld [vmem:[%s6354_s4 + $0x2c] sm:$0xf] }
  0x36   : > { %2400 = vperm.xlu1 %4331, %v4248_v25   ;;  %3412 = vperm.xlu0 %4330, %v4264_v27   ;;  %v4333_v34 = vpop.eup %4332  ;;  %v4198_v9 = vmul.f32 -1.442695, %v4197_v2  ;;  %v4159_v10 = vld [vmem:[%s4793_s20 + $0x4] sm:$0xf]  ;;  %v4200_v12 = vmul.f32 -1.442695, %v4199_v4 }
  0x37   : > { %v4335_v35 = vpop.eup %4334  ;;  %v913_v37 = vadd.f32 1.0, %v4333_v34  ;;  %v4160_v17 = vld [vmem:[%s4793_s20 + $0x38] sm:$0xf]  ;;  %v4203_v22 = vld [vmem:[%s6353_s3 + $0x8] sm:$0x1]  ;;  %vm1951_vm2 = vcmask 1042434  }
  0x38   : > { %v921_v38 = vadd.f32 1.0, %v4335_v35  ;;  %v4337_v40 = vpop.eup %4336  ;;  %v4204_v29 = vmul.f32 -1.442695, %v4203_v22  ;;  %v4165_v32 = vld [vmem:[%s4793_s20 + $0x8] sm:$0xf]  ;;  %vm1953_vm3 = vcmask 1043459  }
  0x39   : > { %4352 = vrcp.f32 %v913_v37  ;;  %v4339_v42 = vpop.eup %4338  ;;  %v955_v43 = vadd.f32 1.0, %v4337_v40  ;;  %v4209_v40 = vld [vmem:[%s6353_s3 + $0x9] sm:$0x1]  ;;  %v4172_v56 = vld [vmem:[%s4793_s20 + $0x30] sm:$0xf]  ;;  %vm1955_vm4 = vcmask 1044484  }
  0x3a   : > { %2970 = vperm.xlu1 %4331, %v4254_v31   ;;  %4354 = vrcp.f32 %v921_v38  ;;  %v963_v47 = vadd.f32 1.0, %v4339_v42  ;;  %vm1957_vm5 = vcmask 1045509   ;;  %vm1959_vm6 = vcmask 1046534   ;;  %s5564_s29 = sld [smem:[#allocation6]]  ;;  %s4275_s13 = sshll.u32 %s4714_s25, 10 }
  0x3b   : > { %v4341_v44 = vpop.eup %4340  ;;  %4356 = vrcp.f32 %v955_v43  ;;  %v4211_v43 = vld [vmem:[%s6353_s3 + $0x16] sm:$0x1]  ;;  %vm1961_vm7 = vcmask 1047559   ;;  %s5576_s9 = sld [smem:[#allocation6 + $0x1]]  ;;  %vm2131_vm8 = vcmask 130048   ;;  %s6300_s18 = scalar_lea.hbm %s6356_s6, %s4275_s13 }
  0x3c   : > { %v4343_v49 = vpop.eup %4342  ;;  %4358 = vrcp.f32 %v963_v47  ;;  %v997_v51 = vadd.f32 1.0, %v4341_v44  ;;  %v4212_v53 = vmul.f32 -1.442695, %v4211_v43  ;;  %v291_v43 = vld [vmem:[%s6352_s2] sm:$0x1]  ;;  %s5775_s10 = sld [smem:[#allocation6 + $0x2]] }
  0x3d   : > { %v1005_v52 = vadd.f32 1.0, %v4343_v49  ;;  %4360 = vpow2.f32 %v4186_v48  ;;  %v4345_v57 = vpop.eup %4344  ;;  %v4210_v49 = vmul.f32 -1.442695, %v4209_v40  ;;  %v4233_v40 = vld [vmem:[%s6353_s3 + $0xd] sm:$0x1]  ;;  %s6195_s12 = sld [smem:[#allocation6 + $0x3]] }
  0x3e   : > { %3007 = vperm.xlu1 %4331, %v4255_v36   ;;  %4362 = vpow2.f32 %v4188_v50  ;;  %v4347_v58 = vpop.eup %4346  ;;  %v1039_v63 = vadd.f32 1.0, %v4345_v57  ;;  %v4166_v36 = vld [vmem:[%s4793_s20 + $0x34] sm:$0xf]  ;;  %s4655_s26 = smov [#allocation9]  }
  0x3f   : > { %4364 = vrcp.f32 %v997_v51  ;;  %v4349_v0 = vpop.eup %4348  ;;  %v1047_v1 = vadd.f32 1.0, %v4347_v58  ;;  %s4591_s28 = sshll.u32 %s4655_s26, 4  ;;  %s4592_s28 = int_to_ptr.vmem [resolvable:$false] %s4591_s28 }
  0x40   : > { %4366 = vrcp.f32 %v1005_v52  ;;  %v4351_v3 = vpop.eup %4350  ;;  %v1081_v18 = vadd.f32 1.0, %v4349_v0  ;;  %v4171_v52 = vld [vmem:[%s4793_s20 + $0xc] sm:$0xf]  ;;  %v4217_v0 = vld [vmem:[%s6353_s3 + $0x15] sm:$0x1] }
  0x41   : > { %4368 = vpow2.f32 %v4192_v59  ;;  %v1089_v21 = vadd.f32 1.0, %v4351_v3 }
  0x42   : > { %3577 = vperm.xlu1 %4331, %v4261_v45   ;;  %4370 = vpow2.f32 %v4194_v60  ;;  %v4215_v60 = vld [vmem:[%s6353_s3 + $0xa] sm:$0x1] }
  0x43   : > { %4372 = vrcp.f32 %v1039_v63 }
  0x44   : > { %4374 = vrcp.f32 %v1047_v1 }
  0x45   : > { %4376 = vpow2.f32 %v4198_v9 }
  0x46   : > { %3614 = vperm.xlu1 %4331, %v4262_v54   ;;  %v4353_v5 = vpop.eup %4352  ;;  %4378 = vpow2.f32 %v4200_v12 }
  0x47   : > { %v4355_v6 = vpop.eup %4354  ;;  %v928_v8 = vrot.slane %v4353_v5, %v4868_v62  ;;  %4380 = vrcp.f32 %v1081_v18  ;;  %v4229_v18 = vld [vmem:[%s6353_s3 + $0x13] sm:$0x1] }
  0x48   : > { %v939_v11 = vrot.slane %v4355_v6, %v4868_v62  ;;  %v4357_v15 = vpop.eup %4356  ;;  %4382 = vrcp.f32 %v1089_v21  ;;  %v4177_v6 = vld [vmem:[%s4793_s20 + $0x10] sm:$0xf]  ;;  %v4221_v21 = vld [vmem:[%s6353_s3 + $0xb] sm:$0x1] }
  0x49   : > { %v930_v16 = vmul.f32 %v928_v8, %v4802_v13  ;;  %v4359_v19 = vpop.eup %4358  ;;  %v970_v24 = vrot.slane %v4357_v15, %v4868_v62  ;;  %v4205_v13 = vld [vmem:[%s6353_s3 + $0x17] sm:$0x1]  ;;  %4384 = vpow2.f32 %v4204_v29 }
  0x4a   : > { %2198 = vperm.xlu1 %4331, %v4250_v61   ;;  %v941_v20 = vmul.f32 %v4805_v14, %v939_v11  ;;  %v4361_v25 = vpop.eup %4360  ;;  %v981_v27 = vrot.slane %v4359_v19, %v4868_v62  ;;  %v4206_v33 = vmul.f32 -1.442695, %v4205_v13  ;;  %v4223_v11 = vld [vmem:[%s6353_s3 + $0x14] sm:$0x1]  ;;  %v4235_v13 = vld [vmem:[%s6353_s3 + $0x12] sm:$0x1] }
  0x4b   : > { %v933_v23 = vadd.f32 %v4159_v10, %v930_v16  ;;  %v4363_v14 = vpop.eup %4362  ;;  %v1123_v37 = vadd.f32 1.0, %v4361_v25  ;;  %v4218_v10 = vmul.f32 -1.442695, %v4217_v0  ;;  %v4178_v16 = vld [vmem:[%s4793_s20 + $0x2c] sm:$0xf] }
  0x4c   : > { %v944_v26 = vadd.f32 %v4160_v17, %v941_v20  ;;  %v4365_v30 = vpop.eup %4364  ;;  %v1131_v39 = vadd.f32 1.0, %v4363_v14  ;;  %4386 = vpow2.f32 %v4206_v33  ;;  %v4230_v14 = vmul.f32 -1.442695, %v4229_v18 }
  0x4d   : > { %v934_v28 = vmax.f32 %v933_v23, 0.0  ;;  %v4367_v34 = vpop.eup %4366  ;;  %v1012_v42 = vrot.slane %v4365_v30, %v4868_v62  ;;  %4388 = vrcp.f32 %v1123_v37  ;;  %v4183_v30 = vld [vmem:[%s4793_s20 + $0x14] sm:$0xf] }
  0x4e   : > { %3375 = vperm.xlu1 %4331, %v4263_v7   ;;  %v945_v31 = vmax.f32 %v944_v26, 0.0  ;;  %v4369_v44 = vpop.eup %4368  ;;  %v1023_v46 = vrot.slane %v4367_v34, %v4868_v62  ;;  %4390 = vrcp.f32 %v1131_v39  ;;  %v4216_v7 = vmul.f32 -1.442695, %v4215_v60 }
  0x4f   : > { %947 = vst.msk [vmem:[#allocation4 + $0x4] sm:$0xf] %vm287_vm0, %v934_v28  ;;  %v972_v35 = vmul.f32 %v970_v24, %v934_v28  ;;  %v4371_v47 = vpop.eup %4370  ;;  %v1165_v57 = vadd.f32 1.0, %v4369_v44  ;;  %4392 = vpow2.f32 %v4210_v49  ;;  %v4224_v24 = vmul.f32 -1.442695, %v4223_v11 }
  0x50   : > { %v983_v38 = vmul.f32 %v981_v27, %v945_v31  ;;  %949 = vst.msk [vmem:[#allocation5 + $0x38] sm:$0xf] %vm287_vm0, %v945_v31  ;;  %v4373_v50 = vpop.eup %4372  ;;  %v1173_v59 = vadd.f32 1.0, %v4371_v47  ;;  %4394 = vpow2.f32 %v4212_v53  ;;  %v4222_v31 = vmul.f32 -1.442695, %v4221_v21 }
  0x51   : > { %v975_v41 = vadd.f32 %v4165_v32, %v972_v35  ;;  %v4375_v54 = vpop.eup %4374  ;;  %v1054_v63 = vrot.slane %v4373_v50, %v4868_v62  ;;  %4396 = vrcp.f32 %v1165_v57  ;;  %v4236_v34 = vmul.f32 -1.442695, %v4235_v13  ;;  %v4227_v35 = vld [vmem:[%s6353_s3 + $0xc] sm:$0x1]  ;;  %v4241_v21 = vld [vmem:[%s6353_s3 + $0x11] sm:$0x1] }
  0x52   : > { %v986_v45 = vadd.f32 %v4166_v36, %v983_v38  ;;  %v4377_v1 = vpop.eup %4376  ;;  %v1065_v3 = vrot.slane %v4375_v54, %v4868_v62  ;;  %4398 = vrcp.f32 %v1173_v59  ;;  %v4184_v38 = vld [vmem:[%s4793_s20 + $0x28] sm:$0xf]  ;;  %v4234_v50 = vmul.f32 -1.442695, %v4233_v40  ;;  %v4190_v59 = vld [vmem:[%s4793_s20 + $0x24] sm:$0xf] }
  0x53   : > { %v976_v48 = vmax.f32 %v975_v41, 0.0  ;;  %v4379_v4 = vpop.eup %4378  ;;  %v1207_v17 = vadd.f32 1.0, %v4377_v1  ;;  %4400 = vpow2.f32 %v4216_v7  ;;  %v4067_v53 = vmul.f32 -1.442695, %v291_v43  ;;  %v4068_v13 = vld [vmem:[%s6352_s2 + $0x1f] sm:$0x1] }
  0x54   : > { %v987_v51 = vmax.f32 %v986_v45, 0.0  ;;  %v4381_v8 = vpop.eup %4380  ;;  %v1215_v20 = vadd.f32 1.0, %v4379_v4  ;;  %4402 = vpow2.f32 %v4218_v10  ;;  %v4195_v10 = vld [vmem:[%s4793_s20 + $0x1c] sm:$0xf] }
  0x55   : > { %989 = vst.msk [vmem:[#allocation4 + $0x8] sm:$0xf] %vm287_vm0, %v976_v48  ;;  %v1014_v55 = vmul.f32 %v1012_v42, %v976_v48  ;;  %v4383_v12 = vpop.eup %4382  ;;  %v1096_v23 = vrot.slane %v4381_v8, %v4868_v62  ;;  %4404 = vrcp.f32 %v1207_v17 }
  0x56   : > { %v1025_v58 = vmul.f32 %v1023_v46, %v987_v51  ;;  %991 = vst.msk [vmem:[#allocation5 + $0x34] sm:$0xf] %vm287_vm0, %v987_v51  ;;  %v4385_v25 = vpop.eup %4384  ;;  %v1107_v27 = vrot.slane %v4383_v12, %v4868_v62  ;;  %4406 = vrcp.f32 %v1215_v20  ;;  %v4228_v46 = vmul.f32 -1.442695, %v4227_v35 }
  0x57   : > { %v1017_v61 = vadd.f32 %v4171_v52, %v1014_v55  ;;  %v1247_v39 = vadd.f32 1.0, %v4385_v25  ;;  %4408 = vpow2.f32 %v4224_v24 }
  0x58   : > { %v1028_v2 = vadd.f32 %v4172_v56, %v1025_v58  ;;  %4410 = vpow2.f32 %v4230_v14  ;;  %v4189_v56 = vld [vmem:[%s4793_s20 + $0x18] sm:$0xf] }
  0x59   : > { %v1018_v5 = vmax.f32 %v1017_v61, 0.0  ;;  %v4387_v28 = vpop.eup %4386  ;;  %4412 = vpow2.f32 %v4222_v31 }
  0x5a   : > { %v1029_v9 = vmax.f32 %v1028_v2, 0.0  ;;  %v4389_v32 = vpop.eup %4388  ;;  %v1255_v42 = vadd.f32 1.0, %v4387_v28  ;;  %4414 = vpow2.f32 %v4236_v34  ;;  %v4239_v2 = vld [vmem:[%s6353_s3 + $0xe] sm:$0x1] }
  0x5b   : > { %1031 = vst.msk [vmem:[#allocation4 + $0xc] sm:$0xf] %vm287_vm0, %v1018_v5  ;;  %v1056_v15 = vmul.f32 %v1054_v63, %v1018_v5  ;;  %v4391_v36 = vpop.eup %4390  ;;  %v1138_v45 = vrot.slane %v4389_v32, %v4868_v62  ;;  %4416 = vrcp.f32 %v1247_v39  ;;  %v4240_v11 = vmul.f32 -1.442695, %v4239_v2  ;;  %v4201_v32 = vld [vmem:[%s4793_s20 + $0x20] sm:$0xf] }
  0x5c   : > { %v1067_v19 = vmul.f32 %v1065_v3, %v1029_v9  ;;  %1033 = vst.msk [vmem:[#allocation5 + $0x30] sm:$0xf] %vm287_vm0, %v1029_v9  ;;  %v4393_v47 = vpop.eup %4392  ;;  %v1149_v49 = vrot.slane %v4391_v36, %v4868_v62  ;;  %4418 = vrcp.f32 %v1255_v42  ;;  %v4202_v36 = vld [vmem:[%s4793_s20 + $0x1c] sm:$0xf] }
  0x5d   : > { %v1059_v22 = vadd.f32 %v4177_v6, %v1056_v15  ;;  %v4395_v51 = vpop.eup %4394  ;;  %v1287_v60 = vadd.f32 1.0, %v4393_v47  ;;  %4420 = vpow2.f32 %v4228_v46 }
  0x5e   : > { %v1070_v26 = vadd.f32 %v4178_v16, %v1067_v19  ;;  %v4397_v54 = vpop.eup %4396  ;;  %v1295_v63 = vadd.f32 1.0, %v4395_v51  ;;  %4422 = vpow2.f32 %v4234_v50  ;;  %v4196_v16 = vld [vmem:[%s4793_s20 + $0x20] sm:$0xf] }
  0x5f   : > { %v1060_v29 = vmax.f32 %v1059_v22, 0.0  ;;  %v4399_v57 = vpop.eup %4398  ;;  %v1180_v1 = vrot.slane %v4397_v54, %v4868_v62  ;;  %4424 = vpow2.f32 %v4067_v53  ;;  %v4072_v51 = vld [vmem:[%s6352_s2 + $0x1] sm:$0x1]  ;;  %v4207_v54 = vld [vmem:[%s4793_s20 + $0x24] sm:$0xf] }
  0x60   : > { %v1071_v33 = vmax.f32 %v1070_v26, 0.0  ;;  %v4401_v3 = vpop.eup %4400  ;;  %v1191_v5 = vrot.slane %v4399_v57, %v4868_v62  ;;  %4426 = vrcp.f32 %v1287_v60 }
  0x61   : > { %1073 = vst.msk [vmem:[#allocation4 + $0x10] sm:$0xf] %vm287_vm0, %v1060_v29  ;;  %v1098_v37 = vmul.f32 %v1096_v23, %v1060_v29  ;;  %v4403_v6 = vpop.eup %4402  ;;  %4428 = vrcp.f32 %v1295_v63  ;;  %v1327_v17 = vadd.f32 1.0, %v4401_v3  ;;  %v4242_v29 = vmul.f32 -1.442695, %v4241_v21 }
  0x62   : > { %v1109_v41 = vmul.f32 %v1107_v27, %v1071_v33  ;;  %1075 = vst.msk [vmem:[#allocation5 + $0x2c] sm:$0xf] %vm287_vm0, %v1071_v33  ;;  %v4405_v8 = vpop.eup %4404  ;;  %v1335_v20 = vadd.f32 1.0, %v4403_v6  ;;  %4430 = vpow2.f32 %v4240_v11  ;;  %v4069_v33 = vmul.f32 -1.442695, %v4068_v13 }
  0x63   : > { %v1101_v44 = vadd.f32 %v4183_v30, %v1098_v37  ;;  %v4407_v12 = vpop.eup %4406  ;;  %v1222_v24 = vrot.slane %v4405_v8, %v4868_v62  ;;  %4432 = vrcp.f32 %v1327_v17 }
  0x64   : > { %v1112_v48 = vadd.f32 %v4184_v38, %v1109_v41  ;;  %v4409_v18 = vpop.eup %4408  ;;  %v1232_v27 = vrot.slane %v4407_v12, %v4868_v62  ;;  %4434 = vrcp.f32 %v1335_v20  ;;  %v4092_v20 = vld [vmem:[%s6352_s2 + $0x1b] sm:$0x1] }
  0x65   : > { %v1102_v52 = vmax.f32 %v1101_v44, 0.0  ;;  %v4411_v22 = vpop.eup %4410  ;;  %v1375_v40 = vadd.f32 1.0, %v4409_v18  ;;  %4436 = vpow2.f32 %v4242_v29  ;;  %v4098_v29 = vld [vmem:[%s6352_s2 + $0x1a] sm:$0x1] }
  0x66   : > { %v1113_v55 = vmax.f32 %v1112_v48, 0.0  ;;  %v4413_v25 = vpop.eup %4412  ;;  %v1415_v44 = vadd.f32 1.0, %v4411_v22  ;;  %4438 = vpow2.f32 %v4069_v33 }
  0x67   : > { %1115 = vst.msk [vmem:[#allocation4 + $0x14] sm:$0xf] %vm287_vm0, %v1102_v52  ;;  %v1140_v58 = vmul.f32 %v1138_v45, %v1102_v52  ;;  %v4415_v14 = vpop.eup %4414  ;;  %v1367_v37 = vadd.f32 1.0, %v4413_v25 }
  0x68   : > { %v1151_v61 = vmul.f32 %v1149_v49, %v1113_v55  ;;  %1117 = vst.msk [vmem:[#allocation5 + $0x28] sm:$0xf] %vm287_vm0, %v1113_v55  ;;  %v4417_v30 = vpop.eup %4416  ;;  %v1455_v48 = vadd.f32 1.0, %v4415_v14 }
  0x69   : > { %v1143_v0 = vadd.f32 %v4189_v56, %v1140_v58  ;;  %v4419_v34 = vpop.eup %4418  ;;  %v1262_v43 = vrot.slane %v4417_v30, %v4868_v62  ;;  %4440 = vrcp.f32 %v1367_v37  ;;  %v4074_v56 = vld [vmem:[%s6352_s2 + $0x1e] sm:$0x1] }
  0x6a   : > { %v1154_v4 = vadd.f32 %v4190_v59, %v1151_v61  ;;  %v4421_v38 = vpop.eup %4420  ;;  %v1272_v47 = vrot.slane %v4419_v34, %v4868_v62  ;;  %4442 = vrcp.f32 %v1375_v40  ;;  %v4208_v59 = vld [vmem:[%s4793_s20 + $0x18] sm:$0xf]  ;;  %v4078_v61 = vld [vmem:[%s6352_s2 + $0x2] sm:$0x1]  ;;  %v4102_v34 = vld [vmem:[%s6352_s2 + $0x6] sm:$0x1] }
  0x6b   : > { %v1144_v7 = vmax.f32 %v1143_v0, 0.0  ;;  %v4423_v41 = vpop.eup %4422  ;;  %v1407_v50 = vadd.f32 1.0, %v4421_v38  ;;  %4444 = vrcp.f32 %v1415_v44  ;;  %v4073_v0 = vmul.f32 -1.442695, %v4072_v51  ;;  %v4219_v40 = vld [vmem:[%s4793_s20 + $0x2c] sm:$0xf] }
  0x6c   : > { %v1155_v9 = vmax.f32 %v1154_v4, 0.0  ;;  %v4425_v45 = vpop.eup %4424  ;;  %v1447_v55 = vadd.f32 1.0, %v4423_v41  ;;  %4446 = vrcp.f32 %v1455_v48  ;;  %v4075_v4 = vmul.f32 -1.442695, %v4074_v56 }
  0x6d   : > { %1157 = vst.msk [vmem:[#allocation4 + $0x18] sm:$0xf] %vm287_vm0, %v1144_v7  ;;  %v1182_v15 = vmul.f32 %v1180_v1, %v1144_v7  ;;  %v4427_v52 = vpop.eup %4426  ;;  %v295_v60 = vadd.f32 1.0, %v4425_v45  ;;  %v4080_v1 = vld [vmem:[%s6352_s2 + $0x1d] sm:$0x1]  ;;  %4448 = vrcp.f32 %v1407_v50 }
  0x6e   : > { %1159 = vst.msk [vmem:[#allocation5 + $0x24] sm:$0xf] %vm287_vm0, %v1155_v9  ;;  %v1193_v19 = vmul.f32 %v1191_v5, %v1155_v9  ;;  %v4429_v57 = vpop.eup %4428  ;;  %v1302_v3 = vrot.slane %v4427_v52, %v4868_v62  ;;  %v4084_v5 = vld [vmem:[%s6352_s2 + $0x3] sm:$0x1]  ;;  %v4213_v7 = vld [vmem:[%s4793_s20 + $0x28] sm:$0xf]  ;;  %4450 = vrcp.f32 %v1447_v55 }
  0x6f   : > { %v1185_v23 = vadd.f32 %v4195_v10, %v1182_v15  ;;  %v1312_v8 = vrot.slane %v4429_v57, %v4868_v62  ;;  %v4079_v9 = vmul.f32 -1.442695, %v4078_v61  ;;  %v4086_v10 = vld [vmem:[%s6352_s2 + $0x1c] sm:$0x1]  ;;  %v4431_v11 = vpop.eup %4430  ;;  %4452 = vrcp.f32 %v295_v60  ;;  %v4110_v50 = vld [vmem:[%s6352_s2 + $0x18] sm:$0x1] }
  0x70   : > { %v1196_v26 = vadd.f32 %v4196_v16, %v1193_v19  ;;  %v4081_v15 = vmul.f32 -1.442695, %v4080_v1  ;;  %v4090_v16 = vld [vmem:[%s6352_s2 + $0x4] sm:$0x1]  ;;  %v4433_v17 = vpop.eup %4432  ;;  %4454 = vpow2.f32 %v4073_v0  ;;  %v4085_v19 = vmul.f32 -1.442695, %v4084_v5 }
  0x71   : > { %v1186_v28 = vmax.f32 %v1185_v23, 0.0  ;;  %v4435_v21 = vpop.eup %4434  ;;  %v4214_v23 = vld [vmem:[%s4793_s20 + $0x14] sm:$0xf]  ;;  %4456 = vpow2.f32 %v4075_v4  ;;  %v4091_v25 = vmul.f32 -1.442695, %v4090_v16  ;;  %v1342_v14 = vrot.slane %v4433_v17, %v4868_v62 }
  0x72   : > { %v1197_v31 = vmax.f32 %v1196_v26, 0.0  ;;  %4458 = vpow2.f32 %v4079_v9  ;;  %v4096_v26 = vld [vmem:[%s6352_s2 + $0x5] sm:$0x1]  ;;  %v4437_v30 = vpop.eup %4436  ;;  %v1487_v33 = vadd.f32 1.0, %v4431_v11  ;;  %v4099_v41 = vmul.f32 -1.442695, %v4098_v29 }
  0x73   : > { %1199 = vst.msk [vmem:[#allocation4 + $0x1c] sm:$0xf] %vm287_vm0, %v1186_v28  ;;  %v1224_v35 = vmul.f32 %v1222_v24, %v1186_v28  ;;  %v4087_v24 = vmul.f32 -1.442695, %v4086_v10  ;;  %4460 = vpow2.f32 %v4081_v15  ;;  %v4093_v28 = vmul.f32 -1.442695, %v4092_v20 }
  0x74   : > { %1201 = vst.msk [vmem:[#allocation5 + $0x20] sm:$0xf] %vm287_vm0, %v1197_v31  ;;  %v1234_v39 = vmul.f32 %v1232_v27, %v1197_v31  ;;  %4462 = vpow2.f32 %v4085_v19  ;;  %v4097_v37 = vmul.f32 -1.442695, %v4096_v26  ;;  %v4103_v45 = vmul.f32 -1.442695, %v4102_v34 }
  0x75   : > { %v1226_v42 = vadd.f32 %v4201_v32, %v1224_v35  ;;  %v1352_v32 = vrot.slane %v4435_v21, %v4868_v62  ;;  %v4439_v35 = vpop.eup %4438  ;;  %4464 = vpow2.f32 %v4087_v24  ;;  %v4111_v61 = vmul.f32 -1.442695, %v4110_v50  ;;  %v4226_v5 = vld [vmem:[%s4793_s20 + $0xc] sm:$0xf]  ;;  %v284_v20 = vld [vmem:[%s5055_s11] sm:$0xf] }
  0x76   : > { %v1236_v46 = vadd.f32 %v4202_v36, %v1234_v39  ;;  %v4441_v38 = vpop.eup %4440  ;;  %4466 = vpow2.f32 %v4091_v25  ;;  %288 = vst.msk [vmem:[#allocation2] sm:$0xf] %vm287_vm0, %v284_v20  ;;  %v4231_v25 = vld [vmem:[%s4793_s20 + $0x34] sm:$0xf] }
  0x77   : > { %v1227_v49 = vmax.f32 %v1226_v42, 0.0  ;;  %v4443_v42 = vpop.eup %4442  ;;  %4468 = vpow2.f32 %v4093_v28 }
  0x78   : > { %v1237_v53 = vmax.f32 %v1236_v46, 0.0  ;;  %v4104_v46 = vld [vmem:[%s6352_s2 + $0x19] sm:$0x1]  ;;  %4470 = vrcp.f32 %v1487_v33  ;;  %v1392_v57 = vrot.slane %v4443_v42, %v4868_v62 }
  0x79   : > { %1239 = vst.msk [vmem:[#allocation4 + $0x20] sm:$0xf] %vm287_vm0, %v1227_v49  ;;  %v1264_v58 = vmul.f32 %v1262_v43, %v1227_v49  ;;  %v4220_v43 = vld [vmem:[%s4793_s20 + $0x10] sm:$0xf]  ;;  %v1495_v49 = vadd.f32 1.0, %v4437_v30  ;;  %4472 = vpow2.f32 %v4097_v37 }
  0x7a   : > { %1241 = vst.msk [vmem:[#allocation5 + $0x1c] sm:$0xf] %vm287_vm0, %v1237_v53  ;;  %v1274_v63 = vmul.f32 %v1272_v47, %v1237_v53  ;;  %v5028_v47 = vpop.eup %4444  ;;  %v1382_v53 = vrot.slane %v4441_v38, %v4868_v62  ;;  %4474 = vpow2.f32 %v4099_v41  ;;  %v4128_v38 = vld [vmem:[%s6352_s2 + $0x15] sm:$0x1] }
  0x7b   : > { %v1266_v2 = vadd.f32 %v4207_v54, %v1264_v58  ;;  %v5034_v51 = vpop.eup %4446  ;;  %v303_v54 = vadd.f32 1.0, %v4439_v35  ;;  %v4105_v58 = vmul.f32 -1.442695, %v4104_v46  ;;  %4476 = vpow2.f32 %v4103_v45 }
  0x7c   : > { %v1276_v6 = vadd.f32 %v4208_v59, %v1274_v63  ;;  %v4449_v55 = vpop.eup %4448  ;;  %v4116_v63 = vld [vmem:[%s6352_s2 + $0x17] sm:$0x1]  ;;  %4478 = vrcp.f32 %v1495_v49  ;;  %v1472_v41 = vrot.slane %v5034_v51, %v4868_v62  ;;  %v4129_v49 = vmul.f32 -1.442695, %v4128_v38 }
  0x7d   : > { %v1267_v12 = vmax.f32 %v1266_v2, 0.0  ;;  %v5038_v59 = vpop.eup %4450  ;;  %v4225_v2 = vld [vmem:[%s4793_s20 + $0x30] sm:$0xf]  ;;  %4480 = vrcp.f32 %v303_v54  ;;  %v4117_v9 = vmul.f32 -1.442695, %v4116_v63 }
  0x7e   : > { %v1277_v18 = vmax.f32 %v1276_v6, 0.0  ;;  %v5043_v0 = vpop.eup %4452  ;;  %4482 = vpow2.f32 %v4105_v58 }
  0x7f   : > { %1279 = vst.msk [vmem:[#allocation4 + $0x24] sm:$0xf] %vm287_vm0, %v1267_v12  ;;  %v1304_v22 = vmul.f32 %v1302_v3, %v1267_v12  ;;  %v4122_v3 = vld [vmem:[%s6352_s2 + $0x16] sm:$0x1]  ;;  %v4455_v4 = vpop.eup %4454  ;;  %v1422_v12 = vrot.slane %v4449_v55, %v4868_v62  ;;  %4484 = vpow2.f32 %v4111_v61 }
  0x80   : > { %1281 = vst.msk [vmem:[#allocation5 + $0x18] sm:$0xf] %vm287_vm0, %v1277_v18  ;;  %v1314_v13 = vmul.f32 %v1312_v8, %v1277_v18  ;;  %v4123_v15 = vmul.f32 -1.442695, %v4122_v3  ;;  %v1432_v18 = vrot.slane %v5028_v47, %v4868_v62  ;;  %v337_v19 = vadd.f32 1.0, %v4455_v4 }
  0x81   : > { %v1306_v27 = vadd.f32 %v4213_v7, %v1304_v22  ;;  %v4457_v7 = vpop.eup %4456  ;;  %4486 = vpow2.f32 %v4117_v9  ;;  %v1733_v4 = vld [vmem:[#allocation4 + $0x8] sm:$0xf]  ;;  %v1736_v9 = vld [vmem:[#allocation4 + $0x14] sm:$0xf] }
  0x82   : > { %v1316_v31 = vadd.f32 %v4214_v23, %v1314_v13  ;;  %v4459_v10 = vpop.eup %4458  ;;  %v345_v23 = vadd.f32 1.0, %v4457_v7  ;;  %4488 = vpow2.f32 %v4123_v15  ;;  %v1515_v7 = vld [vmem:[%s4793_s20] sm:$0xf] }
  0x83   : > { %v1307_v36 = vmax.f32 %v1306_v27, 0.0  ;;  %v4461_v16 = vpop.eup %4460  ;;  %v379_v26 = vadd.f32 1.0, %v4459_v10  ;;  %4490 = vrcp.f32 %v337_v19 }
  0x84   : > { %v1317_v39 = vmax.f32 %v1316_v31, 0.0  ;;  %v4463_v21 = vpop.eup %4462  ;;  %v387_v29 = vadd.f32 1.0, %v4461_v16  ;;  %4492 = vrcp.f32 %v345_v23  ;;  %v1737_v16 = vld [vmem:[#allocation4 + $0x18] sm:$0xf]  ;;  %v1739_v23 = vld [vmem:[#allocation4 + $0x20] sm:$0xf] }
  0x85   : > { %1319 = vst.msk [vmem:[#allocation4 + $0x28] sm:$0xf] %vm287_vm0, %v1307_v36  ;;  %v1344_v44 = vmul.f32 %v1342_v14, %v1307_v36  ;;  %v4465_v24 = vpop.eup %4464  ;;  %v4232_v14 = vld [vmem:[%s4793_s20 + $0x8] sm:$0xf]  ;;  %v421_v33 = vadd.f32 1.0, %v4463_v21  ;;  %v310_v36 = vrot.slane %v5043_v0, %v4868_v62  ;;  %4494 = vrcp.f32 %v379_v26 }
  0x86   : > { %1321 = vst.msk [vmem:[#allocation5 + $0x14] sm:$0xf] %vm287_vm0, %v1317_v39  ;;  %v1354_v48 = vmul.f32 %v1352_v32, %v1317_v39  ;;  %v4467_v27 = vpop.eup %4466  ;;  %v1462_v32 = vrot.slane %v5038_v59, %v4868_v62  ;;  %v429_v37 = vadd.f32 1.0, %v4465_v24  ;;  %4496 = vrcp.f32 %v387_v29  ;;  %v1731_v59 = vld [vmem:[#allocation4] sm:$0xf] }
  0x87   : > { %v1346_v52 = vadd.f32 %v4219_v40, %v1344_v44  ;;  %v4469_v30 = vpop.eup %4468  ;;  %v463_v42 = vadd.f32 1.0, %v4467_v27  ;;  %4498 = vrcp.f32 %v421_v33  ;;  %v312_v55 = vmul.f32 %v310_v36, %v284_v20  ;;  %v1740_v24 = vld [vmem:[#allocation4 + $0x24] sm:$0xf] }
  0x88   : > { %v1356_v56 = vadd.f32 %v4220_v43, %v1354_v48  ;;  %v5070_v34 = vpop.eup %4470  ;;  %v471_v45 = vadd.f32 1.0, %v4469_v30  ;;  %v4237_v48 = vld [vmem:[%s4793_s20 + $0x38] sm:$0xf]  ;;  %4500 = vrcp.f32 %v429_v37 }
  0x89   : > { %v1347_v60 = vmax.f32 %v1346_v52, 0.0  ;;  %v4473_v39 = vpop.eup %4472  ;;  %v4238_v52 = vld [vmem:[%s4793_s20 + $0x4] sm:$0xf]  ;;  %4502 = vrcp.f32 %v463_v42  ;;  %v1502_v63 = vrot.slane %v5070_v34, %v4868_v62 }
  0x8a   : > { %v1357_v1 = vmax.f32 %v1356_v56, 0.0  ;;  %v4475_v43 = vpop.eup %4474  ;;  %v505_v54 = vadd.f32 1.0, %v4473_v39  ;;  %4504 = vrcp.f32 %v471_v45  ;;  %v1774_v45 = vld [vmem:[#allocation5 + $0x18] sm:$0xf] }
  0x8b   : > { %1359 = vst.msk [vmem:[#allocation4 + $0x2c] sm:$0xf] %vm287_vm0, %v1347_v60  ;;  %v1384_v6 = vmul.f32 %v1382_v53, %v1347_v60  ;;  %v4477_v46 = vpop.eup %4476  ;;  %v1732_v60 = vld [vmem:[#allocation4 + $0x4] sm:$0xf]  ;;  %4506 = vpow2.f32 %v4129_v49 }
  0x8c   : > { %1361 = vst.msk [vmem:[#allocation5 + $0x10] sm:$0xf] %vm287_vm0, %v1357_v1  ;;  %v1394_v8 = vmul.f32 %v1392_v57, %v1357_v1  ;;  %v4479_v50 = vpop.eup %4478  ;;  %v513_v57 = vadd.f32 1.0, %v4475_v43  ;;  %v547_v0 = vadd.f32 1.0, %v4477_v46  ;;  %4508 = vrcp.f32 %v505_v54  ;;  %v1741_v30 = vld [vmem:[#allocation4 + $0x28] sm:$0xf] }
  0x8d   : > { %v1386_v11 = vadd.f32 %v4225_v2, %v1384_v6  ;;  %v5082_v51 = vpop.eup %4480  ;;  %v1512_v3 = vrot.slane %v4479_v50, %v4868_v62  ;;  %v4070_v6 = vld [vmem:[%s5055_s11 + $0x4] sm:$0xf]  ;;  %v1775_v46 = vld [vmem:[#allocation5 + $0x1c] sm:$0xf] }
  0x8e   : > { %v1396_v17 = vadd.f32 %v4226_v5, %v1394_v8  ;;  %v4483_v58 = vpop.eup %4482  ;;  %v1734_v5 = vld [vmem:[#allocation4 + $0xc] sm:$0xf]  ;;  %v1735_v8 = vld [vmem:[#allocation4 + $0x10] sm:$0xf]  ;;  %4510 = vrcp.f32 %v513_v57 }
  0x8f   : > { %v1387_v22 = vmax.f32 %v1386_v11, 0.0  ;;  %v4485_v1 = vpop.eup %4484  ;;  %v4243_v11 = vld [vmem:[%s4793_s20 + $0x3c] sm:$0xf]  ;;  %v5095_v19 = vadd.f32 1.0, %v4483_v58  ;;  %4512 = vrcp.f32 %v547_v0 }
  0x90   : > { %v1397_v13 = vmax.f32 %v1396_v17, 0.0  ;;  %v1738_v17 = vld [vmem:[#allocation4 + $0x1c] sm:$0xf]  ;;  %v5097_v20 = vpop.eup %4486 }
  0x91   : > { %1399 = vst.msk [vmem:[#allocation4 + $0x30] sm:$0xf] %vm287_vm0, %v1387_v22  ;;  %v1424_v28 = vmul.f32 %v1422_v12, %v1387_v22  ;;  %v5091_v12 = vadd.f32 %v4070_v6, %v312_v55  ;;  %v5105_v26 = vpop.eup %4488  ;;  %4514 = vrcp.f32 %v5095_v19 }
  0x92   : > { %1401 = vst.msk [vmem:[#allocation5 + $0xc] sm:$0xf] %vm287_vm0, %v1397_v13  ;;  %v1434_v31 = vmul.f32 %v1432_v18, %v1397_v13  ;;  %v321_v18 = vrot.slane %v5082_v51, %v4868_v62  ;;  %v5102_v13 = vadd.f32 1.0, %v4485_v1  ;;  %v5115_v33 = vpop.eup %4490  ;;  %v4114_v51 = vld [vmem:[%s6352_s2 + $0x8] sm:$0x1] }
  0x93   : > { %v1426_v35 = vadd.f32 %v4231_v25, %v1424_v28  ;;  %v6357_v25 = vmax.f32 %v5091_v12, 0.0 }
  0x94   : > { %v1436_v40 = vadd.f32 %v4232_v14, %v1434_v31  ;;  %v1742_v31 = vld [vmem:[#allocation4 + $0x2c] sm:$0xf]  ;;  %4516 = vrcp.f32 %v5102_v13 }
  0x95   : > { %v1427_v44 = vmax.f32 %v1426_v35, 0.0  ;;  %329 = vst.msk [vmem:[#allocation2 + $0x4] sm:$0xf] %vm287_vm0, %v6357_v25 }
  0x96   : > { %v1437_v47 = vmax.f32 %v1436_v40, 0.0  ;;  %v1772_v40 = vld [vmem:[#allocation5 + $0x10] sm:$0xf] }
  0x97   : > { %1439 = vst.msk [vmem:[#allocation4 + $0x34] sm:$0xf] %vm287_vm0, %v1427_v44  ;;  %v1464_v53 = vmul.f32 %v1462_v32, %v1427_v44  ;;  %v1773_v44 = vld [vmem:[#allocation5 + $0x14] sm:$0xf] }
  0x98   : > { %1441 = vst.msk [vmem:[#allocation5 + $0x8] sm:$0xf] %vm287_vm0, %v1437_v47  ;;  %v1474_v56 = vmul.f32 %v1472_v41, %v1437_v47  ;;  %v1743_v32 = vld [vmem:[#allocation4 + $0x30] sm:$0xf]  ;;  %v5124_v41 = vpop.eup %4492 }
  0x99   : > { %v1466_v61 = vadd.f32 %v4237_v48, %v1464_v53  ;;  %v1771_v39 = vld [vmem:[#allocation5 + $0xc] sm:$0xf]  ;;  %v5130_v49 = vpop.eup %4494 }
  0x9a   : > { %v1476_v2 = vadd.f32 %v4238_v52, %v1474_v56  ;;  %v5146_v57 = vpop.eup %4496 }
  0x9b   : > { %v1467_v10 = vmax.f32 %v1466_v61, 0.0 }
  0x9c   : > { %v1477_v15 = vmax.f32 %v1476_v2, 0.0 }
  0x9d   : > { %1479 = vst.msk [vmem:[#allocation4 + $0x38] sm:$0xf] %vm287_vm0, %v1467_v10  ;;  %v1504_v22 = vmul.f32 %v1502_v63, %v1467_v10  ;;  %v5151_v63 = vpop.eup %4498 }
  0x9e   : > { %1481 = vst.msk [vmem:[#allocation5 + $0x4] sm:$0xf] %vm287_vm0, %v1477_v15  ;;  %v1514_v27 = vmul.f32 %v1512_v3, %v1477_v15  ;;  %v1744_v52 = vld [vmem:[#allocation4 + $0x34] sm:$0xf] }
  0x9f   : > { %v1770_v38 = vld [vmem:[#allocation5 + $0x8] sm:$0xf]  ;;  %v1506_v47 = vadd.f32 %v4243_v11, %v1504_v22 }
  0xa0   : > { %v1516_v42 = vadd.f32 %v1515_v7, %v1514_v27 }
  0xa1   : > { %v5099_v21 = vpop.permute.xlu1 %1749  ;;  %v1507_v3 = vmax.f32 %v1506_v47, 0.0 }
  0xa2   : > { %v5109_v14 = vmul.f32 %v5099_v21, %v1731_v59  ;;  %v5112_v28 = vmul.f32 %v5099_v21, %v1732_v60  ;;  %v1754_v29 = vmul.f32 %v5099_v21, %v1733_v4  ;;  %v1755_v34 = vmul.f32 %v5099_v21, %v1734_v5  ;;  %v5156_v4 = vpop.eup %4500 }
  0xa3   : > { %v1756_v35 = vmul.f32 %v5099_v21, %v1735_v8  ;;  %v1757_v36 = vmul.f32 %v5099_v21, %v1736_v9  ;;  %v1758_v37 = vmul.f32 %v5099_v21, %v1737_v16  ;;  %v1759_v43 = vmul.f32 %v5099_v21, %v1738_v17  ;;  %v5162_v10 = vpop.eup %4502  ;;  %1519 = vst.msk [vmem:[#allocation4 + $0x3c] sm:$0xf] %vm287_vm0, %v1507_v3 }
  0xa4   : > { %v5128_v48 = vmul.f32 %v5099_v21, %v1739_v23  ;;  %v5135_v53 = vmul.f32 %v5099_v21, %v1740_v24  ;;  %v5138_v54 = vmul.f32 %v5099_v21, %v1741_v30  ;;  %v5141_v55 = vmul.f32 %v5099_v21, %v1742_v31  ;;  %v1745_v8 = vld [vmem:[#allocation4 + $0x38] sm:$0xf]  ;;  %v5168_v23 = vpop.eup %4504 }
  0xa5   : > { %v5132_v50 = vpop.permute.xlu1 %1786  ;;  %v5144_v56 = vmul.f32 %v5099_v21, %v1743_v32  ;;  %v1517_v58 = vmax.f32 %v1516_v42, 0.0  ;;  %v5160_v9 = vmul.f32 %v5099_v21, %v1744_v52  ;;  %v1769_v11 = vld [vmem:[#allocation5 + $0x4] sm:$0xf]  ;;  %v5166_v22 = vmul.f32 %v5099_v21, %v1745_v8  ;;  %v5174_v31 = vpop.eup %4506 }
  0xa6   : > { %v1791_v59 = vmul.f32 %v5132_v50, %v1770_v38  ;;  %v1792_v60 = vmul.f32 %v5132_v50, %v1771_v39  ;;  %v1793_v61 = vmul.f32 %v5132_v50, %v1772_v40  ;;  %v1794_v0 = vmul.f32 %v5132_v50, %v1773_v44  ;;  %v5177_v38 = vpop.eup %4508 }
  0xa7   : > { %v1795_v1 = vmul.f32 %v5132_v50, %v1774_v45  ;;  %v1796_v2 = vmul.f32 %v5132_v50, %v1775_v46  ;;  %1520 = vst.msk [vmem:[#allocation5] sm:$0xf] %vm287_vm0, %v1517_v58  ;;  %v1790_v24 = vmul.f32 %v5132_v50, %v1769_v11  ;;  %v5182_v44 = vpop.eup %4510 }
  0xa8   : > { %v1807_v5 = vadd.f32 %v1791_v59, %v1754_v29  ;;  %v1808_v6 = vadd.f32 %v1792_v60, %v1755_v34  ;;  %v1809_v7 = vadd.f32 %v1793_v61, %v1756_v35  ;;  %v1810_v15 = vadd.f32 %v1794_v0, %v1757_v36  ;;  %v5184_v58 = vpop.eup %4512 }
  0xa9   : > { %v1811_v16 = vadd.f32 %v1795_v1, %v1758_v37  ;;  %v1812_v17 = vadd.f32 %v1796_v2, %v1759_v43  ;;  %v1776_v37 = vld [vmem:[#allocation5 + $0x20] sm:$0xf]  ;;  %v1806_v39 = vadd.f32 %v1790_v24, %v5112_v28 }
  0xaa   : > { %v1835_v27 = vsel %vm287_vm0, %v1807_v5, 0.0  ;;  %v1842_v29 = vsel %vm287_vm0, %v1808_v6, 0.0  ;;  %v1849_v30 = vsel %vm287_vm0, %v1809_v7, 0.0  ;;  %v1856_v36 = vsel %vm287_vm0, %v1810_v15, 0.0 }
  0xab   : > { %v1836_v32 = vrot.slane %v1835_v27, 4  ;;  %v1843_v34 = vrot.slane %v1842_v29, 4  ;;  %v1850_v35 = vrot.slane %v1849_v30, 4  ;;  %v1857_v40 = vrot.slane %v1856_v36, 4 }
  0xac   : > { %v1863_v42 = vsel %vm287_vm0, %v1811_v16, 0.0  ;;  %v1870_v43 = vsel %vm287_vm0, %v1812_v17, 0.0  ;;  %v1828_v59 = vsel %vm287_vm0, %v1806_v39, 0.0  ;;  %v1797_v0 = vmul.f32 %v5132_v50, %v1776_v37 }
  0xad   : > { %v1837_v45 = vadd.f32 %v1836_v32, %v1835_v27  ;;  %v1844_v46 = vadd.f32 %v1843_v34, %v1842_v29  ;;  %v1851_v47 = vadd.f32 %v1850_v35, %v1849_v30  ;;  %v1864_v52 = vrot.slane %v1863_v42, 4 }
  0xae   : > { %v1858_v60 = vadd.f32 %v1857_v40, %v1856_v36  ;;  %v1871_v61 = vrot.slane %v1870_v43, 4  ;;  %v1768_v28 = vld [vmem:[#allocation5] sm:$0xf]  ;;  %v1829_v1 = vrot.slane %v1828_v59, 4 }
  0xaf   : > { %v1838_v2 = vrot.slane %v1837_v45, 2  ;;  %v1845_v3 = vrot.slane %v1844_v46, 2  ;;  %v1852_v5 = vrot.slane %v1851_v47, 2  ;;  %v1789_v6 = vmul.f32 %v5132_v50, %v1768_v28 }
  0xb0   : > { %v1859_v7 = vrot.slane %v1858_v60, 2  ;;  %v1865_v8 = vadd.f32 %v1864_v52, %v1863_v42  ;;  %v1872_v11 = vadd.f32 %v1871_v61, %v1870_v43  ;;  %v1830_v15 = vadd.f32 %v1829_v1, %v1828_v59  ;;  %v1746_v42 = vld [vmem:[#allocation4 + $0x3c] sm:$0xf]  ;;  %v1777_v43 = vld [vmem:[#allocation5 + $0x24] sm:$0xf] }
  0xb1   : > { %v1839_v16 = vadd.f32 %v1838_v2, %v1837_v45  ;;  %v1846_v17 = vadd.f32 %v1845_v3, %v1844_v46  ;;  %v1853_v24 = vadd.f32 %v1852_v5, %v1851_v47  ;;  %v1805_v27 = vadd.f32 %v1789_v6, %v5109_v14  ;;  %v1778_v47 = vld [vmem:[#allocation5 + $0x28] sm:$0xf]  ;;  %v1779_v59 = vld [vmem:[#allocation5 + $0x2c] sm:$0xf]  ;;  %v1780_v5 = vld [vmem:[#allocation5 + $0x30] sm:$0xf] }
  0xb2   : > { %v1860_v29 = vadd.f32 %v1859_v7, %v1858_v60  ;;  %v1866_v30 = vrot.slane %v1865_v8, 2  ;;  %v1873_v32 = vrot.slane %v1872_v11, 2  ;;  %v1831_v34 = vrot.slane %v1830_v15, 2  ;;  %v1783_v60 = vld [vmem:[#allocation5 + $0x3c] sm:$0xf] }
  0xb3   : > { %v1840_v35 = vrot.slane %v1839_v16, 1  ;;  %v1847_v36 = vrot.slane %v1846_v17, 1  ;;  %v1854_v37 = vrot.slane %v1853_v24, 1  ;;  %v1821_v39 = vsel %vm287_vm0, %v1805_v27, 0.0  ;;  %v1781_v6 = vld [vmem:[#allocation5 + $0x34] sm:$0xf] }
  0xb4   : > { %v1861_v40 = vrot.slane %v1860_v29, 1  ;;  %v1867_v28 = vadd.f32 %v1866_v30, %v1865_v8  ;;  %v1874_v25 = vadd.f32 %v1873_v32, %v1872_v11  ;;  %v1822_v52 = vrot.slane %v1821_v39, 4 }
  0xb5   : > { %v1832_v45 = vadd.f32 %v1831_v34, %v1830_v15  ;;  %v5191_v46 = vadd.f32 %v1840_v35, %v1839_v16  ;;  %v5193_v14 = vadd.f32 %v1847_v36, %v1846_v17  ;;  %v5195_v61 = vadd.f32 %v1854_v37, %v1853_v24  ;;  %v1782_v15 = vld [vmem:[#allocation5 + $0x38] sm:$0xf]  ;;  %v5202_v17 = vld [vmem:[%s5055_s11 + $0x3c] sm:$0xf] }
  0xb6   : > { %v5197_v1 = vadd.f32 %v1861_v40, %v1860_v29  ;;  %v1868_v2 = vrot.slane %v1867_v28, 1  ;;  %v1875_v3 = vrot.slane %v1874_v25, 1  ;;  %v1823_v7 = vadd.f32 %v1822_v52, %v1821_v39  ;;  %290 = vst.msk [vmem:[#allocation3 + $0x3c] sm:$0xf] %vm287_vm0, %v5202_v17 }
  0xb7   : > { %v1833_v8 = vrot.slane %v1832_v45, 1  ;;  %v1767_v11 = vmul.f32 %v5099_v21, %v1746_v42  ;;  %v1798_v16 = vmul.f32 %v5132_v50, %v1777_v43  ;;  %v1799_v24 = vmul.f32 %v5132_v50, %v1778_v47 }
  0xb8   : > { %v5204_v27 = vadd.f32 %v1868_v2, %v1867_v28  ;;  %v5206_v30 = vadd.f32 %v1875_v3, %v1874_v25  ;;  %v1800_v29 = vmul.f32 %v5132_v50, %v1779_v59  ;;  %v1824_v32 = vrot.slane %v1823_v7, 2 }
  0xb9   : > { %v1834_v34 = vadd.f32 %v1833_v8, %v1832_v45  ;;  %v1801_v21 = vmul.f32 %v5132_v50, %v1780_v5  ;;  %v1802_v35 = vmul.f32 %v5132_v50, %v1781_v6  ;;  %v1803_v36 = vmul.f32 %v5132_v50, %v1782_v15  ;;  %v5228_v5 = vpop.permute.xlu1 %2161 }
  0xba   : > { %v1804_v25 = vmul.f32 %v5132_v50, %v1783_v60  ;;  %v1813_v37 = vadd.f32 %v1797_v0, %v5128_v48  ;;  %v1814_v39 = vadd.f32 %v1798_v16, %v5135_v53  ;;  %v1825_v40 = vadd.f32 %v1824_v32, %v1823_v7 }
  0xbb   : > { %v1815_v28 = vadd.f32 %v1799_v24, %v5138_v54  ;;  %v1816_v42 = vadd.f32 %v1800_v29, %v5141_v55  ;;  %v1817_v43 = vadd.f32 %v1801_v21, %v5144_v56  ;;  %v1818_v52 = vadd.f32 %v1802_v35, %v5160_v9 }
  0xbc   : > { %v1819_v45 = vadd.f32 %v1803_v36, %v5166_v22  ;;  %v1820_v47 = vadd.f32 %v1804_v25, %v1767_v11  ;;  %v1877_v50 = vsel %vm287_vm0, %v1813_v37, 0.0  ;;  %v1826_v59 = vrot.slane %v1825_v40, 1 }
  0xbd   : > { %v1878_v48 = vrot.slane %v1877_v50, 4  ;;  %v1884_v53 = vsel %vm287_vm0, %v1814_v39, 0.0  ;;  %v1891_v0 = vsel %vm287_vm0, %v1815_v28, 0.0  ;;  %v1898_v56 = vsel %vm287_vm0, %v1816_v42, 0.0 }
  0xbe   : > { %v1885_v54 = vrot.slane %v1884_v53, 4  ;;  %v1892_v55 = vrot.slane %v1891_v0, 4  ;;  %v1905_v60 = vsel %vm287_vm0, %v1817_v43, 0.0  ;;  %v1827_v9 = vadd.f32 %v1826_v59, %v1825_v40  ;;  %v5241_v59 = vpop.permute.xlu1 %2363 }
  0xbf   : > { %v1879_v2 = vadd.f32 %v1878_v48, %v1877_v50  ;;  %v1899_v22 = vrot.slane %v1898_v56, 4  ;;  %v1906_v3 = vrot.slane %v1905_v60, 4  ;;  %v1912_v8 = vsel %vm287_vm0, %v1818_v52, 0.0 }
  0xc0   : > { %v1886_v6 = vadd.f32 %v1885_v54, %v1884_v53  ;;  %v1893_v7 = vadd.f32 %v1892_v55, %v1891_v0  ;;  %v1919_v11 = vsel %vm287_vm0, %v1819_v45, 0.0  ;;  %v1950_v15 = vsel %vm1949_vm1, %v1834_v34, %v1827_v9  ;;  %v2345_v54 = vld [vmem:[#allocation4] sm:$0xf]  ;;  %v2346_v9 = vld [vmem:[#allocation4 + $0x4] sm:$0xf] }
  0xc1   : > { %v1880_v16 = vrot.slane %v1879_v2, 2  ;;  %v1900_v24 = vadd.f32 %v1899_v22, %v1898_v56  ;;  %v1907_v29 = vadd.f32 %v1906_v3, %v1905_v60  ;;  %v1952_v32 = vsel %vm1951_vm2, %v5191_v46, %v1950_v15 }
  0xc2   : > { %v1887_v21 = vrot.slane %v1886_v6, 2  ;;  %v1894_v35 = vrot.slane %v1893_v7, 2  ;;  %v1913_v36 = vrot.slane %v1912_v8, 4  ;;  %v1954_v25 = vsel %vm1953_vm3, %v5193_v14, %v1952_v32 }
  0xc3   : > { %v1881_v37 = vadd.f32 %v1880_v16, %v1879_v2  ;;  %v1901_v39 = vrot.slane %v1900_v24, 2  ;;  %v1908_v40 = vrot.slane %v1907_v29, 2  ;;  %v1956_v28 = vsel %vm1955_vm4, %v5195_v61, %v1954_v25  ;;  %v2349_v16 = vld [vmem:[#allocation4 + $0x10] sm:$0xf] }
  0xc4   : > { %v1888_v42 = vadd.f32 %v1887_v21, %v1886_v6  ;;  %v1895_v34 = vadd.f32 %v1894_v35, %v1893_v7  ;;  %v1914_v43 = vadd.f32 %v1913_v36, %v1912_v8  ;;  %v1958_v52 = vsel %vm1957_vm5, %v5197_v1, %v1956_v28  ;;  %v2347_v6 = vld [vmem:[#allocation4 + $0x8] sm:$0xf]  ;;  %v2348_v7 = vld [vmem:[#allocation4 + $0xc] sm:$0xf]  ;;  %v2350_v35 = vld [vmem:[#allocation4 + $0x14] sm:$0xf] }
  0xc5   : > { %v1882_v45 = vrot.slane %v1881_v37, 1  ;;  %v1902_v46 = vadd.f32 %v1901_v39, %v1900_v24  ;;  %v1909_v50 = vadd.f32 %v1908_v40, %v1907_v29  ;;  %v1960_v14 = vsel %vm1959_vm6, %v5204_v27, %v1958_v52  ;;  %v2351_v36 = vld [vmem:[#allocation4 + $0x18] sm:$0xf] }
  0xc6   : > { %v1889_v48 = vrot.slane %v1888_v42, 1  ;;  %v1896_v53 = vrot.slane %v1895_v34, 1  ;;  %v1915_v0 = vrot.slane %v1914_v43, 2  ;;  %v1962_v61 = vsel %vm1961_vm7, %v5206_v30, %v1960_v14 }
  0xc7   : > { %v1883_v55 = vadd.f32 %v1882_v45, %v1881_v37  ;;  %v1903_v56 = vrot.slane %v1902_v46, 1  ;;  %v1910_v60 = vrot.slane %v1909_v50, 1  ;;  %1972 = vxpose.xlu0.b32.start [1/2] (short) (narrow) %v1962_v61, 16  ;;  %v1920_v3 = vrot.slane %v1919_v11, 4  ;;  %v2352_v37 = vld [vmem:[#allocation4 + $0x1c] sm:$0xf] }
  0xc8   : > { %v1890_v1 = vadd.f32 %v1889_v48, %v1888_v42  ;;  %v1897_v2 = vadd.f32 %v1896_v53, %v1895_v34  ;;  %v1916_v22 = vadd.f32 %v1915_v0, %v1914_v43  ;;  %v1926_v15 = vsel %vm287_vm0, %v1820_v47, 0.0  ;;  %v2384_v47 = vld [vmem:[#allocation5 + $0x8] sm:$0xf]  ;;  %v2385_v42 = vld [vmem:[#allocation5 + $0xc] sm:$0xf]  ;;  %v5254_v34 = vpop.permute.xlu1 %2400 }
  0xc9   : > { %v1904_v8 = vadd.f32 %v1903_v56, %v1902_v46  ;;  %v1911_v27 = vadd.f32 %v1910_v60, %v1909_v50  ;;  %v2366_v24 = vmul.f32 %v5241_v59, %v2345_v54  ;;  %v1921_v30 = vadd.f32 %v1920_v3, %v1919_v11  ;;  %v2382_v46 = vld [vmem:[#allocation5] sm:$0xf]  ;;  %v2383_v50 = vld [vmem:[#allocation5 + $0x4] sm:$0xf]  ;;  %v2386_v54 = vld [vmem:[#allocation5 + $0x10] sm:$0xf] }
  0xca   : > { %v1917_v29 = vrot.slane %v1916_v22, 1  ;;  %v1927_v32 = vrot.slane %v1926_v15, 4  ;;  %v1963_v21 = vsel %vm1949_vm1, %v1890_v1, %v1883_v55  ;;  %v2367_v39 = vmul.f32 %v5241_v59, %v2346_v9  ;;  %v2387_v61 = vld [vmem:[#allocation5 + $0x14] sm:$0xf]  ;;  %v2388_v1 = vld [vmem:[#allocation5 + $0x18] sm:$0xf] }
  0xcb   : > { %v1964_v25 = vsel %vm1951_vm2, %v1897_v2, %v1963_v21  ;;  %v2368_v40 = vmul.f32 %v5241_v59, %v2347_v6  ;;  %v2369_v28 = vmul.f32 %v5241_v59, %v2348_v7  ;;  %v1922_v11 = vrot.slane %v1921_v30, 2  ;;  %v2389_v2 = vld [vmem:[#allocation5 + $0x1c] sm:$0xf] }
  0xcc   : > { %v1918_v43 = vadd.f32 %v1917_v29, %v1916_v22  ;;  %v1928_v52 = vadd.f32 %v1927_v32, %v1926_v15  ;;  %v1965_v45 = vsel %vm1953_vm3, %v1904_v8, %v1964_v25  ;;  %v2370_v48 = vmul.f32 %v5241_v59, %v2349_v16 }
  0xcd   : > { %v1966_v14 = vsel %vm1955_vm4, %v1911_v27, %v1965_v45  ;;  %v2371_v53 = vmul.f32 %v5241_v59, %v2350_v35  ;;  %v2372_v0 = vmul.f32 %v5241_v59, %v2351_v36  ;;  %v1923_v55 = vadd.f32 %v1922_v11, %v1921_v30 }
  0xce   : > { %v1929_v56 = vrot.slane %v1928_v52, 2  ;;  %v1967_v60 = vsel %vm1957_vm5, %v1918_v43, %v1966_v14  ;;  %v2373_v9 = vmul.f32 %v5241_v59, %v2352_v37  ;;  %v2403_v22 = vmul.f32 %v5254_v34, %v2382_v46 }
  0xcf   : > { %v2404_v3 = vmul.f32 %v5254_v34, %v2383_v50  ;;  %v2405_v6 = vmul.f32 %v5254_v34, %v2384_v47  ;;  %v2406_v7 = vmul.f32 %v5254_v34, %v2385_v42  ;;  %v1924_v8 = vrot.slane %v1923_v55, 1 }
  0xd0   : > { %v1930_v27 = vadd.f32 %v1929_v56, %v1928_v52  ;;  %v2407_v15 = vmul.f32 %v5254_v34, %v2386_v54  ;;  %v2408_v16 = vmul.f32 %v5254_v34, %v2387_v61  ;;  %v2409_v29 = vmul.f32 %v5254_v34, %v2388_v1 }
  0xd1   : > { %v2410_v30 = vmul.f32 %v5254_v34, %v2389_v2  ;;  %v2419_v32 = vadd.f32 %v2403_v22, %v2366_v24  ;;  %v2420_v21 = vadd.f32 %v2404_v3, %v2367_v39  ;;  %v1925_v35 = vadd.f32 %v1924_v8, %v1923_v55 }
  0xd2   : > { %v1931_v36 = vrot.slane %v1930_v27, 1  ;;  %v2421_v25 = vadd.f32 %v2405_v6, %v2368_v40  ;;  %v2422_v37 = vadd.f32 %v2406_v7, %v2369_v28  ;;  %v2423_v43 = vadd.f32 %v2407_v15, %v2370_v48 }
  0xd3   : > { %v2424_v47 = vadd.f32 %v2408_v16, %v2371_v53  ;;  %v2425_v11 = vadd.f32 %v2409_v29, %v2372_v0  ;;  %v2426_v42 = vadd.f32 %v2410_v30, %v2373_v9  ;;  %v1968_v52 = vsel %vm1959_vm6, %v1925_v35, %v1967_v60 }
  0xd4   : > { %v1932_v45 = vadd.f32 %v1931_v36, %v1930_v27  ;;  %v2435_v46 = vsel %vm287_vm0, %v2419_v32, 0.0  ;;  %v2442_v50 = vsel %vm287_vm0, %v2420_v21, 0.0  ;;  %v2449_v24 = vsel %vm287_vm0, %v2421_v25, 0.0 }
  0xd5   : > { %v2436_v14 = vrot.slane %v2435_v46, 4  ;;  %v2443_v54 = vrot.slane %v2442_v50, 4  ;;  %v2456_v39 = vsel %vm287_vm0, %v2422_v37, 0.0  ;;  %v2450_v28 = vrot.slane %v2449_v24, 4 }
  0xd6   : > { %v1969_v40 = vsel %vm1961_vm7, %v1932_v45, %v1968_v52  ;;  %v2457_v48 = vrot.slane %v2456_v39, 4  ;;  %v2463_v53 = vsel %vm287_vm0, %v2423_v43, 0.0  ;;  %v2470_v56 = vsel %vm287_vm0, %v2424_v47, 0.0 }
  0xd7   : > { %1973 = vxpose.xlu0.b32.end [2/2] (short) (narrow) %v1969_v40, 16  ;;  %v2437_v0 = vadd.f32 %v2436_v14, %v2435_v46  ;;  %v2444_v61 = vadd.f32 %v2443_v54, %v2442_v50  ;;  %v2464_v55 = vrot.slane %v2463_v53, 4  ;;  %v2451_v60 = vadd.f32 %v2450_v28, %v2449_v24  ;;  %v2353_v54 = vld [vmem:[#allocation4 + $0x20] sm:$0xf]  ;;  %v2354_v28 = vld [vmem:[#allocation4 + $0x24] sm:$0xf] }
  0xd8   : > { %v2458_v9 = vadd.f32 %v2457_v48, %v2456_v39  ;;  %v2471_v1 = vrot.slane %v2470_v56, 4  ;;  %v2477_v2 = vsel %vm287_vm0, %v2425_v11, 0.0  ;;  %v2484_v16 = vsel %vm287_vm0, %v2426_v42, 0.0 }
  0xd9   : > { %v2438_v22 = vrot.slane %v2437_v0, 2  ;;  %v2445_v3 = vrot.slane %v2444_v61, 2  ;;  %v2465_v6 = vadd.f32 %v2464_v55, %v2463_v53  ;;  %v2478_v7 = vrot.slane %v2477_v2, 4  ;;  %v2355_v55 = vld [vmem:[#allocation4 + $0x28] sm:$0xf] }
  0xda   : > { %v2452_v8 = vrot.slane %v2451_v60, 2  ;;  %v2459_v27 = vrot.slane %v2458_v9, 2  ;;  %v2472_v15 = vadd.f32 %v2471_v1, %v2470_v56  ;;  %v2485_v37 = vrot.slane %v2484_v16, 4  ;;  %v2356_v56 = vld [vmem:[#allocation4 + $0x2c] sm:$0xf] }
  0xdb   : > { %v2439_v29 = vadd.f32 %v2438_v22, %v2437_v0  ;;  %v2446_v30 = vadd.f32 %v2445_v3, %v2444_v61  ;;  %v2466_v32 = vrot.slane %v2465_v6, 2  ;;  %v2479_v21 = vadd.f32 %v2478_v7, %v2477_v2  ;;  %v2357_v2 = vld [vmem:[#allocation4 + $0x30] sm:$0xf]  ;;  %v2358_v22 = vld [vmem:[#allocation4 + $0x34] sm:$0xf] }
  0xdc   : > { %v2453_v35 = vadd.f32 %v2452_v8, %v2451_v60  ;;  %v2460_v36 = vadd.f32 %v2459_v27, %v2458_v9  ;;  %v2473_v25 = vrot.slane %v2472_v15, 2  ;;  %v2486_v14 = vadd.f32 %v2485_v37, %v2484_v16  ;;  %v2359_v27 = vld [vmem:[#allocation4 + $0x38] sm:$0xf]  ;;  %v2392_v37 = vld [vmem:[#allocation5 + $0x28] sm:$0xf] }
  0xdd   : > { %v2440_v43 = vrot.slane %v2439_v29, 1  ;;  %v2447_v47 = vrot.slane %v2446_v30, 1  ;;  %v2467_v11 = vadd.f32 %v2466_v32, %v2465_v6  ;;  %v2480_v45 = vrot.slane %v2479_v21, 2 }
  0xde   : > { %v2454_v52 = vrot.slane %v2453_v35, 1  ;;  %v2461_v46 = vrot.slane %v2460_v36, 1  ;;  %v2474_v50 = vadd.f32 %v2473_v25, %v2472_v15  ;;  %v2487_v61 = vrot.slane %v2486_v14, 2  ;;  %v2360_v15 = vld [vmem:[#allocation4 + $0x3c] sm:$0xf] }
  0xdf   : > { %v2441_v24 = vadd.f32 %v2440_v43, %v2439_v29  ;;  %v2448_v39 = vadd.f32 %v2447_v47, %v2446_v30  ;;  %v2468_v42 = vrot.slane %v2467_v11, 1  ;;  %v2481_v40 = vadd.f32 %v2480_v45, %v2479_v21  ;;  %v2390_v29 = vld [vmem:[#allocation5 + $0x20] sm:$0xf]  ;;  %v2394_v30 = vld [vmem:[#allocation5 + $0x30] sm:$0xf] }
  0xe0   : > { %v2455_v48 = vadd.f32 %v2454_v52, %v2453_v35  ;;  %v2462_v53 = vadd.f32 %v2461_v46, %v2460_v36  ;;  %v2475_v0 = vrot.slane %v2474_v50, 1  ;;  %v2374_v3 = vmul.f32 %v5241_v59, %v2353_v54  ;;  %v2391_v25 = vld [vmem:[#allocation5 + $0x24] sm:$0xf]  ;;  %v2395_v43 = vld [vmem:[#allocation5 + $0x34] sm:$0xf] }
  0xe1   : > { %v2469_v60 = vadd.f32 %v2468_v42, %v2467_v11  ;;  %v2482_v9 = vrot.slane %v2481_v40, 1  ;;  %v2563_v1 = vsel %vm1949_vm1, %v2448_v39, %v2441_v24  ;;  %v2488_v7 = vadd.f32 %v2487_v61, %v2486_v14  ;;  %v2393_v46 = vld [vmem:[#allocation5 + $0x2c] sm:$0xf]  ;;  %v2397_v39 = vld [vmem:[#allocation5 + $0x3c] sm:$0xf] }
  0xe2   : > { %v2476_v6 = vadd.f32 %v2475_v0, %v2474_v50  ;;  %v2564_v8 = vsel %vm1951_vm2, %v2455_v48, %v2563_v1  ;;  %v2375_v16 = vmul.f32 %v5241_v59, %v2354_v28  ;;  %v2376_v35 = vmul.f32 %v5241_v59, %v2355_v55  ;;  %v2396_v50 = vld [vmem:[#allocation5 + $0x38] sm:$0xf] }
  0xe3   : > { %v2483_v32 = vadd.f32 %v2482_v9, %v2481_v40  ;;  %v2565_v21 = vsel %vm1953_vm3, %v2462_v53, %v2564_v8  ;;  %v2377_v36 = vmul.f32 %v5241_v59, %v2356_v56  ;;  %v2489_v47 = vrot.slane %v2488_v7, 1 }
  0xe4   : > { %v2566_v11 = vsel %vm1955_vm4, %v2469_v60, %v2565_v21  ;;  %v2378_v45 = vmul.f32 %v5241_v59, %v2357_v2  ;;  %v2379_v52 = vmul.f32 %v5241_v59, %v2358_v22  ;;  %v2380_v54 = vmul.f32 %v5241_v59, %v2359_v27 }
  0xe5   : > { %v2567_v14 = vsel %vm1957_vm5, %v2476_v6, %v2566_v11  ;;  %v2381_v24 = vmul.f32 %v5241_v59, %v2360_v15  ;;  %v2411_v42 = vmul.f32 %v5254_v34, %v2390_v29  ;;  %v2490_v40 = vadd.f32 %v2489_v47, %v2488_v7 }
  0xe6   : > { %v2568_v28 = vsel %vm1959_vm6, %v2483_v32, %v2567_v14  ;;  %v2412_v48 = vmul.f32 %v5254_v34, %v2391_v25  ;;  %v2413_v53 = vmul.f32 %v5254_v34, %v2392_v37  ;;  %v2414_v0 = vmul.f32 %v5254_v34, %v2393_v46 }
  0xe7   : > { %v2415_v61 = vmul.f32 %v5254_v34, %v2394_v30  ;;  %v2416_v55 = vmul.f32 %v5254_v34, %v2395_v43  ;;  %v2417_v56 = vmul.f32 %v5254_v34, %v2396_v50  ;;  %v2569_v59 = vsel %vm1961_vm7, %v2490_v40, %v2568_v28 }
  0xe8   : > { %v2418_v60 = vmul.f32 %v5254_v34, %v2397_v39  ;;  %v2427_v9 = vadd.f32 %v2411_v42, %v2374_v3  ;;  %v2428_v1 = vadd.f32 %v2412_v48, %v2375_v16  ;;  %2579 = vxpose.xlu1.b32.start [1/2] (short) (narrow) %v2569_v59, 16  ;;  %v2429_v2 = vadd.f32 %v2413_v53, %v2376_v35 }
  0xe9   : > { %v2430_v22 = vadd.f32 %v2414_v0, %v2377_v36  ;;  %v2431_v6 = vadd.f32 %v2415_v61, %v2378_v45  ;;  %v2432_v7 = vadd.f32 %v2416_v55, %v2379_v52  ;;  %v2433_v8 = vadd.f32 %v2417_v56, %v2380_v54  ;;  %v5312_v55 = vpop.permute.xlu1 %2970 }
  0xea   : > { %v2434_v27 = vadd.f32 %v2418_v60, %v2381_v24  ;;  %v2491_v15 = vsel %vm287_vm0, %v2427_v9, 0.0  ;;  %v2498_v29 = vsel %vm287_vm0, %v2428_v1, 0.0  ;;  %v2505_v21 = vsel %vm287_vm0, %v2429_v2, 0.0 }
  0xeb   : > { %v2492_v30 = vrot.slane %v2491_v15, 4  ;;  %v2499_v32 = vrot.slane %v2498_v29, 4  ;;  %v2512_v25 = vsel %vm287_vm0, %v2430_v22, 0.0  ;;  %v2506_v34 = vrot.slane %v2505_v21, 4 }
  0xec   : > { %v2513_v3 = vrot.slane %v2512_v25, 4  ;;  %v2519_v16 = vsel %vm287_vm0, %v2431_v6, 0.0  ;;  %v2526_v35 = vsel %vm287_vm0, %v2432_v7, 0.0  ;;  %v2533_v52 = vsel %vm287_vm0, %v2433_v8, 0.0 }
  0xed   : > { %v2493_v36 = vadd.f32 %v2492_v30, %v2491_v15  ;;  %v2500_v37 = vadd.f32 %v2499_v32, %v2498_v29  ;;  %v2520_v43 = vrot.slane %v2519_v16, 4  ;;  %v2527_v47 = vrot.slane %v2526_v35, 4  ;;  %v2952_v29 = vld [vmem:[#allocation4] sm:$0xf] }
  0xee   : > { %v2507_v11 = vadd.f32 %v2506_v34, %v2505_v21  ;;  %v2514_v45 = vadd.f32 %v2513_v3, %v2512_v25  ;;  %v2540_v46 = vsel %vm287_vm0, %v2434_v27, 0.0  ;;  %v2534_v40 = vrot.slane %v2533_v52, 4  ;;  %v2953_v34 = vld [vmem:[#allocation4 + $0x4] sm:$0xf] }
  0xef   : > { %v2494_v50 = vrot.slane %v2493_v36, 2  ;;  %v2501_v14 = vrot.slane %v2500_v37, 2  ;;  %v2521_v54 = vadd.f32 %v2520_v43, %v2519_v16  ;;  %v2528_v24 = vadd.f32 %v2527_v47, %v2526_v35  ;;  %v2955_v43 = vld [vmem:[#allocation4 + $0xc] sm:$0xf]  ;;  %v2956_v47 = vld [vmem:[#allocation4 + $0x10] sm:$0xf] }
  0xf0   : > { %v2508_v39 = vrot.slane %v2507_v11, 2  ;;  %v2515_v42 = vrot.slane %v2514_v45, 2  ;;  %v2541_v28 = vrot.slane %v2540_v46, 4  ;;  %v2535_v60 = vadd.f32 %v2534_v40, %v2533_v52  ;;  %v2959_v40 = vld [vmem:[#allocation4 + $0x1c] sm:$0xf] }
  0xf1   : > { %v2495_v48 = vadd.f32 %v2494_v50, %v2493_v36  ;;  %v2502_v53 = vadd.f32 %v2501_v14, %v2500_v37  ;;  %v2522_v0 = vrot.slane %v2521_v54, 2  ;;  %v2529_v61 = vrot.slane %v2528_v24, 2  ;;  %v2954_v37 = vld [vmem:[#allocation4 + $0x8] sm:$0xf]  ;;  %v2958_v50 = vld [vmem:[#allocation4 + $0x18] sm:$0xf] }
  0xf2   : > { %v2509_v56 = vadd.f32 %v2508_v39, %v2507_v11  ;;  %v2516_v59 = vadd.f32 %v2515_v42, %v2514_v45  ;;  %v2542_v9 = vadd.f32 %v2541_v28, %v2540_v46  ;;  %v2536_v27 = vrot.slane %v2535_v60, 2  ;;  %v2957_v46 = vld [vmem:[#allocation4 + $0x14] sm:$0xf] }
  0xf3   : > { %v2496_v1 = vrot.slane %v2495_v48, 1  ;;  %v2503_v2 = vrot.slane %v2502_v53, 1  ;;  %v2523_v22 = vadd.f32 %v2522_v0, %v2521_v54  ;;  %v2530_v6 = vadd.f32 %v2529_v61, %v2528_v24  ;;  %v5316_v54 = vpop.permute.xlu1 %3007 }
  0xf4   : > { %v2510_v7 = vrot.slane %v2509_v56, 1  ;;  %v2517_v8 = vrot.slane %v2516_v59, 1  ;;  %v2543_v15 = vrot.slane %v2542_v9, 2  ;;  %v2537_v35 = vadd.f32 %v2536_v27, %v2535_v60  ;;  %v2991_v60 = vld [vmem:[#allocation5 + $0x8] sm:$0xf] }
  0xf5   : > { %v2497_v30 = vadd.f32 %v2496_v1, %v2495_v48  ;;  %v2504_v32 = vadd.f32 %v2503_v2, %v2502_v53  ;;  %v2524_v21 = vrot.slane %v2523_v22, 1  ;;  %v2531_v25 = vrot.slane %v2530_v6, 1  ;;  %v2989_v48 = vld [vmem:[#allocation5] sm:$0xf]  ;;  %v2995_v27 = vld [vmem:[#allocation5 + $0x18] sm:$0xf] }
  0xf6   : > { %v2511_v3 = vadd.f32 %v2510_v7, %v2509_v56  ;;  %v2518_v16 = vadd.f32 %v2517_v8, %v2516_v59  ;;  %v2544_v36 = vadd.f32 %v2543_v15, %v2542_v9  ;;  %v2973_v14 = vmul.f32 %v5312_v55, %v2952_v29  ;;  %v2990_v59 = vld [vmem:[#allocation5 + $0x4] sm:$0xf]  ;;  %v2992_v9 = vld [vmem:[#allocation5 + $0xc] sm:$0xf]  ;;  %v2993_v7 = vld [vmem:[#allocation5 + $0x10] sm:$0xf] }
  0xf7   : > { %v2525_v11 = vadd.f32 %v2524_v21, %v2523_v22  ;;  %v2532_v45 = vadd.f32 %v2531_v25, %v2530_v6  ;;  %v2570_v52 = vsel %vm1949_vm1, %v2504_v32, %v2497_v30  ;;  %v2538_v24 = vrot.slane %v2537_v35, 1  ;;  %v2994_v8 = vld [vmem:[#allocation5 + $0x14] sm:$0xf]  ;;  %v2996_v32 = vld [vmem:[#allocation5 + $0x1c] sm:$0xf] }
  0xf8   : > { %v2545_v39 = vrot.slane %v2544_v36, 1  ;;  %v2571_v42 = vsel %vm1951_vm2, %v2511_v3, %v2570_v52  ;;  %v2974_v28 = vmul.f32 %v5312_v55, %v2953_v34  ;;  %v2975_v0 = vmul.f32 %v5312_v55, %v2954_v37 }
  0xf9   : > { %v2572_v53 = vsel %vm1953_vm3, %v2518_v16, %v2571_v42  ;;  %v2976_v61 = vmul.f32 %v5312_v55, %v2955_v43  ;;  %v2977_v56 = vmul.f32 %v5312_v55, %v2956_v47  ;;  %v2539_v1 = vadd.f32 %v2538_v24, %v2537_v35 }
  0xfa   : > { %v2546_v2 = vadd.f32 %v2545_v39, %v2544_v36  ;;  %v2573_v22 = vsel %vm1955_vm4, %v2525_v11, %v2572_v53  ;;  %v2978_v6 = vmul.f32 %v5312_v55, %v2957_v46  ;;  %v2979_v29 = vmul.f32 %v5312_v55, %v2958_v50 }
  0xfb   : > { %v2574_v15 = vsel %vm1957_vm5, %v2532_v45, %v2573_v22  ;;  %v2980_v30 = vmul.f32 %v5312_v55, %v2959_v40  ;;  %v3010_v21 = vmul.f32 %v5316_v54, %v2989_v48  ;;  %v3011_v34 = vmul.f32 %v5316_v54, %v2990_v59 }
  0xfc   : > { %v2575_v25 = vsel %vm1959_vm6, %v2539_v1, %v2574_v15  ;;  %v3012_v3 = vmul.f32 %v5316_v54, %v2991_v60  ;;  %v3013_v16 = vmul.f32 %v5316_v54, %v2992_v9  ;;  %v3014_v36 = vmul.f32 %v5316_v54, %v2993_v7 }
  0xfd   : > { %v2576_v35 = vsel %vm1961_vm7, %v2546_v2, %v2575_v25  ;;  %v3015_v37 = vmul.f32 %v5316_v54, %v2994_v8  ;;  %v3016_v43 = vmul.f32 %v5316_v54, %v2995_v27  ;;  %v3017_v47 = vmul.f32 %v5316_v54, %v2996_v32 }
  0xfe   : > { %2580 = vxpose.xlu1.b32.end [2/2] (short) (narrow) %v2576_v35, 16  ;;  %v3026_v11 = vadd.f32 %v3010_v21, %v2973_v14  ;;  %v3027_v45 = vadd.f32 %v3011_v34, %v2974_v28  ;;  %v3028_v52 = vadd.f32 %v3012_v3, %v2975_v0  ;;  %v3029_v46 = vadd.f32 %v3013_v16, %v2976_v61 }
  0xff   : > { %v3030_v50 = vadd.f32 %v3014_v36, %v2977_v56  ;;  %v3031_v24 = vadd.f32 %v3015_v37, %v2978_v6  ;;  %v3032_v39 = vadd.f32 %v3016_v43, %v2979_v29  ;;  %v3033_v42 = vadd.f32 %v3017_v47, %v2980_v30 }
 0x100   : > { %v3042_v40 = vsel %vm287_vm0, %v3026_v11, 0.0  ;;  %v3049_v48 = vsel %vm287_vm0, %v3027_v45, 0.0  ;;  %v3056_v53 = vsel %vm287_vm0, %v3028_v52, 0.0  ;;  %v3063_v1 = vsel %vm287_vm0, %v3029_v46, 0.0 }
 0x101   : > { %v3043_v59 = vrot.slane %v3042_v40, 4  ;;  %v3050_v60 = vrot.slane %v3049_v48, 4  ;;  %v3057_v9 = vrot.slane %v3056_v53, 4  ;;  %v3064_v2 = vrot.slane %v3063_v1, 4 }
 0x102   : > { %v3070_v14 = vsel %vm287_vm0, %v3030_v50, 0.0  ;;  %v3077_v28 = vsel %vm287_vm0, %v3031_v24, 0.0  ;;  %v3084_v0 = vsel %vm287_vm0, %v3032_v39, 0.0  ;;  %v3091_v15 = vsel %vm287_vm0, %v3033_v42, 0.0 }
 0x103   : > { %v3044_v61 = vadd.f32 %v3043_v59, %v3042_v40  ;;  %v3051_v56 = vadd.f32 %v3050_v60, %v3049_v48  ;;  %v3058_v22 = vadd.f32 %v3057_v9, %v3056_v53  ;;  %v3071_v6 = vrot.slane %v3070_v14, 4  ;;  %v2960_v59 = vld [vmem:[#allocation4 + $0x20] sm:$0xf]  ;;  %v2961_v60 = vld [vmem:[#allocation4 + $0x24] sm:$0xf] }
 0x104   : > { %v3065_v7 = vadd.f32 %v3064_v2, %v3063_v1  ;;  %v3078_v8 = vrot.slane %v3077_v28, 4  ;;  %v3085_v27 = vrot.slane %v3084_v0, 4  ;;  %v3092_v16 = vrot.slane %v3091_v15, 4 }
 0x105   : > { %v3045_v29 = vrot.slane %v3044_v61, 2  ;;  %v3052_v30 = vrot.slane %v3051_v56, 2  ;;  %v3059_v32 = vrot.slane %v3058_v22, 2  ;;  %v3072_v21 = vadd.f32 %v3071_v6, %v3070_v14  ;;  %v2963_v6 = vld [vmem:[#allocation4 + $0x2c] sm:$0xf] }
 0x106   : > { %v3066_v25 = vrot.slane %v3065_v7, 2  ;;  %v3079_v34 = vadd.f32 %v3078_v8, %v3077_v28  ;;  %v3086_v3 = vadd.f32 %v3085_v27, %v3084_v0  ;;  %v3093_v52 = vadd.f32 %v3092_v16, %v3091_v15  ;;  %v2962_v28 = vld [vmem:[#allocation4 + $0x28] sm:$0xf]  ;;  %v2965_v15 = vld [vmem:[#allocation4 + $0x34] sm:$0xf] }
 0x107   : > { %v3046_v35 = vadd.f32 %v3045_v29, %v3044_v61  ;;  %v3053_v36 = vadd.f32 %v3052_v30, %v3051_v56  ;;  %v3060_v37 = vadd.f32 %v3059_v32, %v3058_v22  ;;  %v3073_v43 = vrot.slane %v3072_v21, 2  ;;  %v2966_v29 = vld [vmem:[#allocation4 + $0x38] sm:$0xf] }
 0x108   : > { %v3067_v47 = vadd.f32 %v3066_v25, %v3065_v7  ;;  %v3080_v11 = vrot.slane %v3079_v34, 2  ;;  %v3087_v45 = vrot.slane %v3086_v3, 2  ;;  %v3094_v53 = vrot.slane %v3093_v52, 2  ;;  %v2964_v7 = vld [vmem:[#allocation4 + $0x30] sm:$0xf] }
 0x109   : > { %v3047_v46 = vrot.slane %v3046_v35, 1  ;;  %v3054_v50 = vrot.slane %v3053_v36, 1  ;;  %v3061_v24 = vrot.slane %v3060_v37, 1  ;;  %v3074_v39 = vadd.f32 %v3073_v43, %v3072_v21  ;;  %v2997_v21 = vld [vmem:[#allocation5 + $0x20] sm:$0xf] }
 0x10a   : > { %v3068_v42 = vrot.slane %v3067_v47, 1  ;;  %v3081_v40 = vadd.f32 %v3080_v11, %v3079_v34  ;;  %v3088_v48 = vadd.f32 %v3087_v45, %v3086_v3  ;;  %v3095_v22 = vadd.f32 %v3094_v53, %v3093_v52  ;;  %v2999_v45 = vld [vmem:[#allocation5 + $0x28] sm:$0xf]  ;;  %v3000_v52 = vld [vmem:[#allocation5 + $0x2c] sm:$0xf] }
 0x10b   : > { %v3048_v9 = vadd.f32 %v3047_v46, %v3046_v35  ;;  %v3055_v1 = vadd.f32 %v3054_v50, %v3053_v36  ;;  %v3062_v2 = vadd.f32 %v3061_v24, %v3060_v37  ;;  %v3075_v14 = vrot.slane %v3074_v39, 1  ;;  %v2967_v35 = vld [vmem:[#allocation4 + $0x3c] sm:$0xf]  ;;  %v2998_v36 = vld [vmem:[#allocation5 + $0x24] sm:$0xf] }
 0x10c   : > { %v3069_v0 = vadd.f32 %v3068_v42, %v3067_v47  ;;  %v3082_v61 = vrot.slane %v3081_v40, 1  ;;  %v3089_v56 = vrot.slane %v3088_v48, 1  ;;  %v2981_v30 = vmul.f32 %v5312_v55, %v2960_v59  ;;  %v3001_v46 = vld [vmem:[#allocation5 + $0x30] sm:$0xf]  ;;  %v3004_v53 = vld [vmem:[#allocation5 + $0x3c] sm:$0xf] }
 0x10d   : > { %v3076_v8 = vadd.f32 %v3075_v14, %v3074_v39  ;;  %v3170_v27 = vsel %vm1949_vm1, %v3055_v1, %v3048_v9  ;;  %v2982_v32 = vmul.f32 %v5312_v55, %v2961_v60  ;;  %v3096_v3 = vrot.slane %v3095_v22, 1 }
 0x10e   : > { %v3083_v25 = vadd.f32 %v3082_v61, %v3081_v40  ;;  %v3090_v34 = vadd.f32 %v3089_v56, %v3088_v48  ;;  %v3171_v16 = vsel %vm1951_vm2, %v3062_v2, %v3170_v27  ;;  %v2983_v43 = vmul.f32 %v5312_v55, %v2962_v28  ;;  %v3002_v40 = vld [vmem:[#allocation5 + $0x34] sm:$0xf]  ;;  %v3003_v48 = vld [vmem:[#allocation5 + $0x38] sm:$0xf] }
 0x10f   : > { %v3172_v37 = vsel %vm1953_vm3, %v3069_v0, %v3171_v16  ;;  %v2984_v47 = vmul.f32 %v5312_v55, %v2963_v6  ;;  %v2985_v11 = vmul.f32 %v5312_v55, %v2964_v7  ;;  %v3097_v50 = vadd.f32 %v3096_v3, %v3095_v22 }
 0x110   : > { %v3173_v24 = vsel %vm1955_vm4, %v3076_v8, %v3172_v37  ;;  %v2986_v39 = vmul.f32 %v5312_v55, %v2965_v15  ;;  %v2987_v42 = vmul.f32 %v5312_v55, %v2966_v29  ;;  %v2988_v60 = vmul.f32 %v5312_v55, %v2967_v35 }
 0x111   : > { %v3174_v59 = vsel %vm1957_vm5, %v3083_v25, %v3173_v24  ;;  %v3018_v9 = vmul.f32 %v5316_v54, %v2997_v21  ;;  %v3019_v1 = vmul.f32 %v5316_v54, %v2998_v36  ;;  %v3020_v14 = vmul.f32 %v5316_v54, %v2999_v45 }
 0x112   : > { %v3175_v2 = vsel %vm1959_vm6, %v3090_v34, %v3174_v59  ;;  %v3021_v28 = vmul.f32 %v5316_v54, %v3000_v52  ;;  %v3022_v0 = vmul.f32 %v5316_v54, %v3001_v46  ;;  %v3023_v56 = vmul.f32 %v5316_v54, %v3002_v40 }
 0x113   : > { %v3176_v61 = vsel %vm1961_vm7, %v3097_v50, %v3175_v2  ;;  %v3024_v22 = vmul.f32 %v5316_v54, %v3003_v48  ;;  %v3025_v55 = vmul.f32 %v5316_v54, %v3004_v53  ;;  %v3034_v6 = vadd.f32 %v3018_v9, %v2981_v30 }
 0x114   : > { %3186 = vxpose.xlu0.b32.start [1/2] (short) (narrow) %v3176_v61, 16  ;;  %v3035_v7 = vadd.f32 %v3019_v1, %v2982_v32  ;;  %v3036_v8 = vadd.f32 %v3020_v14, %v2983_v43  ;;  %v3037_v27 = vadd.f32 %v3021_v28, %v2984_v47  ;;  %v3038_v15 = vadd.f32 %v3022_v0, %v2985_v11  ;;  %v5378_v28 = vpop.permute.xlu1 %3577 }
 0x115   : > { %v3039_v29 = vadd.f32 %v3023_v56, %v2986_v39  ;;  %v3040_v21 = vadd.f32 %v3024_v22, %v2987_v42  ;;  %v3041_v25 = vadd.f32 %v3025_v55, %v2988_v60  ;;  %v3098_v34 = vsel %vm287_vm0, %v3034_v6, 0.0 }
 0x116   : > { %v3105_v3 = vsel %vm287_vm0, %v3035_v7, 0.0  ;;  %v3112_v16 = vsel %vm287_vm0, %v3036_v8, 0.0  ;;  %v3119_v35 = vsel %vm287_vm0, %v3037_v27, 0.0  ;;  %v3099_v36 = vrot.slane %v3098_v34, 4 }
 0x117   : > { %v3106_v37 = vrot.slane %v3105_v3, 4  ;;  %v3113_v54 = vrot.slane %v3112_v16, 4  ;;  %v3120_v45 = vrot.slane %v3119_v35, 4  ;;  %v3126_v30 = vsel %vm287_vm0, %v3038_v15, 0.0 }
 0x118   : > { %v3133_v32 = vsel %vm287_vm0, %v3039_v29, 0.0  ;;  %v3140_v43 = vsel %vm287_vm0, %v3040_v21, 0.0  ;;  %v3147_v47 = vsel %vm287_vm0, %v3041_v25, 0.0  ;;  %v3100_v11 = vadd.f32 %v3099_v36, %v3098_v34  ;;  %v3560_v36 = vld [vmem:[#allocation4 + $0x4] sm:$0xf] }
 0x119   : > { %v3107_v52 = vadd.f32 %v3106_v37, %v3105_v3  ;;  %v3114_v46 = vadd.f32 %v3113_v54, %v3112_v16  ;;  %v3121_v50 = vadd.f32 %v3120_v45, %v3119_v35  ;;  %v3127_v24 = vrot.slane %v3126_v30, 4  ;;  %v3559_v35 = vld [vmem:[#allocation4] sm:$0xf]  ;;  %v3561_v37 = vld [vmem:[#allocation4 + $0x8] sm:$0xf] }
 0x11a   : > { %v3134_v39 = vrot.slane %v3133_v32, 4  ;;  %v3141_v42 = vrot.slane %v3140_v43, 4  ;;  %v3148_v40 = vrot.slane %v3147_v47, 4  ;;  %v3101_v48 = vrot.slane %v3100_v11, 2 }
 0x11b   : > { %v3108_v53 = vrot.slane %v3107_v52, 2  ;;  %v3115_v59 = vrot.slane %v3114_v46, 2  ;;  %v3122_v60 = vrot.slane %v3121_v50, 2  ;;  %v3128_v9 = vadd.f32 %v3127_v24, %v3126_v30  ;;  %v3564_v24 = vld [vmem:[#allocation4 + $0x14] sm:$0xf] }
 0x11c   : > { %v3135_v1 = vadd.f32 %v3134_v39, %v3133_v32  ;;  %v3142_v2 = vadd.f32 %v3141_v42, %v3140_v43  ;;  %v3149_v14 = vadd.f32 %v3148_v40, %v3147_v47  ;;  %v3102_v0 = vadd.f32 %v3101_v48, %v3100_v11  ;;  %v3562_v43 = vld [vmem:[#allocation4 + $0xc] sm:$0xf]  ;;  %v3563_v47 = vld [vmem:[#allocation4 + $0x10] sm:$0xf]  ;;  %v5380_v39 = vpop.permute.xlu1 %3614  ;;  %v3565_v40 = vld [vmem:[#allocation4 + $0x18] sm:$0xf] }
 0x11d   : > { %v3109_v61 = vadd.f32 %v3108_v53, %v3107_v52  ;;  %v3116_v56 = vadd.f32 %v3115_v59, %v3114_v46  ;;  %v3123_v22 = vadd.f32 %v3122_v60, %v3121_v50  ;;  %v3129_v55 = vrot.slane %v3128_v9, 2  ;;  %v3566_v48 = vld [vmem:[#allocation4 + $0x1c] sm:$0xf] }
 0x11e   : > { %v3136_v6 = vrot.slane %v3135_v1, 2  ;;  %v3143_v7 = vrot.slane %v3142_v2, 2  ;;  %v3150_v8 = vrot.slane %v3149_v14, 2  ;;  %v3103_v27 = vrot.slane %v3102_v0, 1 }
 0x11f   : > { %v3110_v15 = vrot.slane %v3109_v61, 1  ;;  %v3117_v29 = vrot.slane %v3116_v56, 1  ;;  %v3124_v21 = vrot.slane %v3123_v22, 1  ;;  %v3130_v25 = vadd.f32 %v3129_v55, %v3128_v9  ;;  %v3596_v9 = vld [vmem:[#allocation5] sm:$0xf] }
 0x120   : > { %v3137_v34 = vadd.f32 %v3136_v6, %v3135_v1  ;;  %v3144_v3 = vadd.f32 %v3143_v7, %v3142_v2  ;;  %v3151_v16 = vadd.f32 %v3150_v8, %v3149_v14  ;;  %v3104_v54 = vadd.f32 %v3103_v27, %v3102_v0  ;;  %v3600_v27 = vld [vmem:[#allocation5 + $0x10] sm:$0xf] }
 0x121   : > { %v3111_v45 = vadd.f32 %v3110_v15, %v3109_v61  ;;  %v3118_v30 = vadd.f32 %v3117_v29, %v3116_v56  ;;  %v3125_v32 = vadd.f32 %v3124_v21, %v3123_v22  ;;  %v3131_v11 = vrot.slane %v3130_v25, 1  ;;  %v3597_v61 = vld [vmem:[#allocation5 + $0x4] sm:$0xf]  ;;  %v3598_v56 = vld [vmem:[#allocation5 + $0x8] sm:$0xf] }
 0x122   : > { %v3138_v52 = vrot.slane %v3137_v34, 1  ;;  %v3145_v46 = vrot.slane %v3144_v3, 1  ;;  %v3152_v50 = vrot.slane %v3151_v16, 1  ;;  %v3580_v53 = vmul.f32 %v5378_v28, %v3559_v35  ;;  %v3599_v22 = vld [vmem:[#allocation5 + $0xc] sm:$0xf] }
 0x123   : > { %v3177_v42 = vsel %vm1949_vm1, %v3111_v45, %v3104_v54  ;;  %v3581_v59 = vmul.f32 %v5378_v28, %v3560_v36  ;;  %v3582_v60 = vmul.f32 %v5378_v28, %v3561_v37  ;;  %v3132_v1 = vadd.f32 %v3131_v11, %v3130_v25  ;;  %v3601_v15 = vld [vmem:[#allocation5 + $0x14] sm:$0xf]  ;;  %v3602_v29 = vld [vmem:[#allocation5 + $0x18] sm:$0xf] }
 0x124   : > { %v3139_v2 = vadd.f32 %v3138_v52, %v3137_v34  ;;  %v3146_v14 = vadd.f32 %v3145_v46, %v3144_v3  ;;  %v3153_v0 = vadd.f32 %v3152_v50, %v3151_v16  ;;  %v3178_v55 = vsel %vm1951_vm2, %v3118_v30, %v3177_v42  ;;  %v3603_v3 = vld [vmem:[#allocation5 + $0x1c] sm:$0xf] }
 0x125   : > { %v3583_v6 = vmul.f32 %v5378_v28, %v3562_v43  ;;  %v3584_v7 = vmul.f32 %v5378_v28, %v3563_v47  ;;  %v3585_v8 = vmul.f32 %v5378_v28, %v3564_v24  ;;  %v3179_v21 = vsel %vm1953_vm3, %v3125_v32, %v3178_v55 }
 0x126   : > { %v3586_v25 = vmul.f32 %v5378_v28, %v3565_v40  ;;  %v3587_v34 = vmul.f32 %v5378_v28, %v3566_v48  ;;  %v3617_v16 = vmul.f32 %v5380_v39, %v3596_v9  ;;  %v3180_v35 = vsel %vm1955_vm4, %v3132_v1, %v3179_v21 }
 0x127   : > { %v3618_v36 = vmul.f32 %v5380_v39, %v3597_v61  ;;  %v3619_v37 = vmul.f32 %v5380_v39, %v3598_v56  ;;  %v3620_v54 = vmul.f32 %v5380_v39, %v3599_v22  ;;  %v3181_v45 = vsel %vm1957_vm5, %v3139_v2, %v3180_v35 }
 0x128   : > { %v3621_v30 = vmul.f32 %v5380_v39, %v3600_v27  ;;  %v3622_v32 = vmul.f32 %v5380_v39, %v3601_v15  ;;  %v3623_v43 = vmul.f32 %v5380_v39, %v3602_v29  ;;  %v3182_v47 = vsel %vm1959_vm6, %v3146_v14, %v3181_v45 }
 0x129   : > { %v3624_v11 = vmul.f32 %v5380_v39, %v3603_v3  ;;  %v3633_v52 = vadd.f32 %v3617_v16, %v3580_v53  ;;  %v3634_v46 = vadd.f32 %v3618_v36, %v3581_v59  ;;  %v3183_v50 = vsel %vm1961_vm7, %v3153_v0, %v3182_v47 }
 0x12a   : > { %v3635_v24 = vadd.f32 %v3619_v37, %v3582_v60  ;;  %v3636_v42 = vadd.f32 %v3620_v54, %v3583_v6  ;;  %v3637_v40 = vadd.f32 %v3621_v30, %v3584_v7  ;;  %3187 = vxpose.xlu0.b32.end [2/2] (short) (narrow) %v3183_v50, 16  ;;  %v3638_v48 = vadd.f32 %v3622_v32, %v3585_v8 }
 0x12b   : > { %v3639_v9 = vadd.f32 %v3623_v43, %v3586_v25  ;;  %v3640_v1 = vadd.f32 %v3624_v11, %v3587_v34  ;;  %v3649_v2 = vsel %vm287_vm0, %v3633_v52, 0.0  ;;  %v3656_v56 = vsel %vm287_vm0, %v3634_v46, 0.0 }
 0x12c   : > { %v3650_v61 = vrot.slane %v3649_v2, 4  ;;  %v3663_v14 = vsel %vm287_vm0, %v3635_v24, 0.0  ;;  %v3670_v22 = vsel %vm287_vm0, %v3636_v42, 0.0  ;;  %v3657_v53 = vrot.slane %v3656_v56, 4 }
 0x12d   : > { %v3664_v59 = vrot.slane %v3663_v14, 4  ;;  %v3671_v55 = vrot.slane %v3670_v22, 4  ;;  %v3677_v60 = vsel %vm287_vm0, %v3637_v40, 0.0  ;;  %v3684_v7 = vsel %vm287_vm0, %v3638_v48, 0.0 }
 0x12e   : > { %v3651_v0 = vadd.f32 %v3650_v61, %v3649_v2  ;;  %v3678_v6 = vrot.slane %v3677_v60, 4  ;;  %v3691_v8 = vsel %vm287_vm0, %v3639_v9, 0.0  ;;  %v3658_v27 = vadd.f32 %v3657_v53, %v3656_v56  ;;  %v3567_v61 = vld [vmem:[#allocation4 + $0x20] sm:$0xf] }
 0x12f   : > { %v3665_v15 = vadd.f32 %v3664_v59, %v3663_v14  ;;  %v3672_v29 = vadd.f32 %v3671_v55, %v3670_v22  ;;  %v3685_v21 = vrot.slane %v3684_v7, 4  ;;  %v3692_v3 = vrot.slane %v3691_v8, 4  ;;  %v3568_v59 = vld [vmem:[#allocation4 + $0x24] sm:$0xf]  ;;  %v3569_v55 = vld [vmem:[#allocation4 + $0x28] sm:$0xf] }
 0x130   : > { %v3652_v25 = vrot.slane %v3651_v0, 2  ;;  %v3679_v34 = vadd.f32 %v3678_v6, %v3677_v60  ;;  %v3698_v16 = vsel %vm287_vm0, %v3640_v1, 0.0  ;;  %v3659_v35 = vrot.slane %v3658_v27, 2 }
 0x131   : > { %v3666_v36 = vrot.slane %v3665_v15, 2  ;;  %v3673_v37 = vrot.slane %v3672_v29, 2  ;;  %v3686_v54 = vadd.f32 %v3685_v21, %v3684_v7  ;;  %v3693_v32 = vadd.f32 %v3692_v3, %v3691_v8  ;;  %v3570_v8 = vld [vmem:[#allocation4 + $0x2c] sm:$0xf] }
 0x132   : > { %v3653_v45 = vadd.f32 %v3652_v25, %v3651_v0  ;;  %v3680_v30 = vrot.slane %v3679_v34, 2  ;;  %v3699_v43 = vrot.slane %v3698_v16, 4  ;;  %v3660_v47 = vadd.f32 %v3659_v35, %v3658_v27  ;;  %v3571_v27 = vld [vmem:[#allocation4 + $0x30] sm:$0xf]  ;;  %v3572_v25 = vld [vmem:[#allocation4 + $0x34] sm:$0xf] }
 0x133   : > { %v3667_v11 = vadd.f32 %v3666_v36, %v3665_v15  ;;  %v3674_v52 = vadd.f32 %v3673_v37, %v3672_v29  ;;  %v3687_v46 = vrot.slane %v3686_v54, 2  ;;  %v3694_v42 = vrot.slane %v3693_v32, 2  ;;  %v3574_v36 = vld [vmem:[#allocation4 + $0x3c] sm:$0xf] }
 0x134   : > { %v3654_v50 = vrot.slane %v3653_v45, 1  ;;  %v3681_v24 = vadd.f32 %v3680_v30, %v3679_v34  ;;  %v3700_v40 = vadd.f32 %v3699_v43, %v3698_v16  ;;  %v3661_v48 = vrot.slane %v3660_v47, 1  ;;  %v3573_v34 = vld [vmem:[#allocation4 + $0x38] sm:$0xf]  ;;  %v3605_v30 = vld [vmem:[#allocation5 + $0x24] sm:$0xf] }
 0x135   : > { %v3668_v9 = vrot.slane %v3667_v11, 1  ;;  %v3675_v2 = vrot.slane %v3674_v52, 1  ;;  %v3688_v1 = vadd.f32 %v3687_v46, %v3686_v54  ;;  %v3695_v22 = vadd.f32 %v3694_v42, %v3693_v32  ;;  %v3607_v46 = vld [vmem:[#allocation5 + $0x2c] sm:$0xf] }
 0x136   : > { %v3655_v56 = vadd.f32 %v3654_v50, %v3653_v45  ;;  %v3682_v14 = vrot.slane %v3681_v24, 1  ;;  %v3701_v53 = vrot.slane %v3700_v40, 2  ;;  %v3662_v60 = vadd.f32 %v3661_v48, %v3660_v47  ;;  %v3604_v45 = vld [vmem:[#allocation5 + $0x20] sm:$0xf]  ;;  %v3608_v48 = vld [vmem:[#allocation5 + $0x30] sm:$0xf] }
 0x137   : > { %v3669_v0 = vadd.f32 %v3668_v9, %v3667_v11  ;;  %v3676_v6 = vadd.f32 %v3675_v2, %v3674_v52  ;;  %v3689_v7 = vrot.slane %v3688_v1, 1  ;;  %v3696_v29 = vrot.slane %v3695_v22, 1  ;;  %v3606_v52 = vld [vmem:[#allocation5 + $0x28] sm:$0xf]  ;;  %v3609_v9 = vld [vmem:[#allocation5 + $0x34] sm:$0xf] }
 0x138   : > { %v3683_v15 = vadd.f32 %v3682_v14, %v3681_v24  ;;  %v3702_v21 = vadd.f32 %v3701_v53, %v3700_v40  ;;  %v3588_v3 = vmul.f32 %v5378_v28, %v3567_v61  ;;  %v3777_v35 = vsel %vm1949_vm1, %v3662_v60, %v3655_v56  ;;  %v3610_v2 = vld [vmem:[#allocation5 + $0x38] sm:$0xf]  ;;  %v3611_v14 = vld [vmem:[#allocation5 + $0x3c] sm:$0xf] }
 0x139   : > { %v3690_v16 = vadd.f32 %v3689_v7, %v3688_v1  ;;  %v3589_v37 = vmul.f32 %v5378_v28, %v3568_v59  ;;  %v3590_v54 = vmul.f32 %v5378_v28, %v3569_v55  ;;  %v3697_v32 = vadd.f32 %v3696_v29, %v3695_v22 }
 0x13a   : > { %v3703_v43 = vrot.slane %v3702_v21, 1  ;;  %v3778_v47 = vsel %vm1951_vm2, %v3669_v0, %v3777_v35  ;;  %v3591_v11 = vmul.f32 %v5378_v28, %v3570_v8  ;;  %v3592_v24 = vmul.f32 %v5378_v28, %v3571_v27 }
 0x13b   : > { %v3779_v50 = vsel %vm1953_vm3, %v3676_v6, %v3778_v47  ;;  %v3593_v42 = vmul.f32 %v5378_v28, %v3572_v25  ;;  %v3594_v40 = vmul.f32 %v5378_v28, %v3573_v34  ;;  %v3595_v56 = vmul.f32 %v5378_v28, %v3574_v36 }
 0x13c   : > { %v3704_v1 = vadd.f32 %v3703_v43, %v3702_v21  ;;  %v3780_v61 = vsel %vm1955_vm4, %v3683_v15, %v3779_v50  ;;  %v3625_v22 = vmul.f32 %v5380_v39, %v3604_v45  ;;  %v3626_v59 = vmul.f32 %v5380_v39, %v3605_v30 }
 0x13d   : > { %v3781_v53 = vsel %vm1957_vm5, %v3690_v16, %v3780_v61  ;;  %v3627_v55 = vmul.f32 %v5380_v39, %v3606_v52  ;;  %v3628_v60 = vmul.f32 %v5380_v39, %v3607_v46  ;;  %v3629_v6 = vmul.f32 %v5380_v39, %v3608_v48 }
 0x13e   : > { %v3782_v0 = vsel %vm1959_vm6, %v3697_v32, %v3781_v53  ;;  %v3630_v7 = vmul.f32 %v5380_v39, %v3609_v9  ;;  %v3631_v8 = vmul.f32 %v5380_v39, %v3610_v2  ;;  %v3632_v27 = vmul.f32 %v5380_v39, %v3611_v14 }
 0x13f   : > { %v3783_v28 = vsel %vm1961_vm7, %v3704_v1, %v3782_v0  ;;  %v3641_v15 = vadd.f32 %v3625_v22, %v3588_v3  ;;  %v3642_v29 = vadd.f32 %v3626_v59, %v3589_v37  ;;  %v3643_v21 = vadd.f32 %v3627_v55, %v3590_v54 }
 0x140   : > { %3793 = vxpose.xlu1.b32.start [1/2] (short) (narrow) %v3783_v28, 16  ;;  %v3644_v25 = vadd.f32 %v3628_v60, %v3591_v11  ;;  %v3645_v34 = vadd.f32 %v3629_v6, %v3592_v24  ;;  %v3646_v16 = vadd.f32 %v3630_v7, %v3593_v42  ;;  %v3647_v35 = vadd.f32 %v3631_v8, %v3594_v40  ;;  %v5444_v7 = vpop.permute.xlu0 %1547 }
 0x141   : > { %v3648_v36 = vadd.f32 %v3632_v27, %v3595_v56  ;;  %v3705_v45 = vsel %vm287_vm0, %v3641_v15, 0.0  ;;  %v3712_v30 = vsel %vm287_vm0, %v3642_v29, 0.0  ;;  %v3719_v47 = vsel %vm287_vm0, %v3643_v21, 0.0 }
 0x142   : > { %v3706_v32 = vrot.slane %v3705_v45, 4  ;;  %v3713_v43 = vrot.slane %v3712_v30, 4  ;;  %v3726_v52 = vsel %vm287_vm0, %v3644_v25, 0.0  ;;  %v3720_v39 = vrot.slane %v3719_v47, 4 }
 0x143   : > { %v3727_v3 = vrot.slane %v3726_v52, 4  ;;  %v3733_v37 = vsel %vm287_vm0, %v3645_v34, 0.0  ;;  %v3740_v54 = vsel %vm287_vm0, %v3646_v16, 0.0  ;;  %v3747_v48 = vsel %vm287_vm0, %v3647_v35, 0.0 }
 0x144   : > { %v3707_v11 = vadd.f32 %v3706_v32, %v3705_v45  ;;  %v3714_v46 = vadd.f32 %v3713_v43, %v3712_v30  ;;  %v3734_v50 = vrot.slane %v3733_v37, 4  ;;  %v3741_v24 = vrot.slane %v3740_v54, 4 }
 0x145   : > { %v3721_v42 = vadd.f32 %v3720_v39, %v3719_v47  ;;  %v3728_v40 = vadd.f32 %v3727_v3, %v3726_v52  ;;  %v3754_v9 = vsel %vm287_vm0, %v3648_v36, 0.0  ;;  %v3748_v53 = vrot.slane %v3747_v48, 4  ;;  %v4134_v52 = vld [vmem:[%s6352_s2 + $0x14] sm:$0x1] }
 0x146   : > { %v3708_v2 = vrot.slane %v3707_v11, 2  ;;  %v3715_v1 = vrot.slane %v3714_v46, 2  ;;  %v3735_v61 = vadd.f32 %v3734_v50, %v3733_v37  ;;  %v3742_v56 = vadd.f32 %v3741_v24, %v3740_v54 }
 0x147   : > { %v3722_v14 = vrot.slane %v3721_v42, 2  ;;  %v3729_v22 = vrot.slane %v3728_v40, 2  ;;  %v3755_v59 = vrot.slane %v3754_v9, 4  ;;  %v3749_v27 = vadd.f32 %v3748_v53, %v3747_v48 }
 0x148   : > { %v3709_v55 = vadd.f32 %v3708_v2, %v3707_v11  ;;  %v3716_v60 = vadd.f32 %v3715_v1, %v3714_v46  ;;  %v3736_v0 = vrot.slane %v3735_v61, 2  ;;  %v3743_v6 = vrot.slane %v3742_v56, 2  ;;  %v4140_v11 = vld [vmem:[%s6352_s2 + $0x13] sm:$0x1]  ;;  %v4146_v46 = vld [vmem:[%s6352_s2 + $0x12] sm:$0x1] }
 0x149   : > { %v3723_v8 = vadd.f32 %v3722_v14, %v3721_v42  ;;  %v3730_v28 = vadd.f32 %v3729_v22, %v3728_v40  ;;  %v3756_v15 = vadd.f32 %v3755_v59, %v3754_v9  ;;  %v3750_v36 = vrot.slane %v3749_v27, 2  ;;  %v5459_v40 = vpop.permute.xlu0 %1584  ;;  %v4152_v1 = vld [vmem:[%s6352_s2 + $0x11] sm:$0x1] }
 0x14a   : > { %v3710_v29 = vrot.slane %v3709_v55, 1  ;;  %v3717_v21 = vrot.slane %v3716_v60, 1  ;;  %v3737_v25 = vadd.f32 %v3736_v0, %v3735_v61  ;;  %v3744_v34 = vadd.f32 %v3743_v6, %v3742_v56  ;;  %v4071_v6 = vld [vmem:[%s5055_s11 + $0x38] sm:$0xf] }
 0x14b   : > { %v3724_v16 = vrot.slane %v3723_v8, 1  ;;  %v3731_v35 = vrot.slane %v3730_v28, 1  ;;  %v3757_v45 = vrot.slane %v3756_v15, 2  ;;  %v3751_v3 = vadd.f32 %v3750_v36, %v3749_v27  ;;  %v4132_v36 = vld [vmem:[%s6352_s2 + $0xb] sm:$0x1] }
 0x14c   : > { %v3711_v30 = vadd.f32 %v3710_v29, %v3709_v55  ;;  %v3718_v32 = vadd.f32 %v3717_v21, %v3716_v60  ;;  %v3738_v43 = vrot.slane %v3737_v25, 1  ;;  %v3745_v47 = vrot.slane %v3744_v34, 1 }
 0x14d   : > { %v3725_v39 = vadd.f32 %v3724_v16, %v3723_v8  ;;  %v3758_v37 = vadd.f32 %v3757_v45, %v3756_v15  ;;  %v352_v54 = vrot.slane %v5115_v33, %v4868_v62  ;;  %v3732_v50 = vadd.f32 %v3731_v35, %v3730_v28  ;;  %v4076_v8 = vld [vmem:[%s5055_s11 + $0x8] sm:$0xf]  ;;  %v4077_v16 = vld [vmem:[%s5055_s11 + $0x34] sm:$0xf]  ;;  %v4082_v35 = vld [vmem:[%s5055_s11 + $0xc] sm:$0xf] }
 0x14e   : > { %v3739_v24 = vadd.f32 %v3738_v43, %v3737_v25  ;;  %v3784_v42 = vsel %vm1949_vm1, %v3718_v32, %v3711_v30  ;;  %v3752_v48 = vrot.slane %v3751_v3, 1  ;;  %v4135_v2 = vmul.f32 -1.442695, %v4134_v52  ;;  %v4108_v25 = vld [vmem:[%s6352_s2 + $0x7] sm:$0x1] }
 0x14f   : > { %v3759_v9 = vrot.slane %v3758_v37, 1  ;;  %v3785_v33 = vsel %vm1951_vm2, %v3725_v39, %v3784_v42  ;;  %v3746_v61 = vadd.f32 %v3745_v47, %v3744_v34  ;;  %v4141_v14 = vmul.f32 -1.442695, %v4140_v11  ;;  %v4126_v34 = vld [vmem:[%s6352_s2 + $0xa] sm:$0x1]  ;;  %v5519_v42 = vpop.eup %4514 }
 0x150   : > { %v3786_v56 = vsel %vm1953_vm3, %v3732_v50, %v3785_v33  ;;  %v4147_v22 = vmul.f32 -1.442695, %v4146_v46  ;;  %v3753_v53 = vadd.f32 %v3752_v48, %v3751_v3  ;;  %v637_v59 = vadd.f32 1.0, %v5097_v20  ;;  %v4144_v43 = vld [vmem:[%s6352_s2 + $0xd] sm:$0x1] }
 0x151   : > { %v3787_v19 = vsel %vm1955_vm4, %v3739_v24, %v3786_v56  ;;  %v3760_v55 = vadd.f32 %v3759_v9, %v3758_v37  ;;  %4518 = vpow2.f32 %v4135_v2  ;;  %v4153_v0 = vmul.f32 -1.442695, %v4152_v1  ;;  %v4150_v11 = vld [vmem:[%s6352_s2 + $0xe] sm:$0x1] }
 0x152   : > { %v3788_v60 = vsel %vm1957_vm5, %v3746_v61, %v3787_v19  ;;  %4520 = vpow2.f32 %v4141_v14  ;;  %v323_v27 = vmul.f32 %v5202_v17, %v321_v18  ;;  %v6373_v15 = vmax.f32 %v5091_v12, 0.0  ;;  %v5489_v12 = vpop.permute.xlu0 %2768  ;;  %v4083_v14 = vld [vmem:[%s5055_s11 + $0x30] sm:$0xf] }
 0x153   : > { %v3789_v28 = vsel %vm1959_vm6, %v3753_v53, %v3788_v60  ;;  %v363_v29 = vrot.slane %v5124_v41, %v4868_v62  ;;  %v677_v21 = vadd.f32 1.0, %v5105_v26  ;;  %4522 = vpow2.f32 %v4147_v22  ;;  %6374 = vst [vmem:[#allocation12_spill] sm:$0xff] %v5489_v12  ;;  %v4120_v26 = vld [vmem:[%s6352_s2 + $0x9] sm:$0x1]  ;;  %v4088_v22 = vld [vmem:[%s5055_s11 + $0x10] sm:$0xf] }
 0x154   : > { %v354_v13 = vmul.f32 %v352_v54, %v6373_v15  ;;  %v3790_v20 = vsel %vm1961_vm7, %v3760_v55, %v3789_v28  ;;  %v394_v18 = vrot.slane %v5130_v49, %v4868_v62  ;;  %4524 = vrcp.f32 %v637_v59  ;;  %v4138_v49 = vld [vmem:[%s6352_s2 + $0xc] sm:$0x1] }
 0x155   : > { %3794 = vxpose.xlu1.b32.end [2/2] (short) (narrow) %v3790_v20, 16  ;;  %v326_v17 = vadd.f32 %v4071_v6, %v323_v27  ;;  %4526 = vpow2.f32 %v4153_v0  ;;  %v4109_v32 = vmul.f32 -1.442695, %v4108_v25  ;;  %v4115_v47 = vmul.f32 -1.442695, %v4114_v51 }
 0x156   : > { %v357_v41 = vadd.f32 %v4076_v8, %v354_v13  ;;  %4528 = vrcp.f32 %v677_v21  ;;  %v4121_v52 = vmul.f32 -1.442695, %v4120_v26  ;;  %v4127_v39 = vmul.f32 -1.442695, %v4126_v34  ;;  %v5521_v48 = vpop.permute.xlu0 %2805 }
 0x157   : > { %v327_v45 = vmax.f32 %v326_v17, 0.0  ;;  %4530 = vpow2.f32 %v4109_v32  ;;  %v4133_v54 = vmul.f32 -1.442695, %v4132_v36  ;;  %v405_v46 = vrot.slane %v5146_v57, %v4868_v62  ;;  %6375 = vst [vmem:[#allocation13_spill] sm:$0xff] %v5521_v48  ;;  %v5523_v57 = vpop.eup %4516  ;;  %v4094_v17 = vld [vmem:[%s5055_s11 + $0x14] sm:$0xf] }
 0x158   : > { %v358_v30 = vmax.f32 %v357_v41, 0.0  ;;  %v436_v50 = vrot.slane %v5151_v63, %v4868_v62  ;;  %4532 = vpow2.f32 %v4115_v47  ;;  %v4139_v24 = vmul.f32 -1.442695, %v4138_v49  ;;  %v2751_v48 = vld [vmem:[#allocation2 + $0x4] sm:$0xf] }
 0x159   : > { %v365_v3 = vmul.f32 %v363_v29, %v327_v45  ;;  %331 = vst.msk [vmem:[#allocation3 + $0x38] sm:$0xf] %vm287_vm0, %v327_v45  ;;  %4534 = vpow2.f32 %v4121_v52  ;;  %v4145_v2 = vmul.f32 -1.442695, %v4144_v43  ;;  %v4151_v1 = vmul.f32 -1.442695, %v4150_v11 }
 0x15a   : > { %371 = vst.msk [vmem:[#allocation2 + $0x8] sm:$0xf] %vm287_vm0, %v358_v30  ;;  %v396_v37 = vmul.f32 %v394_v18, %v358_v30  ;;  %4536 = vpow2.f32 %v4127_v39  ;;  %v717_v63 = vadd.f32 1.0, %v5174_v31  ;;  %v5530_v0 = vpop.permute.xlu0 %3412  ;;  %v447_v31 = vrot.slane %v5156_v4, %v4868_v62  ;;  %v4089_v18 = vld [vmem:[%s5055_s11 + $0x2c] sm:$0xf] }
 0x15b   : > { %v368_v9 = vadd.f32 %v4077_v16, %v365_v3  ;;  %4538 = vpow2.f32 %v4133_v54  ;;  %6376 = vst [vmem:[#allocation14_spill] sm:$0xff] %v5530_v0  ;;  %v478_v6 = vrot.slane %v5162_v10, %v4868_v62  ;;  %v489_v25 = vrot.slane %v5168_v23, %v4868_v62  ;;  %v4100_v3 = vld [vmem:[%s5055_s11 + $0x18] sm:$0xf]  ;;  %v4118_v39 = vld [vmem:[%s5055_s11 + $0x24] sm:$0xf] }
 0x15c   : > { %v399_v33 = vadd.f32 %v4082_v35, %v396_v37  ;;  %4540 = vpow2.f32 %v4139_v24  ;;  %v520_v4 = vrot.slane %v5177_v38, %v4868_v62  ;;  %v531_v51 = vrot.slane %v5182_v44, %v4868_v62  ;;  %v4119_v0 = vld [vmem:[%s5055_s11 + $0x18] sm:$0xf] }
 0x15d   : > { %v369_v61 = vmax.f32 %v368_v9, 0.0  ;;  %4542 = vpow2.f32 %v4145_v2  ;;  %v562_v26 = vrot.slane %v5184_v58, %v4868_v62  ;;  %v573_v34 = vrot.slane %v5519_v42, %v4868_v62 }
 0x15e   : > { %v400_v56 = vmax.f32 %v399_v33, 0.0  ;;  %v4519_v53 = vpop.eup %4518  ;;  %4544 = vpow2.f32 %v4151_v1  ;;  %v5552_v16 = vpop.trf.xlu0  ;;  %v614_v36 = vrot.slane %v5523_v57, %v4868_v62  ;;  %v4095_v33 = vld [vmem:[%s5055_s11 + $0x28] sm:$0xf] }
 0x15f   : > { %v407_v19 = vmul.f32 %v405_v46, %v369_v61  ;;  %373 = vst.msk [vmem:[#allocation3 + $0x34] sm:$0xf] %vm287_vm0, %v369_v61  ;;  %v4521_v55 = vpop.eup %4520  ;;  %4546 = vrcp.f32 %v717_v63  ;;  %v757_v15 = vadd.f32 1.0, %v4519_v53 }
 0x160   : > { %413 = vst.msk [vmem:[#allocation2 + $0xc] sm:$0xf] %vm287_vm0, %v400_v56  ;;  %v438_v59 = vmul.f32 %v436_v50, %v400_v56  ;;  %v4523_v60 = vpop.eup %4522  ;;  %v797_v20 = vadd.f32 1.0, %v4521_v55 }
 0x161   : > { %v410_v8 = vadd.f32 %v4083_v14, %v407_v19  ;;  %v5536_v27 = vpop.eup %4524  ;;  %v837_v10 = vadd.f32 1.0, %v4523_v60  ;;  %4548 = vrcp.f32 %v757_v15  ;;  %v1531_v44 = vld [vmem:[#allocation2 + $0x8] sm:$0xf] }
 0x162   : > { %v441_v28 = vadd.f32 %v4088_v22, %v438_v59  ;;  %v4527_v13 = vpop.eup %4526  ;;  %4550 = vrcp.f32 %v797_v20  ;;  %v5571_v53 = vpop.trf.xlu0  ;;  %v4101_v20 = vld [vmem:[%s5055_s11 + $0x24] sm:$0xf] }
 0x163   : > { %v411_v29 = vmax.f32 %v410_v8, 0.0  ;;  %v5546_v41 = vpop.eup %4528  ;;  %v877_v45 = vadd.f32 1.0, %v4527_v13  ;;  %4552 = vrcp.f32 %v837_v10  ;;  %v5579_v13 = vpop.permute.xlu1 %2198  ;;  %v4112_v10 = vld [vmem:[%s5055_s11 + $0x20] sm:$0xf] }
 0x164   : > { %v442_v21 = vmax.f32 %v441_v28, 0.0  ;;  %v4531_v35 = vpop.eup %4530 }
 0x165   : > { %v449_v23 = vmul.f32 %v447_v31, %v411_v29  ;;  %415 = vst.msk [vmem:[#allocation3 + $0x30] sm:$0xf] %vm287_vm0, %v411_v29  ;;  %v4533_v30 = vpop.eup %4532  ;;  %v589_v47 = vadd.f32 1.0, %v4531_v35  ;;  %v4106_v29 = vld [vmem:[%s5055_s11 + $0x1c] sm:$0xf] }
 0x166   : > { %455 = vst.msk [vmem:[#allocation2 + $0x10] sm:$0xf] %vm287_vm0, %v442_v21  ;;  %v480_v38 = vmul.f32 %v478_v6, %v442_v21  ;;  %v4535_v52 = vpop.eup %4534  ;;  %v629_v54 = vadd.f32 1.0, %v4533_v30  ;;  %v1529_v21 = vld [vmem:[#allocation2] sm:$0xf] }
 0x167   : > { %v452_v32 = vadd.f32 %v4089_v18, %v449_v23  ;;  %v4537_v11 = vpop.eup %4536  ;;  %4554 = vrcp.f32 %v589_v47  ;;  %v669_v24 = vadd.f32 1.0, %v4535_v52  ;;  %v1581_v30 = vld [vmem:[#allocation3 + $0x3c] sm:$0xf] }
 0x168   : > { %v483_v43 = vadd.f32 %v4094_v17, %v480_v38  ;;  %v4539_v9 = vpop.eup %4538  ;;  %4556 = vrcp.f32 %v877_v45  ;;  %v709_v61 = vadd.f32 1.0, %v4537_v11  ;;  %v1530_v38 = vld [vmem:[#allocation2 + $0x4] sm:$0xf]  ;;  %v2143_v11 = vld [vmem:[#allocation2] sm:$0xf] }
 0x169   : > { %v453_v46 = vmax.f32 %v452_v32, 0.0  ;;  %v4541_v56 = vpop.eup %4540  ;;  %4558 = vrcp.f32 %v629_v54  ;;  %v749_v22 = vadd.f32 1.0, %v4539_v9  ;;  %v5609_v58 = vmul.f32 %v5444_v7, %v1530_v38  ;;  %v2145_v9 = vld [vmem:[#allocation2 + $0x8] sm:$0xf]  ;;  %v4107_v54 = vld [vmem:[%s5055_s11 + $0x20] sm:$0xf] }
 0x16a   : > { %v484_v50 = vmax.f32 %v483_v43, 0.0  ;;  %v4543_v19 = vpop.eup %4542  ;;  %v789_v31 = vadd.f32 1.0, %v4541_v56  ;;  %4560 = vrcp.f32 %v669_v24  ;;  %v5603_v24 = vstv %s5564_s29  ;;  %v2195_v43 = vld [vmem:[#allocation3 + $0x3c] sm:$0xf]  ;;  %s4593_s29 = scalar_lea.vmem %s4592_s28, 2048 }
 0x16b   : > { %v491_v63 = vmul.f32 %v489_v25, %v453_v46  ;;  %457 = vst.msk [vmem:[#allocation3 + $0x2c] sm:$0xf] %vm287_vm0, %v453_v46  ;;  %v4545_v6 = vpop.eup %4544  ;;  %4562 = vrcp.f32 %v709_v61  ;;  %v829_v35 = vadd.f32 1.0, %v4543_v19  ;;  %v2144_v46 = vld [vmem:[#allocation2 + $0x4] sm:$0xf]  ;;  %v5645_v37 = vmul.f32 %v5228_v5, %v2145_v9 }
 0x16c   : > { %497 = vst.msk [vmem:[#allocation2 + $0x14] sm:$0xf] %vm287_vm0, %v484_v50  ;;  %v522_v14 = vmul.f32 %v520_v4, %v484_v50  ;;  %v5586_v18 = vpop.eup %4546  ;;  %4564 = vrcp.f32 %v749_v22  ;;  %v869_v45 = vadd.f32 1.0, %v4545_v6  ;;  %v5614_v22 = vmul.f32 %v5459_v40, %v1581_v30  ;;  %v2146_v19 = vld [vmem:[#allocation2 + $0xc] sm:$0xf]  ;;  %v5618_v6 = vpop.permute.xlu1 %3375 }
 0x16d   : > { %v494_v8 = vadd.f32 %v4095_v33, %v491_v63  ;;  %4566 = vrcp.f32 %v789_v31  ;;  %v1532_v63 = vld [vmem:[#allocation2 + $0xc] sm:$0xf]  ;;  %6377 = vst [vmem:[#allocation15_spill] sm:$0xff] %v5618_v6  ;;  %6380 = vst [vmem:[#allocation18_spill] sm:$0xff] %v5645_v37  ;;  %v4113_v50 = vld [vmem:[%s5055_s11 + $0x1c] sm:$0xf] }
 0x16e   : > { %v525_v28 = vadd.f32 %v4100_v3, %v522_v14  ;;  %v5611_v33 = vpop.eup %4548  ;;  %4568 = vrcp.f32 %v829_v35  ;;  %v1579_v14 = vld [vmem:[#allocation3 + $0x34] sm:$0xf]  ;;  %v5632_v35 = vmul.f32 %v5444_v7, %v1531_v44  ;;  %v5648_v44 = vmul.f32 %v5228_v5, %v2146_v19  ;;  %v2194_v3 = vld [vmem:[#allocation3 + $0x38] sm:$0xf] }
 0x16f   : > { %v495_v17 = vmax.f32 %v494_v8, 0.0  ;;  %v5616_v31 = vpop.eup %4550  ;;  %v1533_v8 = vld [vmem:[#allocation2 + $0x10] sm:$0xf]  ;;  %4570 = vrcp.f32 %v869_v45 }
 0x170   : > { %v526_v23 = vmax.f32 %v525_v28, 0.0  ;;  %v1578_v28 = vld [vmem:[#allocation3 + $0x30] sm:$0xf]  ;;  %6381 = vst [vmem:[#allocation19_spill] sm:$0xff] %v5648_v44 }
 0x171   : > { %v533_v47 = vmul.f32 %v531_v51, %v495_v17  ;;  %499 = vst.msk [vmem:[#allocation3 + $0x28] sm:$0xf] %vm287_vm0, %v495_v17  ;;  %v5606_v51 = vmul.f32 %v5444_v7, %v1529_v21  ;;  %v5621_v21 = vstv %s5576_s9  ;;  %v5629_v17 = vpop.eup %4552  ;;  %v2147_v45 = vld [vmem:[#allocation2 + $0x10] sm:$0xf]  ;;  %v5662_v19 = vmul.f32 %v5459_v40, %v1578_v28 }
 0x172   : > { %539 = vst.msk [vmem:[#allocation2 + $0x18] sm:$0xf] %vm287_vm0, %v526_v23  ;;  %v564_v52 = vmul.f32 %v562_v26, %v526_v23  ;;  %v1580_v26 = vld [vmem:[#allocation3 + $0x38] sm:$0xf]  ;;  %6378 = vst [vmem:[#allocation16_spill] sm:$0xff] %v5621_v21 }
 0x173   : > { %v536_v61 = vadd.f32 %v4101_v20, %v533_v47  ;;  %v5624_v20 = vmul.f32 %v5228_v5, %v2143_v11  ;;  %v5635_v30 = vmul.f32 %v5459_v40, %v1580_v26  ;;  %v2192_v47 = vld [vmem:[#allocation3 + $0x30] sm:$0xf]  ;;  %v5639_v11 = vmul.f32 %v5444_v7, %v1532_v63  ;;  %v1534_v63 = vld [vmem:[#allocation2 + $0x14] sm:$0xf]  ;;  %v1577_v4 = vld [vmem:[#allocation3 + $0x2c] sm:$0xf] }
 0x174   : > { %v567_v56 = vadd.f32 %v4106_v29, %v564_v52  ;;  %v5627_v29 = vmul.f32 %v5228_v5, %v2144_v46  ;;  %v4555_v52 = vpop.eup %4554  ;;  %v5642_v46 = vmul.f32 %v5459_v40, %v1579_v14  ;;  %v5657_v14 = vmul.f32 %v5444_v7, %v1533_v8  ;;  %v2148_v1 = vld [vmem:[#allocation2 + $0x14] sm:$0xf]  ;;  %v2191_v59 = vld [vmem:[#allocation3 + $0x2c] sm:$0xf]  ;;  %v2754_v44 = vld [vmem:[#allocation2 + $0x10] sm:$0xf] }
 0x175   : > { %v537_v23 = vmax.f32 %v536_v61, 0.0  ;;  %v2193_v61 = vld [vmem:[#allocation3 + $0x34] sm:$0xf]  ;;  %v5650_v26 = vpop.eup %4556  ;;  %v604_v9 = vrot.slane %v4555_v52, %v4868_v62  ;;  %v5675_v52 = vmul.f32 %v5579_v13, %v2192_v47  ;;  %v5687_v47 = vmul.f32 %v5444_v7, %v1534_v63 }
 0x176   : > { %6379 = vst [vmem:[#allocation17_spill] sm:$0xff] %v5627_v29  ;;  %v568_v38 = vmax.f32 %v567_v56, 0.0  ;;  %v4559_v32 = vpop.eup %4558  ;;  %v5669_v8 = vpop.trf.xlu1  ;;  %v5680_v55 = vmul.f32 %v5579_v13, %v2193_v61 }
 0x177   : > { %v575_v56 = vmul.f32 %v573_v34, %v537_v23  ;;  %541 = vst.msk [vmem:[#allocation3 + $0x24] sm:$0xf] %vm287_vm0, %v537_v23  ;;  %6382 = vst [vmem:[#allocation20_spill] sm:$0xff] %v5669_v8  ;;  %v5672_v23 = vmul.f32 %v5228_v5, %v2147_v45  ;;  %v5682_v60 = vpop.eup %4560  ;;  %v5690_v34 = vmul.f32 %v5579_v13, %v2194_v3 }
 0x178   : > { %581 = vst.msk [vmem:[#allocation2 + $0x1c] sm:$0xf] %vm287_vm0, %v568_v38  ;;  %6384 = vst [vmem:[#allocation22_spill] sm:$0xff] %v5675_v52  ;;  %v606_v2 = vmul.f32 %v604_v9, %v568_v38  ;;  %v5695_v38 = vpop.eup %4562  ;;  %v644_v61 = vrot.slane %v4559_v32, %v4868_v62  ;;  %v1576_v28 = vld [vmem:[#allocation3 + $0x28] sm:$0xf]  ;;  %v5699_v45 = vmul.f32 %v5459_v40, %v1577_v4 }
 0x179   : > { %6383 = vst [vmem:[#allocation21_spill] sm:$0xff] %v5672_v23  ;;  %v578_v25 = vadd.f32 %v4107_v54, %v575_v56  ;;  %6385 = vst [vmem:[#allocation23_spill] sm:$0xff] %v5680_v55  ;;  %v1535_v15 = vld [vmem:[#allocation2 + $0x18] sm:$0xf]  ;;  %v5693_v54 = vmul.f32 %v5579_v13, %v2195_v43  ;;  %v5701_v63 = vpop.eup %4564  ;;  %v5705_v3 = vmul.f32 %v5228_v5, %v2148_v1  ;;  %v4124_v55 = vld [vmem:[%s5055_s11 + $0x28] sm:$0xf] }
 0x17a   : > { %6386 = vst [vmem:[#allocation24_spill] sm:$0xff] %v5690_v34  ;;  %v608_v9 = vadd.f32 %v4112_v10, %v606_v2  ;;  %v2149_v42 = vld [vmem:[#allocation2 + $0x18] sm:$0xf]  ;;  %v5712_v2 = vpop.eup %4566  ;;  %v5718_v10 = vmul.f32 %v5444_v7, %v1535_v15  ;;  %v684_v1 = vrot.slane %v5682_v60, %v4868_v62  ;;  %v5727_v43 = vmul.f32 %v5459_v40, %v1576_v28  ;;  %v5733_v15 = vpop.trf.xlu1  ;;  %v2753_v23 = vld [vmem:[#allocation2 + $0xc] sm:$0xf] }
 0x17b   : > { %6387 = vst [vmem:[#allocation25_spill] sm:$0xff] %v5693_v54  ;;  %v579_v56 = vmax.f32 %v578_v25, 0.0  ;;  %6388 = vst [vmem:[#allocation26_spill] sm:$0xff] %v5705_v3  ;;  %v5710_v25 = vmul.f32 %v5579_v13, %v2191_v59  ;;  %v5730_v57 = vmul.f32 %v5228_v5, %v2149_v42  ;;  %v5739_v28 = vpop.eup %4568  ;;  %v2750_v59 = vld [vmem:[#allocation2] sm:$0xf] }
 0x17c   : > { %v609_v32 = vmax.f32 %v608_v9, 0.0  ;;  %6390 = vst [vmem:[#allocation28_spill] sm:$0xff] %v5733_v15  ;;  %v4125_v15 = vld [vmem:[%s5055_s11 + $0x14] sm:$0xf]  ;;  %v2752_v3 = vld [vmem:[#allocation2 + $0x8] sm:$0xf] }
 0x17d   : > { %6389 = vst [vmem:[#allocation27_spill] sm:$0xff] %v5710_v25  ;;  %v616_v4 = vmul.f32 %v614_v36, %v579_v56  ;;  %583 = vst.msk [vmem:[#allocation3 + $0x20] sm:$0xf] %vm287_vm0, %v579_v56  ;;  %v2190_v56 = vld [vmem:[#allocation3 + $0x28] sm:$0xf] }
 0x17e   : > { %621 = vst.msk [vmem:[#allocation2 + $0x20] sm:$0xf] %vm287_vm0, %v609_v32  ;;  %v646_v9 = vmul.f32 %v644_v61, %v609_v32  ;;  %v1575_v61 = vld [vmem:[#allocation3 + $0x24] sm:$0xf]  ;;  %v5750_v32 = vmul.f32 %v5579_v13, %v2190_v56  ;;  %v2756_v37 = vld [vmem:[#allocation2 + $0x18] sm:$0xf] }
 0x17f   : > { %v618_v49 = vadd.f32 %v4113_v50, %v616_v4  ;;  %v5747_v4 = vpop.eup %4570  ;;  %v1536_v54 = vld [vmem:[#allocation2 + $0x1c] sm:$0xf] }
 0x180   : > { %v648_v34 = vadd.f32 %v4118_v39, %v646_v9  ;;  %6391 = vst [vmem:[#allocation29_spill] sm:$0xff] %v5750_v32  ;;  %v2150_v52 = vld [vmem:[#allocation2 + $0x1c] sm:$0xf]  ;;  %v2189_v9 = vld [vmem:[#allocation3 + $0x24] sm:$0xf]  ;;  %v1557_v42 = vmul.f32 %v5444_v7, %v1536_v54  ;;  %v5770_v32 = vmul.f32 %v5459_v40, %v1575_v61 }
 0x181   : > { %v619_v60 = vmax.f32 %v618_v49, 0.0  ;;  %v6392_v49 = vrot.slane %v5536_v27, %v4868_v62  ;;  %v2171_v21 = vmul.f32 %v5228_v5, %v2150_v52  ;;  %v2210_v8 = vmul.f32 %v5579_v13, %v2189_v9  ;;  %v2755_v52 = vld [vmem:[#allocation2 + $0x14] sm:$0xf]  ;;  %v2757_v29 = vld [vmem:[#allocation2 + $0x1c] sm:$0xf] }
 0x182   : > { %v649_v56 = vmax.f32 %v648_v34, 0.0  ;;  %v3357_v34 = vld [vmem:[#allocation2] sm:$0xf]  ;;  %v5789_v9 = vmul.f32 %v5489_v12, %v2752_v3  ;;  %v3358_v3 = vld [vmem:[#allocation2 + $0x4] sm:$0xf] }
 0x183   : > { %623 = vst.msk [vmem:[#allocation3 + $0x1c] sm:$0xf] %vm287_vm0, %v619_v60  ;;  %v656_v39 = vmul.f32 %v6392_v49, %v619_v60 }
 0x184   : > { %v1574_v36 = vld [vmem:[#allocation3 + $0x20] sm:$0xf]  ;;  %661 = vst.msk [vmem:[#allocation2 + $0x24] sm:$0xf] %vm287_vm0, %v649_v56  ;;  %v686_v49 = vmul.f32 %v684_v1, %v649_v56  ;;  %v5784_v1 = vmul.f32 %v5489_v12, %v2751_v48  ;;  %6395 = vst [vmem:[#allocation32_spill] sm:$0xff] %v5789_v9  ;;  %v5795_v48 = vmul.f32 %v5489_v12, %v2754_v44 }
 0x185   : > { %v2188_v27 = vld [vmem:[#allocation3 + $0x20] sm:$0xf]  ;;  %v658_v60 = vadd.f32 %v4119_v0, %v656_v39  ;;  %v1595_v25 = vmul.f32 %v5459_v40, %v1574_v36  ;;  %v5781_v0 = vmul.f32 %v5489_v12, %v2750_v59  ;;  %v5792_v59 = vmul.f32 %v5489_v12, %v2753_v23 }
 0x186   : > { %v2209_v54 = vmul.f32 %v5579_v13, %v2188_v27  ;;  %v1537_v50 = vld [vmem:[#allocation2 + $0x20] sm:$0xf]  ;;  %6394 = vst [vmem:[#allocation31_spill] sm:$0xff] %v5784_v1  ;;  %v688_v39 = vadd.f32 %v4124_v55, %v686_v49  ;;  %v5798_v55 = vmul.f32 %v5618_v6, %v3357_v34  ;;  %v5806_v44 = vmul.f32 %v5489_v12, %v2755_v52 }
 0x187   : > { %v2151_v61 = vld [vmem:[#allocation2 + $0x20] sm:$0xf]  ;;  %6393 = vst [vmem:[#allocation30_spill] sm:$0xff] %v5781_v0  ;;  %v659_v36 = vmax.f32 %v658_v60, 0.0  ;;  %v1558_v56 = vmul.f32 %v5444_v7, %v1537_v50  ;;  %v6397_v50 = vrot.slane %v5546_v41, %v4868_v62  ;;  %v4130_v0 = vld [vmem:[%s5055_s11 + $0x2c] sm:$0xf]  ;;  %v5809_v34 = vmul.f32 %v5489_v12, %v2756_v37 }
 0x188   : > { %v2172_v27 = vmul.f32 %v5228_v5, %v2151_v61  ;;  %6396 = vst [vmem:[#allocation33_spill] sm:$0xff] %v5798_v55  ;;  %v689_v49 = vmax.f32 %v688_v39, 0.0  ;;  %v5812_v55 = vmul.f32 %v5489_v12, %v2757_v29  ;;  %v5815_v41 = vmul.f32 %v5618_v6, %v3358_v3  ;;  %v4131_v6 = vld [vmem:[%s5055_s11 + $0x10] sm:$0xf] }
 0x189   : > { %663 = vst.msk [vmem:[#allocation3 + $0x18] sm:$0xf] %vm287_vm0, %v659_v36  ;;  %v696_v60 = vmul.f32 %v6397_v50, %v659_v36  ;;  %v1611_v61 = vadd.f32 %v1595_v25, %v1558_v56  ;;  %v6399_v36 = vrot.slane %v5695_v38, %v4868_v62  ;;  %v5826_v3 = vstv %s5775_s10 }
 0x18a   : > { %v2225_v1 = vadd.f32 %v2209_v54, %v2172_v27  ;;  %v1573_v9 = vld [vmem:[#allocation3 + $0x1c] sm:$0xf]  ;;  %6398 = vst [vmem:[#allocation34_spill] sm:$0xff] %v5815_v41  ;;  %701 = vst.msk [vmem:[#allocation2 + $0x28] sm:$0xf] %vm287_vm0, %v689_v49 }
 0x18b   : > { %v2187_v23 = vld [vmem:[#allocation3 + $0x1c] sm:$0xf]  ;;  %v698_v25 = vadd.f32 %v4125_v15, %v696_v60  ;;  %v1594_v54 = vmul.f32 %v5459_v40, %v1573_v9  ;;  %v726_v39 = vmul.f32 %v6399_v36, %v689_v49  ;;  %v1675_v56 = vsel %vm287_vm0, %v1611_v61, 0.0  ;;  %v1538_v37 = vld [vmem:[#allocation2 + $0x24] sm:$0xf]  ;;  %6400 = vst [vmem:[#allocation35_spill] sm:$0xff] %v5826_v3 }
 0x18c   : > { %v1676_v27 = vrot.slane %v1675_v56, 4  ;;  %v2208_v29 = vmul.f32 %v5579_v13, %v2187_v23  ;;  %v2152_v52 = vld [vmem:[#allocation2 + $0x24] sm:$0xf]  ;;  %v2289_v50 = vsel %vm287_vm0, %v2225_v1, 0.0  ;;  %v1559_v41 = vmul.f32 %v5444_v7, %v1538_v37 }
 0x18d   : > { %v699_v15 = vmax.f32 %v698_v25, 0.0  ;;  %v1610_v9 = vadd.f32 %v1594_v54, %v1557_v42  ;;  %v728_v60 = vadd.f32 %v4130_v0, %v726_v39  ;;  %v2173_v61 = vmul.f32 %v5228_v5, %v2152_v52  ;;  %v4136_v42 = vld [vmem:[%s5055_s11 + $0x30] sm:$0xf] }
 0x18e   : > { %v1677_v38 = vadd.f32 %v1676_v27, %v1675_v56  ;;  %v5830_v49 = vadd.f32 %v2208_v29, %v2171_v21  ;;  %v2290_v36 = vrot.slane %v2289_v50, 4  ;;  %v6401_v23 = vrot.slane %v5586_v18, %v4868_v62 }
 0x18f   : > { %703 = vst.msk [vmem:[#allocation3 + $0x14] sm:$0xf] %vm287_vm0, %v699_v15  ;;  %v1668_v12 = vsel %vm287_vm0, %v1610_v9, 0.0  ;;  %v729_v25 = vmax.f32 %v728_v60, 0.0  ;;  %v1612_v0 = vadd.f32 %v5770_v32, %v1559_v41  ;;  %v5840_v37 = vadd.f32 %v2210_v8, %v2173_v61 }
 0x190   : > { %v736_v1 = vmul.f32 %v6401_v23, %v699_v15  ;;  %v1572_v54 = vld [vmem:[#allocation3 + $0x18] sm:$0xf]  ;;  %v1669_v39 = vrot.slane %v1668_v12, 4  ;;  %v1678_v56 = vrot.slane %v1677_v38, 2  ;;  %v5842_v27 = vadd.f32 %v2290_v36, %v2289_v50 }
 0x191   : > { %v2186_v21 = vld [vmem:[#allocation3 + $0x18] sm:$0xf]  ;;  %v1593_v52 = vmul.f32 %v5459_v40, %v1572_v54  ;;  %741 = vst.msk [vmem:[#allocation2 + $0x2c] sm:$0xf] %vm287_vm0, %v729_v25  ;;  %v6402_v18 = vrot.slane %v5701_v63, %v4868_v62  ;;  %v1682_v32 = vsel %vm287_vm0, %v1612_v0, 0.0 }
 0x192   : > { %v738_v29 = vadd.f32 %v4131_v6, %v736_v1  ;;  %v1670_v41 = vadd.f32 %v1669_v39, %v1668_v12  ;;  %v1539_v9 = vld [vmem:[#allocation2 + $0x28] sm:$0xf]  ;;  %v1679_v60 = vadd.f32 %v1678_v56, %v1677_v38  ;;  %v1683_v23 = vrot.slane %v1682_v32, 4  ;;  %v4137_v1 = vld [vmem:[%s5055_s11 + $0xc] sm:$0xf] }
 0x193   : > { %v766_v15 = vmul.f32 %v6402_v18, %v729_v25  ;;  %v2207_v8 = vmul.f32 %v5579_v13, %v2186_v21  ;;  %v1609_v50 = vadd.f32 %v1593_v52, %v5718_v10  ;;  %v1560_v36 = vmul.f32 %v5444_v7, %v1539_v9 }
 0x194   : > { %v739_v61 = vmax.f32 %v738_v29, 0.0  ;;  %v1671_v54 = vrot.slane %v1670_v41, 2  ;;  %v1680_v3 = vrot.slane %v1679_v60, 1  ;;  %v1684_v63 = vadd.f32 %v1683_v23, %v1682_v32  ;;  %v4142_v29 = vld [vmem:[%s5055_s11 + $0x34] sm:$0xf] }
 0x195   : > { %v768_v6 = vadd.f32 %v4136_v42, %v766_v15  ;;  %v5855_v25 = vadd.f32 %v2207_v8, %v5730_v57  ;;  %v6403_v12 = vrot.slane %v5611_v33, %v4868_v62  ;;  %v1661_v0 = vsel %vm287_vm0, %v1609_v50, 0.0 }
 0x196   : > { %743 = vst.msk [vmem:[#allocation3 + $0x10] sm:$0xf] %vm287_vm0, %v739_v61  ;;  %v1613_v42 = vadd.f32 %v5727_v43, %v1560_v36  ;;  %v1571_v39 = vld [vmem:[#allocation3 + $0x14] sm:$0xf]  ;;  %v1662_v56 = vrot.slane %v1661_v0, 4  ;;  %v1672_v21 = vadd.f32 %v1671_v54, %v1670_v41  ;;  %v5864_v52 = vadd.f32 %v1680_v3, %v1679_v60 }
 0x197   : > { %v776_v38 = vmul.f32 %v6403_v12, %v739_v61  ;;  %v769_v10 = vmax.f32 %v768_v6, 0.0  ;;  %v1685_v57 = vrot.slane %v1684_v63, 2  ;;  %v1592_v15 = vmul.f32 %v5459_v40, %v1571_v39  ;;  %v4143_v36 = vld [vmem:[%s5055_s11 + $0x8] sm:$0xf] }
 0x198   : > { %v6404_v33 = vrot.slane %v5712_v2, %v4868_v62  ;;  %v1689_v9 = vsel %vm287_vm0, %v1613_v42, 0.0  ;;  %v1663_v43 = vadd.f32 %v1662_v56, %v1661_v0  ;;  %v1673_v23 = vrot.slane %v1672_v21, 1  ;;  %v1540_v8 = vld [vmem:[#allocation2 + $0x2c] sm:$0xf] }
 0x199   : > { %v778_v18 = vadd.f32 %v4137_v1, %v776_v38  ;;  %781 = vst.msk [vmem:[#allocation2 + $0x30] sm:$0xf] %vm287_vm0, %v769_v10  ;;  %v1686_v41 = vadd.f32 %v1685_v57, %v1684_v63  ;;  %v1690_v61 = vrot.slane %v1689_v9, 4  ;;  %v1608_v60 = vadd.f32 %v1592_v15, %v5687_v47 }
 0x19a   : > { %v806_v32 = vmul.f32 %v6404_v33, %v769_v10  ;;  %v1561_v6 = vmul.f32 %v5444_v7, %v1540_v8  ;;  %v1664_v1 = vrot.slane %v1663_v43, 2  ;;  %v1674_v54 = vadd.f32 %v1673_v23, %v1672_v21  ;;  %v4148_v21 = vld [vmem:[%s5055_s11 + $0x38] sm:$0xf] }
 0x19b   : > { %v779_v3 = vmax.f32 %v778_v18, 0.0  ;;  %v1687_v12 = vrot.slane %v1686_v41, 1  ;;  %v1691_v2 = vadd.f32 %v1690_v61, %v1689_v9  ;;  %v6405_v38 = vrot.slane %v5616_v31, %v4868_v62 }
 0x19c   : > { %v808_v50 = vadd.f32 %v4142_v29, %v806_v32  ;;  %v1654_v63 = vsel %vm287_vm0, %v1608_v60, 0.0  ;;  %v1614_v47 = vadd.f32 %v5699_v45, %v1561_v6  ;;  %v1665_v56 = vadd.f32 %v1664_v1, %v1663_v43  ;;  %v4149_v6 = vld [vmem:[%s5055_s11 + $0x4] sm:$0xf] }
 0x19d   : > { %783 = vst.msk [vmem:[#allocation3 + $0xc] sm:$0xf] %vm287_vm0, %v779_v3  ;;  %v816_v0 = vmul.f32 %v6405_v38, %v779_v3  ;;  %v1570_v42 = vld [vmem:[#allocation3 + $0x10] sm:$0xf]  ;;  %v1655_v39 = vrot.slane %v1654_v63, 4  ;;  %v6406_v29 = vrot.slane %v5552_v16, 7  ;;  %v5884_v18 = vadd.f32 %v1687_v12, %v1686_v41 }
 0x19e   : > { %v809_v10 = vmax.f32 %v808_v50, 0.0  ;;  %v1591_v33 = vmul.f32 %v5459_v40, %v1570_v42  ;;  %v6407_v31 = vrot.slane %v5739_v28, %v4868_v62  ;;  %v1692_v45 = vrot.slane %v1691_v2, 2 }
 0x19f   : > { %v2043_v57 = vadd.f32 %v6406_v29, %v1674_v54  ;;  %v818_v15 = vadd.f32 %v4143_v36, %v816_v0  ;;  %v1656_v9 = vadd.f32 %v1655_v39, %v1654_v63  ;;  %v1666_v23 = vrot.slane %v1665_v56, 1 }
 0x1a0   : > { %821 = vst.msk [vmem:[#allocation2 + $0x34] sm:$0xf] %vm287_vm0, %v809_v10  ;;  %v846_v32 = vmul.f32 %v6407_v31, %v809_v10  ;;  %v1541_v8 = vld [vmem:[#allocation2 + $0x30] sm:$0xf]  ;;  %v1696_v61 = vsel %vm287_vm0, %v1614_v47, 0.0  ;;  %v1607_v41 = vadd.f32 %v1591_v33, %v5657_v14  ;;  %v1693_v54 = vadd.f32 %v1692_v45, %v1691_v2 }
 0x1a1   : > { %v2060_v43 = vadd.f32 %v5603_v24, %v2043_v57  ;;  %v819_v3 = vmax.f32 %v818_v15, 0.0  ;;  %v1562_v50 = vmul.f32 %v5444_v7, %v1541_v8  ;;  %v1657_v36 = vrot.slane %v1656_v9, 2  ;;  %v4154_v2 = vld [vmem:[%s5055_s11 + $0x3c] sm:$0xf] }
 0x1a2   : > { %v848_v60 = vadd.f32 %v4148_v21, %v846_v32  ;;  %v1667_v1 = vadd.f32 %v1666_v23, %v1665_v56  ;;  %v6408_v12 = vrot.slane %v5629_v17, %v4868_v62  ;;  %v1647_v0 = vsel %vm287_vm0, %v1607_v41, 0.0  ;;  %v897_v41 = vld [vmem:[%s5055_s11] sm:$0xf]  ;;  %s271_s11 = sand.u32 1, %s4643_s22  }
 0x1a3   : > { %v2076_v28 = vmax.f32 %v2060_v43, 0.0  ;;  %823 = vst.msk [vmem:[#allocation3 + $0x8] sm:$0xf] %vm287_vm0, %v819_v3  ;;  %v1615_v14 = vadd.f32 %v5662_v19, %v1562_v50  ;;  %v1648_v47 = vrot.slane %v1647_v0, 4  ;;  %v1658_v42 = vadd.f32 %v1657_v36, %v1656_v9  ;;  %s4061_s15 = sshll.u32 %s271_s11, 6  ;;  %s6310_s25 = scalar_lea.sflag [#allocation7], %s271_s11 }
 0x1a4   : > { %v856_v38 = vmul.f32 %v6408_v12, %v819_v3  ;;  %v849_v63 = vmax.f32 %v848_v60, 0.0  ;;  %v1569_v10 = vld [vmem:[#allocation3 + $0xc] sm:$0xf]  ;;  %v6409_v39 = vrot.slane %v5552_v16, 6  ;;  %v6410_v17 = vrot.slane %v5747_v4, %v4868_v62  ;;  %s6021_s20 = scalar_lea.vmem [#allocation9], %s4061_s15 }
 0x1a5   : > { %v5904_v56 = vrot.slane %v2076_v28, 1  ;;  %v1590_v21 = vmul.f32 %v5459_v40, %v1569_v10  ;;  %v1694_v19 = vrot.slane %v1693_v54, 1  ;;  %v1649_v33 = vadd.f32 %v1648_v47, %v1647_v0  ;;  %s3969_s14 = sshll.u32 %s6021_s20, 4  ;;  %s6302_s14 = int_to_ptr.vmem [resolvable:$true] %s3969_s14 }
 0x1a6   : > { %v2042_v29 = vadd.f32 %v6409_v39, %v1667_v1  ;;  %v858_v57 = vadd.f32 %v4149_v6, %v856_v38  ;;  %861 = vst.msk [vmem:[#allocation2 + $0x38] sm:$0xf] %vm287_vm0, %v849_v63  ;;  %v886_v15 = vmul.f32 %v6410_v17, %v849_v63  ;;  %v1659_v31 = vrot.slane %v1658_v42, 1  ;;  %s4587_s19 = scalar_lea.vmem %s6302_s14, 1024  ;;  %p4594_p13 = scmp.lt.s32.totalorder %s6302_s14, %s4592_s28 }
 0x1a7   : > { %v1542_v45 = vld [vmem:[#allocation2 + $0x34] sm:$0xf]  ;;  %v1697_v9 = vrot.slane %v1696_v61, 4  ;;  %v1606_v43 = vadd.f32 %v1590_v21, %v5639_v11  ;;  %v1650_v60 = vrot.slane %v1649_v33, 2  ;;  %v5916_v36 = vadd.f32 %v1694_v19, %v1693_v54  ;;  %p4588_p9 = scmp.ne.s32.totalorder %s6302_s14, %s4587_s19  ;;  %p4595_p0 = scmp.lt.s32.totalorder %s4593_s29, %s4587_s19 }
 0x1a8   : > { %v2059_v32 = vadd.f32 %v5603_v24, %v2042_v29  ;;  %v859_v23 = vmax.f32 %v858_v57, 0.0  ;;  %v888_v8 = vadd.f32 %v4154_v2, %v886_v15  ;;  %v1563_v3 = vmul.f32 %v5444_v7, %v1542_v45 }
 0x1a9   : > { %v1660_v50 = vadd.f32 %v1659_v31, %v1658_v42  ;;  %v6411_v4 = vrot.slane %v5650_v26, %v4868_v62  ;;  %v1640_v28 = vsel %vm287_vm0, %v1606_v43, 0.0  ;;  %v1651_v63 = vadd.f32 %v1650_v60, %v1649_v33  ;;  %p4589_p10 = pnand %p4588_p9, %p4731_p5  ;;  %p4596_p1 = por %p4595_p0, %p4594_p13 }
 0x1aa   : > { %v2075_v6 = vmax.f32 %v2059_v32, 0.0  ;;  %863 = vst.msk [vmem:[#allocation3 + $0x4] sm:$0xf] %vm287_vm0, %v859_v23  ;;  %v889_v12 = vmax.f32 %v888_v8, 0.0  ;;  %v1616_v11 = vadd.f32 %v5642_v46, %v1563_v3  ;;  %v1568_v38 = vld [vmem:[#allocation3 + $0x8] sm:$0xf]  ;;  %v1698_v62 = vadd.f32 %v1697_v9, %v1696_v61 }
 0x1ab   : > { %v896_v1 = vmul.f32 %v6411_v4, %v859_v23  ;;  %v1641_v0 = vrot.slane %v1640_v28, 4  ;;  %v6412_v10 = vrot.slane %v5552_v16, 5  ;;  %v1589_v39 = vmul.f32 %v5459_v40, %v1568_v38  ;;  %p4590_p12 = pneg %p4589_p10 }
 0x1ac   : > { %v5926_v42 = vrot.slane %v2075_v6, 2  ;;  %901 = vst.msk [vmem:[#allocation2 + $0x3c] sm:$0xf] %vm287_vm0, %v889_v12  ;;  %v1703_v26 = vsel %vm287_vm0, %v1615_v14, 0.0  ;;  %v1652_v2 = vrot.slane %v1651_v63, 1  ;;  %v1699_v33 = vrot.slane %v1698_v62, 2 }
 0x1ad   : > { %v2041_v47 = vadd.f32 %v6412_v10, %v1660_v50  ;;  %v898_v54 = vadd.f32 %v897_v41, %v896_v1  ;;  %v1642_v29 = vadd.f32 %v1641_v0, %v1640_v28  ;;  %v1543_v57 = vld [vmem:[#allocation2 + $0x38] sm:$0xf]  ;;  %v1704_v21 = vrot.slane %v1703_v26, 4  ;;  %p4597_p2 = pnand %p4596_p1, %p4590_p12 }
 0x1ae   : > { %v1605_v15 = vadd.f32 %v1589_v39, %v5632_v35  ;;  %v1564_v19 = vmul.f32 %v5444_v7, %v1543_v57  ;;  %v1653_v32 = vadd.f32 %v1652_v2, %v1651_v63  ;;  %v1700_v9 = vadd.f32 %v1699_v33, %v1698_v62 }
 0x1af   : > { %v2058_v46 = vadd.f32 %v5603_v24, %v2041_v47  ;;  %v899_v17 = vmax.f32 %v898_v54, 0.0  ;;  %v1643_v31 = vrot.slane %v1642_v29, 2  ;;  %v1705_v23 = vadd.f32 %v1704_v21, %v1703_v26 }
 0x1b0   : > { %v1633_v61 = vsel %vm287_vm0, %v1605_v15, 0.0  ;;  %v1617_v14 = vadd.f32 %v5635_v30, %v1564_v19  ;;  %v1710_v43 = vsel %vm287_vm0, %v1616_v11, 0.0  ;;  %v6413_v35 = vrot.slane %v5552_v16, 4 }
 0x1b1   : > { %v2074_v45 = vmax.f32 %v2058_v46, 0.0  ;;  %902 = vst.msk [vmem:[#allocation3] sm:$0xf] %vm287_vm0, %v899_v17  ;;  %v1567_v8 = vld [vmem:[#allocation3 + $0x4] sm:$0xf]  ;;  %v1634_v3 = vrot.slane %v1633_v61, 4  ;;  %v1644_v41 = vadd.f32 %v1643_v31, %v1642_v29 }
 0x1b2   : > { %v2040_v60 = vadd.f32 %v6413_v35, %v1653_v32  ;;  %v1588_v6 = vmul.f32 %v5459_v40, %v1567_v8  ;;  %v1701_v4 = vrot.slane %v1700_v9, 1  ;;  %v1706_v1 = vrot.slane %v1705_v23, 2 }
 0x1b3   : > { %v5940_v50 = vrot.slane %v2074_v45, 3  ;;  %v1711_v28 = vrot.slane %v1710_v43, 4  ;;  %v1635_v12 = vadd.f32 %v1634_v3, %v1633_v61  ;;  %v1645_v38 = vrot.slane %v1644_v41, 1  ;;  %v1544_v0 = vld [vmem:[#allocation2 + $0x3c] sm:$0xf] }
 0x1b4   : > { %v2057_v30 = vadd.f32 %v5603_v24, %v2040_v60  ;;  %v1717_v11 = vsel %vm287_vm0, %v1617_v14, 0.0  ;;  %v1604_v63 = vadd.f32 %v1588_v6, %v5609_v58  ;;  %v1565_v10 = vmul.f32 %v5444_v7, %v1544_v0 }
 0x1b5   : > { %v1702_v47 = vadd.f32 %v1701_v4, %v1700_v9  ;;  %v1707_v54 = vadd.f32 %v1706_v1, %v1705_v23  ;;  %v1636_v39 = vrot.slane %v1635_v12, 2  ;;  %v1646_v62 = vadd.f32 %v1645_v38, %v1644_v41 }
 0x1b6   : > { %v2073_v26 = vmax.f32 %v2057_v30, 0.0  ;;  %v1712_v29 = vadd.f32 %v1711_v28, %v1710_v43  ;;  %v1626_v2 = vsel %vm287_vm0, %v1604_v63, 0.0  ;;  %v1618_v46 = vadd.f32 %v5614_v22, %v1565_v10 }
 0x1b7   : > { %v1708_v57 = vrot.slane %v1707_v54, 1  ;;  %v1718_v21 = vrot.slane %v1717_v11, 4  ;;  %v1627_v15 = vrot.slane %v1626_v2, 4  ;;  %v1637_v19 = vadd.f32 %v1636_v39, %v1635_v12 }
 0x1b8   : > { %v1566_v17 = vld [vmem:[#allocation3] sm:$0xf]  ;;  %v6414_v33 = vrot.slane %v5552_v16, 3  ;;  %v5951_v31 = vrot.slane %v2073_v26, 4  ;;  %v1713_v45 = vrot.slane %v1712_v29, 2  ;;  %v1724_v22 = vsel %vm287_vm0, %v1618_v46, 0.0 }
 0x1b9   : > { %v1587_v7 = vmul.f32 %v5459_v40, %v1566_v17  ;;  %v1709_v32 = vadd.f32 %v1708_v57, %v1707_v54  ;;  %v1719_v23 = vadd.f32 %v1718_v21, %v1717_v11  ;;  %v1628_v61 = vadd.f32 %v1627_v15, %v1626_v2 }
 0x1ba   : > { %v2039_v58 = vadd.f32 %v6414_v33, %v1646_v62  ;;  %v1638_v14 = vrot.slane %v1637_v19, 1  ;;  %v1714_v8 = vadd.f32 %v1713_v45, %v1712_v29  ;;  %v1725_v41 = vrot.slane %v1724_v22, 4 }
 0x1bb   : > { %v1603_v43 = vadd.f32 %v1587_v7, %v5606_v51  ;;  %v1720_v3 = vrot.slane %v1719_v23, 2  ;;  %v1629_v35 = vrot.slane %v1628_v61, 2  ;;  %v2044_v40 = vadd.f32 %v5571_v53, %v5864_v52 }
 0x1bc   : > { %v2056_v9 = vadd.f32 %v5603_v24, %v2039_v58  ;;  %v1639_v60 = vadd.f32 %v1638_v14, %v1637_v19  ;;  %v1715_v1 = vrot.slane %v1714_v8, 1  ;;  %v1726_v12 = vadd.f32 %v1725_v41, %v1724_v22 }
 0x1bd   : > { %v1619_v4 = vsel %vm287_vm0, %v1603_v43, 0.0  ;;  %v1721_v28 = vadd.f32 %v1720_v3, %v1719_v23  ;;  %v1630_v30 = vadd.f32 %v1629_v35, %v1628_v61  ;;  %v6415_v0 = vrot.slane %v5552_v16, 2 }
 0x1be   : > { %v2072_v6 = vmax.f32 %v2056_v9, 0.0  ;;  %v1620_v38 = vrot.slane %v1619_v4, 4  ;;  %v1716_v63 = vadd.f32 %v1715_v1, %v1714_v8  ;;  %v1727_v54 = vrot.slane %v1726_v12, 2 }
 0x1bf   : > { %v2038_v11 = vadd.f32 %v6415_v0, %v1639_v60  ;;  %v1722_v10 = vrot.slane %v1721_v28, 1  ;;  %v6416_v39 = vrot.slane %v5571_v53, 1  ;;  %v1631_v26 = vrot.slane %v1630_v30, 1 }
 0x1c0   : > { %v5962_v51 = vrot.slane %v2072_v6, 5  ;;  %v1621_v52 = vadd.f32 %v1620_v38, %v1619_v4  ;;  %v6417_v2 = vrot.slane %v5571_v53, 2  ;;  %v1728_v21 = vadd.f32 %v1727_v54, %v1726_v12 }
 0x1c1   : > { %v2045_v62 = vadd.f32 %v6416_v39, %v5884_v18  ;;  %v2055_v29 = vadd.f32 %v5603_v24, %v2038_v11  ;;  %v1723_v57 = vadd.f32 %v1722_v10, %v1721_v28  ;;  %v6418_v17 = vrot.slane %v5571_v53, 3 }
 0x1c2   : > { %v2046_v46 = vadd.f32 %v6417_v2, %v5916_v36  ;;  %v6419_v19 = vrot.slane %v5571_v53, 4  ;;  %v1622_v58 = vrot.slane %v1621_v52, 2  ;;  %v1632_v7 = vadd.f32 %v1631_v26, %v1630_v30 }
 0x1c3   : > { %v2047_v15 = vadd.f32 %v6418_v17, %v1702_v47  ;;  %v2071_v45 = vmax.f32 %v2055_v29, 0.0  ;;  %v6420_v18 = vrot.slane %v5571_v53, 5  ;;  %v1729_v61 = vrot.slane %v1728_v21, 1 }
 0x1c4   : > { %v2048_v33 = vadd.f32 %v6419_v19, %v1709_v32  ;;  %v6421_v14 = vrot.slane %v5571_v53, 6  ;;  %v2061_v36 = vadd.f32 %v5603_v24, %v2044_v40  ;;  %v2062_v22 = vadd.f32 %v5603_v24, %v2045_v62  ;;  %v2181_v62 = vld [vmem:[#allocation3 + $0x4] sm:$0xf] }
 0x1c5   : > { %v2049_v23 = vadd.f32 %v6420_v18, %v1716_v63  ;;  %v1623_v43 = vadd.f32 %v1622_v58, %v1621_v52  ;;  %v6422_v47 = vrot.slane %v5552_v16, 1  ;;  %v2103_v3 = vrot.slane %v2071_v45, 6  ;;  %v2183_v52 = vld [vmem:[#allocation3 + $0xc] sm:$0xf] }
 0x1c6   : > { %v2050_v9 = vadd.f32 %v6421_v14, %v1723_v57  ;;  %v2063_v32 = vadd.f32 %v5603_v24, %v2046_v46  ;;  %v1730_v41 = vadd.f32 %v1729_v61, %v1728_v21  ;;  %v2064_v35 = vadd.f32 %v5603_v24, %v2047_v15  ;;  %v2180_v57 = vld [vmem:[#allocation3] sm:$0xf]  ;;  %v2185_v21 = vld [vmem:[#allocation3 + $0x14] sm:$0xf] }
 0x1c7   : > { %v2037_v8 = vadd.f32 %v6422_v47, %v1632_v7  ;;  %v2065_v60 = vadd.f32 %v5603_v24, %v2048_v33  ;;  %v2066_v6 = vadd.f32 %v5603_v24, %v2049_v23  ;;  %v1624_v4 = vrot.slane %v1623_v43, 1  ;;  %v2182_v33 = vld [vmem:[#allocation3 + $0x8] sm:$0xf]  ;;  %v2184_v23 = vld [vmem:[#allocation3 + $0x10] sm:$0xf] }
 0x1c8   : > { %v2067_v40 = vadd.f32 %v5603_v24, %v2050_v9  ;;  %v2077_v28 = vmax.f32 %v2061_v36, 0.0  ;;  %v6423_v12 = vrot.slane %v5571_v53, 7  ;;  %v2078_v30 = vmax.f32 %v2062_v22, 0.0 }
 0x1c9   : > { %v2054_v1 = vadd.f32 %v5603_v24, %v2037_v8  ;;  %v2079_v0 = vmax.f32 %v2063_v32, 0.0  ;;  %v2080_v11 = vmax.f32 %v2064_v35, 0.0  ;;  %v1625_v63 = vadd.f32 %v1624_v4, %v1623_v43 }
 0x1ca   : > { %v2051_v38 = vadd.f32 %v6423_v12, %v1730_v41  ;;  %v2081_v54 = vmax.f32 %v2065_v60, 0.0  ;;  %v2082_v39 = vmax.f32 %v2066_v6, 0.0  ;;  %v2083_v29 = vmax.f32 %v2067_v40, 0.0  ;;  %v6424_v6 = vld [vmem:[#allocation17_spill] sm:$0xff] }
 0x1cb   : > { %v2070_v10 = vmax.f32 %v2054_v1, 0.0  ;;  %v2115_v2 = vrot.slane %v2078_v30, 7  ;;  %v2117_v46 = vrot.slane %v2079_v0, 6  ;;  %v2036_v53 = vadd.f32 %v5552_v16, %v1625_v63  ;;  %v6425_v1 = vld [vmem:[#allocation18_spill] sm:$0xff]  ;;  %v6427_v0 = vld [vmem:[#allocation21_spill] sm:$0xff] }
 0x1cc   : > { %v2068_v26 = vadd.f32 %v5603_v24, %v2051_v38  ;;  %v2119_v15 = vrot.slane %v2080_v11, 5  ;;  %v2121_v19 = vrot.slane %v2081_v54, 4  ;;  %v2123_v45 = vrot.slane %v2082_v39, 3  ;;  %v6426_v38 = vld [vmem:[#allocation19_spill] sm:$0xff] }
 0x1cd   : > { %v2101_v17 = vrot.slane %v2070_v10, 7  ;;  %v2116_v7 = vsel %vm1949_vm1, %v2115_v2, %v2077_v28  ;;  %v2125_v18 = vrot.slane %v2083_v29, 2  ;;  %v2053_v61 = vadd.f32 %v5603_v24, %v2036_v53  ;;  %v6428_v10 = vld [vmem:[#allocation26_spill] sm:$0xff] }
 0x1ce   : > { %v2084_v58 = vmax.f32 %v2068_v26, 0.0  ;;  %v2118_v14 = vsel %vm1951_vm2, %v2117_v46, %v2116_v7  ;;  %v2201_v9 = vmul.f32 %v5579_v13, %v2180_v57  ;;  %v2202_v16 = vmul.f32 %v5579_v13, %v2181_v62 }
 0x1cf   : > { %v2120_v36 = vsel %vm1953_vm3, %v2119_v15, %v2118_v14  ;;  %v2203_v43 = vmul.f32 %v5579_v13, %v2182_v33  ;;  %v2204_v47 = vmul.f32 %v5579_v13, %v2183_v52  ;;  %v2069_v8 = vmax.f32 %v2053_v61, 0.0 }
 0x1d0   : > { %v2127_v22 = vrot.slane %v2084_v58, 1  ;;  %v2122_v32 = vsel %vm1955_vm4, %v2121_v19, %v2120_v36  ;;  %v2205_v24 = vmul.f32 %v5579_v13, %v2184_v23  ;;  %v2206_v41 = vmul.f32 %v5579_v13, %v2185_v21 }
 0x1d1   : > { %v2124_v35 = vsel %vm1957_vm5, %v2123_v45, %v2122_v32  ;;  %v2217_v60 = vadd.f32 %v2201_v9, %v5624_v20  ;;  %v2218_v4 = vadd.f32 %v2202_v16, %v6424_v6  ;;  %v2219_v40 = vadd.f32 %v2203_v43, %v6425_v1 }
 0x1d2   : > { %v2102_v28 = vsel %vm1949_vm1, %v2101_v17, %v2069_v8  ;;  %v2126_v12 = vsel %vm1959_vm6, %v2125_v18, %v2124_v35  ;;  %v2220_v30 = vadd.f32 %v2204_v47, %v6426_v38  ;;  %v2221_v11 = vadd.f32 %v2205_v24, %v6427_v0 }
 0x1d3   : > { %v2104_v63 = vsel %vm1951_vm2, %v2103_v3, %v2102_v28  ;;  %v2128_v13 = vsel %vm1961_vm7, %v2127_v22, %v2126_v12  ;;  %v2222_v54 = vadd.f32 %v2206_v41, %v6428_v10  ;;  %v2233_v20 = vsel %vm287_vm0, %v2217_v60, 0.0 }
 0x1d4   : > { %v2106_v39 = vsel %vm1953_vm3, %v5962_v51, %v2104_v63  ;;  %2133 = vst.msk [vmem:[%s6021_s20 + $0x8] sm:$0xff] %vm2131_vm8, %v2128_v13  ;;  %v2234_v62 = vrot.slane %v2233_v20, 4  ;;  %v2240_v52 = vsel %vm287_vm0, %v2218_v4, 0.0  ;;  %v2247_v26 = vsel %vm287_vm0, %v2219_v40, 0.0  ;;  %v6429_v63 = vld [vmem:[#allocation20_spill] sm:$0xff] }
 0x1d5   : > { %v2108_v3 = vsel %vm1955_vm4, %v5951_v31, %v2106_v39  ;;  %v2241_v29 = vrot.slane %v2240_v52, 4  ;;  %v2248_v2 = vrot.slane %v2247_v26, 4  ;;  %v2254_v46 = vsel %vm287_vm0, %v2220_v30, 0.0 }
 0x1d6   : > { %v2110_v51 = vsel %vm1957_vm5, %v5940_v50, %v2108_v3  ;;  %v2235_v57 = vadd.f32 %v2234_v62, %v2233_v20  ;;  %v2255_v21 = vrot.slane %v2254_v46, 4  ;;  %v2261_v53 = vsel %vm287_vm0, %v2221_v11, 0.0 }
 0x1d7   : > { %v2112_v17 = vsel %vm1959_vm6, %v5926_v42, %v2110_v51  ;;  %v2242_v15 = vadd.f32 %v2241_v29, %v2240_v52  ;;  %v2249_v19 = vadd.f32 %v2248_v2, %v2247_v26  ;;  %v2262_v33 = vrot.slane %v2261_v53, 4 }
 0x1d8   : > { %v2114_v31 = vsel %vm1961_vm7, %v5904_v56, %v2112_v17  ;;  %v2236_v58 = vrot.slane %v2235_v57, 2  ;;  %v2256_v7 = vadd.f32 %v2255_v21, %v2254_v46  ;;  %v2268_v45 = vsel %vm287_vm0, %v2222_v54, 0.0  ;;  %v6433_v46 = vld [vmem:[#allocation16_spill] sm:$0xff] }
 0x1d9   : > { %2132 = vst.msk [vmem:[%s6021_s20] sm:$0xff] %vm2131_vm8, %v2114_v31  ;;  %v2243_v50 = vrot.slane %v2242_v15, 2  ;;  %v2250_v18 = vrot.slane %v2249_v19, 2  ;;  %v2263_v23 = vadd.f32 %v2262_v33, %v2261_v53  ;;  %v2269_v61 = vrot.slane %v2268_v45, 4 }
 0x1da   : > { %v2237_v14 = vadd.f32 %v2236_v58, %v2235_v57  ;;  %v2257_v9 = vrot.slane %v2256_v7, 2  ;;  %v2275_v42 = vsel %vm287_vm0, %v5855_v25, 0.0  ;;  %v2282_v16 = vsel %vm287_vm0, %v5830_v49, 0.0 }
 0x1db   : > { %v2244_v36 = vadd.f32 %v2243_v50, %v2242_v15  ;;  %v2251_v56 = vadd.f32 %v2250_v18, %v2249_v19  ;;  %v2264_v22 = vrot.slane %v2263_v23, 2  ;;  %v2270_v43 = vadd.f32 %v2269_v61, %v2268_v45  ;;  %v2153_v19 = vld [vmem:[#allocation2 + $0x28] sm:$0xf] }
 0x1dc   : > { %v2238_v47 = vrot.slane %v2237_v14, 1  ;;  %v2258_v8 = vadd.f32 %v2257_v9, %v2256_v7  ;;  %v2276_v32 = vrot.slane %v2275_v42, 4  ;;  %v2283_v24 = vrot.slane %v2282_v16, 4 }
 0x1dd   : > { %v2245_v41 = vrot.slane %v2244_v36, 1  ;;  %v2252_v35 = vrot.slane %v2251_v56, 1  ;;  %v2265_v60 = vadd.f32 %v2264_v22, %v2263_v23  ;;  %v2271_v6 = vrot.slane %v2270_v43, 2 }
 0x1de   : > { %v2239_v4 = vadd.f32 %v2238_v47, %v2237_v14  ;;  %v2259_v1 = vrot.slane %v2258_v8, 1  ;;  %v2277_v40 = vadd.f32 %v2276_v32, %v2275_v42  ;;  %v2284_v28 = vadd.f32 %v2283_v24, %v2282_v16  ;;  %v2154_v14 = vld [vmem:[#allocation2 + $0x2c] sm:$0xf]  ;;  %v2156_v32 = vld [vmem:[#allocation2 + $0x34] sm:$0xf] }
 0x1df   : > { %v2246_v25 = vadd.f32 %v2245_v41, %v2244_v36  ;;  %v2253_v12 = vadd.f32 %v2252_v35, %v2251_v56  ;;  %v2266_v38 = vrot.slane %v2265_v60, 1  ;;  %v2272_v49 = vadd.f32 %v2271_v6, %v2270_v43  ;;  %v2155_v36 = vld [vmem:[#allocation2 + $0x30] sm:$0xf] }
 0x1e0   : > { %v2260_v30 = vadd.f32 %v2259_v1, %v2258_v8  ;;  %v2278_v0 = vrot.slane %v2277_v40, 2  ;;  %v2285_v11 = vrot.slane %v2284_v28, 2  ;;  %v2643_v13 = vadd.f32 %v6429_v63, %v2239_v4  ;;  %v2157_v4 = vld [vmem:[#allocation2 + $0x38] sm:$0xf]  ;;  %v2158_v1 = vld [vmem:[#allocation2 + $0x3c] sm:$0xf] }
 0x1e1   : > { %v2267_v10 = vadd.f32 %v2266_v38, %v2265_v60  ;;  %v2273_v54 = vrot.slane %v2272_v49, 1  ;;  %v6430_v20 = vrot.slane %v6429_v63, 1  ;;  %v6431_v62 = vrot.slane %v6429_v63, 2 }
 0x1e2   : > { %v2279_v26 = vadd.f32 %v2278_v0, %v2277_v40  ;;  %v2286_v3 = vadd.f32 %v2285_v11, %v2284_v28  ;;  %v6432_v29 = vrot.slane %v6429_v63, 3  ;;  %v2660_v51 = vadd.f32 %v6433_v46, %v2643_v13 }
 0x1e3   : > { %v2644_v39 = vadd.f32 %v6430_v20, %v2246_v25  ;;  %v2645_v52 = vadd.f32 %v6431_v62, %v2253_v12  ;;  %v2274_v57 = vadd.f32 %v2273_v54, %v2272_v49  ;;  %v6434_v21 = vrot.slane %v6429_v63, 4 }
 0x1e4   : > { %v2646_v2 = vadd.f32 %v6432_v29, %v2260_v30  ;;  %v2280_v33 = vrot.slane %v2279_v26, 1  ;;  %v2287_v31 = vrot.slane %v2286_v3, 1  ;;  %v2676_v7 = vmax.f32 %v2660_v51, 0.0  ;;  %v6439_v29 = vld [vmem:[#allocation27_spill] sm:$0xff]  ;;  %v6440_v51 = vld [vmem:[#allocation22_spill] sm:$0xff] }
 0x1e5   : > { %v2647_v53 = vadd.f32 %v6434_v21, %v2267_v10  ;;  %v2661_v17 = vadd.f32 %v6433_v46, %v2644_v39  ;;  %v2662_v15 = vadd.f32 %v6433_v46, %v2645_v52  ;;  %v6435_v45 = vrot.slane %v6429_v63, 5  ;;  %v6438_v52 = vld [vmem:[#allocation29_spill] sm:$0xff]  ;;  %v6441_v21 = vld [vmem:[#allocation23_spill] sm:$0xff] }
 0x1e6   : > { %v2663_v58 = vadd.f32 %v6433_v46, %v2646_v2  ;;  %v2281_v9 = vadd.f32 %v2280_v33, %v2279_v26  ;;  %v2288_v42 = vadd.f32 %v2287_v31, %v2286_v3  ;;  %v2174_v56 = vmul.f32 %v5228_v5, %v2153_v19  ;;  %v6442_v19 = vld [vmem:[#allocation24_spill] sm:$0xff] }
 0x1e7   : > { %v2648_v50 = vadd.f32 %v6435_v45, %v2274_v57  ;;  %v2664_v18 = vadd.f32 %v6433_v46, %v2647_v53  ;;  %v2677_v23 = vmax.f32 %v2661_v17, 0.0  ;;  %v2678_v61 = vmax.f32 %v2662_v15, 0.0 }
 0x1e8   : > { %v2679_v16 = vmax.f32 %v2663_v58, 0.0  ;;  %v6436_v24 = vrot.slane %v6429_v63, 6  ;;  %v6437_v35 = vrot.slane %v6429_v63, 7  ;;  %v2175_v40 = vmul.f32 %v5228_v5, %v2154_v14 }
 0x1e9   : > { %v2665_v22 = vadd.f32 %v6433_v46, %v2648_v50  ;;  %v2680_v43 = vmax.f32 %v2664_v18, 0.0  ;;  %v2708_v47 = vrot.slane %v2677_v23, 7  ;;  %v2710_v8 = vrot.slane %v2678_v61, 6 }
 0x1ea   : > { %v2649_v41 = vadd.f32 %v6436_v24, %v2281_v9  ;;  %v2650_v60 = vadd.f32 %v6437_v35, %v2288_v42  ;;  %v2712_v6 = vrot.slane %v2679_v16, 5  ;;  %v2176_v38 = vmul.f32 %v5228_v5, %v2155_v36 }
 0x1eb   : > { %v2681_v28 = vmax.f32 %v2665_v22, 0.0  ;;  %v2709_v25 = vsel %vm1949_vm1, %v2708_v47, %v2676_v7  ;;  %v2714_v12 = vrot.slane %v2680_v43, 4  ;;  %v2177_v11 = vmul.f32 %v5228_v5, %v2156_v32 }
 0x1ec   : > { %v2666_v49 = vadd.f32 %v6433_v46, %v2649_v41  ;;  %v2667_v30 = vadd.f32 %v6433_v46, %v2650_v60  ;;  %v2711_v0 = vsel %vm1951_vm2, %v2710_v8, %v2709_v25  ;;  %v2178_v10 = vmul.f32 %v5228_v5, %v2157_v4 }
 0x1ed   : > { %v2713_v63 = vsel %vm1953_vm3, %v2712_v6, %v2711_v0  ;;  %v2716_v13 = vrot.slane %v2681_v28, 3  ;;  %v2179_v54 = vmul.f32 %v5228_v5, %v2158_v1  ;;  %v2227_v26 = vadd.f32 %v6438_v52, %v2174_v56  ;;  %v6443_v5 = vld [vmem:[#allocation25_spill] sm:$0xff] }
 0x1ee   : > { %v2682_v20 = vmax.f32 %v2666_v49, 0.0  ;;  %v2683_v39 = vmax.f32 %v2667_v30, 0.0  ;;  %v2715_v62 = vsel %vm1955_vm4, %v2714_v12, %v2713_v63  ;;  %v2228_v2 = vadd.f32 %v6439_v29, %v2175_v40 }
 0x1ef   : > { %v2717_v3 = vsel %vm1957_vm5, %v2716_v13, %v2715_v62  ;;  %v2229_v57 = vadd.f32 %v6440_v51, %v2176_v38  ;;  %v2230_v53 = vadd.f32 %v6441_v21, %v2177_v11  ;;  %v2231_v33 = vadd.f32 %v6442_v19, %v2178_v10  ;;  %v6444_v11 = vld [vmem:[#allocation28_spill] sm:$0xff] }
 0x1f0   : > { %v2718_v17 = vrot.slane %v2682_v20, 2  ;;  %v2720_v15 = vrot.slane %v2683_v39, 1  ;;  %v2232_v31 = vadd.f32 %v6443_v5, %v2179_v54  ;;  %v2292_v58 = vrot.slane %v5842_v27, 2 }
 0x1f1   : > { %v2296_v7 = vsel %vm287_vm0, %v5840_v37, 0.0  ;;  %v2303_v45 = vsel %vm287_vm0, %v2227_v26, 0.0  ;;  %v2310_v50 = vsel %vm287_vm0, %v2228_v2, 0.0  ;;  %v2317_v16 = vsel %vm287_vm0, %v2229_v57, 0.0  ;;  %v2787_v57 = vld [vmem:[#allocation3] sm:$0xf] }
 0x1f2   : > { %v2719_v18 = vsel %vm1959_vm6, %v2718_v17, %v2717_v3  ;;  %v2297_v23 = vrot.slane %v2296_v7, 4  ;;  %v2304_v61 = vrot.slane %v2303_v45, 4  ;;  %v2311_v14 = vrot.slane %v2310_v50, 4 }
 0x1f3   : > { %v2721_v9 = vsel %vm1961_vm7, %v2720_v15, %v2719_v18  ;;  %v2293_v42 = vadd.f32 %v2292_v58, %v5842_v27  ;;  %v2324_v36 = vsel %vm287_vm0, %v2230_v53, 0.0  ;;  %v2318_v43 = vrot.slane %v2317_v16, 4 }
 0x1f4   : > { %4252 = vst.msk [vmem:[%s6021_s20 + $0x10] sm:$0xff] %vm2131_vm8, %v2721_v9  ;;  %v2298_v37 = vadd.f32 %v2297_v23, %v2296_v7  ;;  %v2305_v56 = vadd.f32 %v2304_v61, %v2303_v45  ;;  %v2312_v22 = vadd.f32 %v2311_v14, %v2310_v50  ;;  %v2325_v8 = vrot.slane %v2324_v36, 4  ;;  %v2788_v50 = vld [vmem:[#allocation3 + $0x4] sm:$0xf]  ;;  %v6448_v14 = vld [vmem:[#allocation13_spill] sm:$0xff] }
 0x1f5   : > { %v2294_v47 = vrot.slane %v2293_v42, 1  ;;  %v2331_v32 = vsel %vm287_vm0, %v2231_v33, 0.0  ;;  %v2338_v24 = vsel %vm287_vm0, %v2232_v31, 0.0  ;;  %v2319_v27 = vadd.f32 %v2318_v43, %v2317_v16 }
 0x1f6   : > { %v2299_v41 = vrot.slane %v2298_v37, 2  ;;  %v2306_v35 = vrot.slane %v2305_v56, 2  ;;  %v2313_v60 = vrot.slane %v2312_v22, 2  ;;  %v2326_v4 = vadd.f32 %v2325_v8, %v2324_v36 }
 0x1f7   : > { %v2295_v6 = vadd.f32 %v2294_v47, %v2293_v42  ;;  %v2332_v1 = vrot.slane %v2331_v32, 4  ;;  %v2339_v40 = vrot.slane %v2338_v24, 4  ;;  %v2320_v38 = vrot.slane %v2319_v27, 2 }
 0x1f8   : > { %v2300_v28 = vadd.f32 %v2299_v41, %v2298_v37  ;;  %v2307_v25 = vadd.f32 %v2306_v35, %v2305_v56  ;;  %v2314_v12 = vadd.f32 %v2313_v60, %v2312_v22  ;;  %v2327_v49 = vrot.slane %v2326_v4, 2  ;;  %v2789_v22 = vld [vmem:[#allocation3 + $0x8] sm:$0xf] }
 0x1f9   : > { %v2333_v30 = vadd.f32 %v2332_v1, %v2331_v32  ;;  %v2340_v0 = vadd.f32 %v2339_v40, %v2338_v24  ;;  %v2651_v63 = vadd.f32 %v6444_v11, %v2295_v6  ;;  %v2321_v20 = vadd.f32 %v2320_v38, %v2319_v27  ;;  %v2790_v6 = vld [vmem:[#allocation3 + $0xc] sm:$0xf]  ;;  %v2792_v38 = vld [vmem:[#allocation3 + $0x14] sm:$0xf] }
 0x1fa   : > { %v2301_v13 = vrot.slane %v2300_v28, 1  ;;  %v2308_v10 = vrot.slane %v2307_v25, 1  ;;  %v2315_v54 = vrot.slane %v2314_v12, 1  ;;  %v2328_v39 = vadd.f32 %v2327_v49, %v2326_v4 }
 0x1fb   : > { %v2334_v62 = vrot.slane %v2333_v30, 2  ;;  %v2341_v52 = vrot.slane %v2340_v0, 2  ;;  %v2668_v26 = vadd.f32 %v6433_v46, %v2651_v63  ;;  %v2322_v51 = vrot.slane %v2321_v20, 1 }
 0x1fc   : > { %v2302_v3 = vadd.f32 %v2301_v13, %v2300_v28  ;;  %v2309_v29 = vadd.f32 %v2308_v10, %v2307_v25  ;;  %v2316_v2 = vadd.f32 %v2315_v54, %v2314_v12  ;;  %v2329_v21 = vrot.slane %v2328_v39, 1  ;;  %v2791_v12 = vld [vmem:[#allocation3 + $0x10] sm:$0xf] }
 0x1fd   : > { %v2335_v53 = vadd.f32 %v2334_v62, %v2333_v30  ;;  %v2342_v17 = vadd.f32 %v2341_v52, %v2340_v0  ;;  %v2684_v15 = vmax.f32 %v2668_v26, 0.0  ;;  %v2323_v19 = vadd.f32 %v2322_v51, %v2321_v20  ;;  %v2794_v62 = vld [vmem:[#allocation3 + $0x1c] sm:$0xf] }
 0x1fe   : > { %v6445_v33 = vrot.slane %v6444_v11, 1  ;;  %v6446_v31 = vrot.slane %v6444_v11, 2  ;;  %v6447_v7 = vrot.slane %v6444_v11, 3  ;;  %v2330_v18 = vadd.f32 %v2329_v21, %v2328_v39  ;;  %v2793_v39 = vld [vmem:[#allocation3 + $0x18] sm:$0xf] }
 0x1ff   : > { %v2336_v23 = vrot.slane %v2335_v53, 1  ;;  %v2343_v61 = vrot.slane %v2342_v17, 1  ;;  %v2808_v9 = vmul.f32 %v6448_v14, %v2787_v57  ;;  %v6449_v42 = vrot.slane %v6444_v11, 4 }
 0x200   : > { %v2652_v5 = vadd.f32 %v6445_v33, %v2302_v3  ;;  %v2653_v58 = vadd.f32 %v6446_v31, %v2309_v29  ;;  %v2654_v45 = vadd.f32 %v6447_v7, %v2316_v2  ;;  %v6450_v8 = vrot.slane %v6444_v11, 5 }
 0x201   : > { %v2655_v16 = vadd.f32 %v6449_v42, %v2323_v19  ;;  %v2337_v43 = vadd.f32 %v2336_v23, %v2335_v53  ;;  %v2344_v47 = vadd.f32 %v2343_v61, %v2342_v17  ;;  %v2809_v24 = vmul.f32 %v6448_v14, %v2788_v50  ;;  %v6453_v19 = vld [vmem:[#allocation30_spill] sm:$0xff]  ;;  %v6455_v50 = vld [vmem:[#allocation32_spill] sm:$0xff] }
 0x202   : > { %v2669_v36 = vadd.f32 %v6433_v46, %v2652_v5  ;;  %v2670_v37 = vadd.f32 %v6433_v46, %v2653_v58  ;;  %v2671_v56 = vadd.f32 %v6433_v46, %v2654_v45  ;;  %v2656_v32 = vadd.f32 %v6450_v8, %v2330_v18  ;;  %v6454_v58 = vld [vmem:[#allocation31_spill] sm:$0xff] }
 0x203   : > { %v2672_v41 = vadd.f32 %v6433_v46, %v2655_v16  ;;  %v6451_v4 = vrot.slane %v6444_v11, 6  ;;  %v6452_v40 = vrot.slane %v6444_v11, 7  ;;  %v2810_v49 = vmul.f32 %v6448_v14, %v2789_v22 }
 0x204   : > { %v2685_v35 = vmax.f32 %v2669_v36, 0.0  ;;  %v2686_v60 = vmax.f32 %v2670_v37, 0.0  ;;  %v2687_v27 = vmax.f32 %v2671_v56, 0.0  ;;  %v2673_v25 = vadd.f32 %v6433_v46, %v2656_v32 }
 0x205   : > { %v2657_v1 = vadd.f32 %v6451_v4, %v2337_v43  ;;  %v2658_v28 = vadd.f32 %v6452_v40, %v2344_v47  ;;  %v2688_v30 = vmax.f32 %v2672_v41, 0.0  ;;  %v2811_v11 = vmul.f32 %v6448_v14, %v2790_v6 }
 0x206   : > { %v2722_v0 = vrot.slane %v2685_v35, 7  ;;  %v2724_v63 = vrot.slane %v2686_v60, 6  ;;  %v2726_v13 = vrot.slane %v2687_v27, 5  ;;  %v2689_v20 = vmax.f32 %v2673_v25, 0.0 }
 0x207   : > { %v2674_v10 = vadd.f32 %v6433_v46, %v2657_v1  ;;  %v2675_v54 = vadd.f32 %v6433_v46, %v2658_v28  ;;  %v2728_v26 = vrot.slane %v2688_v30, 4  ;;  %v2812_v3 = vmul.f32 %v6448_v14, %v2791_v12 }
 0x208   : > { %v2723_v52 = vsel %vm1949_vm1, %v2722_v0, %v2684_v15  ;;  %v2813_v29 = vmul.f32 %v6448_v14, %v2792_v38  ;;  %v2730_v21 = vrot.slane %v2689_v20, 3  ;;  %v2814_v46 = vmul.f32 %v6448_v14, %v2793_v39 }
 0x209   : > { %v2690_v2 = vmax.f32 %v2674_v10, 0.0  ;;  %v2691_v51 = vmax.f32 %v2675_v54, 0.0  ;;  %v2725_v57 = vsel %vm1951_vm2, %v2724_v63, %v2723_v52  ;;  %v2815_v17 = vmul.f32 %v6448_v14, %v2794_v62 }
 0x20a   : > { %v2727_v53 = vsel %vm1953_vm3, %v2726_v13, %v2725_v57  ;;  %v2824_v33 = vadd.f32 %v2808_v9, %v6453_v19  ;;  %v2825_v7 = vadd.f32 %v2809_v24, %v6454_v58  ;;  %v2826_v18 = vadd.f32 %v2810_v49, %v6455_v50 }
 0x20b   : > { %v2729_v15 = vsel %vm1955_vm4, %v2728_v26, %v2727_v53  ;;  %v2732_v5 = vrot.slane %v2690_v2, 2  ;;  %v2734_v31 = vrot.slane %v2691_v51, 1  ;;  %v2827_v23 = vadd.f32 %v2811_v11, %v5792_v59  ;;  %v3202_v2 = vpop.trf.xlu0 }
 0x20c   : > { %v2731_v45 = vsel %vm1957_vm5, %v2730_v21, %v2729_v15  ;;  %v2828_v61 = vadd.f32 %v2812_v3, %v5795_v48  ;;  %v2829_v16 = vadd.f32 %v2813_v29, %v5806_v44  ;;  %v2830_v9 = vadd.f32 %v2814_v46, %v5809_v34 }
 0x20d   : > { %v2733_v42 = vsel %vm1959_vm6, %v2732_v5, %v2731_v45  ;;  %v2831_v36 = vadd.f32 %v2815_v17, %v5812_v55  ;;  %v2840_v56 = vsel %vm287_vm0, %v2824_v33, 0.0  ;;  %v2847_v22 = vsel %vm287_vm0, %v2825_v7, 0.0 }
 0x20e   : > { %v2735_v37 = vsel %vm1961_vm7, %v2734_v31, %v2733_v42  ;;  %v2854_v43 = vsel %vm287_vm0, %v2826_v18, 0.0  ;;  %v2841_v59 = vrot.slane %v2840_v56, 4  ;;  %v2848_v48 = vrot.slane %v2847_v22, 4 }
 0x20f   : > { %4253 = vst.msk [vmem:[%s6021_s20 + $0x18] sm:$0xff] %vm2131_vm8, %v2735_v37  ;;  %v2855_v47 = vrot.slane %v2854_v43, 4  ;;  %v2861_v8 = vsel %vm287_vm0, %v2827_v23, 0.0  ;;  %v2868_v34 = vsel %vm287_vm0, %v2828_v61, 0.0  ;;  %v2875_v55 = vsel %vm287_vm0, %v2829_v16, 0.0 }
 0x210   : > { %v2862_v44 = vrot.slane %v2861_v8, 4  ;;  %v2882_v32 = vsel %vm287_vm0, %v2830_v9, 0.0  ;;  %v2842_v24 = vadd.f32 %v2841_v59, %v2840_v56  ;;  %v2849_v41 = vadd.f32 %v2848_v48, %v2847_v22 }
 0x211   : > { %v2856_v35 = vadd.f32 %v2855_v47, %v2854_v43  ;;  %v2869_v60 = vrot.slane %v2868_v34, 4  ;;  %v2876_v6 = vrot.slane %v2875_v55, 4  ;;  %v2883_v4 = vrot.slane %v2882_v32, 4 }
 0x212   : > { %v2863_v27 = vadd.f32 %v2862_v44, %v2861_v8  ;;  %v2889_v1 = vsel %vm287_vm0, %v2831_v36, 0.0  ;;  %v2843_v40 = vrot.slane %v2842_v24, 2  ;;  %v2850_v28 = vrot.slane %v2849_v41, 2 }
 0x213   : > { %v2857_v25 = vrot.slane %v2856_v35, 2  ;;  %v2870_v12 = vadd.f32 %v2869_v60, %v2868_v34  ;;  %v2877_v49 = vadd.f32 %v2876_v6, %v2875_v55  ;;  %v2884_v30 = vadd.f32 %v2883_v4, %v2882_v32  ;;  %v6456_v34 = vld [vmem:[#allocation35_spill] sm:$0xff]  ;;  %v2758_v60 = vld [vmem:[#allocation2 + $0x20] sm:$0xf] }
 0x214   : > { %v2864_v38 = vrot.slane %v2863_v27, 2  ;;  %v2890_v0 = vrot.slane %v2889_v1, 4  ;;  %v2844_v63 = vadd.f32 %v2843_v40, %v2842_v24  ;;  %v2851_v13 = vadd.f32 %v2850_v28, %v2849_v41  ;;  %v2760_v28 = vld [vmem:[#allocation2 + $0x28] sm:$0xf] }
 0x215   : > { %v2858_v10 = vadd.f32 %v2857_v25, %v2856_v35  ;;  %v2871_v54 = vrot.slane %v2870_v12, 2  ;;  %v2878_v39 = vrot.slane %v2877_v49, 2  ;;  %v2885_v62 = vrot.slane %v2884_v30, 2  ;;  %v2761_v25 = vld [vmem:[#allocation2 + $0x2c] sm:$0xf] }
 0x216   : > { %v2865_v20 = vadd.f32 %v2864_v38, %v2863_v27  ;;  %v2891_v11 = vadd.f32 %v2890_v0, %v2889_v1  ;;  %v2845_v52 = vrot.slane %v2844_v63, 1  ;;  %v2852_v26 = vrot.slane %v2851_v13, 1  ;;  %v2759_v27 = vld [vmem:[#allocation2 + $0x24] sm:$0xf]  ;;  %v2762_v0 = vld [vmem:[#allocation2 + $0x30] sm:$0xf] }
 0x217   : > { %v2859_v3 = vrot.slane %v2858_v10, 1  ;;  %v2872_v29 = vadd.f32 %v2871_v54, %v2870_v12  ;;  %v2879_v57 = vadd.f32 %v2878_v39, %v2877_v49  ;;  %v2886_v21 = vadd.f32 %v2885_v62, %v2884_v30  ;;  %v6457_v39 = vld [vmem:[#allocation12_spill] sm:$0xff] }
 0x218   : > { %v2866_v51 = vrot.slane %v2865_v20, 1  ;;  %v2892_v53 = vrot.slane %v2891_v11, 2  ;;  %v2846_v46 = vadd.f32 %v2845_v52, %v2844_v63  ;;  %v2853_v17 = vadd.f32 %v2852_v26, %v2851_v13  ;;  %v2763_v63 = vld [vmem:[#allocation2 + $0x34] sm:$0xf]  ;;  %v2796_v52 = vld [vmem:[#allocation3 + $0x24] sm:$0xf] }
 0x219   : > { %v2860_v19 = vadd.f32 %v2859_v3, %v2858_v10  ;;  %v2873_v33 = vrot.slane %v2872_v29, 1  ;;  %v2880_v5 = vrot.slane %v2879_v57, 1  ;;  %v2887_v31 = vrot.slane %v2886_v21, 1 }
 0x21a   : > { %v2867_v15 = vadd.f32 %v2866_v51, %v2865_v20  ;;  %v2893_v58 = vadd.f32 %v2892_v53, %v2891_v11  ;;  %v3220_v45 = vrot.slane %v3202_v2, 1  ;;  %v3221_v50 = vrot.slane %v3202_v2, 2  ;;  %v2764_v20 = vld [vmem:[#allocation2 + $0x38] sm:$0xf]  ;;  %v2795_v11 = vld [vmem:[#allocation3 + $0x20] sm:$0xf] }
 0x21b   : > { %v2874_v7 = vadd.f32 %v2873_v33, %v2872_v29  ;;  %v3222_v18 = vrot.slane %v3202_v2, 3  ;;  %v2881_v23 = vadd.f32 %v2880_v5, %v2879_v57  ;;  %v2888_v61 = vadd.f32 %v2887_v31, %v2886_v21  ;;  %v2797_v51 = vld [vmem:[#allocation3 + $0x28] sm:$0xf]  ;;  %v2798_v31 = vld [vmem:[#allocation3 + $0x2c] sm:$0xf] }
 0x21c   : > { %v2894_v42 = vrot.slane %v2893_v58, 1  ;;  %v3223_v16 = vrot.slane %v3202_v2, 4  ;;  %v3224_v9 = vrot.slane %v3202_v2, 5  ;;  %v3225_v36 = vrot.slane %v3202_v2, 6 }
 0x21d   : > { %v3226_v37 = vrot.slane %v3202_v2, 7  ;;  %v3250_v56 = vadd.f32 %v3202_v2, %v2846_v46  ;;  %v3251_v43 = vadd.f32 %v3220_v45, %v2853_v17  ;;  %v3252_v59 = vadd.f32 %v3221_v50, %v2860_v19  ;;  %v2765_v46 = vld [vmem:[#allocation2 + $0x3c] sm:$0xf] }
 0x21e   : > { %v2895_v22 = vadd.f32 %v2894_v42, %v2893_v58  ;;  %v3253_v48 = vadd.f32 %v3222_v18, %v2867_v15  ;;  %v3254_v47 = vadd.f32 %v3223_v16, %v2874_v7  ;;  %v3255_v8 = vadd.f32 %v3224_v9, %v2881_v23  ;;  %v2799_v58 = vld [vmem:[#allocation3 + $0x30] sm:$0xf]  ;;  %v2800_v23 = vld [vmem:[#allocation3 + $0x34] sm:$0xf]  ;;  %v2802_v42 = vld [vmem:[#allocation3 + $0x3c] sm:$0xf] }
 0x21f   : > { %v3256_v44 = vadd.f32 %v3225_v36, %v2888_v61  ;;  %v3267_v55 = vadd.f32 %v6456_v34, %v3250_v56  ;;  %v3268_v24 = vadd.f32 %v6456_v34, %v3251_v43  ;;  %v3269_v41 = vadd.f32 %v6456_v34, %v3252_v59  ;;  %v2801_v61 = vld [vmem:[#allocation3 + $0x38] sm:$0xf] }
 0x220   : > { %v3257_v32 = vadd.f32 %v3226_v37, %v2895_v22  ;;  %v3270_v35 = vadd.f32 %v6456_v34, %v3253_v48  ;;  %v3271_v6 = vadd.f32 %v6456_v34, %v3254_v47  ;;  %v3272_v4 = vadd.f32 %v6456_v34, %v3255_v8 }
 0x221   : > { %v3273_v1 = vadd.f32 %v6456_v34, %v3256_v44  ;;  %v3283_v40 = vmax.f32 %v3267_v55, 0.0  ;;  %v3284_v38 = vmax.f32 %v3268_v24, 0.0  ;;  %v3285_v49 = vmax.f32 %v3269_v41, 0.0 }
 0x222   : > { %v3274_v12 = vadd.f32 %v6456_v34, %v3257_v32  ;;  %v3286_v30 = vmax.f32 %v3270_v35, 0.0  ;;  %v3287_v13 = vmax.f32 %v3271_v6, 0.0  ;;  %v3288_v10 = vmax.f32 %v3272_v4, 0.0 }
 0x223   : > { %v3289_v54 = vmax.f32 %v3273_v1, 0.0  ;;  %v2779_v62 = vmul.f32 %v6457_v39, %v2758_v60  ;;  %v3315_v3 = vrot.slane %v3284_v38, 7  ;;  %v3317_v29 = vrot.slane %v3285_v49, 6 }
 0x224   : > { %v3290_v26 = vmax.f32 %v3274_v12, 0.0  ;;  %v3319_v2 = vrot.slane %v3286_v30, 5  ;;  %v3321_v57 = vrot.slane %v3287_v13, 4  ;;  %v3323_v21 = vrot.slane %v3288_v10, 3 }
 0x225   : > { %v3325_v53 = vrot.slane %v3289_v54, 2  ;;  %v2780_v17 = vmul.f32 %v6457_v39, %v2759_v27  ;;  %v3316_v19 = vsel %vm1949_vm1, %v3315_v3, %v3283_v40  ;;  %v2781_v15 = vmul.f32 %v6457_v39, %v2760_v28 }
 0x226   : > { %v3327_v33 = vrot.slane %v3290_v26, 1  ;;  %v2782_v5 = vmul.f32 %v6457_v39, %v2761_v25  ;;  %v3318_v7 = vsel %vm1951_vm2, %v3317_v29, %v3316_v19  ;;  %v2783_v45 = vmul.f32 %v6457_v39, %v2762_v0 }
 0x227   : > { %v2784_v50 = vmul.f32 %v6457_v39, %v2763_v63  ;;  %v2785_v18 = vmul.f32 %v6457_v39, %v2764_v20  ;;  %v3320_v16 = vsel %vm1953_vm3, %v3319_v2, %v3318_v7  ;;  %v2786_v9 = vmul.f32 %v6457_v39, %v2765_v46 }
 0x228   : > { %v2816_v36 = vmul.f32 %v6448_v14, %v2795_v11  ;;  %v2817_v37 = vmul.f32 %v6448_v14, %v2796_v52  ;;  %v3322_v56 = vsel %vm1955_vm4, %v3321_v57, %v3320_v16  ;;  %v2818_v22 = vmul.f32 %v6448_v14, %v2797_v51 }
 0x229   : > { %v2819_v43 = vmul.f32 %v6448_v14, %v2798_v31  ;;  %v2820_v59 = vmul.f32 %v6448_v14, %v2799_v58  ;;  %v3324_v48 = vsel %vm1957_vm5, %v3323_v21, %v3322_v56  ;;  %v2821_v47 = vmul.f32 %v6448_v14, %v2800_v23  ;;  %v3203_v23 = vpop.trf.xlu0 }
 0x22a   : > { %v2822_v8 = vmul.f32 %v6448_v14, %v2801_v61  ;;  %v2823_v44 = vmul.f32 %v6448_v14, %v2802_v42  ;;  %v3326_v55 = vsel %vm1959_vm6, %v3325_v53, %v3324_v48  ;;  %v2832_v32 = vadd.f32 %v2816_v36, %v2779_v62 }
 0x22b   : > { %v2833_v24 = vadd.f32 %v2817_v37, %v2780_v17  ;;  %v2834_v41 = vadd.f32 %v2818_v22, %v2781_v15  ;;  %v3328_v35 = vsel %vm1961_vm7, %v3327_v33, %v3326_v55  ;;  %v2835_v60 = vadd.f32 %v2819_v43, %v2782_v5 }
 0x22c   : > { %v2836_v27 = vadd.f32 %v2820_v59, %v2783_v45  ;;  %v2837_v6 = vadd.f32 %v2821_v47, %v2784_v50  ;;  %4259 = vst.msk [vmem:[%s6021_s20 + $0x20] sm:$0xff] %vm2131_vm8, %v3328_v35  ;;  %v2838_v4 = vadd.f32 %v2822_v8, %v2785_v18  ;;  %v2839_v1 = vadd.f32 %v2823_v44, %v2786_v9 }
 0x22d   : > { %v2896_v40 = vsel %vm287_vm0, %v2832_v32, 0.0  ;;  %v2903_v28 = vsel %vm287_vm0, %v2833_v24, 0.0  ;;  %v2910_v12 = vsel %vm287_vm0, %v2834_v41, 0.0  ;;  %v2917_v38 = vsel %vm287_vm0, %v2835_v60, 0.0 }
 0x22e   : > { %v2897_v25 = vrot.slane %v2896_v40, 4  ;;  %v2904_v14 = vrot.slane %v2903_v28, 4  ;;  %v2911_v49 = vrot.slane %v2910_v12, 4  ;;  %v2918_v30 = vrot.slane %v2917_v38, 4 }
 0x22f   : > { %v2924_v0 = vsel %vm287_vm0, %v2836_v27, 0.0  ;;  %v2931_v63 = vsel %vm287_vm0, %v2837_v6, 0.0  ;;  %v2938_v11 = vsel %vm287_vm0, %v2838_v4, 0.0  ;;  %v2945_v52 = vsel %vm287_vm0, %v2839_v1, 0.0 }
 0x230   : > { %v2898_v13 = vadd.f32 %v2897_v25, %v2896_v40  ;;  %v2905_v10 = vadd.f32 %v2904_v14, %v2903_v28  ;;  %v2925_v54 = vrot.slane %v2924_v0, 4  ;;  %v2932_v20 = vrot.slane %v2931_v63, 4 }
 0x231   : > { %v2912_v39 = vadd.f32 %v2911_v49, %v2910_v12  ;;  %v2919_v62 = vadd.f32 %v2918_v30, %v2917_v38  ;;  %v2939_v21 = vrot.slane %v2938_v11, 4  ;;  %v2946_v53 = vrot.slane %v2945_v52, 4 }
 0x232   : > { %v2899_v26 = vrot.slane %v2898_v13, 2  ;;  %v2906_v3 = vrot.slane %v2905_v10, 2  ;;  %v2926_v29 = vadd.f32 %v2925_v54, %v2924_v0  ;;  %v2933_v2 = vadd.f32 %v2932_v20, %v2931_v63 }
 0x233   : > { %v2913_v51 = vrot.slane %v2912_v39, 2  ;;  %v2920_v57 = vrot.slane %v2919_v62, 2  ;;  %v2940_v31 = vadd.f32 %v2939_v21, %v2938_v11  ;;  %v2947_v58 = vadd.f32 %v2946_v53, %v2945_v52  ;;  %v3359_v11 = vld [vmem:[#allocation2 + $0x8] sm:$0xf]  ;;  %v3360_v52 = vld [vmem:[#allocation2 + $0xc] sm:$0xf] }
 0x234   : > { %v2900_v46 = vadd.f32 %v2899_v26, %v2898_v13  ;;  %v2907_v17 = vadd.f32 %v2906_v3, %v2905_v10  ;;  %v2927_v19 = vrot.slane %v2926_v29, 2  ;;  %v2934_v33 = vrot.slane %v2933_v2, 2  ;;  %v3363_v21 = vld [vmem:[#allocation2 + $0x18] sm:$0xf] }
 0x235   : > { %v2914_v15 = vadd.f32 %v2913_v51, %v2912_v39  ;;  %v2921_v5 = vadd.f32 %v2920_v57, %v2919_v62  ;;  %v2941_v16 = vrot.slane %v2940_v31, 2  ;;  %v2948_v9 = vrot.slane %v2947_v58, 2  ;;  %v3361_v51 = vld [vmem:[#allocation2 + $0x10] sm:$0xf]  ;;  %v3362_v57 = vld [vmem:[#allocation2 + $0x14] sm:$0xf] }
 0x236   : > { %v2901_v7 = vrot.slane %v2900_v46, 1  ;;  %v2908_v45 = vrot.slane %v2907_v17, 1  ;;  %v2928_v50 = vadd.f32 %v2927_v19, %v2926_v29  ;;  %v2935_v18 = vadd.f32 %v2934_v33, %v2933_v2  ;;  %v3364_v33 = vld [vmem:[#allocation2 + $0x1c] sm:$0xf] }
 0x237   : > { %v2915_v61 = vrot.slane %v2914_v15, 1  ;;  %v2922_v42 = vrot.slane %v2921_v5, 1  ;;  %v2942_v48 = vadd.f32 %v2941_v16, %v2940_v31  ;;  %v2949_v47 = vadd.f32 %v2948_v9, %v2947_v58 }
 0x238   : > { %v2902_v36 = vadd.f32 %v2901_v7, %v2900_v46  ;;  %v2909_v37 = vadd.f32 %v2908_v45, %v2907_v17  ;;  %v2929_v56 = vrot.slane %v2928_v50, 1  ;;  %v2936_v22 = vrot.slane %v2935_v18, 1  ;;  %v3395_v45 = vld [vmem:[#allocation3 + $0x4] sm:$0xf] }
 0x239   : > { %v2916_v43 = vadd.f32 %v2915_v61, %v2914_v15  ;;  %v2923_v59 = vadd.f32 %v2922_v42, %v2921_v5  ;;  %v3227_v55 = vrot.slane %v3203_v23, 1  ;;  %v3228_v32 = vrot.slane %v3203_v23, 2  ;;  %v3394_v15 = vld [vmem:[#allocation3] sm:$0xf]  ;;  %v3396_v42 = vld [vmem:[#allocation3 + $0x8] sm:$0xf] }
 0x23a   : > { %v2930_v8 = vadd.f32 %v2929_v56, %v2928_v50  ;;  %v2937_v44 = vadd.f32 %v2936_v22, %v2935_v18  ;;  %v2943_v24 = vrot.slane %v2942_v48, 1  ;;  %v2950_v41 = vrot.slane %v2949_v47, 1  ;;  %v3397_v56 = vld [vmem:[#allocation3 + $0xc] sm:$0xf]  ;;  %v3398_v22 = vld [vmem:[#allocation3 + $0x10] sm:$0xf] }
 0x23b   : > { %v3229_v35 = vrot.slane %v3203_v23, 3  ;;  %v3230_v60 = vrot.slane %v3203_v23, 4  ;;  %v3231_v27 = vrot.slane %v3203_v23, 5  ;;  %v3232_v6 = vrot.slane %v3203_v23, 6 }
 0x23c   : > { %v3233_v4 = vrot.slane %v3203_v23, 7  ;;  %v3258_v1 = vadd.f32 %v3203_v23, %v2902_v36  ;;  %v2944_v40 = vadd.f32 %v2943_v24, %v2942_v48  ;;  %v2951_v28 = vadd.f32 %v2950_v41, %v2949_v47  ;;  %v6458_v23 = vld [vmem:[#allocation15_spill] sm:$0xff]  ;;  %v6459_v41 = vld [vmem:[#allocation14_spill] sm:$0xff] }
 0x23d   : > { %v3259_v25 = vadd.f32 %v3227_v55, %v2909_v37  ;;  %v3260_v14 = vadd.f32 %v3228_v32, %v2916_v43  ;;  %v3261_v12 = vadd.f32 %v3229_v35, %v2923_v59  ;;  %v3262_v38 = vadd.f32 %v3230_v60, %v2930_v8  ;;  %v3399_v8 = vld [vmem:[#allocation3 + $0x14] sm:$0xf]  ;;  %v3401_v55 = vld [vmem:[#allocation3 + $0x1c] sm:$0xf] }
 0x23e   : > { %v3263_v49 = vadd.f32 %v3231_v27, %v2937_v44  ;;  %v3275_v30 = vadd.f32 %v6456_v34, %v3258_v1  ;;  %v3264_v0 = vadd.f32 %v3232_v6, %v2944_v40  ;;  %v3265_v63 = vadd.f32 %v3233_v4, %v2951_v28  ;;  %v3400_v44 = vld [vmem:[#allocation3 + $0x18] sm:$0xf] }
 0x23f   : > { %v3276_v13 = vadd.f32 %v6456_v34, %v3259_v25  ;;  %v3277_v10 = vadd.f32 %v6456_v34, %v3260_v14  ;;  %v3278_v54 = vadd.f32 %v6456_v34, %v3261_v12  ;;  %v3279_v20 = vadd.f32 %v6456_v34, %v3262_v38  ;;  %v6460_v38 = vld [vmem:[#allocation33_spill] sm:$0xff] }
 0x240   : > { %v3280_v39 = vadd.f32 %v6456_v34, %v3263_v49  ;;  %v3291_v62 = vmax.f32 %v3275_v30, 0.0  ;;  %v3281_v26 = vadd.f32 %v6456_v34, %v3264_v0  ;;  %v3282_v3 = vadd.f32 %v6456_v34, %v3265_v63  ;;  %v6461_v30 = vld [vmem:[#allocation34_spill] sm:$0xff] }
 0x241   : > { %v3292_v29 = vmax.f32 %v3276_v13, 0.0  ;;  %v3293_v2 = vmax.f32 %v3277_v10, 0.0  ;;  %v3294_v53 = vmax.f32 %v3278_v54, 0.0  ;;  %v3295_v46 = vmax.f32 %v3279_v20, 0.0 }
 0x242   : > { %v3296_v17 = vmax.f32 %v3280_v39, 0.0  ;;  %v6206_v19 = vstv %s6195_s12  ;;  %v3297_v5 = vmax.f32 %v3281_v26, 0.0  ;;  %v3298_v31 = vmax.f32 %v3282_v3, 0.0 }
 0x243   : > { %v3329_v58 = vrot.slane %v3292_v29, 7  ;;  %v3331_v7 = vrot.slane %v3293_v2, 6  ;;  %v3333_v50 = vrot.slane %v3294_v53, 5  ;;  %v3335_v18 = vrot.slane %v3295_v46, 4 }
 0x244   : > { %v3337_v34 = vrot.slane %v3296_v17, 3  ;;  %v3380_v61 = vmul.f32 %v6458_v23, %v3359_v11  ;;  %v3339_v9 = vrot.slane %v3297_v5, 2  ;;  %v3341_v36 = vrot.slane %v3298_v31, 1 }
 0x245   : > { %v3330_v16 = vsel %vm1949_vm1, %v3329_v58, %v3291_v62  ;;  %v3381_v37 = vmul.f32 %v6458_v23, %v3360_v52  ;;  %v3382_v59 = vmul.f32 %v6458_v23, %v3361_v51  ;;  %v3383_v48 = vmul.f32 %v6458_v23, %v3362_v57 }
 0x246   : > { %v3332_v43 = vsel %vm1951_vm2, %v3331_v7, %v3330_v16  ;;  %v3384_v47 = vmul.f32 %v6458_v23, %v3363_v21  ;;  %v3385_v24 = vmul.f32 %v6458_v23, %v3364_v33  ;;  %v3415_v35 = vmul.f32 %v6459_v41, %v3394_v15 }
 0x247   : > { %v3334_v32 = vsel %vm1953_vm3, %v3333_v50, %v3332_v43  ;;  %v3416_v60 = vmul.f32 %v6459_v41, %v3395_v45  ;;  %v3417_v6 = vmul.f32 %v6459_v41, %v3396_v42  ;;  %v3418_v4 = vmul.f32 %v6459_v41, %v3397_v56 }
 0x248   : > { %v3336_v27 = vsel %vm1955_vm4, %v3335_v18, %v3334_v32  ;;  %v3419_v1 = vmul.f32 %v6459_v41, %v3398_v22  ;;  %v3420_v28 = vmul.f32 %v6459_v41, %v3399_v8  ;;  %v3421_v25 = vmul.f32 %v6459_v41, %v3400_v44 }
 0x249   : > { %v3338_v40 = vsel %vm1957_vm5, %v3337_v34, %v3336_v27  ;;  %v3422_v14 = vmul.f32 %v6459_v41, %v3401_v55  ;;  %v3431_v49 = vadd.f32 %v3415_v35, %v6460_v38  ;;  %v3432_v0 = vadd.f32 %v3416_v60, %v6461_v30 }
 0x24a   : > { %v3340_v12 = vsel %vm1959_vm6, %v3339_v9, %v3338_v40  ;;  %v3433_v63 = vadd.f32 %v3417_v6, %v3380_v61  ;;  %v3434_v10 = vadd.f32 %v3418_v4, %v3381_v37  ;;  %v3435_v54 = vadd.f32 %v3419_v1, %v3382_v59 }
 0x24b   : > { %v3342_v13 = vsel %vm1961_vm7, %v3341_v36, %v3340_v12  ;;  %v3436_v20 = vadd.f32 %v3420_v28, %v3383_v48  ;;  %v3437_v39 = vadd.f32 %v3421_v25, %v3384_v47  ;;  %v3438_v62 = vadd.f32 %v3422_v14, %v3385_v24  ;;  %v3809_v24 = vpop.trf.xlu1 }
 0x24c   : > { %4260 = vst.msk [vmem:[%s6021_s20 + $0x28] sm:$0xff] %vm2131_vm8, %v3342_v13  ;;  %v3447_v11 = vsel %vm287_vm0, %v3431_v49, 0.0  ;;  %v3454_v52 = vsel %vm287_vm0, %v3432_v0, 0.0  ;;  %v3461_v29 = vsel %vm287_vm0, %v3433_v63, 0.0  ;;  %v3468_v2 = vsel %vm287_vm0, %v3434_v10, 0.0 }
 0x24d   : > { %v3448_v26 = vrot.slane %v3447_v11, 4  ;;  %v3455_v3 = vrot.slane %v3454_v52, 4  ;;  %v3462_v51 = vrot.slane %v3461_v29, 4  ;;  %v3469_v57 = vrot.slane %v3468_v2, 4 }
 0x24e   : > { %v3475_v21 = vsel %vm287_vm0, %v3435_v54, 0.0  ;;  %v3482_v53 = vsel %vm287_vm0, %v3436_v20, 0.0  ;;  %v3489_v58 = vsel %vm287_vm0, %v3437_v39, 0.0  ;;  %v3496_v7 = vsel %vm287_vm0, %v3438_v62, 0.0 }
 0x24f   : > { %v3449_v46 = vadd.f32 %v3448_v26, %v3447_v11  ;;  %v3456_v17 = vadd.f32 %v3455_v3, %v3454_v52  ;;  %v3476_v33 = vrot.slane %v3475_v21, 4  ;;  %v3483_v15 = vrot.slane %v3482_v53, 4 }
 0x250   : > { %v3463_v5 = vadd.f32 %v3462_v51, %v3461_v29  ;;  %v3470_v31 = vadd.f32 %v3469_v57, %v3468_v2  ;;  %v3490_v16 = vrot.slane %v3489_v58, 4  ;;  %v3497_v9 = vrot.slane %v3496_v7, 4 }
 0x251   : > { %v3450_v45 = vrot.slane %v3449_v46, 2  ;;  %v3457_v50 = vrot.slane %v3456_v17, 2  ;;  %v3477_v18 = vadd.f32 %v3476_v33, %v3475_v21  ;;  %v3484_v34 = vadd.f32 %v3483_v15, %v3482_v53 }
 0x252   : > { %v3464_v61 = vrot.slane %v3463_v5, 2  ;;  %v3471_v42 = vrot.slane %v3470_v31, 2  ;;  %v3491_v48 = vadd.f32 %v3490_v16, %v3489_v58  ;;  %v3498_v47 = vadd.f32 %v3497_v9, %v3496_v7  ;;  %v3368_v9 = vld [vmem:[#allocation2 + $0x2c] sm:$0xf] }
 0x253   : > { %v3451_v36 = vadd.f32 %v3450_v45, %v3449_v46  ;;  %v3458_v37 = vadd.f32 %v3457_v50, %v3456_v17  ;;  %v3478_v56 = vrot.slane %v3477_v18, 2  ;;  %v3485_v22 = vrot.slane %v3484_v34, 2  ;;  %v3366_v50 = vld [vmem:[#allocation2 + $0x24] sm:$0xf] }
 0x254   : > { %v3465_v43 = vadd.f32 %v3464_v61, %v3463_v5  ;;  %v3472_v59 = vadd.f32 %v3471_v42, %v3470_v31  ;;  %v3492_v27 = vrot.slane %v3491_v48, 2  ;;  %v3499_v6 = vrot.slane %v3498_v47, 2  ;;  %v3365_v5 = vld [vmem:[#allocation2 + $0x20] sm:$0xf] }
 0x255   : > { %v3452_v8 = vrot.slane %v3451_v36, 1  ;;  %v3459_v44 = vrot.slane %v3458_v37, 1  ;;  %v3479_v55 = vadd.f32 %v3478_v56, %v3477_v18  ;;  %v3486_v32 = vadd.f32 %v3485_v22, %v3484_v34  ;;  %v3367_v18 = vld [vmem:[#allocation2 + $0x28] sm:$0xf] }
 0x256   : > { %v3466_v35 = vrot.slane %v3465_v43, 1  ;;  %v3473_v60 = vrot.slane %v3472_v59, 1  ;;  %v3493_v12 = vadd.f32 %v3492_v27, %v3491_v48  ;;  %v3500_v38 = vadd.f32 %v3499_v6, %v3498_v47  ;;  %v3372_v48 = vld [vmem:[#allocation2 + $0x3c] sm:$0xf] }
 0x257   : > { %v3453_v4 = vadd.f32 %v3452_v8, %v3451_v36  ;;  %v3460_v1 = vadd.f32 %v3459_v44, %v3458_v37  ;;  %v3480_v40 = vrot.slane %v3479_v55, 1  ;;  %v3487_v28 = vrot.slane %v3486_v32, 1  ;;  %v3369_v36 = vld [vmem:[#allocation2 + $0x30] sm:$0xf]  ;;  %v3370_v37 = vld [vmem:[#allocation2 + $0x34] sm:$0xf] }
 0x258   : > { %v3467_v25 = vadd.f32 %v3466_v35, %v3465_v43  ;;  %v3474_v14 = vadd.f32 %v3473_v60, %v3472_v59  ;;  %v3827_v0 = vrot.slane %v3809_v24, 1  ;;  %v3828_v63 = vrot.slane %v3809_v24, 2  ;;  %v3371_v59 = vld [vmem:[#allocation2 + $0x38] sm:$0xf] }
 0x259   : > { %v3481_v49 = vadd.f32 %v3480_v40, %v3479_v55  ;;  %v3488_v30 = vadd.f32 %v3487_v28, %v3486_v32  ;;  %v3494_v13 = vrot.slane %v3493_v12, 1  ;;  %v3501_v10 = vrot.slane %v3500_v38, 1 }
 0x25a   : > { %v3829_v54 = vrot.slane %v3809_v24, 3  ;;  %v3830_v20 = vrot.slane %v3809_v24, 4  ;;  %v3831_v39 = vrot.slane %v3809_v24, 5  ;;  %v3832_v62 = vrot.slane %v3809_v24, 6 }
 0x25b   : > { %v3833_v11 = vrot.slane %v3809_v24, 7  ;;  %v3857_v52 = vadd.f32 %v3809_v24, %v3453_v4  ;;  %v3495_v26 = vadd.f32 %v3494_v13, %v3493_v12  ;;  %v3502_v3 = vadd.f32 %v3501_v10, %v3500_v38  ;;  %v3402_v24 = vld [vmem:[#allocation3 + $0x20] sm:$0xf]  ;;  %v3403_v4 = vld [vmem:[#allocation3 + $0x24] sm:$0xf] }
 0x25c   : > { %v3858_v29 = vadd.f32 %v3827_v0, %v3460_v1  ;;  %v3859_v2 = vadd.f32 %v3828_v63, %v3467_v25  ;;  %v3860_v51 = vadd.f32 %v3829_v54, %v3474_v14  ;;  %v3861_v57 = vadd.f32 %v3830_v20, %v3481_v49  ;;  %v3404_v14 = vld [vmem:[#allocation3 + $0x28] sm:$0xf]  ;;  %v3405_v12 = vld [vmem:[#allocation3 + $0x2c] sm:$0xf]  ;;  %v3406_v63 = vld [vmem:[#allocation3 + $0x30] sm:$0xf] }
 0x25d   : > { %v3862_v21 = vadd.f32 %v3831_v39, %v3488_v30  ;;  %v3874_v53 = vadd.f32 %v6206_v19, %v3857_v52  ;;  %v3863_v46 = vadd.f32 %v3832_v62, %v3495_v26  ;;  %v3864_v17 = vadd.f32 %v3833_v11, %v3502_v3  ;;  %v3407_v13 = vld [vmem:[#allocation3 + $0x34] sm:$0xf]  ;;  %v3408_v10 = vld [vmem:[#allocation3 + $0x38] sm:$0xf]  ;;  %v3409_v62 = vld [vmem:[#allocation3 + $0x3c] sm:$0xf] }
 0x25e   : > { %v3875_v33 = vadd.f32 %v6206_v19, %v3858_v29  ;;  %v3876_v15 = vadd.f32 %v6206_v19, %v3859_v2  ;;  %v3877_v31 = vadd.f32 %v6206_v19, %v3860_v51  ;;  %v3878_v58 = vadd.f32 %v6206_v19, %v3861_v57 }
 0x25f   : > { %v3879_v7 = vadd.f32 %v6206_v19, %v3862_v21  ;;  %v3890_v45 = vmax.f32 %v3874_v53, 0.0  ;;  %v3880_v34 = vadd.f32 %v6206_v19, %v3863_v46  ;;  %v3881_v61 = vadd.f32 %v6206_v19, %v3864_v17 }
 0x260   : > { %v3891_v42 = vmax.f32 %v3875_v33, 0.0  ;;  %v3892_v16 = vmax.f32 %v3876_v15, 0.0  ;;  %v3893_v56 = vmax.f32 %v3877_v31, 0.0  ;;  %v3894_v22 = vmax.f32 %v3878_v58, 0.0 }
 0x261   : > { %v3895_v43 = vmax.f32 %v3879_v7, 0.0  ;;  %v3386_v47 = vmul.f32 %v6458_v23, %v3365_v5  ;;  %v3896_v8 = vmax.f32 %v3880_v34, 0.0  ;;  %v3897_v44 = vmax.f32 %v3881_v61, 0.0 }
 0x262   : > { %v3922_v55 = vrot.slane %v3891_v42, 7  ;;  %v3924_v32 = vrot.slane %v3892_v16, 6  ;;  %v3926_v35 = vrot.slane %v3893_v56, 5  ;;  %v3928_v60 = vrot.slane %v3894_v22, 4 }
 0x263   : > { %v3930_v27 = vrot.slane %v3895_v43, 3  ;;  %v3387_v6 = vmul.f32 %v6458_v23, %v3366_v50  ;;  %v3932_v40 = vrot.slane %v3896_v8, 2  ;;  %v3934_v28 = vrot.slane %v3897_v44, 1 }
 0x264   : > { %v3923_v1 = vsel %vm1949_vm1, %v3922_v55, %v3890_v45  ;;  %v3388_v25 = vmul.f32 %v6458_v23, %v3367_v18  ;;  %v3389_v49 = vmul.f32 %v6458_v23, %v3368_v9  ;;  %v3390_v30 = vmul.f32 %v6458_v23, %v3369_v36 }
 0x265   : > { %v3925_v38 = vsel %vm1951_vm2, %v3924_v32, %v3923_v1  ;;  %v3391_v0 = vmul.f32 %v6458_v23, %v3370_v37  ;;  %v3392_v20 = vmul.f32 %v6458_v23, %v3371_v59  ;;  %v3393_v39 = vmul.f32 %v6458_v23, %v3372_v48 }
 0x266   : > { %v3927_v54 = vsel %vm1953_vm3, %v3926_v35, %v3925_v38  ;;  %v3423_v11 = vmul.f32 %v6459_v41, %v3402_v24  ;;  %v3424_v26 = vmul.f32 %v6459_v41, %v3403_v4  ;;  %v3425_v3 = vmul.f32 %v6459_v41, %v3404_v14 }
 0x267   : > { %v3929_v52 = vsel %vm1955_vm4, %v3928_v60, %v3927_v54  ;;  %v3426_v29 = vmul.f32 %v6459_v41, %v3405_v12  ;;  %v3427_v51 = vmul.f32 %v6459_v41, %v3406_v63  ;;  %v3428_v57 = vmul.f32 %v6459_v41, %v3407_v13  ;;  %v3810_v13 = vpop.trf.xlu1 }
 0x268   : > { %v3931_v2 = vsel %vm1957_vm5, %v3930_v27, %v3929_v52  ;;  %v3429_v23 = vmul.f32 %v6459_v41, %v3408_v10  ;;  %v3430_v53 = vmul.f32 %v6459_v41, %v3409_v62  ;;  %v3439_v46 = vadd.f32 %v3423_v11, %v3386_v47 }
 0x269   : > { %v3933_v21 = vsel %vm1959_vm6, %v3932_v40, %v3931_v2  ;;  %v3440_v17 = vadd.f32 %v3424_v26, %v3387_v6  ;;  %v3441_v15 = vadd.f32 %v3425_v3, %v3388_v25  ;;  %v3442_v5 = vadd.f32 %v3426_v29, %v3389_v49 }
 0x26a   : > { %v3935_v33 = vsel %vm1961_vm7, %v3934_v28, %v3933_v21  ;;  %v3443_v31 = vadd.f32 %v3427_v51, %v3390_v30  ;;  %v3444_v58 = vadd.f32 %v3428_v57, %v3391_v0  ;;  %v3445_v7 = vadd.f32 %v3429_v23, %v3392_v20 }
 0x26b   : > { %4266 = vst.msk [vmem:[%s6021_s20 + $0x30] sm:$0xff] %vm2131_vm8, %v3935_v33  ;;  %v3446_v45 = vadd.f32 %v3430_v53, %v3393_v39  ;;  %v3503_v50 = vsel %vm287_vm0, %v3439_v46, 0.0  ;;  %v3510_v34 = vsel %vm287_vm0, %v3440_v17, 0.0  ;;  %v3517_v61 = vsel %vm287_vm0, %v3441_v15, 0.0 }
 0x26c   : > { %v3504_v18 = vrot.slane %v3503_v50, 4  ;;  %v3524_v41 = vsel %vm287_vm0, %v3442_v5, 0.0  ;;  %v3511_v42 = vrot.slane %v3510_v34, 4  ;;  %v3518_v16 = vrot.slane %v3517_v61, 4 }
 0x26d   : > { %v3525_v9 = vrot.slane %v3524_v41, 4  ;;  %v3531_v36 = vsel %vm287_vm0, %v3443_v31, 0.0  ;;  %v3538_v22 = vsel %vm287_vm0, %v3444_v58, 0.0  ;;  %v3545_v43 = vsel %vm287_vm0, %v3445_v7, 0.0 }
 0x26e   : > { %v3505_v37 = vadd.f32 %v3504_v18, %v3503_v50  ;;  %v3532_v56 = vrot.slane %v3531_v36, 4  ;;  %v3512_v59 = vadd.f32 %v3511_v42, %v3510_v34  ;;  %v3519_v48 = vadd.f32 %v3518_v16, %v3517_v61 }
 0x26f   : > { %v3526_v47 = vadd.f32 %v3525_v9, %v3524_v41  ;;  %v3539_v8 = vrot.slane %v3538_v22, 4  ;;  %v3546_v32 = vrot.slane %v3545_v43, 4  ;;  %v3552_v24 = vsel %vm287_vm0, %v3446_v45, 0.0 }
 0x270   : > { %v3506_v44 = vrot.slane %v3505_v37, 2  ;;  %v3533_v55 = vadd.f32 %v3532_v56, %v3531_v36  ;;  %v3513_v35 = vrot.slane %v3512_v59, 2  ;;  %v3520_v60 = vrot.slane %v3519_v48, 2 }
 0x271   : > { %v3527_v27 = vrot.slane %v3526_v47, 2  ;;  %v3540_v6 = vadd.f32 %v3539_v8, %v3538_v22  ;;  %v3547_v40 = vadd.f32 %v3546_v32, %v3545_v43  ;;  %v3553_v28 = vrot.slane %v3552_v24, 4 }
 0x272   : > { %v3507_v4 = vadd.f32 %v3506_v44, %v3505_v37  ;;  %v3534_v1 = vrot.slane %v3533_v55, 2  ;;  %v3514_v25 = vadd.f32 %v3513_v35, %v3512_v59  ;;  %v3521_v14 = vadd.f32 %v3520_v60, %v3519_v48 }
 0x273   : > { %v3528_v12 = vadd.f32 %v3527_v27, %v3526_v47  ;;  %v3541_v38 = vrot.slane %v3540_v6, 2  ;;  %v3548_v0 = vrot.slane %v3547_v40, 2  ;;  %v3554_v63 = vadd.f32 %v3553_v28, %v3552_v24 }
 0x274   : > { %v3508_v49 = vrot.slane %v3507_v4, 1  ;;  %v3535_v30 = vadd.f32 %v3534_v1, %v3533_v55  ;;  %v3515_v10 = vrot.slane %v3514_v25, 1  ;;  %v3522_v54 = vrot.slane %v3521_v14, 1 }
 0x275   : > { %v3529_v20 = vrot.slane %v3528_v12, 1  ;;  %v3542_v39 = vadd.f32 %v3541_v38, %v3540_v6  ;;  %v3549_v52 = vadd.f32 %v3548_v0, %v3547_v40  ;;  %v3555_v26 = vrot.slane %v3554_v63, 2 }
 0x276   : > { %v3509_v62 = vadd.f32 %v3508_v49, %v3507_v4  ;;  %v3536_v11 = vrot.slane %v3535_v30, 1  ;;  %v3516_v3 = vadd.f32 %v3515_v10, %v3514_v25  ;;  %v3523_v29 = vadd.f32 %v3522_v54, %v3521_v14 }
 0x277   : > { %v3530_v2 = vadd.f32 %v3529_v20, %v3528_v12  ;;  %v3543_v51 = vrot.slane %v3542_v39, 1  ;;  %v3550_v23 = vrot.slane %v3549_v52, 1  ;;  %v3556_v21 = vadd.f32 %v3555_v26, %v3554_v63 }
 0x278   : > { %v3537_v57 = vadd.f32 %v3536_v11, %v3535_v30  ;;  %v3834_v53 = vrot.slane %v3810_v13, 1  ;;  %v3835_v17 = vrot.slane %v3810_v13, 2  ;;  %v3836_v33 = vrot.slane %v3810_v13, 3 }
 0x279   : > { %v3544_v46 = vadd.f32 %v3543_v51, %v3542_v39  ;;  %v3837_v15 = vrot.slane %v3810_v13, 4  ;;  %v3551_v5 = vadd.f32 %v3550_v23, %v3549_v52  ;;  %v3557_v31 = vrot.slane %v3556_v21, 1 }
 0x27a   : > { %v3838_v58 = vrot.slane %v3810_v13, 5  ;;  %v3839_v7 = vrot.slane %v3810_v13, 6  ;;  %v3840_v45 = vrot.slane %v3810_v13, 7  ;;  %v3865_v50 = vadd.f32 %v3810_v13, %v3509_v62 }
 0x27b   : > { %v3866_v18 = vadd.f32 %v3834_v53, %v3516_v3  ;;  %v3867_v34 = vadd.f32 %v3835_v17, %v3523_v29  ;;  %v3558_v61 = vadd.f32 %v3557_v31, %v3556_v21  ;;  %v3868_v41 = vadd.f32 %v3836_v33, %v3530_v2 }
 0x27c   : > { %v3869_v42 = vadd.f32 %v3837_v15, %v3537_v57  ;;  %v3870_v16 = vadd.f32 %v3838_v58, %v3544_v46  ;;  %v3871_v9 = vadd.f32 %v3839_v7, %v3551_v5  ;;  %v3882_v36 = vadd.f32 %v6206_v19, %v3865_v50 }
 0x27d   : > { %v3883_v37 = vadd.f32 %v6206_v19, %v3866_v18  ;;  %v3884_v56 = vadd.f32 %v6206_v19, %v3867_v34  ;;  %v3872_v22 = vadd.f32 %v3840_v45, %v3558_v61  ;;  %v3885_v43 = vadd.f32 %v6206_v19, %v3868_v41 }
 0x27e   : > { %v3886_v59 = vadd.f32 %v6206_v19, %v3869_v42  ;;  %v3887_v48 = vadd.f32 %v6206_v19, %v3870_v16  ;;  %v3888_v47 = vadd.f32 %v6206_v19, %v3871_v9  ;;  %v3898_v35 = vmax.f32 %v3882_v36, 0.0 }
 0x27f   : > { %v3899_v8 = vmax.f32 %v3883_v37, 0.0  ;;  %v3900_v44 = vmax.f32 %v3884_v56, 0.0  ;;  %v3889_v55 = vadd.f32 %v6206_v19, %v3872_v22  ;;  %v3901_v32 = vmax.f32 %v3885_v43, 0.0 }
 0x280   : > { %v3902_v24 = vmax.f32 %v3886_v59, 0.0  ;;  %v3903_v60 = vmax.f32 %v3887_v48, 0.0  ;;  %v3904_v4 = vmax.f32 %v3888_v47, 0.0 }
 0x281   : > { %v3936_v27 = vrot.slane %v3899_v8, 7  ;;  %v3938_v6 = vrot.slane %v3900_v44, 6  ;;  %v3905_v1 = vmax.f32 %v3889_v55, 0.0  ;;  %v3940_v28 = vrot.slane %v3901_v32, 5 }
 0x282   : > { %v3942_v14 = vrot.slane %v3902_v24, 4  ;;  %v3944_v12 = vrot.slane %v3903_v60, 3  ;;  %v3946_v49 = vrot.slane %v3904_v4, 2 }
 0x283   : > { %v3937_v40 = vsel %vm1949_vm1, %v3936_v27, %v3898_v35  ;;  %v3948_v0 = vrot.slane %v3905_v1, 1 }
 0x284   : > { %v3939_v25 = vsel %vm1951_vm2, %v3938_v6, %v3937_v40 }
 0x285   : > { %v3941_v19 = vsel %vm1953_vm3, %v3940_v28, %v3939_v25 }
 0x286   : > { %v3943_v38 = vsel %vm1955_vm4, %v3942_v14, %v3941_v19 }
 0x287   : > { %v3945_v30 = vsel %vm1957_vm5, %v3944_v12, %v3943_v38 }
 0x288   : > { %v3947_v63 = vsel %vm1959_vm6, %v3946_v49, %v3945_v30 }
 0x289   : > { %v3949_v13 = vsel %vm1961_vm7, %v3948_v0, %v3947_v63 }
 0x28a   : > { %4267 = vst.msk [vmem:[%s6021_s20 + $0x38] sm:$0xff] %vm2131_vm8, %v3949_v13 }
 0x28b   : > { %4600 = shalt.err (!%p4597_p2)
}
 0x28c   : > { %s4601_s9 = scalar_lea.hbm %s6300_s18, 1024  ;;  %s4605_s15 = scalar_lea.hbm %s6356_s6, 2048 }
 0x28d   : > { %p4602_p3 = scmp.ne.s32.totalorder %s6300_s18, %s4601_s9  ;;  %p4606_p8 = scmp.lt.s32.totalorder %s6300_s18, %s6356_s6 }
 0x28e   : > { %p4607_p11 = scmp.lt.s32.totalorder %s4605_s15, %s4601_s9 }
 0x28f   : > { %p4603_p4 = pnand %p4602_p3, %p4731_p5 }
 0x290   : > { %p4608_p9 = por %p4607_p11, %p4606_p8 }
 0x291   : > { %p4604_p7 = pneg %p4603_p4 }
 0x293   : > { %p4609_p10 = pnand %p4608_p9, %p4604_p7 }
 0x295   : > { %4612 = shalt.err (!%p4609_p10)
}
 0x296   : > { %s4656_s13 = smov 128   ;;  %s4657_s16 = smov 8  }
 0x297   : > { %4280 = dma.vmem_to_hbm [thread:$0]  (%p4731_p5), %s6302_s14, 1024, %s6300_s18, %s6310_s25, %s4656_s13, %s4656_s13, %s4657_s16  }
 0x298 PF: > { %p4292_p12 = scmp.ge.s32.totalorder %s4651_s24, 2  ;;  %s3984_s17 = sand.u32 1, %s4639_s21  }
 0x299   : > { %s3985_s19 = scalar_lea.sflag [#allocation7], %s3984_s17 }
 0x29a   : > { %p4287_p13 = pnand %p4292_p12, %p4735_p6 }
 0x29c   : > { %p4288_p0 = pneg %p4287_p13 }
 0x29e   : > { %4634 = dma.done.wait (%p4288_p0), %s3985_s19, 1024  }
 0x29f   : > { %4636 = vsyncadd (%p4288_p0), %s3985_s19, 4294966272  ;;  %p17_p1 = scmp.ge.s32.totalorder %s4718_s27, 4   ;;  %s6462_s21 = smov %s4643_s22 }
 0x2a0   : > { %s6463_s22 = smov %s4647_s23  ;;  %s6464_s23 = smov %s4729_s30 }
 0x2a1   : > { %s6465_s24 = smov %s4718_s27  ;;  %19 = sbr.rel (!%p17_p1) target bundleno = 4 (0x4), region = 253 }
 0x2a6   :  { %3990 = vsyncpa [#allocation7], 1 }
 0x2a7   :  { %3992 = vsyncpa [#allocation7 + $0x1], 1 }
 0x2a8   :  { %3993 = vsyncpa [#allocation8], 1 }
 0x2a9   :  { %3995 = vsyncpa [#allocation8 + $0x1], 1 }

</bundles_post_ra>
